<compile_context>
chip_gen: v6e
topology: v6e:2x2x1
jax: 0.10.0
libtpu: 0.0.40
codegen_flags: <defaults>
</compile_context>

<pallas_src>
import jax
import jax.numpy as jnp
from jax.experimental import pallas as pl
from jax.experimental.pallas import tpu as pltpu

# ---- config (stands in for conf.model.* / conf.dataset.*) ----
N_LAYERS = 3        # conf.model.n_layers
INPUT_DIM = 16      # conf.dataset.one_hot_dim
HIDDEN = 32         # conf.model.hidden_dim
OUTPUT_DIM = 8      # conf.model.output_dim
EMB_DIM = HIDDEN * (N_LAYERS + 1)

# ---- kernel layout constants ----
INP = 128           # input feature dim zero-padded to a full 128-lane slab
HP = 128            # hidden dim zero-padded to a full 128-lane slab
OUT_PAD = 128       # output dim zero-padded for a lane-dense final store
NODE_TILE = 128     # node count zero-padded to a multiple of this
BP = 8              # graph count zero-padded to a full sublane group
_VMEM_LIMIT = 32 * 1024 * 1024   # safe on v5e/v6e (128 MiB) and v7x (64 MiB)

_F32 = jnp.float32
_BF16 = jnp.bfloat16


# --------------------------------------------------------------------------
# Single fused kernel: pre-linear -> 3x (GIN layer + fused add-pool) -> post-MLP
# Everything is VMEM-resident; the layer loop is unrolled at trace time.
# --------------------------------------------------------------------------
def _fused_embed_kernel(x0_ref, adj_ref, pool_ref,
                        wpre_ref, bpre_ref,
                        w1_ref, b1_ref, w2_ref, b2_ref,
                        wp1_ref, bp1_ref, wp2_ref, bp2_ref,
                        out_ref):
    adj = adj_ref[...].astype(_F32)      # [Np, Np]  A + I (padded rows/cols are 0)
    pool = pool_ref[...].astype(_F32)    # [BP, Np]  (padded rows/cols are 0)

    # pre linear (no ReLU, matching the PyTorch module)
    x = jnp.dot(x0_ref[...], wpre_ref[...],
                preferred_element_type=_F32) + bpre_ref[...]

    # fused global_add_pool + first post-linear:  acc = sum_l (pool @ emb_l) @ Wp1[l]
    pooled = jnp.dot(pool, x, preferred_element_type=_F32)
    acc = jnp.dot(pooled, wp1_ref[0], preferred_element_type=_F32)

    xres = x
    for l in range(N_LAYERS):                       # static unroll (N_LAYERS = 3)
        # GIN aggregation (A + I) @ x followed by the 2-layer MLP
        agg = jnp.dot(adj, x, preferred_element_type=_F32)
        h1 = jnp.maximum(
            jnp.dot(agg, w1_ref[l], preferred_element_type=_F32) + b1_ref[l], 0.0)
        h2 = jnp.dot(h1, w2_ref[l], preferred_element_type=_F32) + b2_ref[l]
        if l & 1:                                   # residual on odd layers (pre-ReLU)
            h2 = h2 + xres
            xres = h2
        x = jnp.maximum(h2, 0.0)
        pooled = jnp.dot(pool, x, preferred_element_type=_F32)
        acc = acc + jnp.dot(pooled, wp1_ref[l + 1], preferred_element_type=_F32)

    # post MLP: Linear -> ReLU -> Linear  (lane-dense [BP, 128] f32 store)
    pact = jnp.maximum(acc + bp1_ref[...], 0.0)
    out_ref[...] = jnp.dot(pact, wp2_ref[...],
                           preferred_element_type=_F32) + bp2_ref[...]


def embed_forward(x0, adj_hat, pool_mat, params):
    np_, inp = x0.shape
    bp = pool_mat.shape[0]
    assert inp == INP and adj_hat.shape == (np_, np_) and pool_mat.shape == (bp, np_)

    # rough VMEM residency budget (bf16 HBM copy + in-kernel f32 copy of adj/pool,
    # all weights, plus headroom for a few [Np, HP] f32 activation temporaries)
    resident_bytes = (adj_hat.size * 6 + pool_mat.size * 6 + x0.size * 4
                      + sum(p.size * p.dtype.itemsize for p in params)
                      + 6 * np_ * HP * 4)
    assert resident_bytes < _VMEM_LIMIT, (
        "graph too large for the fused VMEM-resident kernel; use a tiled path")

    vmem_spec = pl.BlockSpec(memory_space=pltpu.MemorySpace.VMEM)
    return pl.pallas_call(
        _fused_embed_kernel,
        out_shape=jax.ShapeDtypeStruct((bp, OUT_PAD), _F32),
        in_specs=[vmem_spec] * (3 + len(params)),
        out_specs=vmem_spec,
        compiler_params=pltpu.CompilerParams(vmem_limit_bytes=_VMEM_LIMIT),
    )(x0, adj_hat, pool_mat, *params)


# --------------------------------------------------------------------------
# Parameters (f32, zero-padded to lane-dense 128-wide layouts)
# --------------------------------------------------------------------------
def init_params(key):
    ks = jax.random.split(key, 10)

    def lin(k, fan_in, shape):
        return jax.random.normal(k, shape, _F32) / jnp.sqrt(jnp.float32(fan_in))

    wpre = lin(ks[0], INPUT_DIM, (INPUT_DIM, HIDDEN))
    bpre = lin(ks[1], INPUT_DIM, (1, HIDDEN))
    w1 = lin(ks[2], HIDDEN, (N_LAYERS, HIDDEN, HIDDEN))
    b1 = lin(ks[3], HIDDEN, (N_LAYERS, 1, HIDDEN))
    w2 = lin(ks[4], HIDDEN, (N_LAYERS, HIDDEN, HIDDEN))
    b2 = lin(ks[5], HIDDEN, (N_LAYERS, 1, HIDDEN))
    # post first linear stored chunked: wp1[l] acts on embedding chunk l
    wp1 = lin(ks[6], EMB_DIM, (N_LAYERS + 1, HIDDEN, HIDDEN))
    bp1 = lin(ks[7], EMB_DIM, (1, HIDDEN))
    wp2 = lin(ks[8], HIDDEN, (HIDDEN, OUTPUT_DIM))
    bp2 = lin(ks[9], HIDDEN, (1, OUTPUT_DIM))

    def pad(a, shape):
        out = jnp.zeros(shape, _F32)
        return out.at[tuple(slice(0, s) for s in a.shape)].set(a)

    return (pad(wpre, (INP, HP)),
            pad(bpre, (1, HP)),
            pad(w1, (N_LAYERS, HP, HP)),
            pad(b1, (N_LAYERS, 1, HP)),
            pad(w2, (N_LAYERS, HP, HP)),
            pad(b2, (N_LAYERS, 1, HP)),
            pad(wp1, (N_LAYERS + 1, HP, HP)),
            pad(bp1, (1, HP)),
            pad(wp2, (HP, OUT_PAD)),
            pad(bp2, (1, OUT_PAD)))


# --------------------------------------------------------------------------
# Pure-JAX reference mirroring the same (f32 activation) numerics
# --------------------------------------------------------------------------
def reference_forward(x0, adj_hat, pool_mat, params):
    wpre, bpre, w1, b1, w2, b2, wp1, bp1, wp2, bp2 = params
    adj = adj_hat.astype(_F32)
    pool = pool_mat.astype(_F32)

    x = jnp.dot(x0, wpre, preferred_element_type=_F32) + bpre
    acc = jnp.dot(jnp.dot(pool, x, preferred_element_type=_F32), wp1[0],
                  preferred_element_type=_F32)
    xres = x
    for l in range(N_LAYERS):
        agg = jnp.dot(adj, x, preferred_element_type=_F32)
        h1 = jnp.maximum(jnp.dot(agg, w1[l], preferred_element_type=_F32) + b1[l], 0.0)
        h2 = jnp.dot(h1, w2[l], preferred_element_type=_F32) + b2[l]
        if l & 1:
            h2 = h2 + xres
            xres = h2
        x = jnp.maximum(h2, 0.0)
        acc = acc + jnp.dot(jnp.dot(pool, x, preferred_element_type=_F32), wp1[l + 1],
                            preferred_element_type=_F32)
    pact = jnp.maximum(acc + bp1, 0.0)
    return jnp.dot(pact, wp2, preferred_element_type=_F32) + bp2


if __name__ == "__main__":
    key = jax.random.PRNGKey(0)
    k_feat, k_param = jax.random.split(key)

    # small multi-graph problem: 4 graphs x 72 nodes -> N=288, padded to 384
    nodes_per_graph = 72
    B = 4
    N = B * nodes_per_graph
    NP = ((N + NODE_TILE - 1) // NODE_TILE) * NODE_TILE

    # deterministic one-hot node features
    labels = jax.random.randint(k_feat, (N,), 0, INPUT_DIM)
    x0 = jax.nn.one_hot(labels, INPUT_DIM, dtype=_F32)

    # edge_index: bidirectional ring within each graph -> dense adjacency
    src, dst = [], []
    for g in range(B):
        base = g * nodes_per_graph
        for i in range(nodes_per_graph):
            a = base + i
            b = base + (i + 1) % nodes_per_graph
            src += [a, b]
            dst += [b, a]
    src = jnp.array(src)
    dst = jnp.array(dst)
    adj = jnp.zeros((N, N), _F32).at[dst, src].add(1.0)
    adj_hat = adj + jnp.eye(N, dtype=_F32)          # GIN eps=0: (A + I) @ x

    # batch vector -> pooling matrix [B, N]
    batch = jnp.array([g for g in range(B) for _ in range(nodes_per_graph)])
    pool_mat = jax.nn.one_hot(batch, B, dtype=_F32).T

    # zero-pad nodes -> NP, graphs -> BP, input features -> INP lanes.
    # Invariant (required for correctness): padded adjacency rows/columns and padded
    # pool columns are EXACTLY zero, so padded nodes (which acquire bias activations
    # inside the MLPs) never leak into real nodes or pooled graph sums.
    x0_p = jnp.zeros((NP, INP), _F32).at[:N, :INPUT_DIM].set(x0)
    adj_p = jnp.zeros((NP, NP), _F32).at[:N, :N].set(adj_hat).astype(_BF16)
    pool_p = jnp.zeros((BP, NP), _F32).at[:B, :N].set(pool_mat).astype(_BF16)
    assert float(jnp.abs(adj_p.astype(_F32)[:, N:]).sum()) == 0.0
    assert float(jnp.abs(pool_p.astype(_F32)[:, N:]).sum()) == 0.0

    params = init_params(k_param)

    out_pad = jax.jit(embed_forward)(x0_p, adj_p, pool_p, params)
    out_pad = jax.block_until_ready(out_pad)
    out = out_pad[:B, :OUTPUT_DIM]

    ref = reference_forward(x0_p, adj_p, pool_p, params)[:B, :OUTPUT_DIM]
    assert out.shape == (B, OUTPUT_DIM)
    # kernel and reference share cast points / f32 accumulation; the remaining
    # difference is MXU vs. XLA matmul pass rounding and accumulation order.
    assert jnp.allclose(out, ref, atol=1e-1, rtol=2e-2), (out, ref)
    print("KERNEL_OK")
</pallas_src>

<mosaic_0001>
module attributes {stable_mosaic.version = 11 : i64} {
  func.func @_fused_embed_kernel(%arg0: memref<384x128xf32, #tpu.memory_space<vmem>>, %arg1: memref<384x384xbf16, #tpu.memory_space<vmem>>, %arg2: memref<8x384xbf16, #tpu.memory_space<vmem>>, %arg3: memref<128x128xf32, #tpu.memory_space<vmem>>, %arg4: memref<1x128xf32, #tpu.memory_space<vmem>>, %arg5: memref<3x128x128xf32, #tpu.memory_space<vmem>>, %arg6: memref<3x1x128xf32, #tpu.memory_space<vmem>>, %arg7: memref<3x128x128xf32, #tpu.memory_space<vmem>>, %arg8: memref<3x1x128xf32, #tpu.memory_space<vmem>>, %arg9: memref<4x128x128xf32, #tpu.memory_space<vmem>>, %arg10: memref<1x128xf32, #tpu.memory_space<vmem>>, %arg11: memref<128x128xf32, #tpu.memory_space<vmem>>, %arg12: memref<1x128xf32, #tpu.memory_space<vmem>>, %arg13: memref<8x128xf32, #tpu.memory_space<vmem>>) attributes {dimension_semantics = [], scalar_prefetch = 0 : i64, scratch_operands = 0 : i64, tpu.core_type = #tpu.core_type<tc>} {
    %c0 = arith.constant 0 : index
    %c0_0 = arith.constant 0 : index
    %0 = vector.load %arg1[%c0, %c0_0] : memref<384x384xbf16, #tpu.memory_space<vmem>>, vector<384x384xbf16>
    %1 = arith.extf %0 : vector<384x384xbf16> to vector<384x384xf32>
    %c0_1 = arith.constant 0 : index
    %c0_2 = arith.constant 0 : index
    %2 = vector.load %arg2[%c0_1, %c0_2] : memref<8x384xbf16, #tpu.memory_space<vmem>>, vector<8x384xbf16>
    %3 = arith.extf %2 : vector<8x384xbf16> to vector<8x384xf32>
    %c0_3 = arith.constant 0 : index
    %c0_4 = arith.constant 0 : index
    %4 = vector.load %arg0[%c0_3, %c0_4] : memref<384x128xf32, #tpu.memory_space<vmem>>, vector<384x128xf32>
    %c0_5 = arith.constant 0 : index
    %c0_6 = arith.constant 0 : index
    %5 = vector.load %arg3[%c0_5, %c0_6] : memref<128x128xf32, #tpu.memory_space<vmem>>, vector<128x128xf32>
    %cst = arith.constant dense<0.000000e+00> : vector<384x128xf32>
    %6 = tpu.matmul %4, %5, %cst {dimension_numbers = #tpu.dot_dimension_numbers<[1], [0], [0], [1], [0, 0, 1, 1], [], []>} : vector<384x128xf32>, vector<128x128xf32>, vector<384x128xf32> -> vector<384x128xf32>
    %c0_7 = arith.constant 0 : index
    %c0_8 = arith.constant 0 : index
    %7 = vector.load %arg4[%c0_7, %c0_8] : memref<1x128xf32, #tpu.memory_space<vmem>>, vector<1x128xf32>
    %8 = vector.broadcast %7 : vector<1x128xf32> to vector<384x128xf32>
    %9 = arith.addf %6, %8 : vector<384x128xf32>
    %cst_9 = arith.constant dense<0.000000e+00> : vector<8x128xf32>
    %10 = tpu.matmul %3, %9, %cst_9 {dimension_numbers = #tpu.dot_dimension_numbers<[1], [0], [0], [1], [0, 0, 1, 1], [], []>} : vector<8x384xf32>, vector<384x128xf32>, vector<8x128xf32> -> vector<8x128xf32>
    %c0_10 = arith.constant 0 : index
    %c0_11 = arith.constant 0 : index
    %c0_12 = arith.constant 0 : index
    %11 = vector.load %arg9[%c0_10, %c0_11, %c0_12] : memref<4x128x128xf32, #tpu.memory_space<vmem>>, vector<1x128x128xf32>
    %12 = vector.shape_cast %11 : vector<1x128x128xf32> to vector<128x128xf32>
    %cst_13 = arith.constant dense<0.000000e+00> : vector<8x128xf32>
    %13 = tpu.matmul %10, %12, %cst_13 {dimension_numbers = #tpu.dot_dimension_numbers<[1], [0], [0], [1], [0, 0, 1, 1], [], []>} : vector<8x128xf32>, vector<128x128xf32>, vector<8x128xf32> -> vector<8x128xf32>
    %cst_14 = arith.constant dense<0.000000e+00> : vector<384x128xf32>
    %14 = tpu.matmul %1, %9, %cst_14 {dimension_numbers = #tpu.dot_dimension_numbers<[1], [0], [0], [1], [0, 0, 1, 1], [], []>} : vector<384x384xf32>, vector<384x128xf32>, vector<384x128xf32> -> vector<384x128xf32>
    %c0_15 = arith.constant 0 : index
    %c0_16 = arith.constant 0 : index
    %c0_17 = arith.constant 0 : index
    %15 = vector.load %arg5[%c0_15, %c0_16, %c0_17] : memref<3x128x128xf32, #tpu.memory_space<vmem>>, vector<1x128x128xf32>
    %16 = vector.shape_cast %15 : vector<1x128x128xf32> to vector<128x128xf32>
    %cst_18 = arith.constant dense<0.000000e+00> : vector<384x128xf32>
    %17 = tpu.matmul %14, %16, %cst_18 {dimension_numbers = #tpu.dot_dimension_numbers<[1], [0], [0], [1], [0, 0, 1, 1], [], []>} : vector<384x128xf32>, vector<128x128xf32>, vector<384x128xf32> -> vector<384x128xf32>
    %c0_19 = arith.constant 0 : index
    %c0_20 = arith.constant 0 : index
    %c0_21 = arith.constant 0 : index
    %18 = vector.load %arg6[%c0_19, %c0_20, %c0_21] : memref<3x1x128xf32, #tpu.memory_space<vmem>>, vector<1x1x128xf32>
    %19 = vector.shape_cast %18 : vector<1x1x128xf32> to vector<1x128xf32>
    %20 = vector.broadcast %19 : vector<1x128xf32> to vector<384x128xf32>
    %21 = arith.addf %17, %20 : vector<384x128xf32>
    %cst_22 = arith.constant 0.000000e+00 : f32
    %22 = vector.broadcast %cst_22 : f32 to vector<384x128xf32>
    %23 = arith.maximumf %21, %22 : vector<384x128xf32>
    %c0_23 = arith.constant 0 : index
    %c0_24 = arith.constant 0 : index
    %c0_25 = arith.constant 0 : index
    %24 = vector.load %arg7[%c0_23, %c0_24, %c0_25] : memref<3x128x128xf32, #tpu.memory_space<vmem>>, vector<1x128x128xf32>
    %25 = vector.shape_cast %24 : vector<1x128x128xf32> to vector<128x128xf32>
    %cst_26 = arith.constant dense<0.000000e+00> : vector<384x128xf32>
    %26 = tpu.matmul %23, %25, %cst_26 {dimension_numbers = #tpu.dot_dimension_numbers<[1], [0], [0], [1], [0, 0, 1, 1], [], []>} : vector<384x128xf32>, vector<128x128xf32>, vector<384x128xf32> -> vector<384x128xf32>
    %c0_27 = arith.constant 0 : index
    %c0_28 = arith.constant 0 : index
    %c0_29 = arith.constant 0 : index
    %27 = vector.load %arg8[%c0_27, %c0_28, %c0_29] : memref<3x1x128xf32, #tpu.memory_space<vmem>>, vector<1x1x128xf32>
    %28 = vector.shape_cast %27 : vector<1x1x128xf32> to vector<1x128xf32>
    %29 = vector.broadcast %28 : vector<1x128xf32> to vector<384x128xf32>
    %30 = arith.addf %26, %29 : vector<384x128xf32>
    %cst_30 = arith.constant 0.000000e+00 : f32
    %31 = vector.broadcast %cst_30 : f32 to vector<384x128xf32>
    %32 = arith.maximumf %30, %31 : vector<384x128xf32>
    %cst_31 = arith.constant dense<0.000000e+00> : vector<8x128xf32>
    %33 = tpu.matmul %3, %32, %cst_31 {dimension_numbers = #tpu.dot_dimension_numbers<[1], [0], [0], [1], [0, 0, 1, 1], [], []>} : vector<8x384xf32>, vector<384x128xf32>, vector<8x128xf32> -> vector<8x128xf32>
    %c1 = arith.constant 1 : index
    %c0_32 = arith.constant 0 : index
    %c0_33 = arith.constant 0 : index
    %34 = vector.load %arg9[%c1, %c0_32, %c0_33] : memref<4x128x128xf32, #tpu.memory_space<vmem>>, vector<1x128x128xf32>
    %35 = vector.shape_cast %34 : vector<1x128x128xf32> to vector<128x128xf32>
    %cst_34 = arith.constant dense<0.000000e+00> : vector<8x128xf32>
    %36 = tpu.matmul %33, %35, %cst_34 {dimension_numbers = #tpu.dot_dimension_numbers<[1], [0], [0], [1], [0, 0, 1, 1], [], []>} : vector<8x128xf32>, vector<128x128xf32>, vector<8x128xf32> -> vector<8x128xf32>
    %37 = arith.addf %13, %36 : vector<8x128xf32>
    %cst_35 = arith.constant dense<0.000000e+00> : vector<384x128xf32>
    %38 = tpu.matmul %1, %32, %cst_35 {dimension_numbers = #tpu.dot_dimension_numbers<[1], [0], [0], [1], [0, 0, 1, 1], [], []>} : vector<384x384xf32>, vector<384x128xf32>, vector<384x128xf32> -> vector<384x128xf32>
    %c1_36 = arith.constant 1 : index
    %c0_37 = arith.constant 0 : index
    %c0_38 = arith.constant 0 : index
    %39 = vector.load %arg5[%c1_36, %c0_37, %c0_38] : memref<3x128x128xf32, #tpu.memory_space<vmem>>, vector<1x128x128xf32>
    %40 = vector.shape_cast %39 : vector<1x128x128xf32> to vector<128x128xf32>
    %cst_39 = arith.constant dense<0.000000e+00> : vector<384x128xf32>
    %41 = tpu.matmul %38, %40, %cst_39 {dimension_numbers = #tpu.dot_dimension_numbers<[1], [0], [0], [1], [0, 0, 1, 1], [], []>} : vector<384x128xf32>, vector<128x128xf32>, vector<384x128xf32> -> vector<384x128xf32>
    %c1_40 = arith.constant 1 : index
    %c0_41 = arith.constant 0 : index
    %c0_42 = arith.constant 0 : index
    %42 = vector.load %arg6[%c1_40, %c0_41, %c0_42] : memref<3x1x128xf32, #tpu.memory_space<vmem>>, vector<1x1x128xf32>
    %43 = vector.shape_cast %42 : vector<1x1x128xf32> to vector<1x128xf32>
    %44 = vector.broadcast %43 : vector<1x128xf32> to vector<384x128xf32>
    %45 = arith.addf %41, %44 : vector<384x128xf32>
    %cst_43 = arith.constant 0.000000e+00 : f32
    %46 = vector.broadcast %cst_43 : f32 to vector<384x128xf32>
    %47 = arith.maximumf %45, %46 : vector<384x128xf32>
    %c1_44 = arith.constant 1 : index
    %c0_45 = arith.constant 0 : index
    %c0_46 = arith.constant 0 : index
    %48 = vector.load %arg7[%c1_44, %c0_45, %c0_46] : memref<3x128x128xf32, #tpu.memory_space<vmem>>, vector<1x128x128xf32>
    %49 = vector.shape_cast %48 : vector<1x128x128xf32> to vector<128x128xf32>
    %cst_47 = arith.constant dense<0.000000e+00> : vector<384x128xf32>
    %50 = tpu.matmul %47, %49, %cst_47 {dimension_numbers = #tpu.dot_dimension_numbers<[1], [0], [0], [1], [0, 0, 1, 1], [], []>} : vector<384x128xf32>, vector<128x128xf32>, vector<384x128xf32> -> vector<384x128xf32>
    %c1_48 = arith.constant 1 : index
    %c0_49 = arith.constant 0 : index
    %c0_50 = arith.constant 0 : index
    %51 = vector.load %arg8[%c1_48, %c0_49, %c0_50] : memref<3x1x128xf32, #tpu.memory_space<vmem>>, vector<1x1x128xf32>
    %52 = vector.shape_cast %51 : vector<1x1x128xf32> to vector<1x128xf32>
    %53 = vector.broadcast %52 : vector<1x128xf32> to vector<384x128xf32>
    %54 = arith.addf %50, %53 : vector<384x128xf32>
    %55 = arith.addf %54, %9 : vector<384x128xf32>
    %cst_51 = arith.constant 0.000000e+00 : f32
    %56 = vector.broadcast %cst_51 : f32 to vector<384x128xf32>
    %57 = arith.maximumf %55, %56 : vector<384x128xf32>
    %cst_52 = arith.constant dense<0.000000e+00> : vector<8x128xf32>
    %58 = tpu.matmul %3, %57, %cst_52 {dimension_numbers = #tpu.dot_dimension_numbers<[1], [0], [0], [1], [0, 0, 1, 1], [], []>} : vector<8x384xf32>, vector<384x128xf32>, vector<8x128xf32> -> vector<8x128xf32>
    %c2 = arith.constant 2 : index
    %c0_53 = arith.constant 0 : index
    %c0_54 = arith.constant 0 : index
    %59 = vector.load %arg9[%c2, %c0_53, %c0_54] : memref<4x128x128xf32, #tpu.memory_space<vmem>>, vector<1x128x128xf32>
    %60 = vector.shape_cast %59 : vector<1x128x128xf32> to vector<128x128xf32>
    %cst_55 = arith.constant dense<0.000000e+00> : vector<8x128xf32>
    %61 = tpu.matmul %58, %60, %cst_55 {dimension_numbers = #tpu.dot_dimension_numbers<[1], [0], [0], [1], [0, 0, 1, 1], [], []>} : vector<8x128xf32>, vector<128x128xf32>, vector<8x128xf32> -> vector<8x128xf32>
    %62 = arith.addf %37, %61 : vector<8x128xf32>
    %cst_56 = arith.constant dense<0.000000e+00> : vector<384x128xf32>
    %63 = tpu.matmul %1, %57, %cst_56 {dimension_numbers = #tpu.dot_dimension_numbers<[1], [0], [0], [1], [0, 0, 1, 1], [], []>} : vector<384x384xf32>, vector<384x128xf32>, vector<384x128xf32> -> vector<384x128xf32>
    %c2_57 = arith.constant 2 : index
    %c0_58 = arith.constant 0 : index
    %c0_59 = arith.constant 0 : index
    %64 = vector.load %arg5[%c2_57, %c0_58, %c0_59] : memref<3x128x128xf32, #tpu.memory_space<vmem>>, vector<1x128x128xf32>
    %65 = vector.shape_cast %64 : vector<1x128x128xf32> to vector<128x128xf32>
    %cst_60 = arith.constant dense<0.000000e+00> : vector<384x128xf32>
    %66 = tpu.matmul %63, %65, %cst_60 {dimension_numbers = #tpu.dot_dimension_numbers<[1], [0], [0], [1], [0, 0, 1, 1], [], []>} : vector<384x128xf32>, vector<128x128xf32>, vector<384x128xf32> -> vector<384x128xf32>
    %c2_61 = arith.constant 2 : index
    %c0_62 = arith.constant 0 : index
    %c0_63 = arith.constant 0 : index
    %67 = vector.load %arg6[%c2_61, %c0_62, %c0_63] : memref<3x1x128xf32, #tpu.memory_space<vmem>>, vector<1x1x128xf32>
    %68 = vector.shape_cast %67 : vector<1x1x128xf32> to vector<1x128xf32>
    %69 = vector.broadcast %68 : vector<1x128xf32> to vector<384x128xf32>
    %70 = arith.addf %66, %69 : vector<384x128xf32>
    %cst_64 = arith.constant 0.000000e+00 : f32
    %71 = vector.broadcast %cst_64 : f32 to vector<384x128xf32>
    %72 = arith.maximumf %70, %71 : vector<384x128xf32>
    %c2_65 = arith.constant 2 : index
    %c0_66 = arith.constant 0 : index
    %c0_67 = arith.constant 0 : index
    %73 = vector.load %arg7[%c2_65, %c0_66, %c0_67] : memref<3x128x128xf32, #tpu.memory_space<vmem>>, vector<1x128x128xf32>
    %74 = vector.shape_cast %73 : vector<1x128x128xf32> to vector<128x128xf32>
    %cst_68 = arith.constant dense<0.000000e+00> : vector<384x128xf32>
    %75 = tpu.matmul %72, %74, %cst_68 {dimension_numbers = #tpu.dot_dimension_numbers<[1], [0], [0], [1], [0, 0, 1, 1], [], []>} : vector<384x128xf32>, vector<128x128xf32>, vector<384x128xf32> -> vector<384x128xf32>
    %c2_69 = arith.constant 2 : index
    %c0_70 = arith.constant 0 : index
    %c0_71 = arith.constant 0 : index
    %76 = vector.load %arg8[%c2_69, %c0_70, %c0_71] : memref<3x1x128xf32, #tpu.memory_space<vmem>>, vector<1x1x128xf32>
    %77 = vector.shape_cast %76 : vector<1x1x128xf32> to vector<1x128xf32>
    %78 = vector.broadcast %77 : vector<1x128xf32> to vector<384x128xf32>
    %79 = arith.addf %75, %78 : vector<384x128xf32>
    %cst_72 = arith.constant 0.000000e+00 : f32
    %80 = vector.broadcast %cst_72 : f32 to vector<384x128xf32>
    %81 = arith.maximumf %79, %80 : vector<384x128xf32>
    %cst_73 = arith.constant dense<0.000000e+00> : vector<8x128xf32>
    %82 = tpu.matmul %3, %81, %cst_73 {dimension_numbers = #tpu.dot_dimension_numbers<[1], [0], [0], [1], [0, 0, 1, 1], [], []>} : vector<8x384xf32>, vector<384x128xf32>, vector<8x128xf32> -> vector<8x128xf32>
    %c3 = arith.constant 3 : index
    %c0_74 = arith.constant 0 : index
    %c0_75 = arith.constant 0 : index
    %83 = vector.load %arg9[%c3, %c0_74, %c0_75] : memref<4x128x128xf32, #tpu.memory_space<vmem>>, vector<1x128x128xf32>
    %84 = vector.shape_cast %83 : vector<1x128x128xf32> to vector<128x128xf32>
    %cst_76 = arith.constant dense<0.000000e+00> : vector<8x128xf32>
    %85 = tpu.matmul %82, %84, %cst_76 {dimension_numbers = #tpu.dot_dimension_numbers<[1], [0], [0], [1], [0, 0, 1, 1], [], []>} : vector<8x128xf32>, vector<128x128xf32>, vector<8x128xf32> -> vector<8x128xf32>
    %86 = arith.addf %62, %85 : vector<8x128xf32>
    %c0_77 = arith.constant 0 : index
    %c0_78 = arith.constant 0 : index
    %87 = vector.load %arg10[%c0_77, %c0_78] : memref<1x128xf32, #tpu.memory_space<vmem>>, vector<1x128xf32>
    %88 = vector.broadcast %87 : vector<1x128xf32> to vector<8x128xf32>
    %89 = arith.addf %86, %88 : vector<8x128xf32>
    %cst_79 = arith.constant 0.000000e+00 : f32
    %90 = vector.broadcast %cst_79 : f32 to vector<8x128xf32>
    %91 = arith.maximumf %89, %90 : vector<8x128xf32>
    %c0_80 = arith.constant 0 : index
    %c0_81 = arith.constant 0 : index
    %92 = vector.load %arg11[%c0_80, %c0_81] : memref<128x128xf32, #tpu.memory_space<vmem>>, vector<128x128xf32>
    %cst_82 = arith.constant dense<0.000000e+00> : vector<8x128xf32>
    %93 = tpu.matmul %91, %92, %cst_82 {dimension_numbers = #tpu.dot_dimension_numbers<[1], [0], [0], [1], [0, 0, 1, 1], [], []>} : vector<8x128xf32>, vector<128x128xf32>, vector<8x128xf32> -> vector<8x128xf32>
    %c0_83 = arith.constant 0 : index
    %c0_84 = arith.constant 0 : index
    %94 = vector.load %arg12[%c0_83, %c0_84] : memref<1x128xf32, #tpu.memory_space<vmem>>, vector<1x128xf32>
    %95 = vector.broadcast %94 : vector<1x128xf32> to vector<8x128xf32>
    %96 = arith.addf %93, %95 : vector<8x128xf32>
    %c0_85 = arith.constant 0 : index
    %c0_86 = arith.constant 0 : index
    %97 = vector.load %arg13[%c0_85, %c0_86] : memref<8x128xf32, #tpu.memory_space<vmem>>, vector<8x128xf32>
    tpu.vector_store %arg13[%c0_85, %c0_86], %96 {strides = array<i32>} : memref<8x128xf32, #tpu.memory_space<vmem>>, vector<8x128xf32>,
    return
  }
}

</mosaic_0001>

<bundles_post_ra>
// kernel: embed_forward.1
= control target key start
LH: loop header
LB: loop body
LE: loop exit
PB: predicated region body
PF: predicated region fallthrough
CT: control target
= control target key end

     0   :  { %18 = vsyncpa [#allocation3], 0  ;;  %s11085_s0 = inlined_call_operand.hbm [shape: f32[384,128], index: 0, kind: input, shape index: {}]   ;;  %s11086_s1 = inlined_call_operand.hbm [shape: bf16[384,384], index: 1, kind: input, shape index: {}]   ;;  %s11087_s2 = inlined_call_operand.hbm [shape: bf16[8,384], index: 2, kind: input, shape index: {}]   ;;  %s11088_s3 = inlined_call_operand.hbm [shape: f32[128,128], index: 3, kind: input, shape index: {}]   ;;  %s11089_s4 = inlined_call_operand.vmem [shape: f32[1,128], index: 4, kind: input, shape index: {}]   ;;  %s11090_s5 = inlined_call_operand.hbm [shape: f32[3,128,128], index: 5, kind: input, shape index: {}]   ;;  %s11091_s6 = inlined_call_operand.vmem [shape: f32[3,1,128], index: 6, kind: input, shape index: {}]   ;;  %s11092_s7 = inlined_call_operand.hbm [shape: f32[3,128,128], index: 7, kind: input, shape index: {}]   ;;  %s11093_s8 = inlined_call_operand.vmem [shape: f32[3,1,128], index: 8, kind: input, shape index: {}]   ;;  %s11094_s9 = inlined_call_operand.hbm [shape: f32[4,128,128], index: 9, kind: input, shape index: {}]   ;;  %s11095_s10 = inlined_call_operand.vmem [shape: f32[1,128], index: 10, kind: input, shape index: {}]   ;;  %s11096_s11 = inlined_call_operand.hbm [shape: f32[128,128], index: 11, kind: input, shape index: {}]   ;;  %s11097_s12 = inlined_call_operand.vmem [shape: f32[1,128], index: 12, kind: input, shape index: {}]   ;;  %s11098_s13 = inlined_call_operand.hbm [shape: f32[8,128], index: 13, kind: output, shape index: {}]  }
   0x1   :  { %19 = vsyncpa [#allocation6], 0 }
   0x2   :  { %20 = vsyncpa [#allocation9], 0 }
   0x3   :  { %21 = vsyncpa [#allocation12], 0 }
   0x4   :  { %22 = vsyncpa [#allocation15], 0 }
   0x5   :  { %23 = vsyncpa [#allocation4], 0  ;;  %s8454_s25 = smov [#allocation5]  }
   0x6   :  { %s41_s26 = sshll.u32 %s8454_s25, 4  ;;  %s42_s26 = int_to_ptr.vmem [resolvable:$true] %s41_s26 }
   0x7   :  { %s8270_s27 = scalar_lea.vmem %s42_s26, 9216  ;;  %p8275_p1 = scmp.lt.s32.totalorder %s42_s26, %s42_s26 }
   0x8   :  { %p8271_p0 = scmp.ne.s32.totalorder %s42_s26, %s8270_s27  ;;  %p8276_p2 = scmp.lt.s32.totalorder %s8270_s27, %s8270_s27 }
   0xa   :  { %p8277_p3 = por %p8276_p2, %p8275_p1 }
   0xc   :  { %p8278_p4 = pnand %p8277_p3, %p8271_p0 }
   0xe   :  { %8281 = shalt.err (!%p8278_p4)
}
   0xf   :  { %s8455_s28 = smov 192   ;;  %s8456_s29 = smov 12  }
  0x10   :  { %47 = dma.hbm_to_vmem [thread:$0]  %s11086_s1, 9216, %s42_s26, [#allocation6], %s8455_s28, %s8455_s28, %s8456_s29  }
  0x11   :  { %s8457_s15 = smov [#allocation8]   ;;  %s8458_s17 = smov [#allocation11]  }
  0x12   :  { %s63_s16 = sshll.u32 %s8457_s15, 4  ;;  %s91_s18 = sshll.u32 %s8458_s17, 4  ;;  %s64_s16 = int_to_ptr.vmem [resolvable:$true] %s63_s16  ;;  %s92_s18 = int_to_ptr.vmem [resolvable:$true] %s91_s18 }
  0x13   :  { %s8290_s19 = scalar_lea.vmem %s64_s16, 2048  ;;  %p8295_p6 = scmp.lt.s32.totalorder %s64_s16, %s64_s16 }
  0x14   :  { %p8291_p5 = scmp.ne.s32.totalorder %s64_s16, %s8290_s19  ;;  %p8296_p7 = scmp.lt.s32.totalorder %s8290_s19, %s8290_s19 }
  0x16   :  { %p8297_p8 = por %p8296_p7, %p8295_p6 }
  0x18   :  { %p8298_p9 = pnand %p8297_p8, %p8291_p5 }
  0x1a   :  { %8301 = shalt.err (!%p8298_p9)
}
  0x1b   :  { %s8459_s20 = smov 128   ;;  %s8460_s21 = smov 8  }
  0x1c   :  { %69 = dma.hbm_to_vmem [thread:$0]  %s11088_s3, 2048, %s64_s16, [#allocation9], %s8459_s20, %s8459_s20, %s8460_s21  }
  0x1d   :  { %s8310_s1 = scalar_lea.vmem %s92_s18, 6144  ;;  %p8315_p11 = scmp.lt.s32.totalorder %s92_s18, %s92_s18 }
  0x1e   :  { %p8311_p10 = scmp.ne.s32.totalorder %s92_s18, %s8310_s1  ;;  %p8316_p12 = scmp.lt.s32.totalorder %s8310_s1, %s8310_s1 }
  0x20   :  { %p8317_p13 = por %p8316_p12, %p8315_p11 }
  0x22   :  { %p8318_p0 = pnand %p8317_p13, %p8311_p10 }
  0x24   :  { %8321 = shalt.err (!%p8318_p0)
}
  0x25   :  { %97 = dma.hbm_to_vmem [thread:$0]  %s11092_s7, 6144, %s92_s18, [#allocation12], %s8459_s20, %s8459_s20, %s8460_s21  }
  0x26   :  { %s8461_s26 = smov [#allocation2]   ;;  %s8462_s28 = smov [#allocation7]  }
  0x27   :  { %s29_s27 = sshll.u32 %s8461_s26, 4  ;;  %s54_s3 = sshll.u32 %s8462_s28, 4  ;;  %s30_s27 = int_to_ptr.vmem [resolvable:$true] %s29_s27  ;;  %s55_s3 = int_to_ptr.vmem [resolvable:$true] %s54_s3 }
  0x28   :  { %s8330_s29 = scalar_lea.vmem %s30_s27, 6144  ;;  %p8335_p2 = scmp.lt.s32.totalorder %s30_s27, %s30_s27 }
  0x29   :  { %p8331_p1 = scmp.ne.s32.totalorder %s30_s27, %s8330_s29  ;;  %p8336_p3 = scmp.lt.s32.totalorder %s8330_s29, %s8330_s29 }
  0x2b   :  { %p8337_p4 = por %p8336_p3, %p8335_p2 }
  0x2d   :  { %p8338_p5 = pnand %p8337_p4, %p8331_p1 }
  0x2f   :  { %8341 = shalt.err (!%p8338_p5)
}
  0x30   :  { %35 = dma.hbm_to_vmem [thread:$0]  %s11085_s0, 6144, %s30_s27, [#allocation3], %s8459_s20, %s8459_s20, %s8460_s21  }
  0x31   :  { %s8350_s7 = scalar_lea.vmem %s55_s3, 192  ;;  %p8355_p7 = scmp.lt.s32.totalorder %s55_s3, %s55_s3 }
  0x32   :  { %p8351_p6 = scmp.ne.s32.totalorder %s55_s3, %s8350_s7  ;;  %p8356_p8 = scmp.lt.s32.totalorder %s8350_s7, %s8350_s7 }
  0x34   :  { %p8357_p9 = por %p8356_p8, %p8355_p7 }
  0x36   :  { %p8358_p10 = pnand %p8357_p9, %p8351_p6 }
  0x38   :  { %8361 = shalt.err (!%p8358_p10)
}
  0x39   :  { %57 = dma.hbm_to_vmem [thread:$0]  %s11087_s2, 192, %s55_s3, [#allocation6]  }
  0x3a   :  { %s8463_s17 = smov [#allocation10]   ;;  %s8464_s19 = smov [#allocation13]  }
  0x3b   :  { %s77_s18 = sshll.u32 %s8463_s17, 4  ;;  %s105_s22 = sshll.u32 %s8464_s19, 4  ;;  %s78_s18 = int_to_ptr.vmem [resolvable:$true] %s77_s18  ;;  %s106_s22 = int_to_ptr.vmem [resolvable:$true] %s105_s22 }
  0x3c   :  { %s8370_s23 = scalar_lea.vmem %s78_s18, 6144  ;;  %p8375_p12 = scmp.lt.s32.totalorder %s78_s18, %s78_s18 }
  0x3d   :  { %p8371_p11 = scmp.ne.s32.totalorder %s78_s18, %s8370_s23  ;;  %p8376_p13 = scmp.lt.s32.totalorder %s8370_s23, %s8370_s23 }
  0x3f   :  { %p8377_p0 = por %p8376_p13, %p8375_p12 }
  0x41   :  { %p8378_p1 = pnand %p8377_p0, %p8371_p11 }
  0x43   :  { %8381 = shalt.err (!%p8378_p1)
}
  0x44   :  { %83 = dma.hbm_to_vmem [thread:$0]  %s11090_s5, 6144, %s78_s18, [#allocation9], %s8459_s20, %s8459_s20, %s8460_s21  }
  0x45   :  { %s8390_s2 = scalar_lea.vmem %s106_s22, 8192  ;;  %p8395_p3 = scmp.lt.s32.totalorder %s106_s22, %s106_s22 }
  0x46   :  { %p8391_p2 = scmp.ne.s32.totalorder %s106_s22, %s8390_s2  ;;  %p8396_p4 = scmp.lt.s32.totalorder %s8390_s2, %s8390_s2 }
  0x48   :  { %p8397_p5 = por %p8396_p4, %p8395_p3 }
  0x4a   :  { %p8398_p6 = pnand %p8397_p5, %p8391_p2 }
  0x4c   :  { %8401 = shalt.err (!%p8398_p6)
}
  0x4d   :  { %111 = dma.hbm_to_vmem [thread:$0]  %s11094_s9, 8192, %s106_s22, [#allocation12], %s8459_s20, %s8459_s20, %s8460_s21  }
  0x4e   :  { %s8465_s26 = smov [#allocation14]  }
  0x4f   :  { %s119_s27 = sshll.u32 %s8465_s26, 4  ;;  %s120_s27 = int_to_ptr.vmem [resolvable:$true] %s119_s27 }
  0x50   :  { %s8410_s28 = scalar_lea.vmem %s120_s27, 2048  ;;  %p8415_p8 = scmp.lt.s32.totalorder %s120_s27, %s120_s27 }
  0x51   :  { %p8411_p7 = scmp.ne.s32.totalorder %s120_s27, %s8410_s28  ;;  %p8416_p9 = scmp.lt.s32.totalorder %s8410_s28, %s8410_s28 }
  0x53   :  { %p8417_p10 = por %p8416_p9, %p8415_p8 }
  0x55   :  { %p8418_p11 = pnand %p8417_p10, %p8411_p7 }
  0x57   :  { %8421 = shalt.err (!%p8418_p11)
}
  0x58   :  { %125 = dma.hbm_to_vmem [thread:$0]  %s11096_s11, 2048, %s120_s27, [#allocation15], %s8459_s20, %s8459_s20, %s8460_s21  }
  0x59   :  { %8442 = dma.done.wait [#allocation3], 6144  }
  0x5a   :  { %8443 = vsyncadd [#allocation3], 4294961152 }
  0x5b   :  { %8444 = dma.done.wait [#allocation6], 9408  }
  0x5c   :  { %8445 = vsyncadd [#allocation6], 4294957888 }
  0x5d   :  { %8446 = dma.done.wait [#allocation9], 8192  }
  0x5e   :  { %8447 = vsyncadd [#allocation9], 4294959104 }
  0x5f   :  { %8448 = dma.done.wait [#allocation12], 14336  }
  0x60   :  { %8449 = vsyncadd [#allocation12], 4294952960 }
  0x61   :  { %8450 = dma.done.wait [#allocation15], 2048  }
  0x62   :  { %8451 = vsyncadd [#allocation15], 4294965248  ;;  %v460_v0 = vld [vmem:[#allocation8 + $0x78] sm:$0xff]  ;;  %v459_v1 = vld [vmem:[#allocation8 + $0x70] sm:$0xff]  ;;  %vm8467_vm0 = vmmov 0   ;;  %s8468_s0 = smov [#allocation16]  }
  0x63   :  { %6892 = vmatprep.subr.mxu0 %v460_v0  ;;  %v458_v2 = vld [vmem:[#allocation8 + $0x68] sm:$0xff]  ;;  %v457_v3 = vld [vmem:[#allocation8 + $0x60] sm:$0xff]  ;;  %v397_v4 = vld [vmem:[#allocation2] sm:$0xff]  ;;  %s5933_s1 = sshll.u32 %s8468_s0, 4  ;;  %s5934_s1 = int_to_ptr.vmem [resolvable:$true] %s5933_s1 }
  0x64   :  { %6893 = vmatpush3.msra.mxu0 %v460_v0  ;;  %v456_v5 = vld [vmem:[#allocation8 + $0x58] sm:$0xff]  ;;  %6924 = vmatprep.mubr.f32.mxu0 %v397_v4  ;;  %v455_v6 = vld [vmem:[#allocation8 + $0x50] sm:$0xff]  ;;  %v454_v7 = vld [vmem:[#allocation8 + $0x48] sm:$0xff]  ;;  %v11113_v0 = vmov 0.0   ;;  %s8422_s2 = scalar_lea.vmem %s5934_s1, 128  ;;  %p8427_p13 = scmp.lt.s32.totalorder %s5934_s1, %s5934_s1 }
  0x65   :  { %6894 = vmatprep.subr.mxu0 %v459_v1  ;;  %v453_v8 = vld [vmem:[#allocation8 + $0x40] sm:$0xff]  ;;  %v452_v9 = vld [vmem:[#allocation8 + $0x38] sm:$0xff]  ;;  %v451_v10 = vld [vmem:[#allocation8 + $0x30] sm:$0xff]  ;;  %p8423_p12 = scmp.ne.s32.totalorder %s5934_s1, %s8422_s2  ;;  %p8428_p0 = scmp.lt.s32.totalorder %s8422_s2, %s8422_s2 }
  0x66   :  { %6895 = vmatpush3.msra.mxu0 %v459_v1  ;;  %v450_v11 = vld [vmem:[#allocation8 + $0x28] sm:$0xff]  ;;  %v449_v12 = vld [vmem:[#allocation8 + $0x20] sm:$0xff]  ;;  %v448_v13 = vld [vmem:[#allocation8 + $0x18] sm:$0xff] }
  0x67   :  { %6896 = vmatprep.subr.mxu0 %v458_v2  ;;  %v447_v14 = vld [vmem:[#allocation8 + $0x10] sm:$0xff]  ;;  %v446_v15 = vld [vmem:[#allocation8 + $0x8] sm:$0xff]  ;;  %v445_v16 = vld [vmem:[#allocation8] sm:$0xff]  ;;  %p8429_p1 = por %p8428_p0, %p8427_p13 }
  0x68   :  { %6897 = vmatpush3.msra.mxu0 %v458_v2  ;;  %v398_v17 = vld [vmem:[#allocation2 + $0x8] sm:$0xff]  ;;  %v399_v18 = vld [vmem:[#allocation2 + $0x10] sm:$0xff]  ;;  %v400_v19 = vld [vmem:[#allocation2 + $0x18] sm:$0xff] }
  0x69   :  { %6898 = vmatprep.subr.mxu0 %v457_v3  ;;  %v401_v20 = vld [vmem:[#allocation2 + $0x20] sm:$0xff]  ;;  %v402_v21 = vld [vmem:[#allocation2 + $0x28] sm:$0xff]  ;;  %v403_v22 = vld [vmem:[#allocation2 + $0x30] sm:$0xff]  ;;  %p8430_p2 = pnand %p8429_p1, %p8423_p12 }
  0x6a   :  { %6899 = vmatpush3.msra.mxu0 %v457_v3  ;;  %v404_v23 = vld [vmem:[#allocation2 + $0x38] sm:$0xff]  ;;  %v405_v24 = vld [vmem:[#allocation2 + $0x40] sm:$0xff]  ;;  %v406_v25 = vld [vmem:[#allocation2 + $0x48] sm:$0xff] }
  0x6b   :  { %6900 = vmatprep.subr.mxu0 %v456_v5  ;;  %v407_v26 = vld [vmem:[#allocation2 + $0x50] sm:$0xff]  ;;  %v408_v27 = vld [vmem:[#allocation2 + $0x58] sm:$0xff]  ;;  %v409_v28 = vld [vmem:[#allocation2 + $0x60] sm:$0xff] }
  0x6c   :  { %6901 = vmatpush3.msra.mxu0 %v456_v5  ;;  %v410_v29 = vld [vmem:[#allocation2 + $0x68] sm:$0xff]  ;;  %v411_v30 = vld [vmem:[#allocation2 + $0x70] sm:$0xff]  ;;  %v412_v31 = vld [vmem:[#allocation2 + $0x78] sm:$0xff] }
  0x6d   :  { %6902 = vmatprep.subr.mxu0 %v455_v6  ;;  %v413_v32 = vld [vmem:[#allocation2 + $0x80] sm:$0xff]  ;;  %v414_v33 = vld [vmem:[#allocation2 + $0x88] sm:$0xff]  ;;  %v415_v34 = vld [vmem:[#allocation2 + $0x90] sm:$0xff] }
  0x6e   :  { %6903 = vmatpush3.msra.mxu0 %v455_v6  ;;  %v416_v35 = vld [vmem:[#allocation2 + $0x98] sm:$0xff]  ;;  %v417_v36 = vld [vmem:[#allocation2 + $0xa0] sm:$0xff]  ;;  %v418_v37 = vld [vmem:[#allocation2 + $0xa8] sm:$0xff] }
  0x6f   :  { %6904 = vmatprep.subr.mxu0 %v454_v7  ;;  %v419_v38 = vld [vmem:[#allocation2 + $0xb0] sm:$0xff]  ;;  %v420_v39 = vld [vmem:[#allocation2 + $0xb8] sm:$0xff]  ;;  %v421_v40 = vld [vmem:[#allocation2 + $0xc0] sm:$0xff] }
  0x70   :  { %6905 = vmatpush3.msra.mxu0 %v454_v7  ;;  %v422_v41 = vld [vmem:[#allocation2 + $0xc8] sm:$0xff]  ;;  %v423_v42 = vld [vmem:[#allocation2 + $0xd0] sm:$0xff]  ;;  %v424_v43 = vld [vmem:[#allocation2 + $0xd8] sm:$0xff] }
  0x71   :  { %6906 = vmatprep.subr.mxu0 %v453_v8  ;;  %v425_v44 = vld [vmem:[#allocation2 + $0xe0] sm:$0xff]  ;;  %v426_v45 = vld [vmem:[#allocation2 + $0xe8] sm:$0xff]  ;;  %v427_v46 = vld [vmem:[#allocation2 + $0xf0] sm:$0xff] }
  0x72   :  { %6907 = vmatpush3.msra.mxu0 %v453_v8  ;;  %v428_v47 = vld [vmem:[#allocation2 + $0xf8] sm:$0xff]  ;;  %v429_v48 = vld [vmem:[#allocation2 + $0x100] sm:$0xff]  ;;  %v430_v49 = vld [vmem:[#allocation2 + $0x108] sm:$0xff] }
  0x73   :  { %6908 = vmatprep.subr.mxu0 %v452_v9  ;;  %v431_v50 = vld [vmem:[#allocation2 + $0x110] sm:$0xff]  ;;  %v432_v51 = vld [vmem:[#allocation2 + $0x118] sm:$0xff]  ;;  %v433_v52 = vld [vmem:[#allocation2 + $0x120] sm:$0xff] }
  0x74   :  { %6909 = vmatpush3.msra.mxu0 %v452_v9  ;;  %v434_v53 = vld [vmem:[#allocation2 + $0x128] sm:$0xff]  ;;  %v435_v54 = vld [vmem:[#allocation2 + $0x130] sm:$0xff]  ;;  %v436_v55 = vld [vmem:[#allocation2 + $0x138] sm:$0xff] }
  0x75   :  { %6910 = vmatprep.subr.mxu0 %v451_v10  ;;  %v437_v56 = vld [vmem:[#allocation2 + $0x140] sm:$0xff]  ;;  %v438_v57 = vld [vmem:[#allocation2 + $0x148] sm:$0xff]  ;;  %v439_v58 = vld [vmem:[#allocation2 + $0x150] sm:$0xff] }
  0x76   :  { %6911 = vmatpush3.msra.mxu0 %v451_v10  ;;  %v440_v59 = vld [vmem:[#allocation2 + $0x158] sm:$0xff]  ;;  %v441_v60 = vld [vmem:[#allocation2 + $0x160] sm:$0xff]  ;;  %v442_v61 = vld [vmem:[#allocation2 + $0x168] sm:$0xff] }
  0x77   :  { %6912 = vmatprep.subr.mxu0 %v450_v11  ;;  %v443_v62 = vld [vmem:[#allocation2 + $0x170] sm:$0xff]  ;;  %v444_v63 = vld [vmem:[#allocation2 + $0x178] sm:$0xff]  ;;  %v8582_v1 = vld [vmem:[#allocation5] sm:$0xff] }
  0x78   :  { %6913 = vmatpush3.msra.mxu0 %v450_v11  ;;  %v8585_v2 = vunpack.c.h.bf16 %v8582_v1  ;;  %v8587_v3 = vld [vmem:[#allocation7] sm:$0xff] }
  0x79   :  { %6914 = vmatprep.subr.mxu0 %v449_v12  ;;  %v8591_v4 = vunpack.c.h.bf16 %v8587_v3 }
  0x7a   :  { %6915 = vmatpush3.msra.mxu0 %v449_v12  ;;  %11484 = vst [vmem:[#allocation23_spill] sm:$0xff] %v8585_v2 }
  0x7b   :  { %6916 = vmatprep.subr.mxu0 %v448_v13  ;;  %11485 = vst [vmem:[#allocation24_spill] sm:$0xff] %v8591_v4  ;;  %837 = vmatprep.mubr.f32.mxu1 %v8591_v4 }
  0x7c   :  { %6917 = vmatpush3.msra.mxu0 %v448_v13 }
  0x7d   :  { %6918 = vmatprep.subr.mxu0 %v447_v14 }
  0x7e   :  { %6919 = vmatpush3.msra.mxu0 %v447_v14 }
  0x7f   :  { %6920 = vmatprep.subr.mxu0 %v446_v15 }
  0x80   :  { %6921 = vmatpush3.msra.mxu0 %v446_v15 }
  0x81   :  { %6922 = vmatprep.subr.mxu0 %v445_v16 }
  0x82   :  { %6923 = vmatpush3.msra.mxu0 %v445_v16 }
  0x83   :  { %6925 = vmatmul.mubr.f32.vlgmr.msra.gmra.mxu0 %v398_v17  ;;  %929 = vmatprep.subr.mxu0 %v11113_v0 }
  0x84   :  { %6927 = vmatprep.mubr.f32.mxu0 %v399_v18 }
  0x87   :  { %6928 = vmatmul.mubr.f32.gmra.mxu0 %v400_v19  ;;  %v8603_v19 = vld [vmem:[%s11089_s4] ss:$0 sm:$0xff] }
  0x88   :  { %6930 = vmatprep.mubr.f32.mxu0 %v401_v20 }
  0x8b   :  { %6931 = vmatmul.mubr.f32.gmra.mxu0 %v402_v21 }
  0x8c   :  { %6933 = vmatprep.mubr.f32.mxu0 %v403_v22 }
  0x8f   :  { %6934 = vmatmul.mubr.f32.gmra.mxu0 %v404_v23 }
  0x90   :  { %6936 = vmatprep.mubr.f32.mxu0 %v405_v24 }
  0x93   :  { %6937 = vmatmul.mubr.f32.gmra.mxu0 %v406_v25 }
  0x94   :  { %6939 = vmatprep.mubr.f32.mxu0 %v407_v26 }
  0x97   :  { %6940 = vmatmul.mubr.f32.gmra.mxu0 %v408_v27 }
  0x98   :  { %6942 = vmatprep.mubr.f32.mxu0 %v409_v28 }
  0x9b   :  { %6943 = vmatmul.mubr.f32.gmra.mxu0 %v410_v29 }
  0x9c   :  { %6945 = vmatprep.mubr.f32.mxu0 %v411_v30 }
  0x9f   :  { %6946 = vmatmul.mubr.f32.gmra.mxu0 %v412_v31 }
  0xa0   :  { %6948 = vmatprep.mubr.f32.mxu0 %v413_v32 }
  0xa3   :  { %6949 = vmatmul.mubr.f32.gmra.mxu0 %v414_v33 }
  0xa4   :  { %6951 = vmatprep.mubr.f32.mxu0 %v415_v34 }
  0xa7   :  { %6952 = vmatmul.mubr.f32.gmra.mxu0 %v416_v35 }
  0xa8   :  { %6954 = vmatprep.mubr.f32.mxu0 %v417_v36 }
  0xab   :  { %6955 = vmatmul.mubr.f32.gmra.mxu0 %v418_v37 }
  0xac   :  { %6957 = vmatprep.mubr.f32.mxu0 %v419_v38 }
  0xaf   :  { %6958 = vmatmul.mubr.f32.gmra.mxu0 %v420_v39 }
  0xb0   :  { %6960 = vmatprep.mubr.f32.mxu0 %v421_v40 }
  0xb3   :  { %6961 = vmatmul.mubr.f32.gmra.mxu0 %v422_v41 }
  0xb4   :  { %6963 = vmatprep.mubr.f32.mxu0 %v423_v42 }
  0xb7   :  { %6964 = vmatmul.mubr.f32.gmra.mxu0 %v424_v43 }
  0xb8   :  { %6966 = vmatprep.mubr.f32.mxu0 %v425_v44 }
  0xbb   :  { %6967 = vmatmul.mubr.f32.gmra.mxu0 %v426_v45 }
  0xbc   :  { %6969 = vmatprep.mubr.f32.mxu0 %v427_v46 }
  0xbf   :  { %6970 = vmatmul.mubr.f32.gmra.mxu0 %v428_v47 }
  0xc0   :  { %6972 = vmatprep.mubr.f32.mxu0 %v429_v48 }
  0xc3   :  { %6973 = vmatmul.mubr.f32.gmra.mxu0 %v430_v49 }
  0xc4   :  { %6975 = vmatprep.mubr.f32.mxu0 %v431_v50 }
  0xc7   :  { %6976 = vmatmul.mubr.f32.gmra.mxu0 %v432_v51 }
  0xc8   :  { %6978 = vmatprep.mubr.f32.mxu0 %v433_v52 }
  0xcb   :  { %6979 = vmatmul.mubr.f32.gmra.mxu0 %v434_v53 }
  0xcc   :  { %6981 = vmatprep.mubr.f32.mxu0 %v435_v54 }
  0xcf   :  { %6982 = vmatmul.mubr.f32.gmra.mxu0 %v436_v55 }
  0xd0   :  { %6984 = vmatprep.mubr.f32.mxu0 %v437_v56 }
  0xd3   :  { %6985 = vmatmul.mubr.f32.gmra.mxu0 %v438_v57 }
  0xd4   :  { %6987 = vmatprep.mubr.f32.mxu0 %v439_v58 }
  0xd7   :  { %6988 = vmatmul.mubr.f32.gmra.mxu0 %v440_v59 }
  0xd8   :  { %6990 = vmatprep.mubr.f32.mxu0 %v441_v60 }
  0xdb   :  { %6991 = vmatmul.mubr.f32.gmra.mxu0 %v442_v61 }
  0xdc   :  { %6993 = vmatprep.mubr.f32.mxu0 %v443_v62 }
  0xdf   :  { %6994 = vmatmul.mubr.f32.gmra.mxu0 %v444_v63 }
  0xe0   :  { %993 = vmatprep.mubr.f32.mxu0 %v8585_v2 }
 0x143   :  { %v8594_v5 = vpop.f32.mrf.mxu0 }
 0x144   :  { %v8692_v49 = vadd.f32 %v8594_v5, %v8603_v19 }
 0x145   :  { %v8596_v6 = vpop.f32.mrf.mxu0 }
 0x146   :  { %11500 = vst [vmem:[#allocation39_spill] sm:$0xff] %v8692_v49  ;;  %v8698_v51 = vadd.f32 %v8603_v19, %v8596_v6 }
 0x147   :  { %v6929_v7 = vpop.f32.mrf.mxu0 }
 0x148   :  { %v8680_v45 = vadd.f32 %v6929_v7, %v8603_v19  ;;  %11501 = vst [vmem:[#allocation40_spill] sm:$0xff] %v8698_v51 }
 0x149   :  { %v8598_v8 = vpop.f32.mrf.mxu0 }
 0x14a   :  { %11498 = vst [vmem:[#allocation37_spill] sm:$0xff] %v8680_v45  ;;  %v8686_v47 = vadd.f32 %v8603_v19, %v8598_v8 }
 0x14b   :  { %v6932_v9 = vpop.f32.mrf.mxu0 }
 0x14c   :  { %v8670_v41 = vadd.f32 %v6932_v9, %v8603_v19  ;;  %11499 = vst [vmem:[#allocation38_spill] sm:$0xff] %v8686_v47 }
 0x14d   :  { %v554_v10 = vpop.f32.mrf.mxu0 }
 0x14e   :  { %11496 = vst [vmem:[#allocation35_spill] sm:$0xff] %v8670_v41  ;;  %v8675_v43 = vadd.f32 %v8603_v19, %v554_v10 }
 0x14f   :  { %v6935_v11 = vpop.f32.mrf.mxu0 }
 0x150   :  { %v8658_v37 = vadd.f32 %v6935_v11, %v8603_v19  ;;  %11497 = vst [vmem:[#allocation36_spill] sm:$0xff] %v8675_v43 }
 0x151   :  { %v564_v12 = vpop.f32.mrf.mxu0 }
 0x152   :  { %11494 = vst [vmem:[#allocation33_spill] sm:$0xff] %v8658_v37  ;;  %v8665_v39 = vadd.f32 %v8603_v19, %v564_v12 }
 0x153   :  { %v6938_v13 = vpop.f32.mrf.mxu0 }
 0x154   :  { %v8644_v33 = vadd.f32 %v6938_v13, %v8603_v19  ;;  %11495 = vst [vmem:[#allocation34_spill] sm:$0xff] %v8665_v39 }
 0x155   :  { %v574_v14 = vpop.f32.mrf.mxu0 }
 0x156   :  { %11492 = vst [vmem:[#allocation31_spill] sm:$0xff] %v8644_v33  ;;  %v8651_v35 = vadd.f32 %v8603_v19, %v574_v14 }
 0x157   :  { %v6941_v15 = vpop.f32.mrf.mxu0 }
 0x158   :  { %v8630_v29 = vadd.f32 %v6941_v15, %v8603_v19  ;;  %11493 = vst [vmem:[#allocation32_spill] sm:$0xff] %v8651_v35 }
 0x159   :  { %v584_v16 = vpop.f32.mrf.mxu0 }
 0x15a   :  { %11490 = vst [vmem:[#allocation29_spill] sm:$0xff] %v8630_v29  ;;  %v8637_v31 = vadd.f32 %v8603_v19, %v584_v16 }
 0x15b   :  { %v6944_v17 = vpop.f32.mrf.mxu0 }
 0x15c   :  { %v8616_v25 = vadd.f32 %v6944_v17, %v8603_v19  ;;  %11491 = vst [vmem:[#allocation30_spill] sm:$0xff] %v8637_v31 }
 0x15d   :  { %v594_v18 = vpop.f32.mrf.mxu0 }
 0x15e   :  { %11488 = vst [vmem:[#allocation27_spill] sm:$0xff] %v8616_v25  ;;  %v8623_v27 = vadd.f32 %v8603_v19, %v594_v18 }
 0x15f   :  { %v6947_v20 = vpop.f32.mrf.mxu0 }
 0x160   :  { %v8606_v21 = vadd.f32 %v6947_v20, %v8603_v19  ;;  %11489 = vst [vmem:[#allocation28_spill] sm:$0xff] %v8623_v27 }
 0x161   :  { %v604_v22 = vpop.f32.mrf.mxu0 }
 0x162   :  { %11486 = vst [vmem:[#allocation25_spill] sm:$0xff] %v8606_v21  ;;  %v8609_v23 = vadd.f32 %v8603_v19, %v604_v22  ;;  %930 = vmatpush1.msra.mxu0 %v8606_v21 }
 0x163   :  { %v8612_v24 = vpop.f32.mrf.mxu0  ;;  %931 = vmatprep.subr.mxu0 %v11113_v0 }
 0x164   :  { %11487 = vst [vmem:[#allocation26_spill] sm:$0xff] %v8609_v23  ;;  %932 = vmatpush1.msra.mxu0 %v8609_v23 }
 0x165   :  { %v8619_v26 = vpop.f32.mrf.mxu0  ;;  %933 = vmatprep.subr.mxu0 %v11113_v0 }
 0x166   :  { %934 = vmatpush1.msra.mxu0 %v8616_v25 }
 0x167   :  { %v8626_v28 = vpop.f32.mrf.mxu0  ;;  %935 = vmatprep.subr.mxu0 %v11113_v0 }
 0x168   :  { %936 = vmatpush1.msra.mxu0 %v8623_v27  ;;  %v8810_v18 = vadd.f32 %v8626_v28, %v8603_v19  ;;  %v8826_v28 = vadd.f32 %v8612_v24, %v8603_v19  ;;  %v8842_v24 = vunpack.c.l.bf16 %v8587_v3 }
 0x169   :  { %v8633_v30 = vpop.f32.mrf.mxu0  ;;  %937 = vmatprep.subr.mxu0 %v11113_v0 }
 0x16a   :  { %938 = vmatpush1.msra.mxu0 %v8630_v29  ;;  %11514 = vst [vmem:[#allocation53_spill] sm:$0xff] %v8810_v18  ;;  %v8818_v22 = vadd.f32 %v8603_v19, %v8633_v30  ;;  %11516 = vst [vmem:[#allocation55_spill] sm:$0xff] %v8826_v28 }
 0x16b   :  { %v8640_v32 = vpop.f32.mrf.mxu0  ;;  %939 = vmatprep.subr.mxu0 %v11113_v0  ;;  %11519 = vst [vmem:[#allocation58_spill] sm:$0xff] %v8842_v24 }
 0x16c   :  { %940 = vmatpush1.msra.mxu0 %v8637_v31  ;;  %v8792_v14 = vadd.f32 %v8640_v32, %v8603_v19  ;;  %11515 = vst [vmem:[#allocation54_spill] sm:$0xff] %v8818_v22 }
 0x16d   :  { %v8647_v34 = vpop.f32.mrf.mxu0  ;;  %941 = vmatprep.subr.mxu0 %v11113_v0 }
 0x16e   :  { %942 = vmatpush1.msra.mxu0 %v8644_v33  ;;  %11512 = vst [vmem:[#allocation51_spill] sm:$0xff] %v8792_v14  ;;  %v8802_v16 = vadd.f32 %v8603_v19, %v8647_v34  ;;  %v154_v34 = vld [vmem:[#allocation5 + $0xc] sm:$0xff] }
 0x16f   :  { %v8654_v36 = vpop.f32.mrf.mxu0  ;;  %943 = vmatprep.subr.mxu0 %v11113_v0  ;;  %v8855_v3 = vunpack.c.l.bf16 %v154_v34 }
 0x170   :  { %944 = vmatpush1.msra.mxu0 %v8651_v35  ;;  %v8772_v10 = vadd.f32 %v8654_v36, %v8603_v19  ;;  %11513 = vst [vmem:[#allocation52_spill] sm:$0xff] %v8802_v16  ;;  %v8833_v36 = vunpack.c.l.bf16 %v8582_v1  ;;  %v156_v1 = vld [vmem:[#allocation5 + $0x18] sm:$0xff] }
 0x171   :  { %v8661_v38 = vpop.f32.mrf.mxu0  ;;  %945 = vmatprep.subr.mxu0 %v11113_v0  ;;  %11522 = vst [vmem:[#allocation61_spill] sm:$0xff] %v8855_v3 }
 0x172   :  { %946 = vmatpush1.msra.mxu0 %v8658_v37  ;;  %11510 = vst [vmem:[#allocation49_spill] sm:$0xff] %v8772_v10  ;;  %v8782_v12 = vadd.f32 %v8603_v19, %v8661_v38  ;;  %11517 = vst [vmem:[#allocation56_spill] sm:$0xff] %v8833_v36  ;;  %v8837_v38 = vadd.f32 %v8603_v19, %v8619_v26 }
 0x173   :  { %v6962_v40 = vpop.f32.mrf.mxu0  ;;  %947 = vmatprep.subr.mxu0 %v11113_v0 }
 0x174   :  { %948 = vmatpush1.msra.mxu0 %v8665_v39  ;;  %v8753_v6 = vadd.f32 %v6962_v40, %v8603_v19  ;;  %11511 = vst [vmem:[#allocation50_spill] sm:$0xff] %v8782_v12  ;;  %11518 = vst [vmem:[#allocation57_spill] sm:$0xff] %v8837_v38 }
 0x175   :  { %v654_v42 = vpop.f32.mrf.mxu0  ;;  %949 = vmatprep.subr.mxu0 %v11113_v0 }
 0x176   :  { %950 = vmatpush1.msra.mxu0 %v8670_v41  ;;  %11508 = vst [vmem:[#allocation47_spill] sm:$0xff] %v8753_v6  ;;  %v8762_v8 = vadd.f32 %v8603_v19, %v654_v42  ;;  %v8846_v42 = vunpack.c.h.bf16 %v154_v34 }
 0x177   :  { %v6965_v44 = vpop.f32.mrf.mxu0  ;;  %951 = vmatprep.subr.mxu0 %v11113_v0 }
 0x178   :  { %952 = vmatpush1.msra.mxu0 %v8675_v43  ;;  %v8735_v61 = vadd.f32 %v6965_v44, %v8603_v19  ;;  %11509 = vst [vmem:[#allocation48_spill] sm:$0xff] %v8762_v8  ;;  %11520 = vst [vmem:[#allocation59_spill] sm:$0xff] %v8846_v42 }
 0x179   :  { %v664_v46 = vpop.f32.mrf.mxu0  ;;  %953 = vmatprep.subr.mxu0 %v11113_v0 }
 0x17a   :  { %954 = vmatpush1.msra.mxu0 %v8680_v45  ;;  %11506 = vst [vmem:[#allocation45_spill] sm:$0xff] %v8735_v61  ;;  %v8744_v63 = vadd.f32 %v8603_v19, %v664_v46 }
 0x17b   :  { %v6968_v48 = vpop.f32.mrf.mxu0  ;;  %955 = vmatprep.subr.mxu0 %v11113_v0 }
 0x17c   :  { %956 = vmatpush1.msra.mxu0 %v8686_v47  ;;  %v8717_v57 = vadd.f32 %v6968_v48, %v8603_v19  ;;  %11507 = vst [vmem:[#allocation46_spill] sm:$0xff] %v8744_v63  ;;  %v8862_v48 = vunpack.c.h.bf16 %v156_v1 }
 0x17d   :  { %v674_v50 = vpop.f32.mrf.mxu0  ;;  %957 = vmatprep.subr.mxu0 %v11113_v0 }
 0x17e   :  { %958 = vmatpush1.msra.mxu0 %v8692_v49  ;;  %11504 = vst [vmem:[#allocation43_spill] sm:$0xff] %v8717_v57  ;;  %v8726_v59 = vadd.f32 %v8603_v19, %v674_v50  ;;  %11524 = vst [vmem:[#allocation63_spill] sm:$0xff] %v8862_v48 }
 0x17f   :  { %v6971_v52 = vpop.f32.mrf.mxu0  ;;  %959 = vmatprep.subr.mxu0 %v11113_v0 }
 0x180   :  { %v8703_v53 = vadd.f32 %v6971_v52, %v8603_v19  ;;  %960 = vmatpush1.msra.mxu0 %v8698_v51  ;;  %11505 = vst [vmem:[#allocation44_spill] sm:$0xff] %v8726_v59  ;;  %v158_v52 = vld [vmem:[#allocation5 + $0x24] sm:$0xff] }
 0x181   :  { %v684_v54 = vpop.f32.mrf.mxu0  ;;  %961 = vmatprep.subr.mxu0 %v11113_v0  ;;  %v8881_v34 = vunpack.c.h.bf16 %v158_v52 }
 0x182   :  { %11502 = vst [vmem:[#allocation41_spill] sm:$0xff] %v8703_v53  ;;  %v8708_v55 = vadd.f32 %v8603_v19, %v684_v54  ;;  %6023 = vmatprep.subr.mxu1 %v8703_v53  ;;  %962 = vmatpush2.msra.mxu0 %v8703_v53 }
 0x183   :  { %v8712_v56 = vpop.f32.mrf.mxu0  ;;  %6024 = vmatpush3.msra.mxu1 %v8606_v21  ;;  %963 = vmatprep.subr.mxu0 %v11113_v0  ;;  %11528 = vst [vmem:[#allocation67_spill] sm:$0xff] %v8881_v34 }
 0x184   :  { %11503 = vst [vmem:[#allocation42_spill] sm:$0xff] %v8708_v55  ;;  %6025 = vmatprep.subr.mxu1 %v8708_v55  ;;  %964 = vmatpush2.msra.mxu0 %v8708_v55  ;;  %v172_v55 = vld [vmem:[#allocation5 + $0x78] sm:$0xff] }
 0x185   :  { %v8721_v58 = vpop.f32.mrf.mxu0  ;;  %6026 = vmatpush3.msra.mxu1 %v8609_v23  ;;  %965 = vmatprep.subr.mxu0 %v11113_v0  ;;  %v196_v23 = vld [vmem:[#allocation5 + $0x108] sm:$0xff] }
 0x186   :  { %6027 = vmatprep.subr.mxu1 %v8717_v57  ;;  %966 = vmatpush2.msra.mxu0 %v8717_v57 }
 0x187   :  { %v8730_v60 = vpop.f32.mrf.mxu0  ;;  %6028 = vmatpush3.msra.mxu1 %v8616_v25  ;;  %967 = vmatprep.subr.mxu0 %v11113_v0  ;;  %v177_v25 = vld [vmem:[#allocation5 + $0x98] ss:$12 sps:$4 sm:$0xff]  }
 0x188   :  { %6029 = vmatprep.subr.mxu1 %v8726_v59  ;;  %968 = vmatpush2.msra.mxu0 %v8726_v59  ;;  %v8989_v59 = vadd.f32 %v8603_v19, %v8721_v58  ;;  %v174_v58 = vld [vmem:[#allocation5 + $0x84] sm:$0xff] }
 0x189   :  { %v8739_v62 = vpop.f32.mrf.mxu0  ;;  %6030 = vmatpush3.msra.mxu1 %v8623_v27  ;;  %969 = vmatprep.subr.mxu0 %v11113_v0  ;;  %v9022_v57 = vunpack.c.l.bf16 %v174_v58 }
 0x18a   :  { %6031 = vmatprep.subr.mxu1 %v8735_v61  ;;  %970 = vmatpush2.msra.mxu0 %v8735_v61  ;;  %v8981_v61 = vld [vmem:[#allocation5 + $0x8] ss:$12 sps:$4 sm:$0xff]   ;;  %11552 = vst [vmem:[#allocation91_spill] sm:$0xff] %v8989_v59 }
 0x18b   :  { %v8748_v5 = vpop.f32.mrf.mxu0  ;;  %6032 = vmatpush3.msra.mxu1 %v8630_v29  ;;  %971 = vmatprep.subr.mxu0 %v11113_v0  ;;  %11559 = vst [vmem:[#allocation98_spill] sm:$0xff] %v9022_v57 }
 0x18c   :  { %6033 = vmatprep.subr.mxu1 %v8744_v63  ;;  %972 = vmatpush2.msra.mxu0 %v8744_v63 }
 0x18d   :  { %v8757_v7 = vpop.f32.mrf.mxu0  ;;  %6034 = vmatpush3.msra.mxu1 %v8637_v31  ;;  %973 = vmatprep.subr.mxu0 %v11113_v0  ;;  %v173_v31 = vld [vmem:[#allocation5 + $0x80] ss:$12 sps:$4 sm:$0xff]  }
 0x18e   :  { %6035 = vmatprep.subr.mxu1 %v8753_v6  ;;  %974 = vmatpush2.msra.mxu0 %v8753_v6  ;;  %v170_v6 = vld [vmem:[#allocation5 + $0x6c] sm:$0xff]  ;;  %v9132_v27 = vunpack.c.l.bf16 %v173_v31 }
 0x18f   :  { %v8766_v9 = vpop.f32.mrf.mxu0  ;;  %6036 = vmatpush3.msra.mxu1 %v8644_v33  ;;  %975 = vmatprep.subr.mxu0 %v11113_v0  ;;  %v194_v33 = vld [vmem:[#allocation5 + $0xfc] sm:$0xff] }
 0x190   :  { %6037 = vmatprep.subr.mxu1 %v8762_v8  ;;  %976 = vmatpush2.msra.mxu0 %v8762_v8  ;;  %v8969_v8 = vadd.f32 %v8603_v19, %v8739_v62  ;;  %11588 = vst [vmem:[#allocation127_spill] sm:$0xff] %v9132_v27  ;;  %v9135_v21 = vunpack.c.l.bf16 %v194_v33 }
 0x191   :  { %v8776_v11 = vpop.f32.mrf.mxu0  ;;  %6038 = vmatpush3.msra.mxu1 %v8651_v35  ;;  %977 = vmatprep.subr.mxu0 %v11113_v0 }
 0x192   :  { %6039 = vmatprep.subr.mxu1 %v8772_v10  ;;  %978 = vmatpush2.msra.mxu0 %v8772_v10  ;;  %v8957_v10 = vadd.f32 %v8730_v60, %v8603_v19  ;;  %11548 = vst [vmem:[#allocation87_spill] sm:$0xff] %v8969_v8  ;;  %v393_v60 = vld [vmem:[#allocation7 + $0x8] sm:$0xf]  ;;  %11589 = vst [vmem:[#allocation128_spill] sm:$0xff] %v9135_v21 }
 0x193   :  { %v8786_v13 = vpop.f32.mrf.mxu0  ;;  %6040 = vmatpush3.msra.mxu1 %v8658_v37  ;;  %979 = vmatprep.subr.mxu0 %v11113_v0  ;;  %v8985_v62 = vunpack.c.l.bf16 %v393_v60  ;;  %v9000_v60 = vunpack.c.l.bf16 %v170_v6 }
 0x194   :  { %6041 = vmatprep.subr.mxu1 %v8782_v12  ;;  %980 = vmatpush2.msra.mxu0 %v8782_v12  ;;  %v8951_v12 = vadd.f32 %v8603_v19, %v8757_v7  ;;  %11545 = vst [vmem:[#allocation84_spill] sm:$0xff] %v8957_v10 }
 0x195   :  { %v8796_v15 = vpop.f32.mrf.mxu0  ;;  %6042 = vmatpush3.msra.mxu1 %v8665_v39  ;;  %981 = vmatprep.subr.mxu0 %v11113_v0  ;;  %11551 = vst [vmem:[#allocation90_spill] sm:$0xff] %v8985_v62  ;;  %11555 = vst [vmem:[#allocation94_spill] sm:$0xff] %v9000_v60  ;;  %v169_v39 = vld [vmem:[#allocation5 + $0x68] ss:$12 sps:$4 sm:$0xff]  }
 0x196   :  { %6043 = vmatprep.subr.mxu1 %v8792_v14  ;;  %982 = vmatpush2.msra.mxu0 %v8792_v14  ;;  %v8939_v14 = vadd.f32 %v8748_v5, %v8603_v19  ;;  %11544 = vst [vmem:[#allocation83_spill] sm:$0xff] %v8951_v12  ;;  %v168_v5 = vld [vmem:[#allocation5 + $0x60] sm:$0xff]  ;;  %v9120_v35 = vunpack.c.l.bf16 %v169_v39 }
 0x197   :  { %v6989_v17 = vpop.f32.mrf.mxu0  ;;  %6044 = vmatpush3.msra.mxu1 %v8670_v41  ;;  %983 = vmatprep.subr.mxu0 %v11113_v0  ;;  %v8965_v7 = vunpack.c.h.bf16 %v168_v5  ;;  %v8979_v63 = vunpack.c.l.bf16 %v168_v5  ;;  %v8996_v5 = vunpack.c.l.bf16 %v8981_v61  ;;  %v192_v41 = vld [vmem:[#allocation5 + $0xf0] sm:$0xff] }
 0x198   :  { %6045 = vmatprep.subr.mxu1 %v8802_v16  ;;  %984 = vmatpush2.msra.mxu0 %v8802_v16  ;;  %v8933_v16 = vadd.f32 %v8603_v19, %v8776_v11  ;;  %11541 = vst [vmem:[#allocation80_spill] sm:$0xff] %v8939_v14  ;;  %11584 = vst [vmem:[#allocation123_spill] sm:$0xff] %v9120_v35  ;;  %v9123_v29 = vunpack.c.l.bf16 %v192_v41 }
 0x199   :  { %v744_v20 = vpop.f32.mrf.mxu0  ;;  %6046 = vmatpush3.msra.mxu1 %v8675_v43  ;;  %985 = vmatprep.subr.mxu0 %v11113_v0  ;;  %11547 = vst [vmem:[#allocation86_spill] sm:$0xff] %v8965_v7  ;;  %11550 = vst [vmem:[#allocation89_spill] sm:$0xff] %v8979_v63 }
 0x19a   :  { %6047 = vmatprep.subr.mxu1 %v8810_v18  ;;  %986 = vmatpush2.msra.mxu0 %v8810_v18  ;;  %11540 = vst [vmem:[#allocation79_spill] sm:$0xff] %v8933_v16  ;;  %11554 = vst [vmem:[#allocation93_spill] sm:$0xff] %v8996_v5 }
 0x19b   :  { %v6992_v32 = vpop.f32.mrf.mxu0  ;;  %6048 = vmatpush3.msra.mxu1 %v8680_v45  ;;  %987 = vmatprep.subr.mxu0 %v11113_v0  ;;  %v165_v45 = vld [vmem:[#allocation5 + $0x50] ss:$12 sps:$4 sm:$0xff]   ;;  %11585 = vst [vmem:[#allocation124_spill] sm:$0xff] %v9123_v29 }
 0x19c   :  { %6049 = vmatprep.subr.mxu1 %v8818_v22  ;;  %988 = vmatpush2.msra.mxu0 %v8818_v22  ;;  %v8865_v50 = vadd.f32 %v6992_v32, %v8603_v19  ;;  %v8877_v32 = vunpack.c.l.bf16 %v156_v1  ;;  %v8893_v1 = vunpack.c.l.bf16 %v158_v52  ;;  %v164_v22 = vld [vmem:[#allocation5 + $0x48] sm:$0xff] }
 0x19d   :  { %v754_v30 = vpop.f32.mrf.mxu0  ;;  %6050 = vmatpush3.msra.mxu1 %v8686_v47  ;;  %989 = vmatprep.subr.mxu0 %v11113_v0  ;;  %v8929_v18 = vunpack.c.h.bf16 %v164_v22  ;;  %v190_v47 = vld [vmem:[#allocation5 + $0xe4] sm:$0xff] }
 0x19e   :  { %6051 = vmatprep.subr.mxu1 %v8826_v28  ;;  %990 = vmatpush2.msra.mxu0 %v8826_v28  ;;  %11525 = vst [vmem:[#allocation64_spill] sm:$0xff] %v8865_v50  ;;  %v8873_v54 = vadd.f32 %v8603_v19, %v754_v30  ;;  %11527 = vst [vmem:[#allocation66_spill] sm:$0xff] %v8877_v32  ;;  %v8889_v30 = vadd.f32 %v8603_v19, %v744_v20  ;;  %v162_v20 = vld [vmem:[#allocation5 + $0x3c] sm:$0xff]  ;;  %v9111_v37 = vunpack.c.l.bf16 %v190_v47 }
 0x19f   :  { %v6995_v40 = vpop.f32.mrf.mxu0  ;;  %6052 = vmatpush3.msra.mxu1 %v8692_v49  ;;  %991 = vmatprep.subr.mxu0 %v11113_v0  ;;  %11531 = vst [vmem:[#allocation70_spill] sm:$0xff] %v8893_v1  ;;  %v8907_v28 = vadd.f32 %v8603_v19, %v8796_v15  ;;  %v8921_v15 = vadd.f32 %v8766_v9, %v8603_v19  ;;  %11539 = vst [vmem:[#allocation78_spill] sm:$0xff] %v8929_v18  ;;  %v166_v9 = vld [vmem:[#allocation5 + $0x54] sm:$0xff] }
 0x1a0   :  { %v8849_v44 = vadd.f32 %v6995_v40, %v8603_v19  ;;  %6053 = vmatprep.subr.mxu1 %v8837_v38  ;;  %992 = vmatpush2.msra.mxu0 %v8837_v38  ;;  %11526 = vst [vmem:[#allocation65_spill] sm:$0xff] %v8873_v54  ;;  %v8884_v40 = vadd.f32 %v6989_v17, %v8603_v19  ;;  %11530 = vst [vmem:[#allocation69_spill] sm:$0xff] %v8889_v30  ;;  %v8947_v11 = vunpack.c.h.bf16 %v166_v9  ;;  %v161_v49 = vld [vmem:[#allocation5 + $0x38] ss:$12 sps:$4 sm:$0xff]  }
 0x1a1   :  { %v764_v26 = vpop.f32.mrf.mxu0  ;;  %6054 = vmatpush3.msra.mxu1 %v8698_v51  ;;  %994 = vmatmul.mubr.f32.vlgmr.msra.gmra.mxu0 %v8833_v36  ;;  %v8901_v38 = vadd.f32 %v8786_v13, %v8603_v19  ;;  %11534 = vst [vmem:[#allocation73_spill] sm:$0xff] %v8907_v28  ;;  %v8915_v13 = vunpack.c.h.bf16 %v162_v20  ;;  %11537 = vst [vmem:[#allocation76_spill] sm:$0xff] %v8921_v15  ;;  %v188_v51 = vld [vmem:[#allocation5 + $0xd8] sm:$0xff] }
 0x1a2   :  { %11521 = vst [vmem:[#allocation60_spill] sm:$0xff] %v8849_v44  ;;  %v8858_v46 = vadd.f32 %v8603_v19, %v764_v26  ;;  %838 = vmatmul.mubr.f32.vlgmr.msra.gmra.mxu1 %v8842_v24  ;;  %6996 = vmatprep.subr.mxu1 %v11113_v0  ;;  %11529 = vst [vmem:[#allocation68_spill] sm:$0xff] %v8884_v40  ;;  %v160_v26 = vld [vmem:[#allocation5 + $0x30] sm:$0xff]  ;;  %v9099_v43 = vunpack.c.l.bf16 %v188_v51 }
 0x1a3   :  { %6997 = vmatpush3.msra.mxu1 %v8849_v44  ;;  %998 = vmatprep.mubr.f32.mxu0 %v8846_v42  ;;  %v8897_v17 = vunpack.c.h.bf16 %v160_v26  ;;  %11533 = vst [vmem:[#allocation72_spill] sm:$0xff] %v8901_v38  ;;  %v8911_v52 = vunpack.c.l.bf16 %v160_v26  ;;  %11536 = vst [vmem:[#allocation75_spill] sm:$0xff] %v8915_v13  ;;  %v8925_v26 = vunpack.c.l.bf16 %v162_v20  ;;  %v8943_v20 = vunpack.c.l.bf16 %v164_v22 }
 0x1a4   :  { %11523 = vst [vmem:[#allocation62_spill] sm:$0xff] %v8858_v46  ;;  %6998 = vmatprep.subr.mxu1 %v11113_v0  ;;  %7028 = vmatprep.mubr.msk.f32.mxu1 %vm8467_vm0, %v11113_v0  ;;  %11543 = vst [vmem:[#allocation82_spill] sm:$0xff] %v8947_v11  ;;  %v8961_v22 = vunpack.c.l.bf16 %v166_v9  ;;  %v8975_v9 = vadd.f32 %v8712_v56, %v8603_v19  ;;  %v8992_v56 = vunpack.c.h.bf16 %v170_v6  ;;  %v9004_v19 = vunpack.c.h.bf16 %v172_v55 }
 0x1a5   :  { %6999 = vmatpush3.msra.mxu1 %v8858_v46  ;;  %999 = vmatmul.mubr.f32.gmra.mxu0 %v8855_v3  ;;  %11532 = vst [vmem:[#allocation71_spill] sm:$0xff] %v8897_v17  ;;  %11535 = vst [vmem:[#allocation74_spill] sm:$0xff] %v8911_v52  ;;  %v9012_v6 = vunpack.c.l.bf16 %v172_v55  ;;  %v238_v3 = vld [vmem:[#allocation5 + $0x204] sm:$0xff] }
 0x1a6   :  { %7000 = vmatprep.subr.mxu1 %v11113_v0  ;;  %1003 = vmatprep.mubr.f32.mxu0 %v8862_v48  ;;  %11538 = vst [vmem:[#allocation77_spill] sm:$0xff] %v8925_v26  ;;  %11542 = vst [vmem:[#allocation81_spill] sm:$0xff] %v8943_v20  ;;  %v9380_v42 = vunpack.c.l.bf16 %v238_v3 }
 0x1a7   :  { %7001 = vmatpush3.msra.mxu1 %v8865_v50  ;;  %11546 = vst [vmem:[#allocation85_spill] sm:$0xff] %v8961_v22  ;;  %11549 = vst [vmem:[#allocation88_spill] sm:$0xff] %v8975_v9 }
 0x1a8   :  { %7002 = vmatprep.subr.mxu1 %v11113_v0  ;;  %11553 = vst [vmem:[#allocation92_spill] sm:$0xff] %v8992_v56  ;;  %11556 = vst [vmem:[#allocation95_spill] sm:$0xff] %v9004_v19 }
 0x1a9   :  { %7003 = vmatpush3.msra.mxu1 %v8873_v54  ;;  %1004 = vmatmul.mubr.f32.gmra.mxu0 %v8877_v32  ;;  %11557 = vst [vmem:[#allocation96_spill] sm:$0xff] %v9012_v6  ;;  %11577 = vst [vmem:[#allocation116_spill] sm:$0xff] %v9099_v43 }
 0x1aa   :  { %7004 = vmatprep.subr.mxu1 %v11113_v0  ;;  %1008 = vmatprep.mubr.f32.mxu0 %v8881_v34  ;;  %11581 = vst [vmem:[#allocation120_spill] sm:$0xff] %v9111_v37  ;;  %11670 = vst [vmem:[#allocation209_spill] sm:$0xff] %v9380_v42 }
 0x1ab   :  { %7005 = vmatpush3.msra.mxu1 %v8884_v40 }
 0x1ac   :  { %7006 = vmatprep.subr.mxu1 %v11113_v0 }
 0x1ad   :  { %7007 = vmatpush3.msra.mxu1 %v8889_v30  ;;  %1009 = vmatmul.mubr.f32.gmra.mxu0 %v8893_v1  ;;  %v237_v1 = vld [vmem:[#allocation5 + $0x200] ss:$12 sps:$4 sm:$0xff]  }
 0x1ae   :  { %7008 = vmatprep.subr.mxu1 %v11113_v0  ;;  %1013 = vmatprep.mubr.f32.mxu0 %v8897_v17  ;;  %v226_v17 = vld [vmem:[#allocation5 + $0x1bc] sm:$0xff]  ;;  %v9324_v34 = vunpack.c.l.bf16 %v237_v1 }
 0x1af   :  { %7009 = vmatpush3.msra.mxu1 %v8901_v38 }
 0x1b0   :  { %7010 = vmatprep.subr.mxu1 %v11113_v0  ;;  %11652 = vst [vmem:[#allocation191_spill] sm:$0xff] %v9324_v34 }
 0x1b1   :  { %7011 = vmatpush3.msra.mxu1 %v8907_v28  ;;  %1014 = vmatmul.mubr.f32.gmra.mxu0 %v8911_v52  ;;  %v1540_v52 = vld [vmem:[#allocation10 + $0x8] sm:$0xff] }
 0x1b2   :  { %7012 = vmatprep.subr.mxu1 %v11113_v0  ;;  %1018 = vmatprep.mubr.f32.mxu0 %v8915_v13 }
 0x1b3   :  { %7013 = vmatpush3.msra.mxu1 %v8921_v15 }
 0x1b4   :  { %7014 = vmatprep.subr.mxu1 %v11113_v0 }
 0x1b5   :  { %7015 = vmatpush3.msra.mxu1 %v8933_v16  ;;  %1019 = vmatmul.mubr.f32.gmra.mxu0 %v8925_v26  ;;  %v229_v26 = vld [vmem:[#allocation5 + $0x1d0] ss:$12 sps:$4 sm:$0xff]  }
 0x1b6   :  { %7016 = vmatprep.subr.mxu1 %v11113_v0  ;;  %1023 = vmatprep.mubr.f32.mxu0 %v8929_v18  ;;  %v9300_v13 = vunpack.c.l.bf16 %v229_v26 }
 0x1b7   :  { %7017 = vmatpush3.msra.mxu1 %v8939_v14 }
 0x1b8   :  { %7018 = vmatprep.subr.mxu1 %v11113_v0  ;;  %11644 = vst [vmem:[#allocation183_spill] sm:$0xff] %v9300_v13 }
 0x1b9   :  { %7019 = vmatpush3.msra.mxu1 %v8951_v12  ;;  %1024 = vmatmul.mubr.f32.gmra.mxu0 %v8943_v20  ;;  %v1543_v20 = vld [vmem:[#allocation10 + $0x20] sm:$0xff] }
 0x1ba   :  { %7020 = vmatprep.subr.mxu1 %v11113_v0  ;;  %1028 = vmatprep.mubr.f32.mxu0 %v8947_v11 }
 0x1bb   :  { %7021 = vmatpush3.msra.mxu1 %v8957_v10 }
 0x1bc   :  { %7022 = vmatprep.subr.mxu1 %v11113_v0 }
 0x1bd   :  { %7023 = vmatpush3.msra.mxu1 %v8969_v8  ;;  %1029 = vmatmul.mubr.f32.gmra.mxu0 %v8961_v22  ;;  %v221_v22 = vld [vmem:[#allocation5 + $0x1a0] ss:$12 sps:$4 sm:$0xff]  }
 0x1be   :  { %7024 = vmatprep.subr.mxu1 %v11113_v0  ;;  %1033 = vmatprep.mubr.f32.mxu0 %v8965_v7  ;;  %v218_v7 = vld [vmem:[#allocation5 + $0x18c] sm:$0xff]  ;;  %v9276_v11 = vunpack.c.l.bf16 %v221_v22 }
 0x1bf   :  { %7025 = vmatpush3.msra.mxu1 %v8975_v9 }
 0x1c0   :  { %7026 = vmatprep.subr.mxu1 %v11113_v0  ;;  %v9016_v0 = vunpack.c.h.bf16 %v174_v58  ;;  %11636 = vst [vmem:[#allocation175_spill] sm:$0xff] %v9276_v11 }
 0x1c1   :  { %7027 = vmatpush3.msra.mxu1 %v8989_v59  ;;  %1034 = vmatmul.mubr.f32.gmra.mxu0 %v8979_v63  ;;  %v1546_v63 = vld [vmem:[#allocation10 + $0x38] sm:$0xff] }
 0x1c2   :  { %7029 = vmatmul.mubr.f32.vlgmr.msra.gmra.mxu1 %v8985_v62  ;;  %7031 = vmatprep.subr.mxu1 %v8849_v44  ;;  %11558 = vst [vmem:[#allocation97_spill] sm:$0xff] %v9016_v0 }
 0x1c3   :  { %7032 = vmatpush3.msra.mxu1 %v8849_v44  ;;  %1038 = vmatprep.mubr.f32.mxu0 %v8992_v56  ;;  %v176_v44 = vld [vmem:[#allocation5 + $0x90] sm:$0xff]  ;;  %v216_v56 = vld [vmem:[#allocation5 + $0x180] sm:$0xff] }
 0x1c4   :  { %7033 = vmatprep.subr.mxu1 %v8858_v46  ;;  %7063 = vmatprep.mubr.f32.mxu1 %v8996_v5  ;;  %v9026_v55 = vunpack.c.h.bf16 %v176_v44 }
 0x1c5   :  { %1039 = vmatmul.mubr.f32.gmra.mxu0 %v9000_v60  ;;  %7034 = vmatpush3.msra.mxu1 %v8858_v46  ;;  %v178_v46 = vld [vmem:[#allocation5 + $0x9c] sm:$0xff] }
 0x1c6   :  { %7035 = vmatprep.subr.mxu1 %v8865_v50  ;;  %1043 = vmatprep.mubr.f32.mxu0 %v9004_v19  ;;  %11560 = vst [vmem:[#allocation99_spill] sm:$0xff] %v9026_v55  ;;  %v9036_v58 = vunpack.c.h.bf16 %v178_v46  ;;  %v214_v19 = vld [vmem:[#allocation5 + $0x174] sm:$0xff]  ;;  %v213_v60 = vld [vmem:[#allocation5 + $0x170] ss:$12 sps:$4 sm:$0xff]  }
 0x1c7   :  { %7036 = vmatpush3.msra.mxu1 %v8865_v50  ;;  %v9032_v50 = vunpack.c.l.bf16 %v176_v44 }
 0x1c8   :  { %7037 = vmatprep.subr.mxu1 %v8873_v54  ;;  %11562 = vst [vmem:[#allocation101_spill] sm:$0xff] %v9036_v58 }
 0x1c9   :  { %1044 = vmatmul.mubr.f32.gmra.mxu0 %v9012_v6  ;;  %7038 = vmatpush3.msra.mxu1 %v8873_v54  ;;  %11561 = vst [vmem:[#allocation100_spill] sm:$0xff] %v9032_v50  ;;  %v180_v54 = vld [vmem:[#allocation5 + $0xa8] sm:$0xff]  ;;  %v1549_v6 = vld [vmem:[#allocation10 + $0x50] sm:$0xff] }
 0x1ca   :  { %7039 = vmatprep.subr.mxu1 %v8884_v40  ;;  %1048 = vmatprep.mubr.f32.mxu0 %v9016_v0  ;;  %v9046_v44 = vunpack.c.h.bf16 %v180_v54  ;;  %v212_v0 = vld [vmem:[#allocation5 + $0x168] sm:$0xff] }
 0x1cb   :  { %7040 = vmatpush3.msra.mxu1 %v8884_v40  ;;  %v9042_v40 = vunpack.c.l.bf16 %v178_v46 }
 0x1cc   :  { %7041 = vmatprep.subr.mxu1 %v8889_v30  ;;  %11564 = vst [vmem:[#allocation103_spill] sm:$0xff] %v9046_v44 }
 0x1cd   :  { %1049 = vmatmul.mubr.f32.gmra.mxu0 %v9022_v57  ;;  %7042 = vmatpush3.msra.mxu1 %v8889_v30  ;;  %11563 = vst [vmem:[#allocation102_spill] sm:$0xff] %v9042_v40  ;;  %v182_v30 = vld [vmem:[#allocation5 + $0xb4] sm:$0xff] }
 0x1ce   :  { %7043 = vmatprep.subr.mxu1 %v8901_v38  ;;  %1053 = vmatprep.mubr.f32.mxu0 %v9026_v55  ;;  %v9056_v46 = vunpack.c.h.bf16 %v182_v30  ;;  %v1552_v55 = vld [vmem:[#allocation10 + $0x68] sm:$0xff] }
 0x1cf   :  { %7044 = vmatpush3.msra.mxu1 %v8901_v38  ;;  %v9052_v38 = vunpack.c.l.bf16 %v180_v54 }
 0x1d0   :  { %7045 = vmatprep.subr.mxu1 %v8907_v28  ;;  %11566 = vst [vmem:[#allocation105_spill] sm:$0xff] %v9056_v46 }
 0x1d1   :  { %1054 = vmatmul.mubr.f32.gmra.mxu0 %v9032_v50  ;;  %7046 = vmatpush3.msra.mxu1 %v8907_v28  ;;  %11565 = vst [vmem:[#allocation104_spill] sm:$0xff] %v9052_v38  ;;  %v184_v28 = vld [vmem:[#allocation5 + $0xc0] sm:$0xff] }
 0x1d2   :  { %7047 = vmatprep.subr.mxu1 %v8921_v15  ;;  %1058 = vmatprep.mubr.f32.mxu0 %v9036_v58  ;;  %v9066_v54 = vunpack.c.h.bf16 %v184_v28  ;;  %v9072_v53 = vunpack.c.l.bf16 %v184_v28  ;;  %v210_v50 = vld [vmem:[#allocation5 + $0x15c] sm:$0xff] }
 0x1d3   :  { %7048 = vmatpush3.msra.mxu1 %v8921_v15  ;;  %v9062_v15 = vunpack.c.l.bf16 %v182_v30  ;;  %v9077_v30 = vunpack.c.h.bf16 %v8981_v61 }
 0x1d4   :  { %7049 = vmatprep.subr.mxu1 %v8933_v16  ;;  %11568 = vst [vmem:[#allocation107_spill] sm:$0xff] %v9066_v54  ;;  %11569 = vst [vmem:[#allocation108_spill] sm:$0xff] %v9072_v53 }
 0x1d5   :  { %1059 = vmatmul.mubr.f32.gmra.mxu0 %v9042_v40  ;;  %7050 = vmatpush3.msra.mxu1 %v8933_v16  ;;  %11567 = vst [vmem:[#allocation106_spill] sm:$0xff] %v9062_v15  ;;  %v186_v16 = vld [vmem:[#allocation5 + $0xcc] sm:$0xff]  ;;  %11570 = vst [vmem:[#allocation109_spill] sm:$0xff] %v9077_v30  ;;  %v201_v40 = vld [vmem:[#allocation5 + $0x128] ss:$12 sps:$4 sm:$0xff]  }
 0x1d6   :  { %7051 = vmatprep.subr.mxu1 %v8939_v14  ;;  %1063 = vmatprep.mubr.f32.mxu0 %v9046_v44  ;;  %v9087_v28 = vunpack.c.l.bf16 %v186_v16  ;;  %v1554_v44 = vld [vmem:[#allocation10 + $0x78] sm:$0xff]  ;;  %v9216_v58 = vunpack.c.l.bf16 %v201_v40 }
 0x1d7   :  { %7052 = vmatpush3.msra.mxu1 %v8939_v14  ;;  %v157_v14 = vld [vmem:[#allocation5 + $0x20] ss:$12 sps:$4 sm:$0xff]  }
 0x1d8   :  { %7053 = vmatprep.subr.mxu1 %v8951_v12  ;;  %11573 = vst [vmem:[#allocation112_spill] sm:$0xff] %v9087_v28  ;;  %v9091_v61 = vunpack.c.h.bf16 %v157_v14  ;;  %11616 = vst [vmem:[#allocation155_spill] sm:$0xff] %v9216_v58 }
 0x1d9   :  { %1064 = vmatmul.mubr.f32.gmra.mxu0 %v9052_v38  ;;  %7054 = vmatpush3.msra.mxu1 %v8951_v12  ;;  %v9079_v12 = vunpack.c.h.bf16 %v186_v16  ;;  %v9103_v16 = vunpack.c.h.bf16 %v161_v49 }
 0x1da   :  { %7055 = vmatprep.subr.mxu1 %v8957_v10  ;;  %1068 = vmatprep.mubr.f32.mxu0 %v9056_v46  ;;  %11574 = vst [vmem:[#allocation113_spill] sm:$0xff] %v9091_v61  ;;  %v197_v46 = vld [vmem:[#allocation5 + $0x110] ss:$12 sps:$4 sm:$0xff]  }
 0x1db   :  { %7056 = vmatpush3.msra.mxu1 %v8957_v10  ;;  %11571 = vst [vmem:[#allocation110_spill] sm:$0xff] %v9079_v12  ;;  %v9082_v10 = vunpack.c.l.bf16 %v157_v14  ;;  %11578 = vst [vmem:[#allocation117_spill] sm:$0xff] %v9103_v16  ;;  %v9105_v14 = vunpack.c.h.bf16 %v190_v47  ;;  %v9127_v47 = vunpack.c.h.bf16 %v169_v39  ;;  %v9141_v39 = vunpack.c.h.bf16 %v196_v23 }
 0x1dc   :  { %7057 = vmatprep.subr.mxu1 %v8969_v8 }
 0x1dd   :  { %1069 = vmatmul.mubr.f32.gmra.mxu0 %v9062_v15  ;;  %7058 = vmatpush3.msra.mxu1 %v8969_v8  ;;  %11572 = vst [vmem:[#allocation111_spill] sm:$0xff] %v9082_v10  ;;  %v9093_v8 = vunpack.c.h.bf16 %v188_v51  ;;  %11579 = vst [vmem:[#allocation118_spill] sm:$0xff] %v9105_v14  ;;  %v9115_v51 = vunpack.c.h.bf16 %v165_v45 }
 0x1de   :  { %7059 = vmatprep.subr.mxu1 %v8975_v9  ;;  %1073 = vmatprep.mubr.f32.mxu0 %v9066_v54  ;;  %11586 = vst [vmem:[#allocation125_spill] sm:$0xff] %v9127_v47  ;;  %11591 = vst [vmem:[#allocation130_spill] sm:$0xff] %v9141_v39  ;;  %v193_v54 = vld [vmem:[#allocation5 + $0xf8] ss:$12 sps:$4 sm:$0xff]  }
 0x1df   :  { %7060 = vmatpush3.msra.mxu1 %v8975_v9  ;;  %11575 = vst [vmem:[#allocation114_spill] sm:$0xff] %v9093_v8  ;;  %v9096_v9 = vunpack.c.l.bf16 %v161_v49  ;;  %11582 = vst [vmem:[#allocation121_spill] sm:$0xff] %v9115_v51  ;;  %v9117_v49 = vunpack.c.h.bf16 %v192_v41  ;;  %v9139_v41 = vunpack.c.h.bf16 %v173_v31 }
 0x1e0   :  { %7061 = vmatprep.subr.mxu1 %v8989_v59 }
 0x1e1   :  { %1074 = vmatmul.mubr.f32.gmra.mxu0 %v9072_v53  ;;  %7062 = vmatpush3.msra.mxu1 %v8989_v59  ;;  %11576 = vst [vmem:[#allocation115_spill] sm:$0xff] %v9096_v9  ;;  %v9108_v59 = vunpack.c.l.bf16 %v165_v45  ;;  %11583 = vst [vmem:[#allocation122_spill] sm:$0xff] %v9117_v49  ;;  %v9129_v45 = vunpack.c.h.bf16 %v194_v33  ;;  %v9151_v33 = vunpack.c.h.bf16 %v177_v25 }
 0x1e2   :  { %7064 = vmatmul.mubr.f32.vlgmr.msra.gmra.mxu1 %v9077_v30  ;;  %1078 = vmatprep.mubr.f32.mxu0 %v9079_v12  ;;  %11590 = vst [vmem:[#allocation129_spill] sm:$0xff] %v9139_v41  ;;  %v189_v12 = vld [vmem:[#allocation5 + $0xe0] ss:$12 sps:$4 sm:$0xff]  }
 0x1e3   :  { %7066 = vmatprep.mubr.f32.mxu1 %v9082_v10  ;;  %11580 = vst [vmem:[#allocation119_spill] sm:$0xff] %v9108_v59  ;;  %11587 = vst [vmem:[#allocation126_spill] sm:$0xff] %v9129_v45  ;;  %7135 = vmatprep.subr.mxu1 %v1554_v44 }
 0x1e4   :  { %11594 = vst [vmem:[#allocation133_spill] sm:$0xff] %v9151_v33  ;;  %7136 = vmatpush3.msra.mxu1 %v1554_v44 }
 0x1e5   :  { %1079 = vmatmul.mubr.f32.gmra.mxu0 %v9087_v28 }
 0x1e6   :  { %7067 = vmatmul.mubr.f32.gmra.mxu1 %v9091_v61  ;;  %1083 = vmatprep.mubr.f32.mxu0 %v9093_v8  ;;  %v185_v8 = vld [vmem:[#allocation5 + $0xc8] ss:$12 sps:$4 sm:$0xff]  }
 0x1e7   :  { %7069 = vmatprep.mubr.f32.mxu1 %v9096_v9 }
 0x1e9   :  { %1084 = vmatmul.mubr.f32.gmra.mxu0 %v9099_v43  ;;  %v9147_v43 = vunpack.c.l.bf16 %v196_v23 }
 0x1ea   :  { %7070 = vmatmul.mubr.f32.gmra.mxu1 %v9103_v16  ;;  %1088 = vmatprep.mubr.f32.mxu0 %v9105_v14  ;;  %v181_v14 = vld [vmem:[#allocation5 + $0xb0] ss:$12 sps:$4 sm:$0xff]  }
 0x1eb   :  { %7072 = vmatprep.mubr.f32.mxu1 %v9108_v59  ;;  %11593 = vst [vmem:[#allocation132_spill] sm:$0xff] %v9147_v43  ;;  %v9163_v23 = vunpack.c.h.bf16 %v181_v14 }
 0x1ed   :  { %1089 = vmatmul.mubr.f32.gmra.mxu0 %v9111_v37  ;;  %v198_v37 = vld [vmem:[#allocation5 + $0x114] sm:$0xff]  ;;  %11598 = vst [vmem:[#allocation137_spill] sm:$0xff] %v9163_v23 }
 0x1ee   :  { %7073 = vmatmul.mubr.f32.gmra.mxu1 %v9115_v51  ;;  %1093 = vmatprep.mubr.f32.mxu0 %v9117_v49  ;;  %v9144_v49 = vunpack.c.l.bf16 %v177_v25  ;;  %v9153_v31 = vunpack.c.h.bf16 %v198_v37  ;;  %v9159_v28 = vunpack.c.l.bf16 %v198_v37  ;;  %v9175_v37 = vunpack.c.h.bf16 %v185_v8 }
 0x1ef   :  { %7075 = vmatprep.mubr.f32.mxu1 %v9120_v35 }
 0x1f0   :  { %11592 = vst [vmem:[#allocation131_spill] sm:$0xff] %v9144_v49  ;;  %11595 = vst [vmem:[#allocation134_spill] sm:$0xff] %v9153_v31 }
 0x1f1   :  { %1094 = vmatmul.mubr.f32.gmra.mxu0 %v9123_v29  ;;  %v200_v29 = vld [vmem:[#allocation5 + $0x120] sm:$0xff]  ;;  %11597 = vst [vmem:[#allocation136_spill] sm:$0xff] %v9159_v28  ;;  %11602 = vst [vmem:[#allocation141_spill] sm:$0xff] %v9175_v37 }
 0x1f2   :  { %7076 = vmatmul.mubr.f32.gmra.mxu1 %v9127_v47  ;;  %1098 = vmatprep.mubr.f32.mxu0 %v9129_v45  ;;  %v9156_v45 = vunpack.c.l.bf16 %v181_v14  ;;  %v9165_v25 = vunpack.c.h.bf16 %v200_v29  ;;  %v9171_v53 = vunpack.c.l.bf16 %v200_v29  ;;  %v9187_v29 = vunpack.c.h.bf16 %v189_v12 }
 0x1f3   :  { %7078 = vmatprep.mubr.f32.mxu1 %v9132_v27 }
 0x1f4   :  { %11596 = vst [vmem:[#allocation135_spill] sm:$0xff] %v9156_v45  ;;  %11599 = vst [vmem:[#allocation138_spill] sm:$0xff] %v9165_v25 }
 0x1f5   :  { %1099 = vmatmul.mubr.f32.gmra.mxu0 %v9135_v21  ;;  %v202_v21 = vld [vmem:[#allocation5 + $0x12c] sm:$0xff]  ;;  %11601 = vst [vmem:[#allocation140_spill] sm:$0xff] %v9171_v53  ;;  %11606 = vst [vmem:[#allocation145_spill] sm:$0xff] %v9187_v29 }
 0x1f6   :  { %7079 = vmatmul.mubr.f32.gmra.mxu1 %v9139_v41  ;;  %1103 = vmatprep.mubr.f32.mxu0 %v9141_v39  ;;  %v9168_v39 = vunpack.c.l.bf16 %v185_v8  ;;  %v9177_v14 = vunpack.c.h.bf16 %v202_v21  ;;  %v9183_v15 = vunpack.c.l.bf16 %v202_v21  ;;  %v9199_v21 = vunpack.c.h.bf16 %v193_v54 }
 0x1f7   :  { %7081 = vmatprep.mubr.f32.mxu1 %v9144_v49 }
 0x1f8   :  { %11600 = vst [vmem:[#allocation139_spill] sm:$0xff] %v9168_v39  ;;  %11603 = vst [vmem:[#allocation142_spill] sm:$0xff] %v9177_v14 }
 0x1f9   :  { %1104 = vmatmul.mubr.f32.gmra.mxu0 %v9147_v43  ;;  %v204_v43 = vld [vmem:[#allocation5 + $0x138] sm:$0xff]  ;;  %11605 = vst [vmem:[#allocation144_spill] sm:$0xff] %v9183_v15  ;;  %11610 = vst [vmem:[#allocation149_spill] sm:$0xff] %v9199_v21 }
 0x1fa   :  { %7082 = vmatmul.mubr.f32.gmra.mxu1 %v9151_v33  ;;  %1108 = vmatprep.mubr.f32.mxu0 %v9153_v31  ;;  %v9180_v31 = vunpack.c.l.bf16 %v189_v12  ;;  %v9189_v8 = vunpack.c.h.bf16 %v204_v43  ;;  %v9195_v38 = vunpack.c.l.bf16 %v204_v43 }
 0x1fb   :  { %7084 = vmatprep.mubr.f32.mxu1 %v9156_v45 }
 0x1fc   :  { %11604 = vst [vmem:[#allocation143_spill] sm:$0xff] %v9180_v31  ;;  %11607 = vst [vmem:[#allocation146_spill] sm:$0xff] %v9189_v8 }
 0x1fd   :  { %1109 = vmatmul.mubr.f32.gmra.mxu0 %v9159_v28  ;;  %v206_v28 = vld [vmem:[#allocation5 + $0x144] sm:$0xff]  ;;  %11609 = vst [vmem:[#allocation148_spill] sm:$0xff] %v9195_v38 }
 0x1fe   :  { %7085 = vmatmul.mubr.f32.gmra.mxu1 %v9163_v23  ;;  %1113 = vmatprep.mubr.f32.mxu0 %v9165_v25  ;;  %v9192_v25 = vunpack.c.l.bf16 %v193_v54  ;;  %v9201_v12 = vunpack.c.h.bf16 %v206_v28  ;;  %v9207_v43 = vunpack.c.l.bf16 %v206_v28  ;;  %v9211_v54 = vunpack.c.h.bf16 %v197_v46  ;;  %v1551_v28 = vld [vmem:[#allocation10 + $0x60] sm:$0xff] }
 0x1ff   :  { %7087 = vmatprep.mubr.f32.mxu1 %v9168_v39 }
 0x200   :  { %11608 = vst [vmem:[#allocation147_spill] sm:$0xff] %v9192_v25  ;;  %11611 = vst [vmem:[#allocation150_spill] sm:$0xff] %v9201_v12 }
 0x201   :  { %1114 = vmatmul.mubr.f32.gmra.mxu0 %v9171_v53  ;;  %v208_v53 = vld [vmem:[#allocation5 + $0x150] sm:$0xff]  ;;  %11613 = vst [vmem:[#allocation152_spill] sm:$0xff] %v9207_v43  ;;  %11614 = vst [vmem:[#allocation153_spill] sm:$0xff] %v9211_v54 }
 0x202   :  { %7088 = vmatmul.mubr.f32.gmra.mxu1 %v9175_v37  ;;  %1118 = vmatprep.mubr.f32.mxu0 %v9177_v14  ;;  %v9204_v14 = vunpack.c.l.bf16 %v197_v46  ;;  %v9219_v44 = vunpack.c.l.bf16 %v208_v53  ;;  %v9223_v46 = vunpack.c.h.bf16 %v201_v40 }
 0x203   :  { %7090 = vmatprep.mubr.f32.mxu1 %v9180_v31 }
 0x204   :  { %11612 = vst [vmem:[#allocation151_spill] sm:$0xff] %v9204_v14  ;;  %11617 = vst [vmem:[#allocation156_spill] sm:$0xff] %v9219_v44 }
 0x205   :  { %1119 = vmatmul.mubr.f32.gmra.mxu0 %v9183_v15  ;;  %v1553_v15 = vld [vmem:[#allocation10 + $0x70] sm:$0xff]  ;;  %11618 = vst [vmem:[#allocation157_spill] sm:$0xff] %v9223_v46 }
 0x206   :  { %7091 = vmatmul.mubr.f32.gmra.mxu1 %v9187_v29  ;;  %1123 = vmatprep.mubr.f32.mxu0 %v9189_v8  ;;  %v9213_v8 = vunpack.c.h.bf16 %v208_v53  ;;  %v1550_v53 = vld [vmem:[#allocation10 + $0x58] sm:$0xff] }
 0x207   :  { %7093 = vmatprep.mubr.f32.mxu1 %v9192_v25  ;;  %7137 = vmatprep.subr.mxu1 %v1553_v15 }
 0x208   :  { %11615 = vst [vmem:[#allocation154_spill] sm:$0xff] %v9213_v8  ;;  %7138 = vmatpush3.msra.mxu1 %v1553_v15  ;;  %v209_v15 = vld [vmem:[#allocation5 + $0x158] ss:$12 sps:$4 sm:$0xff]  }
 0x209   :  { %1124 = vmatmul.mubr.f32.gmra.mxu0 %v9195_v38  ;;  %v205_v38 = vld [vmem:[#allocation5 + $0x140] ss:$12 sps:$4 sm:$0xff]   ;;  %7139 = vmatprep.subr.mxu1 %v1552_v55 }
 0x20a   :  { %7094 = vmatmul.mubr.f32.gmra.mxu1 %v9199_v21  ;;  %1128 = vmatprep.mubr.f32.mxu0 %v9201_v12  ;;  %v9225_v12 = vunpack.c.h.bf16 %v210_v50  ;;  %v9228_v57 = vunpack.c.l.bf16 %v205_v38  ;;  %v9235_v40 = vunpack.c.h.bf16 %v205_v38  ;;  %v9247_v38 = vunpack.c.h.bf16 %v209_v15 }
 0x20b   :  { %7096 = vmatprep.mubr.f32.mxu1 %v9204_v14  ;;  %7140 = vmatpush3.msra.mxu1 %v1552_v55  ;;  %v9240_v55 = vunpack.c.l.bf16 %v209_v15  ;;  %v9259_v15 = vunpack.c.h.bf16 %v213_v60 }
 0x20c   :  { %11619 = vst [vmem:[#allocation158_spill] sm:$0xff] %v9225_v12  ;;  %11620 = vst [vmem:[#allocation159_spill] sm:$0xff] %v9228_v57  ;;  %7141 = vmatprep.subr.mxu1 %v1551_v28 }
 0x20d   :  { %1129 = vmatmul.mubr.f32.gmra.mxu0 %v9207_v43  ;;  %v9231_v43 = vunpack.c.l.bf16 %v210_v50  ;;  %7142 = vmatpush3.msra.mxu1 %v1551_v28  ;;  %11622 = vst [vmem:[#allocation161_spill] sm:$0xff] %v9235_v40  ;;  %11624 = vst [vmem:[#allocation163_spill] sm:$0xff] %v9240_v55  ;;  %v9243_v50 = vunpack.c.l.bf16 %v212_v0  ;;  %v1548_v28 = vld [vmem:[#allocation10 + $0x48] sm:$0xff] }
 0x20e   :  { %7097 = vmatmul.mubr.f32.gmra.mxu1 %v9211_v54  ;;  %1133 = vmatprep.mubr.f32.mxu0 %v9213_v8  ;;  %v9237_v8 = vunpack.c.h.bf16 %v212_v0  ;;  %11626 = vst [vmem:[#allocation165_spill] sm:$0xff] %v9247_v38  ;;  %v1547_v0 = vld [vmem:[#allocation10 + $0x40] sm:$0xff]  ;;  %11630 = vst [vmem:[#allocation169_spill] sm:$0xff] %v9259_v15 }
 0x20f   :  { %7099 = vmatprep.mubr.f32.mxu1 %v9216_v58  ;;  %11621 = vst [vmem:[#allocation160_spill] sm:$0xff] %v9231_v43  ;;  %7143 = vmatprep.subr.mxu1 %v1550_v53  ;;  %11625 = vst [vmem:[#allocation164_spill] sm:$0xff] %v9243_v50 }
 0x210   :  { %11623 = vst [vmem:[#allocation162_spill] sm:$0xff] %v9237_v8  ;;  %7144 = vmatpush3.msra.mxu1 %v1550_v53  ;;  %v217_v53 = vld [vmem:[#allocation5 + $0x188] ss:$12 sps:$4 sm:$0xff]  }
 0x211   :  { %1134 = vmatmul.mubr.f32.gmra.mxu0 %v9219_v44  ;;  %7145 = vmatprep.subr.mxu1 %v1549_v6  ;;  %v9252_v44 = vunpack.c.l.bf16 %v213_v60  ;;  %v9271_v60 = vunpack.c.h.bf16 %v217_v53 }
 0x212   :  { %7100 = vmatmul.mubr.f32.gmra.mxu1 %v9223_v46  ;;  %1138 = vmatprep.mubr.f32.mxu0 %v9225_v12  ;;  %v9249_v12 = vunpack.c.h.bf16 %v214_v19 }
 0x213   :  { %7102 = vmatprep.mubr.f32.mxu1 %v9228_v57  ;;  %11628 = vst [vmem:[#allocation167_spill] sm:$0xff] %v9252_v44  ;;  %7146 = vmatpush3.msra.mxu1 %v1549_v6  ;;  %v9264_v6 = vunpack.c.l.bf16 %v217_v53  ;;  %11634 = vst [vmem:[#allocation173_spill] sm:$0xff] %v9271_v60 }
 0x214   :  { %11627 = vst [vmem:[#allocation166_spill] sm:$0xff] %v9249_v12  ;;  %7147 = vmatprep.subr.mxu1 %v1548_v28 }
 0x215   :  { %1139 = vmatmul.mubr.f32.gmra.mxu0 %v9231_v43  ;;  %v9255_v43 = vunpack.c.l.bf16 %v214_v19  ;;  %7148 = vmatpush3.msra.mxu1 %v1548_v28  ;;  %11632 = vst [vmem:[#allocation171_spill] sm:$0xff] %v9264_v6  ;;  %v9267_v19 = vunpack.c.l.bf16 %v216_v56  ;;  %v1545_v28 = vld [vmem:[#allocation10 + $0x30] sm:$0xff] }
 0x216   :  { %7103 = vmatmul.mubr.f32.gmra.mxu1 %v9235_v40  ;;  %1143 = vmatprep.mubr.f32.mxu0 %v9237_v8  ;;  %v9261_v8 = vunpack.c.h.bf16 %v216_v56  ;;  %v1544_v56 = vld [vmem:[#allocation10 + $0x28] sm:$0xff] }
 0x217   :  { %7105 = vmatprep.mubr.f32.mxu1 %v9240_v55  ;;  %11629 = vst [vmem:[#allocation168_spill] sm:$0xff] %v9255_v43  ;;  %7149 = vmatprep.subr.mxu1 %v1547_v0  ;;  %11633 = vst [vmem:[#allocation172_spill] sm:$0xff] %v9267_v19 }
 0x218   :  { %11631 = vst [vmem:[#allocation170_spill] sm:$0xff] %v9261_v8  ;;  %7150 = vmatpush3.msra.mxu1 %v1547_v0  ;;  %v225_v0 = vld [vmem:[#allocation5 + $0x1b8] ss:$12 sps:$4 sm:$0xff]  }
 0x219   :  { %1144 = vmatmul.mubr.f32.gmra.mxu0 %v9243_v50  ;;  %7151 = vmatprep.subr.mxu1 %v1546_v63  ;;  %v220_v50 = vld [vmem:[#allocation5 + $0x198] sm:$0xff]  ;;  %v9288_v18 = vunpack.c.l.bf16 %v225_v0 }
 0x21a   :  { %7106 = vmatmul.mubr.f32.gmra.mxu1 %v9247_v38  ;;  %1148 = vmatprep.mubr.f32.mxu0 %v9249_v12  ;;  %v9273_v12 = vunpack.c.h.bf16 %v218_v7  ;;  %v9283_v53 = vunpack.c.h.bf16 %v220_v50 }
 0x21b   :  { %7108 = vmatprep.mubr.f32.mxu1 %v9252_v44  ;;  %7152 = vmatpush3.msra.mxu1 %v1546_v63  ;;  %v222_v63 = vld [vmem:[#allocation5 + $0x1a4] sm:$0xff]  ;;  %11640 = vst [vmem:[#allocation179_spill] sm:$0xff] %v9288_v18 }
 0x21c   :  { %11635 = vst [vmem:[#allocation174_spill] sm:$0xff] %v9273_v12  ;;  %7153 = vmatprep.subr.mxu1 %v1545_v28  ;;  %11638 = vst [vmem:[#allocation177_spill] sm:$0xff] %v9283_v53 }
 0x21d   :  { %1149 = vmatmul.mubr.f32.gmra.mxu0 %v9255_v43  ;;  %v9279_v43 = vunpack.c.l.bf16 %v218_v7  ;;  %7154 = vmatpush3.msra.mxu1 %v1545_v28  ;;  %v9291_v7 = vunpack.c.l.bf16 %v220_v50  ;;  %v1542_v28 = vld [vmem:[#allocation10 + $0x18] sm:$0xff]  ;;  %v1541_v50 = vld [vmem:[#allocation10 + $0x10] sm:$0xff] }
 0x21e   :  { %7109 = vmatmul.mubr.f32.gmra.mxu1 %v9259_v15  ;;  %1153 = vmatprep.mubr.f32.mxu0 %v9261_v8  ;;  %v9285_v8 = vunpack.c.h.bf16 %v221_v22  ;;  %v9295_v22 = vunpack.c.h.bf16 %v222_v63 }
 0x21f   :  { %7111 = vmatprep.mubr.f32.mxu1 %v9264_v6  ;;  %11637 = vst [vmem:[#allocation176_spill] sm:$0xff] %v9279_v43  ;;  %7155 = vmatprep.subr.mxu1 %v1544_v56  ;;  %11641 = vst [vmem:[#allocation180_spill] sm:$0xff] %v9291_v7 }
 0x220   :  { %11639 = vst [vmem:[#allocation178_spill] sm:$0xff] %v9285_v8  ;;  %7156 = vmatpush3.msra.mxu1 %v1544_v56  ;;  %11642 = vst [vmem:[#allocation181_spill] sm:$0xff] %v9295_v22  ;;  %v233_v56 = vld [vmem:[#allocation5 + $0x1e8] ss:$12 sps:$4 sm:$0xff]  }
 0x221   :  { %1154 = vmatmul.mubr.f32.gmra.mxu0 %v9267_v19  ;;  %7157 = vmatprep.subr.mxu1 %v1543_v20  ;;  %v224_v19 = vld [vmem:[#allocation5 + $0x1b0] sm:$0xff] }
 0x222   :  { %7112 = vmatmul.mubr.f32.gmra.mxu1 %v9271_v60  ;;  %1158 = vmatprep.mubr.f32.mxu0 %v9273_v12  ;;  %v9297_v12 = vunpack.c.h.bf16 %v225_v0  ;;  %v9309_v0 = vunpack.c.h.bf16 %v229_v26  ;;  %v9321_v26 = vunpack.c.h.bf16 %v233_v56 }
 0x223   :  { %7114 = vmatprep.mubr.f32.mxu1 %v9276_v11  ;;  %7158 = vmatpush3.msra.mxu1 %v1543_v20  ;;  %v9312_v20 = vunpack.c.l.bf16 %v233_v56  ;;  %v9333_v56 = vunpack.c.h.bf16 %v237_v1  ;;  %v232_v1 = vld [vmem:[#allocation5 + $0x1e0] sm:$0xff] }
 0x224   :  { %11643 = vst [vmem:[#allocation182_spill] sm:$0xff] %v9297_v12  ;;  %7159 = vmatprep.subr.mxu1 %v1542_v28  ;;  %11647 = vst [vmem:[#allocation186_spill] sm:$0xff] %v9309_v0 }
 0x225   :  { %1159 = vmatmul.mubr.f32.gmra.mxu0 %v9279_v43  ;;  %v9303_v43 = vunpack.c.l.bf16 %v222_v63  ;;  %7160 = vmatpush3.msra.mxu1 %v1542_v28  ;;  %11648 = vst [vmem:[#allocation187_spill] sm:$0xff] %v9312_v20  ;;  %v9315_v63 = vunpack.c.l.bf16 %v224_v19  ;;  %v1539_v28 = vld [vmem:[#allocation10] sm:$0xff]  ;;  %11651 = vst [vmem:[#allocation190_spill] sm:$0xff] %v9321_v26 }
 0x226   :  { %1163 = vmatprep.mubr.f32.mxu0 %v9283_v53  ;;  %7115 = vmatmul.mubr.f32.gmra.mxu1 %v9285_v8  ;;  %v9306_v53 = vunpack.c.h.bf16 %v224_v19  ;;  %v9327_v19 = vunpack.c.l.bf16 %v226_v17  ;;  %11655 = vst [vmem:[#allocation194_spill] sm:$0xff] %v9333_v56 }
 0x227   :  { %7117 = vmatprep.mubr.f32.mxu1 %v9288_v18  ;;  %11645 = vst [vmem:[#allocation184_spill] sm:$0xff] %v9303_v43  ;;  %7161 = vmatprep.subr.mxu1 %v1541_v50  ;;  %11649 = vst [vmem:[#allocation188_spill] sm:$0xff] %v9315_v63 }
 0x228   :  { %11646 = vst [vmem:[#allocation185_spill] sm:$0xff] %v9306_v53  ;;  %7162 = vmatpush3.msra.mxu1 %v1541_v50  ;;  %v241_v50 = vld [vmem:[#allocation5 + $0x218] ss:$12 sps:$4 sm:$0xff]   ;;  %11653 = vst [vmem:[#allocation192_spill] sm:$0xff] %v9327_v19 }
 0x229   :  { %1164 = vmatmul.mubr.f32.gmra.mxu0 %v9291_v7  ;;  %7163 = vmatprep.subr.mxu1 %v1540_v52  ;;  %v228_v7 = vld [vmem:[#allocation5 + $0x1c8] sm:$0xff]  ;;  %v9336_v32 = vunpack.c.l.bf16 %v241_v50 }
 0x22a   :  { %1168 = vmatprep.mubr.f32.mxu0 %v9295_v22  ;;  %7118 = vmatmul.mubr.f32.gmra.mxu1 %v9297_v12  ;;  %v9318_v22 = vunpack.c.h.bf16 %v226_v17 }
 0x22b   :  { %7120 = vmatprep.mubr.f32.mxu1 %v9300_v13  ;;  %7164 = vmatpush3.msra.mxu1 %v1540_v52  ;;  %11656 = vst [vmem:[#allocation195_spill] sm:$0xff] %v9336_v32  ;;  %v245_v52 = vld [vmem:[#allocation5 + $0x230] ss:$12 sps:$4 sm:$0xff]  }
 0x22c   :  { %11650 = vst [vmem:[#allocation189_spill] sm:$0xff] %v9318_v22  ;;  %7165 = vmatprep.subr.mxu1 %v1539_v28 }
 0x22d   :  { %1169 = vmatmul.mubr.f32.gmra.mxu0 %v9303_v43  ;;  %7166 = vmatpush3.msra.mxu1 %v1539_v28  ;;  %v230_v43 = vld [vmem:[#allocation5 + $0x1d4] sm:$0xff]  ;;  %v9345_v28 = vunpack.c.h.bf16 %v241_v50  ;;  %v9361_v50 = vunpack.c.l.bf16 %v232_v1 }
 0x22e   :  { %1173 = vmatprep.mubr.f32.mxu0 %v9306_v53  ;;  %7121 = vmatmul.mubr.f32.gmra.mxu1 %v9309_v0  ;;  %v9330_v53 = vunpack.c.h.bf16 %v228_v7  ;;  %v9342_v17 = vunpack.c.h.bf16 %v230_v43  ;;  %v9351_v48 = vunpack.c.l.bf16 %v230_v43  ;;  %v236_v43 = vld [vmem:[#allocation5 + $0x1f8] sm:$0xff] }
 0x22f   :  { %7123 = vmatprep.mubr.f32.mxu1 %v9312_v20  ;;  %11659 = vst [vmem:[#allocation198_spill] sm:$0xff] %v9345_v28  ;;  %11664 = vst [vmem:[#allocation203_spill] sm:$0xff] %v9361_v50 }
 0x230   :  { %11654 = vst [vmem:[#allocation193_spill] sm:$0xff] %v9330_v53  ;;  %11658 = vst [vmem:[#allocation197_spill] sm:$0xff] %v9342_v17 }
 0x231   :  { %1174 = vmatmul.mubr.f32.gmra.mxu0 %v9315_v63  ;;  %v9339_v63 = vunpack.c.l.bf16 %v228_v7  ;;  %11661 = vst [vmem:[#allocation200_spill] sm:$0xff] %v9351_v48  ;;  %v9354_v7 = vunpack.c.h.bf16 %v232_v1  ;;  %v9374_v1 = vunpack.c.l.bf16 %v236_v43 }
 0x232   :  { %1178 = vmatprep.mubr.f32.mxu0 %v9318_v22  ;;  %7124 = vmatmul.mubr.f32.gmra.mxu1 %v9321_v26  ;;  %v9348_v22 = vunpack.c.l.bf16 %v245_v52 }
 0x233   :  { %7126 = vmatprep.mubr.f32.mxu1 %v9324_v34  ;;  %11657 = vst [vmem:[#allocation196_spill] sm:$0xff] %v9339_v63  ;;  %11662 = vst [vmem:[#allocation201_spill] sm:$0xff] %v9354_v7 }
 0x234   :  { %11660 = vst [vmem:[#allocation199_spill] sm:$0xff] %v9348_v22  ;;  %11668 = vst [vmem:[#allocation207_spill] sm:$0xff] %v9374_v1 }
 0x235   :  { %1179 = vmatmul.mubr.f32.gmra.mxu0 %v9327_v19  ;;  %v234_v19 = vld [vmem:[#allocation5 + $0x1ec] sm:$0xff] }
 0x236   :  { %1183 = vmatprep.mubr.f32.mxu0 %v9330_v53  ;;  %7127 = vmatmul.mubr.f32.gmra.mxu1 %v9333_v56  ;;  %v9357_v53 = vunpack.c.h.bf16 %v245_v52  ;;  %v9371_v52 = vunpack.c.h.bf16 %v236_v43 }
 0x237   :  { %7129 = vmatprep.mubr.f32.mxu1 %v9336_v32 }
 0x238   :  { %11663 = vst [vmem:[#allocation202_spill] sm:$0xff] %v9357_v53  ;;  %11667 = vst [vmem:[#allocation206_spill] sm:$0xff] %v9371_v52 }
 0x239   :  { %1184 = vmatmul.mubr.f32.gmra.mxu0 %v9339_v63  ;;  %v9364_v63 = vunpack.c.h.bf16 %v234_v19 }
 0x23a   :  { %1188 = vmatprep.mubr.f32.mxu0 %v9342_v17  ;;  %7130 = vmatmul.mubr.f32.gmra.mxu1 %v9345_v28  ;;  %v9368_v17 = vunpack.c.l.bf16 %v234_v19 }
 0x23b   :  { %7132 = vmatprep.mubr.f32.mxu1 %v9348_v22  ;;  %11665 = vst [vmem:[#allocation204_spill] sm:$0xff] %v9364_v63 }
 0x23c   :  { %11666 = vst [vmem:[#allocation205_spill] sm:$0xff] %v9368_v17 }
 0x23d   :  { %1189 = vmatmul.mubr.f32.gmra.mxu0 %v9351_v48  ;;  %v240_v48 = vld [vmem:[#allocation5 + $0x210] sm:$0xff] }
 0x23e   :  { %1193 = vmatprep.mubr.f32.mxu0 %v9354_v7  ;;  %7133 = vmatmul.mubr.f32.gmra.mxu1 %v9357_v53  ;;  %v9377_v7 = vunpack.c.h.bf16 %v238_v3  ;;  %v9383_v19 = vunpack.c.h.bf16 %v240_v48 }
 0x240   :  { %11669 = vst [vmem:[#allocation208_spill] sm:$0xff] %v9377_v7  ;;  %11671 = vst [vmem:[#allocation210_spill] sm:$0xff] %v9383_v19 }
 0x241   :  { %1194 = vmatmul.mubr.f32.gmra.mxu0 %v9361_v50  ;;  %v9386_v50 = vunpack.c.l.bf16 %v240_v48 }
 0x242   :  { %1198 = vmatprep.mubr.f32.mxu0 %v9364_v63  ;;  %v242_v63 = vld [vmem:[#allocation5 + $0x21c] sm:$0xff] }
 0x243   :  { %11672 = vst [vmem:[#allocation211_spill] sm:$0xff] %v9386_v50  ;;  %v9389_v43 = vunpack.c.h.bf16 %v242_v63 }
 0x245   :  { %1199 = vmatmul.mubr.f32.gmra.mxu0 %v9368_v17  ;;  %11673 = vst [vmem:[#allocation212_spill] sm:$0xff] %v9389_v43  ;;  %v9392_v17 = vunpack.c.l.bf16 %v242_v63 }
 0x246   :  { %1203 = vmatprep.mubr.f32.mxu0 %v9371_v52  ;;  %v244_v52 = vld [vmem:[#allocation5 + $0x228] sm:$0xff] }
 0x247   :  { %11674 = vst [vmem:[#allocation213_spill] sm:$0xff] %v9392_v17  ;;  %v9395_v3 = vunpack.c.h.bf16 %v244_v52 }
 0x249   :  { %1204 = vmatmul.mubr.f32.gmra.mxu0 %v9374_v1  ;;  %11675 = vst [vmem:[#allocation214_spill] sm:$0xff] %v9395_v3  ;;  %v9398_v1 = vunpack.c.l.bf16 %v244_v52 }
 0x24a   :  { %1208 = vmatprep.mubr.f32.mxu0 %v9377_v7  ;;  %v246_v7 = vld [vmem:[#allocation5 + $0x234] sm:$0xff] }
 0x24b   :  { %11676 = vst [vmem:[#allocation215_spill] sm:$0xff] %v9398_v1  ;;  %v9401_v48 = vunpack.c.h.bf16 %v246_v7 }
 0x24d   :  { %1209 = vmatmul.mubr.f32.gmra.mxu0 %v9380_v42  ;;  %11677 = vst [vmem:[#allocation216_spill] sm:$0xff] %v9401_v48 }
 0x24e   :  { %1213 = vmatprep.mubr.f32.mxu0 %v9383_v19  ;;  %v9404_v19 = vunpack.c.l.bf16 %v246_v7 }
 0x250   :  { %11678 = vst [vmem:[#allocation217_spill] sm:$0xff] %v9404_v19 }
 0x251   :  { %1214 = vmatmul.mubr.f32.gmra.mxu0 %v9386_v50 }
 0x252   :  { %1218 = vmatprep.mubr.f32.mxu0 %v9389_v43 }
 0x255   :  { %1219 = vmatmul.mubr.f32.gmra.mxu0 %v9392_v17 }
 0x256   :  { %1223 = vmatprep.mubr.f32.mxu0 %v9395_v3 }
 0x259   :  { %1224 = vmatmul.mubr.f32.gmra.mxu0 %v9398_v1 }
 0x25a   :  { %1228 = vmatprep.mubr.f32.mxu0 %v9401_v48 }
 0x25d   :  { %1229 = vmatmul.mubr.f32.gmra.mxu0 %v9404_v19 }
 0x25e   :  { %2355 = vmatprep.mubr.f32.mxu0 %v8591_v4 }
 0x261   :  { %v995_v63 = vpop.f32.mrf.mxu0 }
 0x262   :  { %v6055_v28 = vpop.f32.mrf.mxu1 }
 0x263   :  { %v997_v43 = vpop.f32.mrf.mxu0 }
 0x264   :  { %v6056_v19 = vpop.f32.mrf.mxu1 }
 0x265   :  { %v1000_v50 = vpop.f32.mrf.mxu0  ;;  %v6057_v56 = vadd.f32 %v6056_v19, %v6055_v28 }
 0x267   :  { %v1002_v17 = vpop.f32.mrf.mxu0 }
 0x269   :  { %v1005_v52 = vpop.f32.mrf.mxu0 }
 0x26b   :  { %v1007_v42 = vpop.f32.mrf.mxu0 }
 0x26d   :  { %v1010_v36 = vpop.f32.mrf.mxu0 }
 0x26f   :  { %v1012_v3 = vpop.f32.mrf.mxu0 }
 0x271   :  { %v1015_v2 = vpop.f32.mrf.mxu0 }
 0x273   :  { %v1017_v53 = vpop.f32.mrf.mxu0 }
 0x275   :  { %v1020_v22 = vpop.f32.mrf.mxu0 }
 0x277   :  { %v1022_v1 = vpop.f32.mrf.mxu0 }
 0x279   :  { %v9409_v7 = vpop.f32.mrf.mxu0 }
 0x27b   :  { %v1027_v48 = vpop.f32.mrf.mxu0 }
 0x27d   :  { %v9411_v32 = vpop.f32.mrf.mxu0 }
 0x27f   :  { %v1032_v4 = vpop.f32.mrf.mxu0 }
 0x281   :  { %v9413_v43 = vpop.f32.mrf.mxu0 }
 0x282   :  { %v909_v17 = vpop.f32.mrf.mxu1 }
 0x283   :  { %v9415_v34 = vadd.f32 %v6057_v56, %v909_v17  ;;  %v1037_v42 = vpop.f32.mrf.mxu0 }
 0x284   :  { %v7030_v3 = vpop.f32.mrf.mxu1 }
 0x285   :  { %v9417_v26 = vpop.f32.mrf.mxu0  ;;  %v1930_v3 = vld [vmem:[#allocation11 + $0x78] sm:$0xff] }
 0x286   :  { %7239 = vmatprep.subr.mxu1 %v1930_v3 }
 0x287   :  { %v1042_v53 = vpop.f32.mrf.mxu0 }
 0x289   :  { %v9419_v1 = vpop.f32.mrf.mxu0 }
 0x28b   :  { %v1047_v20 = vpop.f32.mrf.mxu0 }
 0x28d   :  { %v9421_v0 = vpop.f32.mrf.mxu0 }
 0x28f   :  { %v1052_v48 = vpop.f32.mrf.mxu0 }
 0x291   :  { %v9423_v13 = vpop.f32.mrf.mxu0 }
 0x293   :  { %v1057_v4 = vpop.f32.mrf.mxu0 }
 0x295   :  { %v9425_v28 = vpop.f32.mrf.mxu0 }
 0x297   :  { %v1062_v19 = vpop.f32.mrf.mxu0 }
 0x298   :  { %v1929_v19 = vld [vmem:[#allocation11 + $0x70] sm:$0xff] }
 0x299   :  { %v9427_v12 = vpop.f32.mrf.mxu0 }
 0x29b   :  { %v1067_v56 = vpop.f32.mrf.mxu0 }
 0x29d   :  { %v9429_v17 = vpop.f32.mrf.mxu0 }
 0x29f   :  { %v1072_v42 = vpop.f32.mrf.mxu0 }
 0x2a0   :  { %v1928_v42 = vld [vmem:[#allocation11 + $0x68] sm:$0xff] }
 0x2a1   :  { %v9431_v53 = vpop.f32.mrf.mxu0 }
 0x2a2   :  { %v7065_v20 = vpop.f32.mrf.mxu1 }
 0x2a3   :  { %v1077_v18 = vpop.f32.mrf.mxu0  ;;  %v1306_v4 = vadd.f32 %v7065_v20, %v1000_v50  ;;  %v1926_v20 = vld [vmem:[#allocation11 + $0x58] sm:$0xff] }
 0x2a4   :  { %v1300_v8 = vpop.f32.mrf.mxu1 }
 0x2a5   :  { %v1301_v48 = vadd.f32 %v1300_v8, %v995_v63  ;;  %v9433_v11 = vpop.f32.mrf.mxu0  ;;  %v1927_v8 = vld [vmem:[#allocation11 + $0x60] sm:$0xff] }
 0x2a6   :  { %v7068_v60 = vpop.f32.mrf.mxu1 }
 0x2a7   :  { %v1082_v6 = vpop.f32.mrf.mxu0  ;;  %7167 = vmatprep.mubr.f32.mxu1 %v1301_v48  ;;  %v1316_v38 = vadd.f32 %v7068_v60, %v1010_v36  ;;  %v1925_v36 = vld [vmem:[#allocation11 + $0x50] sm:$0xff] }
 0x2a8   :  { %v1310_v15 = vpop.f32.mrf.mxu1  ;;  %7168 = vmatmul.mubr.f32.vlgmr.msra.gmra.mxu1 %v1306_v4 }
 0x2a9   :  { %v1311_v56 = vadd.f32 %v1310_v15, %v1005_v52  ;;  %v9435_v44 = vpop.f32.mrf.mxu0  ;;  %7240 = vmatpush3.msra.mxu1 %v1930_v3 }
 0x2aa   :  { %v7071_v55 = vpop.f32.mrf.mxu1  ;;  %7241 = vmatprep.subr.mxu1 %v1929_v19 }
 0x2ab   :  { %v1087_v18 = vpop.f32.mrf.mxu0  ;;  %7170 = vmatprep.mubr.f32.mxu1 %v1311_v56  ;;  %7242 = vmatpush3.msra.mxu1 %v1929_v19  ;;  %v1326_v15 = vadd.f32 %v7071_v55, %v1020_v22  ;;  %v1923_v22 = vld [vmem:[#allocation11 + $0x40] sm:$0xff] }
 0x2ac   :  { %v1320_v63 = vpop.f32.mrf.mxu1  ;;  %7171 = vmatmul.mubr.f32.gmra.mxu1 %v1316_v38  ;;  %7243 = vmatprep.subr.mxu1 %v1928_v42 }
 0x2ad   :  { %v1321_v6 = vadd.f32 %v1320_v63, %v1015_v2  ;;  %v9437_v50 = vpop.f32.mrf.mxu0  ;;  %7244 = vmatpush3.msra.mxu1 %v1928_v42  ;;  %v1924_v2 = vld [vmem:[#allocation11 + $0x48] sm:$0xff] }
 0x2ae   :  { %v7074_v52 = vpop.f32.mrf.mxu1  ;;  %7245 = vmatprep.subr.mxu1 %v1927_v8 }
 0x2af   :  { %v1092_v3 = vpop.f32.mrf.mxu0  ;;  %7173 = vmatprep.mubr.f32.mxu1 %v1321_v6  ;;  %7246 = vmatpush3.msra.mxu1 %v1927_v8  ;;  %v1336_v38 = vadd.f32 %v7074_v52, %v9411_v32  ;;  %v1921_v6 = vld [vmem:[#allocation11 + $0x30] sm:$0xff] }
 0x2b0   :  { %v1330_v60 = vpop.f32.mrf.mxu1  ;;  %7174 = vmatmul.mubr.f32.gmra.mxu1 %v1326_v15  ;;  %7247 = vmatprep.subr.mxu1 %v1926_v20 }
 0x2b1   :  { %v1331_v48 = vadd.f32 %v1330_v60, %v9409_v7  ;;  %v9440_v4 = vpop.f32.mrf.mxu0  ;;  %7248 = vmatpush3.msra.mxu1 %v1926_v20  ;;  %v1922_v7 = vld [vmem:[#allocation11 + $0x38] sm:$0xff] }
 0x2b2   :  { %v7077_v19 = vpop.f32.mrf.mxu1  ;;  %7249 = vmatprep.subr.mxu1 %v1925_v36 }
 0x2b3   :  { %v1097_v55 = vpop.f32.mrf.mxu0  ;;  %7176 = vmatprep.mubr.f32.mxu1 %v1331_v48  ;;  %7250 = vmatpush3.msra.mxu1 %v1925_v36  ;;  %v1346_v8 = vadd.f32 %v7077_v19, %v9417_v26  ;;  %v1919_v26 = vld [vmem:[#allocation11 + $0x20] sm:$0xff] }
 0x2b4   :  { %v1340_v56 = vpop.f32.mrf.mxu1  ;;  %7177 = vmatmul.mubr.f32.gmra.mxu1 %v1336_v38  ;;  %7251 = vmatprep.subr.mxu1 %v1924_v2 }
 0x2b5   :  { %v1341_v42 = vadd.f32 %v1340_v56, %v9413_v43  ;;  %v9444_v18 = vpop.f32.mrf.mxu0  ;;  %7252 = vmatpush3.msra.mxu1 %v1924_v2  ;;  %v1920_v43 = vld [vmem:[#allocation11 + $0x28] sm:$0xff] }
 0x2b6   :  { %v7080_v63 = vpop.f32.mrf.mxu1  ;;  %7253 = vmatprep.subr.mxu1 %v1923_v22 }
 0x2b7   :  { %v1102_v32 = vpop.f32.mrf.mxu0  ;;  %7179 = vmatprep.mubr.f32.mxu1 %v1341_v42  ;;  %7254 = vmatpush3.msra.mxu1 %v1923_v22  ;;  %v1356_v3 = vadd.f32 %v7080_v63, %v9421_v0 }
 0x2b8   :  { %v1350_v20 = vpop.f32.mrf.mxu1  ;;  %7180 = vmatmul.mubr.f32.gmra.mxu1 %v1346_v8  ;;  %7255 = vmatprep.subr.mxu1 %v1922_v7 }
 0x2b9   :  { %v1351_v15 = vadd.f32 %v1350_v20, %v9419_v1  ;;  %v1105_v52 = vpop.f32.mrf.mxu0  ;;  %7256 = vmatpush3.msra.mxu1 %v1922_v7 }
 0x2ba   :  { %v7083_v36 = vpop.f32.mrf.mxu1  ;;  %7257 = vmatprep.subr.mxu1 %v1921_v6 }
 0x2bb   :  { %v1107_v60 = vpop.f32.mrf.mxu0  ;;  %7182 = vmatprep.mubr.f32.mxu1 %v1351_v15  ;;  %7258 = vmatpush3.msra.mxu1 %v1921_v6  ;;  %v1366_v1 = vadd.f32 %v7083_v36, %v9425_v28 }
 0x2bc   :  { %v1360_v48 = vpop.f32.mrf.mxu1  ;;  %7183 = vmatmul.mubr.f32.gmra.mxu1 %v1356_v3  ;;  %7259 = vmatprep.subr.mxu1 %v1920_v43 }
 0x2bd   :  { %v1361_v2 = vadd.f32 %v1360_v48, %v9423_v13  ;;  %v1110_v38 = vpop.f32.mrf.mxu0  ;;  %7260 = vmatpush3.msra.mxu1 %v1920_v43 }
 0x2be   :  { %v7086_v19 = vpop.f32.mrf.mxu1  ;;  %7261 = vmatprep.subr.mxu1 %v1919_v26 }
 0x2bf   :  { %v1112_v55 = vpop.f32.mrf.mxu0  ;;  %7185 = vmatprep.mubr.f32.mxu1 %v1361_v2  ;;  %7262 = vmatpush3.msra.mxu1 %v1919_v26  ;;  %v1376_v42 = vadd.f32 %v7086_v19, %v9429_v17 }
 0x2c0   :  { %v1370_v0 = vpop.f32.mrf.mxu1  ;;  %7186 = vmatmul.mubr.f32.gmra.mxu1 %v1366_v1 }
 0x2c1   :  { %v1371_v22 = vadd.f32 %v1370_v0, %v9427_v12  ;;  %v1115_v56 = vpop.f32.mrf.mxu0 }
 0x2c2   :  { %v7089_v7 = vpop.f32.mrf.mxu1 }
 0x2c3   :  { %v1117_v8 = vpop.f32.mrf.mxu0  ;;  %7188 = vmatprep.mubr.f32.mxu1 %v1371_v22  ;;  %v1386_v32 = vadd.f32 %v7089_v7, %v9433_v11 }
 0x2c4   :  { %v1380_v13 = vpop.f32.mrf.mxu1  ;;  %7189 = vmatmul.mubr.f32.gmra.mxu1 %v1376_v42 }
 0x2c5   :  { %v1381_v63 = vadd.f32 %v1380_v13, %v9431_v53  ;;  %v1120_v28 = vpop.f32.mrf.mxu0 }
 0x2c6   :  { %v7092_v6 = vpop.f32.mrf.mxu1 }
 0x2c7   :  { %v1122_v20 = vpop.f32.mrf.mxu0  ;;  %7191 = vmatprep.mubr.f32.mxu1 %v1381_v63  ;;  %v1396_v17 = vadd.f32 %v7092_v6, %v9437_v50 }
 0x2c8   :  { %v1390_v15 = vpop.f32.mrf.mxu1  ;;  %7192 = vmatmul.mubr.f32.gmra.mxu1 %v1386_v32 }
 0x2c9   :  { %v1391_v12 = vadd.f32 %v1390_v15, %v9435_v44  ;;  %v1125_v43 = vpop.f32.mrf.mxu0 }
 0x2ca   :  { %v7095_v3 = vpop.f32.mrf.mxu1 }
 0x2cb   :  { %v1127_v36 = vpop.f32.mrf.mxu0  ;;  %7194 = vmatprep.mubr.f32.mxu1 %v1391_v12  ;;  %v1406_v11 = vadd.f32 %v7095_v3, %v9444_v18 }
 0x2cc   :  { %v1400_v60 = vpop.f32.mrf.mxu1  ;;  %7195 = vmatmul.mubr.f32.gmra.mxu1 %v1396_v17 }
 0x2cd   :  { %v1401_v53 = vadd.f32 %v1400_v60, %v9440_v4  ;;  %v1130_v26 = vpop.f32.mrf.mxu0 }
 0x2ce   :  { %v7098_v48 = vpop.f32.mrf.mxu1 }
 0x2cf   :  { %v1132_v2 = vpop.f32.mrf.mxu0  ;;  %7197 = vmatprep.mubr.f32.mxu1 %v1401_v53  ;;  %v1416_v55 = vadd.f32 %v7098_v48, %v1110_v38 }
 0x2d0   :  { %v1410_v1 = vpop.f32.mrf.mxu1  ;;  %7198 = vmatmul.mubr.f32.gmra.mxu1 %v1406_v11 }
 0x2d1   :  { %v1411_v19 = vadd.f32 %v1410_v1, %v1105_v52  ;;  %v1135_v44 = vpop.f32.mrf.mxu0 }
 0x2d2   :  { %v7101_v0 = vpop.f32.mrf.mxu1 }
 0x2d3   :  { %v1137_v50 = vpop.f32.mrf.mxu0  ;;  %7200 = vmatprep.mubr.f32.mxu1 %v1411_v19  ;;  %v1426_v8 = vadd.f32 %v7101_v0, %v1120_v28 }
 0x2d4   :  { %v1420_v22 = vpop.f32.mrf.mxu1  ;;  %7201 = vmatmul.mubr.f32.gmra.mxu1 %v1416_v55  ;;  %v1918_v55 = vld [vmem:[#allocation11 + $0x18] sm:$0xff] }
 0x2d5   :  { %v1421_v42 = vadd.f32 %v1420_v22, %v1115_v56  ;;  %v1140_v7 = vpop.f32.mrf.mxu0  ;;  %7263 = vmatprep.subr.mxu1 %v1918_v55  ;;  %v1917_v22 = vld [vmem:[#allocation11 + $0x10] sm:$0xff] }
 0x2d6   :  { %v7104_v4 = vpop.f32.mrf.mxu1  ;;  %7264 = vmatpush3.msra.mxu1 %v1918_v55 }
 0x2d7   :  { %v1142_v13 = vpop.f32.mrf.mxu0  ;;  %7203 = vmatprep.mubr.f32.mxu1 %v1421_v42  ;;  %v1436_v6 = vadd.f32 %v7104_v4, %v1130_v26  ;;  %7265 = vmatprep.subr.mxu1 %v1917_v22  ;;  %v1916_v4 = vld [vmem:[#allocation11 + $0x8] sm:$0xff] }
 0x2d8   :  { %v1430_v18 = vpop.f32.mrf.mxu1  ;;  %7204 = vmatmul.mubr.f32.gmra.mxu1 %v1426_v8 }
 0x2d9   :  { %v1431_v63 = vadd.f32 %v1430_v18, %v1125_v43  ;;  %v1145_v32 = vpop.f32.mrf.mxu0  ;;  %7266 = vmatpush3.msra.mxu1 %v1917_v22  ;;  %v1915_v18 = vld [vmem:[#allocation11] sm:$0xff] }
 0x2da   :  { %v7107_v20 = vpop.f32.mrf.mxu1  ;;  %7267 = vmatprep.subr.mxu1 %v1916_v4 }
 0x2db   :  { %v1147_v52 = vpop.f32.mrf.mxu0  ;;  %7206 = vmatprep.mubr.f32.mxu1 %v1431_v63  ;;  %v1446_v17 = vadd.f32 %v7107_v20, %v1140_v7  ;;  %7268 = vmatpush3.msra.mxu1 %v1916_v4  ;;  %v11679_v20 = vmov 0.0  }
 0x2dc   :  { %v1440_v38 = vpop.f32.mrf.mxu1  ;;  %7207 = vmatmul.mubr.f32.gmra.mxu1 %v1436_v6  ;;  %7269 = vmatprep.subr.mxu1 %v1915_v18 }
 0x2dd   :  { %v1441_v15 = vadd.f32 %v1440_v38, %v1135_v44  ;;  %v1150_v12 = vpop.f32.mrf.mxu0  ;;  %7270 = vmatpush3.msra.mxu1 %v1915_v18 }
 0x2de   :  { %v7110_v3 = vpop.f32.mrf.mxu1  ;;  %7413 = vmatprep.subr.mxu1 %v11679_v20 }
 0x2df   :  { %v1152_v56 = vpop.f32.mrf.mxu0  ;;  %7209 = vmatprep.mubr.f32.mxu1 %v1441_v15  ;;  %v1456_v53 = vadd.f32 %v7110_v3, %v1150_v12 }
 0x2e0   :  { %v1450_v28 = vpop.f32.mrf.mxu1  ;;  %7210 = vmatmul.mubr.f32.gmra.mxu1 %v1446_v17 }
 0x2e1   :  { %v1451_v36 = vadd.f32 %v1450_v28, %v1145_v32  ;;  %v1155_v60 = vpop.f32.mrf.mxu0 }
 0x2e2   :  { %v7113_v11 = vpop.f32.mrf.mxu1 }
 0x2e3   :  { %v1157_v43 = vpop.f32.mrf.mxu0  ;;  %7212 = vmatprep.mubr.f32.mxu1 %v1451_v36 }
 0x2e4   :  { %v1460_v26 = vpop.f32.mrf.mxu1  ;;  %7213 = vmatmul.mubr.f32.gmra.mxu1 %v1456_v53 }
 0x2e5   :  { %v1461_v48 = vadd.f32 %v1460_v26, %v1155_v60  ;;  %v1160_v2 = vpop.f32.mrf.mxu0 }
 0x2e6   :  { %v1466_v1 = vadd.f32 %v7113_v11, %v1160_v2  ;;  %v7116_v19 = vpop.f32.mrf.mxu1 }
 0x2e7   :  { %v1162_v44 = vpop.f32.mrf.mxu0  ;;  %7215 = vmatprep.mubr.f32.mxu1 %v1461_v48 }
 0x2e8   :  { %7216 = vmatmul.mubr.f32.gmra.mxu1 %v1466_v1  ;;  %v1470_v0 = vpop.f32.mrf.mxu1 }
 0x2e9   :  { %v1165_v50 = vpop.f32.mrf.mxu0 }
 0x2ea   :  { %v1471_v42 = vadd.f32 %v1470_v0, %v1165_v50  ;;  %v7119_v8 = vpop.f32.mrf.mxu1 }
 0x2eb   :  { %v1167_v7 = vpop.f32.mrf.mxu0 }
 0x2ec   :  { %7218 = vmatprep.mubr.f32.mxu1 %v1471_v42  ;;  %v1480_v6 = vpop.f32.mrf.mxu1 }
 0x2ed   :  { %v1170_v13 = vpop.f32.mrf.mxu0 }
 0x2ee   :  { %v1476_v63 = vadd.f32 %v7116_v19, %v1170_v13  ;;  %v7122_v12 = vpop.f32.mrf.mxu1 }
 0x2ef   :  { %v1172_v32 = vpop.f32.mrf.mxu0 }
 0x2f0   :  { %7219 = vmatmul.mubr.f32.gmra.mxu1 %v1476_v63  ;;  %v1490_v28 = vpop.f32.mrf.mxu1 }
 0x2f1   :  { %v1175_v52 = vpop.f32.mrf.mxu0 }
 0x2f2   :  { %v1481_v38 = vadd.f32 %v1480_v6, %v1175_v52  ;;  %v7125_v11 = vpop.f32.mrf.mxu1 }
 0x2f3   :  { %v1177_v15 = vpop.f32.mrf.mxu0 }
 0x2f4   :  { %7221 = vmatprep.mubr.f32.mxu1 %v1481_v38  ;;  %v1500_v2 = vpop.f32.mrf.mxu1 }
 0x2f5   :  { %v1180_v17 = vpop.f32.mrf.mxu0 }
 0x2f6   :  { %v1486_v3 = vadd.f32 %v7119_v8, %v1180_v17  ;;  %v7128_v55 = vpop.f32.mrf.mxu1 }
 0x2f7   :  { %v1182_v56 = vpop.f32.mrf.mxu0 }
 0x2f8   :  { %7222 = vmatmul.mubr.f32.gmra.mxu1 %v1486_v3  ;;  %v1510_v42 = vpop.f32.mrf.mxu1 }
 0x2f9   :  { %v1185_v36 = vpop.f32.mrf.mxu0 }
 0x2fa   :  { %v1491_v60 = vadd.f32 %v1490_v28, %v1185_v36  ;;  %v7131_v13 = vpop.f32.mrf.mxu1 }
 0x2fb   :  { %v1187_v53 = vpop.f32.mrf.mxu0 }
 0x2fc   :  { %7224 = vmatprep.mubr.f32.mxu1 %v1491_v60  ;;  %v1520_v6 = vpop.f32.mrf.mxu1 }
 0x2fd   :  { %v1190_v43 = vpop.f32.mrf.mxu0 }
 0x2fe   :  { %v1496_v26 = vadd.f32 %v7122_v12, %v1190_v43  ;;  %v7134_v12 = vpop.f32.mrf.mxu1 }
 0x2ff   :  { %v1192_v48 = vpop.f32.mrf.mxu0 }
 0x300   :  { %7225 = vmatmul.mubr.f32.gmra.mxu1 %v1496_v26  ;;  %v1530_v28 = vpop.f32.mrf.mxu1  ;;  %v9463_v48 = vld [vmem:[%s11091_s6] ss:$0 sm:$0xff] }
 0x301   :  { %v1195_v1 = vpop.f32.mrf.mxu0 }
 0x302   :  { %v1501_v19 = vadd.f32 %v1500_v2, %v1195_v1 }
 0x303   :  { %v1197_v44 = vpop.f32.mrf.mxu0 }
 0x304   :  { %7227 = vmatprep.mubr.f32.mxu1 %v1501_v19 }
 0x305   :  { %v1200_v0 = vpop.f32.mrf.mxu0 }
 0x306   :  { %v1506_v50 = vadd.f32 %v7125_v11, %v1200_v0 }
 0x307   :  { %v1202_v22 = vpop.f32.mrf.mxu0 }
 0x308   :  { %7228 = vmatmul.mubr.f32.gmra.mxu1 %v1506_v50 }
 0x309   :  { %v1205_v7 = vpop.f32.mrf.mxu0 }
 0x30a   :  { %v1511_v8 = vadd.f32 %v1510_v42, %v1205_v7  ;;  %v928_v7 = vld [vmem:[#allocation13 + $0x78] sm:$0xff] }
 0x30b   :  { %v1207_v4 = vpop.f32.mrf.mxu0 }
 0x30c   :  { %7230 = vmatprep.mubr.f32.mxu1 %v1511_v8 }
 0x30d   :  { %v1210_v18 = vpop.f32.mrf.mxu0 }
 0x30e   :  { %v1516_v63 = vadd.f32 %v7128_v55, %v1210_v18 }
 0x30f   :  { %v1212_v32 = vpop.f32.mrf.mxu0 }
 0x310   :  { %7231 = vmatmul.mubr.f32.gmra.mxu1 %v1516_v63 }
 0x311   :  { %v1215_v52 = vpop.f32.mrf.mxu0 }
 0x312   :  { %v1521_v38 = vadd.f32 %v1520_v6, %v1215_v52  ;;  %v926_v52 = vld [vmem:[#allocation13 + $0x68] sm:$0xff] }
 0x313   :  { %v1217_v15 = vpop.f32.mrf.mxu0 }
 0x314   :  { %7233 = vmatprep.mubr.f32.mxu1 %v1521_v38 }
 0x315   :  { %v1220_v17 = vpop.f32.mrf.mxu0 }
 0x316   :  { %v1526_v3 = vadd.f32 %v7131_v13, %v1220_v17  ;;  %v927_v13 = vld [vmem:[#allocation13 + $0x70] sm:$0xff] }
 0x317   :  { %v1222_v56 = vpop.f32.mrf.mxu0 }
 0x318   :  { %7234 = vmatmul.mubr.f32.gmra.mxu1 %v1526_v3 }
 0x319   :  { %v1225_v36 = vpop.f32.mrf.mxu0 }
 0x31a   :  { %v1531_v60 = vadd.f32 %v1530_v28, %v1225_v36  ;;  %v924_v36 = vld [vmem:[#allocation13 + $0x58] sm:$0xff] }
 0x31b   :  { %v1227_v53 = vpop.f32.mrf.mxu0 }
 0x31c   :  { %7236 = vmatprep.mubr.f32.mxu1 %v1531_v60 }
 0x31d   :  { %v1230_v11 = vpop.f32.mrf.mxu0 }
 0x31e   :  { %v1536_v43 = vadd.f32 %v7134_v12, %v1230_v11  ;;  %v925_v12 = vld [vmem:[#allocation13 + $0x60] sm:$0xff]  ;;  %v923_v11 = vld [vmem:[#allocation13 + $0x50] sm:$0xff] }
 0x31f   :  { %v1232_v26 = vpop.f32.mrf.mxu0 }
 0x320   :  { %7237 = vmatmul.mubr.f32.gmra.mxu1 %v1536_v43 }
 0x368   :  { %v7169_v2 = vpop.f32.mrf.mxu1 }
 0x369   :  { %v1634_v1 = vadd.f32 %v7169_v2, %v9463_v48 }
 0x36a   :  { %v1628_v19 = vpop.f32.mrf.mxu1 }
 0x36b   :  { %v1629_v44 = vadd.f32 %v9463_v48, %v1628_v19  ;;  %v1868_v50 = vmax.f32 %v1634_v1, 0.0  ;;  %v922_v19 = vld [vmem:[#allocation13 + $0x48] sm:$0xff] }
 0x36c   :  { %v7172_v55 = vpop.f32.mrf.mxu1 }
 0x36d   :  { %v1867_v0 = vmax.f32 %v1629_v44, 0.0  ;;  %v1644_v22 = vadd.f32 %v7172_v55, %v9463_v48 }
 0x36e   :  { %v1638_v42 = vpop.f32.mrf.mxu1 }
 0x36f   :  { %v1639_v8 = vadd.f32 %v9463_v48, %v1638_v42  ;;  %7271 = vmatprep.mubr.f32.mxu1 %v1867_v0  ;;  %v1870_v63 = vmax.f32 %v1644_v22, 0.0  ;;  %v921_v0 = vld [vmem:[#allocation13 + $0x40] sm:$0xff] }
 0x370   :  { %v7175_v4 = vpop.f32.mrf.mxu1  ;;  %7272 = vmatmul.mubr.f32.vlgmr.msra.gmra.mxu1 %v1868_v50 }
 0x371   :  { %v1869_v18 = vmax.f32 %v1639_v8, 0.0  ;;  %7414 = vmatpush3.msra.mxu1 %v928_v7  ;;  %v1654_v32 = vadd.f32 %v7175_v4, %v9463_v48  ;;  %v920_v8 = vld [vmem:[#allocation13 + $0x38] sm:$0xff] }
 0x372   :  { %v1648_v6 = vpop.f32.mrf.mxu1  ;;  %7415 = vmatprep.subr.mxu1 %v11679_v20 }
 0x373   :  { %v1649_v38 = vadd.f32 %v9463_v48, %v1648_v6  ;;  %7274 = vmatprep.mubr.f32.mxu1 %v1869_v18  ;;  %7416 = vmatpush3.msra.mxu1 %v927_v13  ;;  %v1872_v3 = vmax.f32 %v1654_v32, 0.0  ;;  %v919_v18 = vld [vmem:[#allocation13 + $0x30] sm:$0xff] }
 0x374   :  { %v7178_v15 = vpop.f32.mrf.mxu1  ;;  %7275 = vmatmul.mubr.f32.gmra.mxu1 %v1870_v63  ;;  %7417 = vmatprep.subr.mxu1 %v11679_v20 }
 0x375   :  { %v1871_v17 = vmax.f32 %v1649_v38, 0.0  ;;  %7418 = vmatpush3.msra.mxu1 %v926_v52  ;;  %v1664_v56 = vadd.f32 %v7178_v15, %v9463_v48  ;;  %v918_v38 = vld [vmem:[#allocation13 + $0x28] sm:$0xff] }
 0x376   :  { %v1658_v28 = vpop.f32.mrf.mxu1  ;;  %7419 = vmatprep.subr.mxu1 %v11679_v20 }
 0x377   :  { %v1659_v60 = vadd.f32 %v9463_v48, %v1658_v28  ;;  %7277 = vmatprep.mubr.f32.mxu1 %v1871_v17  ;;  %7420 = vmatpush3.msra.mxu1 %v925_v12  ;;  %v1874_v26 = vmax.f32 %v1664_v56, 0.0  ;;  %v917_v17 = vld [vmem:[#allocation13 + $0x20] sm:$0xff] }
 0x378   :  { %v7181_v53 = vpop.f32.mrf.mxu1  ;;  %7278 = vmatmul.mubr.f32.gmra.mxu1 %v1872_v3  ;;  %7421 = vmatprep.subr.mxu1 %v11679_v20 }
 0x379   :  { %v1873_v43 = vmax.f32 %v1659_v60, 0.0  ;;  %7422 = vmatpush3.msra.mxu1 %v924_v36  ;;  %v1674_v2 = vadd.f32 %v7181_v53, %v9463_v48  ;;  %v916_v60 = vld [vmem:[#allocation13 + $0x18] sm:$0xff] }
 0x37a   :  { %v1668_v1 = vpop.f32.mrf.mxu1  ;;  %7423 = vmatprep.subr.mxu1 %v11679_v20 }
 0x37b   :  { %v1669_v44 = vadd.f32 %v9463_v48, %v1668_v1  ;;  %7280 = vmatprep.mubr.f32.mxu1 %v1873_v43  ;;  %7424 = vmatpush3.msra.mxu1 %v923_v11  ;;  %v1876_v22 = vmax.f32 %v1674_v2, 0.0  ;;  %v915_v43 = vld [vmem:[#allocation13 + $0x10] sm:$0xff] }
 0x37c   :  { %v7184_v55 = vpop.f32.mrf.mxu1  ;;  %7281 = vmatmul.mubr.f32.gmra.mxu1 %v1874_v26  ;;  %7425 = vmatprep.subr.mxu1 %v11679_v20 }
 0x37d   :  { %v1875_v50 = vmax.f32 %v1669_v44, 0.0  ;;  %7426 = vmatpush3.msra.mxu1 %v922_v19  ;;  %v1684_v42 = vadd.f32 %v7184_v55, %v9463_v48  ;;  %v914_v44 = vld [vmem:[#allocation13 + $0x8] sm:$0xff] }
 0x37e   :  { %v1678_v7 = vpop.f32.mrf.mxu1  ;;  %7427 = vmatprep.subr.mxu1 %v11679_v20 }
 0x37f   :  { %v1679_v4 = vadd.f32 %v9463_v48, %v1678_v7  ;;  %7283 = vmatprep.mubr.f32.mxu1 %v1875_v50  ;;  %7428 = vmatpush3.msra.mxu1 %v921_v0  ;;  %v1878_v32 = vmax.f32 %v1684_v42, 0.0  ;;  %v913_v50 = vld [vmem:[#allocation13] sm:$0xff] }
 0x380   :  { %v7187_v13 = vpop.f32.mrf.mxu1  ;;  %7284 = vmatmul.mubr.f32.gmra.mxu1 %v1876_v22  ;;  %7429 = vmatprep.subr.mxu1 %v11679_v20 }
 0x381   :  { %v1877_v63 = vmax.f32 %v1679_v4, 0.0  ;;  %7430 = vmatpush3.msra.mxu1 %v920_v8  ;;  %v1694_v6 = vadd.f32 %v7187_v13, %v9463_v48 }
 0x382   :  { %v1688_v52 = vpop.f32.mrf.mxu1  ;;  %7431 = vmatprep.subr.mxu1 %v11679_v20 }
 0x383   :  { %v1689_v15 = vadd.f32 %v9463_v48, %v1688_v52  ;;  %7286 = vmatprep.mubr.f32.mxu1 %v1877_v63  ;;  %7432 = vmatpush3.msra.mxu1 %v919_v18  ;;  %v1880_v56 = vmax.f32 %v1694_v6, 0.0 }
 0x384   :  { %v7190_v12 = vpop.f32.mrf.mxu1  ;;  %7287 = vmatmul.mubr.f32.gmra.mxu1 %v1878_v32  ;;  %7433 = vmatprep.subr.mxu1 %v11679_v20 }
 0x385   :  { %v1879_v3 = vmax.f32 %v1689_v15, 0.0  ;;  %7434 = vmatpush3.msra.mxu1 %v918_v38  ;;  %v1704_v28 = vadd.f32 %v7190_v12, %v9463_v48 }
 0x386   :  { %v1698_v36 = vpop.f32.mrf.mxu1  ;;  %7435 = vmatprep.subr.mxu1 %v11679_v20 }
 0x387   :  { %v1699_v53 = vadd.f32 %v9463_v48, %v1698_v36  ;;  %7289 = vmatprep.mubr.f32.mxu1 %v1879_v3  ;;  %7436 = vmatpush3.msra.mxu1 %v917_v17  ;;  %v1882_v2 = vmax.f32 %v1704_v28, 0.0 }
 0x388   :  { %v7193_v11 = vpop.f32.mrf.mxu1  ;;  %7290 = vmatmul.mubr.f32.gmra.mxu1 %v1880_v56  ;;  %7437 = vmatprep.subr.mxu1 %v11679_v20 }
 0x389   :  { %v1881_v26 = vmax.f32 %v1699_v53, 0.0  ;;  %7438 = vmatpush3.msra.mxu1 %v916_v60  ;;  %v1714_v1 = vadd.f32 %v7193_v11, %v9463_v48 }
 0x38a   :  { %v1708_v19 = vpop.f32.mrf.mxu1  ;;  %7439 = vmatprep.subr.mxu1 %v11679_v20 }
 0x38b   :  { %v1709_v55 = vadd.f32 %v9463_v48, %v1708_v19  ;;  %7292 = vmatprep.mubr.f32.mxu1 %v1881_v26  ;;  %7440 = vmatpush3.msra.mxu1 %v915_v43  ;;  %v1884_v42 = vmax.f32 %v1714_v1, 0.0 }
 0x38c   :  { %v7196_v0 = vpop.f32.mrf.mxu1  ;;  %7293 = vmatmul.mubr.f32.gmra.mxu1 %v1882_v2  ;;  %7441 = vmatprep.subr.mxu1 %v11679_v20 }
 0x38d   :  { %v1883_v22 = vmax.f32 %v1709_v55, 0.0  ;;  %7442 = vmatpush3.msra.mxu1 %v914_v44  ;;  %v1724_v7 = vadd.f32 %v7196_v0, %v9463_v48 }
 0x38e   :  { %v1718_v8 = vpop.f32.mrf.mxu1  ;;  %7443 = vmatprep.subr.mxu1 %v11679_v20 }
 0x38f   :  { %v1719_v4 = vadd.f32 %v9463_v48, %v1718_v8  ;;  %7295 = vmatprep.mubr.f32.mxu1 %v1883_v22  ;;  %7444 = vmatpush3.msra.mxu1 %v913_v50  ;;  %v1886_v63 = vmax.f32 %v1724_v7, 0.0 }
 0x390   :  { %v7199_v13 = vpop.f32.mrf.mxu1  ;;  %7296 = vmatmul.mubr.f32.gmra.mxu1 %v1884_v42 }
 0x391   :  { %v1885_v18 = vmax.f32 %v1719_v4, 0.0  ;;  %v1734_v32 = vadd.f32 %v7199_v13, %v9463_v48 }
 0x392   :  { %v1728_v6 = vpop.f32.mrf.mxu1 }
 0x393   :  { %v1729_v52 = vadd.f32 %v9463_v48, %v1728_v6  ;;  %7298 = vmatprep.mubr.f32.mxu1 %v1885_v18  ;;  %v1888_v12 = vmax.f32 %v1734_v32, 0.0 }
 0x394   :  { %v7202_v38 = vpop.f32.mrf.mxu1  ;;  %7299 = vmatmul.mubr.f32.gmra.mxu1 %v1886_v63 }
 0x395   :  { %v1887_v15 = vmax.f32 %v1729_v52, 0.0  ;;  %v1744_v17 = vadd.f32 %v7202_v38, %v9463_v48 }
 0x396   :  { %v1738_v3 = vpop.f32.mrf.mxu1 }
 0x397   :  { %v1739_v56 = vadd.f32 %v9463_v48, %v1738_v3  ;;  %7301 = vmatprep.mubr.f32.mxu1 %v1887_v15  ;;  %v1890_v60 = vmax.f32 %v1744_v17, 0.0 }
 0x398   :  { %v7205_v28 = vpop.f32.mrf.mxu1  ;;  %7302 = vmatmul.mubr.f32.gmra.mxu1 %v1888_v12 }
 0x399   :  { %v1889_v36 = vmax.f32 %v1739_v56, 0.0  ;;  %v1754_v53 = vadd.f32 %v7205_v28, %v9463_v48 }
 0x39a   :  { %v1748_v11 = vpop.f32.mrf.mxu1 }
 0x39b   :  { %v1749_v43 = vadd.f32 %v9463_v48, %v1748_v11  ;;  %7304 = vmatprep.mubr.f32.mxu1 %v1889_v36  ;;  %v1892_v1 = vmax.f32 %v1754_v53, 0.0 }
 0x39c   :  { %v7208_v26 = vpop.f32.mrf.mxu1  ;;  %7305 = vmatmul.mubr.f32.gmra.mxu1 %v1890_v60 }
 0x39d   :  { %v1891_v2 = vmax.f32 %v1749_v43, 0.0  ;;  %v1764_v19 = vadd.f32 %v7208_v26, %v9463_v48 }
 0x39e   :  { %v1758_v44 = vpop.f32.mrf.mxu1 }
 0x39f   :  { %v1759_v55 = vadd.f32 %v9463_v48, %v1758_v44  ;;  %7307 = vmatprep.mubr.f32.mxu1 %v1891_v2  ;;  %v1894_v22 = vmax.f32 %v1764_v19, 0.0 }
 0x3a0   :  { %v7211_v0 = vpop.f32.mrf.mxu1  ;;  %7308 = vmatmul.mubr.f32.gmra.mxu1 %v1892_v1 }
 0x3a1   :  { %v1893_v50 = vmax.f32 %v1759_v55, 0.0  ;;  %v1774_v42 = vadd.f32 %v7211_v0, %v9463_v48 }
 0x3a2   :  { %v1768_v7 = vpop.f32.mrf.mxu1 }
 0x3a3   :  { %v1769_v8 = vadd.f32 %v9463_v48, %v1768_v7  ;;  %7310 = vmatprep.mubr.f32.mxu1 %v1893_v50  ;;  %v1896_v18 = vmax.f32 %v1774_v42, 0.0 }
 0x3a4   :  { %v7214_v4 = vpop.f32.mrf.mxu1  ;;  %7311 = vmatmul.mubr.f32.gmra.mxu1 %v1894_v22 }
 0x3a5   :  { %v1895_v13 = vmax.f32 %v1769_v8, 0.0  ;;  %v1784_v63 = vadd.f32 %v7214_v4, %v9463_v48 }
 0x3a6   :  { %v1778_v32 = vpop.f32.mrf.mxu1 }
 0x3a7   :  { %v1779_v6 = vadd.f32 %v9463_v48, %v1778_v32  ;;  %7313 = vmatprep.mubr.f32.mxu1 %v1895_v13  ;;  %v1898_v15 = vmax.f32 %v1784_v63, 0.0 }
 0x3a8   :  { %v7217_v52 = vpop.f32.mrf.mxu1  ;;  %7314 = vmatmul.mubr.f32.gmra.mxu1 %v1896_v18 }
 0x3a9   :  { %v1897_v38 = vmax.f32 %v1779_v6, 0.0  ;;  %v1794_v12 = vadd.f32 %v7217_v52, %v9463_v48 }
 0x3aa   :  { %v1788_v17 = vpop.f32.mrf.mxu1 }
 0x3ab   :  { %v1789_v3 = vadd.f32 %v9463_v48, %v1788_v17  ;;  %7316 = vmatprep.mubr.f32.mxu1 %v1897_v38  ;;  %v1900_v28 = vmax.f32 %v1794_v12, 0.0 }
 0x3ac   :  { %7317 = vmatmul.mubr.f32.gmra.mxu1 %v1898_v15 }
 0x3ad   :  { %v1899_v56 = vmax.f32 %v1789_v3, 0.0 }
 0x3af   :  { %7319 = vmatprep.mubr.f32.mxu1 %v1899_v56 }
 0x3b0   :  { %v7220_v36 = vpop.f32.mrf.mxu1  ;;  %7320 = vmatmul.mubr.f32.gmra.mxu1 %v1900_v28 }
 0x3b1   :  { %v1804_v60 = vadd.f32 %v7220_v36, %v9463_v48 }
 0x3b2   :  { %v1798_v53 = vpop.f32.mrf.mxu1 }
 0x3b3   :  { %v1799_v11 = vadd.f32 %v9463_v48, %v1798_v53  ;;  %v1902_v26 = vmax.f32 %v1804_v60, 0.0 }
 0x3b5   :  { %v1901_v43 = vmax.f32 %v1799_v11, 0.0 }
 0x3b7   :  { %7322 = vmatprep.mubr.f32.mxu1 %v1901_v43 }
 0x3b8   :  { %v7223_v2 = vpop.f32.mrf.mxu1  ;;  %7323 = vmatmul.mubr.f32.gmra.mxu1 %v1902_v26 }
 0x3b9   :  { %v1814_v1 = vadd.f32 %v7223_v2, %v9463_v48 }
 0x3ba   :  { %v1808_v19 = vpop.f32.mrf.mxu1 }
 0x3bb   :  { %v1809_v44 = vadd.f32 %v9463_v48, %v1808_v19  ;;  %v1904_v0 = vmax.f32 %v1814_v1, 0.0 }
 0x3bd   :  { %v1903_v55 = vmax.f32 %v1809_v44, 0.0 }
 0x3bf   :  { %7325 = vmatprep.mubr.f32.mxu1 %v1903_v55 }
 0x3c0   :  { %v7226_v50 = vpop.f32.mrf.mxu1  ;;  %7326 = vmatmul.mubr.f32.gmra.mxu1 %v1904_v0 }
 0x3c1   :  { %v1824_v22 = vadd.f32 %v7226_v50, %v9463_v48 }
 0x3c2   :  { %v1818_v42 = vpop.f32.mrf.mxu1 }
 0x3c3   :  { %v1819_v7 = vadd.f32 %v9463_v48, %v1818_v42  ;;  %v1906_v4 = vmax.f32 %v1824_v22, 0.0 }
 0x3c5   :  { %v1905_v8 = vmax.f32 %v1819_v7, 0.0 }
 0x3c7   :  { %7328 = vmatprep.mubr.f32.mxu1 %v1905_v8 }
 0x3c8   :  { %v7229_v13 = vpop.f32.mrf.mxu1  ;;  %7329 = vmatmul.mubr.f32.gmra.mxu1 %v1906_v4 }
 0x3c9   :  { %v1834_v18 = vadd.f32 %v7229_v13, %v9463_v48 }
 0x3ca   :  { %v1828_v63 = vpop.f32.mrf.mxu1 }
 0x3cb   :  { %v1829_v32 = vadd.f32 %v9463_v48, %v1828_v63  ;;  %v1908_v52 = vmax.f32 %v1834_v18, 0.0 }
 0x3cd   :  { %v1907_v6 = vmax.f32 %v1829_v32, 0.0 }
 0x3cf   :  { %7331 = vmatprep.mubr.f32.mxu1 %v1907_v6 }
 0x3d0   :  { %v7232_v38 = vpop.f32.mrf.mxu1  ;;  %7332 = vmatmul.mubr.f32.gmra.mxu1 %v1908_v52 }
 0x3d1   :  { %v1844_v15 = vadd.f32 %v7232_v38, %v9463_v48 }
 0x3d2   :  { %v1838_v12 = vpop.f32.mrf.mxu1 }
 0x3d3   :  { %v1839_v17 = vadd.f32 %v9463_v48, %v1838_v12  ;;  %v1910_v56 = vmax.f32 %v1844_v15, 0.0 }
 0x3d5   :  { %v1909_v3 = vmax.f32 %v1839_v17, 0.0 }
 0x3d7   :  { %7334 = vmatprep.mubr.f32.mxu1 %v1909_v3 }
 0x3d8   :  { %v7235_v28 = vpop.f32.mrf.mxu1  ;;  %7335 = vmatmul.mubr.f32.gmra.mxu1 %v1910_v56 }
 0x3d9   :  { %v1854_v36 = vadd.f32 %v7235_v28, %v9463_v48 }
 0x3da   :  { %v1848_v60 = vpop.f32.mrf.mxu1 }
 0x3db   :  { %v1849_v53 = vadd.f32 %v9463_v48, %v1848_v60  ;;  %v1912_v43 = vmax.f32 %v1854_v36, 0.0 }
 0x3dd   :  { %v1911_v11 = vmax.f32 %v1849_v53, 0.0 }
 0x3df   :  { %7337 = vmatprep.mubr.f32.mxu1 %v1911_v11 }
 0x3e0   :  { %v7238_v26 = vpop.f32.mrf.mxu1  ;;  %7338 = vmatmul.mubr.f32.gmra.mxu1 %v1912_v43 }
 0x3e1   :  { %v1864_v2 = vadd.f32 %v7238_v26, %v9463_v48 }
 0x3e2   :  { %v1858_v1 = vpop.f32.mrf.mxu1 }
 0x3e3   :  { %v1859_v19 = vadd.f32 %v9463_v48, %v1858_v1  ;;  %v1914_v55 = vmax.f32 %v1864_v2, 0.0 }
 0x3e5   :  { %v1913_v44 = vmax.f32 %v1859_v19, 0.0  ;;  %v9563_v19 = vld [vmem:[%s11093_s8] ss:$0 sm:$0xff] }
 0x3e7   :  { %7340 = vmatprep.mubr.f32.mxu1 %v1913_v44 }
 0x3e8   :  { %7341 = vmatmul.mubr.f32.gmra.mxu1 %v1914_v55 }
 0x3e9   :  { %7445 = vmatprep.mubr.msk.f32.mxu1 %vm8467_vm0, %v11679_v20 }
 0x3ec   :  { %7446 = vmatmul.mubr.f32.vlgmr.msra.gmra.mxu1 %v9415_v34 }
 0x3ed   :  { %7480 = vmatprep.mubr.f32.mxu1 %v8996_v5 }
 0x430   :  { %v9532_v0 = vpop.f32.mrf.mxu1 }
 0x432   :  { %v9534_v50 = vpop.f32.mrf.mxu1 }
 0x434   :  { %v9536_v22 = vpop.f32.mrf.mxu1 }
 0x436   :  { %v9538_v42 = vpop.f32.mrf.mxu1 }
 0x438   :  { %v9540_v48 = vpop.f32.mrf.mxu1 }
 0x43a   :  { %v9542_v7 = vpop.f32.mrf.mxu1 }
 0x43c   :  { %v9544_v8 = vpop.f32.mrf.mxu1 }
 0x43e   :  { %v9546_v4 = vpop.f32.mrf.mxu1 }
 0x440   :  { %v7285_v13 = vpop.f32.mrf.mxu1 }
 0x442   :  { %v2044_v34 = vpop.f32.mrf.mxu1 }
 0x444   :  { %v7288_v18 = vpop.f32.mrf.mxu1 }
 0x446   :  { %v2054_v63 = vpop.f32.mrf.mxu1 }
 0x448   :  { %v7291_v32 = vpop.f32.mrf.mxu1 }
 0x449   :  { %v9582_v14 = vadd.f32 %v7291_v32, %v9563_v19 }
 0x44a   :  { %v2064_v6 = vpop.f32.mrf.mxu1 }
 0x44c   :  { %v7294_v52 = vpop.f32.mrf.mxu1 }
 0x44d   :  { %v9566_v44 = vadd.f32 %v7294_v52, %v9563_v19 }
 0x44e   :  { %v2074_v38 = vpop.f32.mrf.mxu1 }
 0x44f   :  { %v9572_v40 = vadd.f32 %v9563_v19, %v2074_v38  ;;  %v11399_v52 = vmax.f32 %v9566_v44, 0.0 }
 0x450   :  { %v9548_v15 = vpop.f32.mrf.mxu1 }
 0x451   :  { %v11401_v21 = vmax.f32 %v9572_v40, 0.0 }
 0x452   :  { %v9550_v12 = vpop.f32.mrf.mxu1 }
 0x454   :  { %v9552_v17 = vpop.f32.mrf.mxu1 }
 0x456   :  { %v9554_v3 = vpop.f32.mrf.mxu1 }
 0x458   :  { %v9556_v56 = vpop.f32.mrf.mxu1 }
 0x45a   :  { %v9558_v28 = vpop.f32.mrf.mxu1 }
 0x45c   :  { %v7306_v36 = vpop.f32.mrf.mxu1 }
 0x45e   :  { %v2114_v60 = vpop.f32.mrf.mxu1 }
 0x460   :  { %v7309_v53 = vpop.f32.mrf.mxu1 }
 0x462   :  { %v2124_v11 = vpop.f32.mrf.mxu1 }
 0x464   :  { %v7312_v43 = vpop.f32.mrf.mxu1 }
 0x466   :  { %v2134_v26 = vpop.f32.mrf.mxu1 }
 0x468   :  { %v7315_v2 = vpop.f32.mrf.mxu1 }
 0x469   :  { %v9575_v46 = vadd.f32 %v7315_v2, %v9563_v19  ;;  %v9592_v2 = vadd.f32 %v9563_v19, %v2064_v6  ;;  %v9610_v6 = vadd.f32 %v9563_v19, %v2134_v26  ;;  %v9628_v26 = vadd.f32 %v7285_v13, %v9563_v19 }
 0x46a   :  { %v2144_v1 = vpop.f32.mrf.mxu1  ;;  %v9646_v13 = vadd.f32 %v7306_v36, %v9563_v19 }
 0x46b   :  { %11681 = vst [vmem:[#allocation219_spill] sm:$0xff] %v9575_v46  ;;  %v11402_v32 = vmax.f32 %v9575_v46, 0.0  ;;  %11685 = vst [vmem:[#allocation223_spill] sm:$0xff] %v9610_v6 }
 0x46c   :  { %v7318_v55 = vpop.f32.mrf.mxu1  ;;  %11688 = vst [vmem:[#allocation226_spill] sm:$0xff] %v9646_v13 }
 0x46d   :  { %v9569_v5 = vadd.f32 %v7318_v55, %v9563_v19  ;;  %v9586_v55 = vadd.f32 %v9563_v19, %v2144_v1  ;;  %v9604_v1 = vadd.f32 %v7288_v18, %v9563_v19  ;;  %v9622_v18 = vadd.f32 %v7309_v53, %v9563_v19 }
 0x46e   :  { %v2154_v57 = vpop.f32.mrf.mxu1  ;;  %v9640_v53 = vadd.f32 %v9563_v19, %v2044_v34  ;;  %v11411_v34 = vmax.f32 %v9628_v26, 0.0 }
 0x46f   :  { %11680 = vst [vmem:[#allocation218_spill] sm:$0xff] %v9569_v5  ;;  %v11398_v58 = vmax.f32 %v9569_v5, 0.0  ;;  %v9579_v54 = vadd.f32 %v9563_v19, %v2154_v57  ;;  %11683 = vst [vmem:[#allocation221_spill] sm:$0xff] %v9586_v55  ;;  %v9598_v57 = vadd.f32 %v7312_v43, %v9563_v19  ;;  %v9616_v43 = vadd.f32 %v9563_v19, %v2054_v63 }
 0x470   :  { %11686 = vst [vmem:[#allocation224_spill] sm:$0xff] %v9622_v18  ;;  %v9634_v63 = vadd.f32 %v9563_v19, %v2124_v11  ;;  %v9653_v11 = vadd.f32 %v9544_v8, %v9563_v19  ;;  %v11414_v8 = vmax.f32 %v9640_v53, 0.0 }
 0x471   :  { %11682 = vst [vmem:[#allocation220_spill] sm:$0xff] %v9579_v54  ;;  %v11400_v38 = vmax.f32 %v9579_v54, 0.0  ;;  %6267 = vmatprep.subr.mxu0 %v11398_v58  ;;  %11684 = vst [vmem:[#allocation222_spill] sm:$0xff] %v9598_v57  ;;  %v11403_v58 = vmax.f32 %v9582_v14, 0.0 }
 0x472   :  { %6268 = vmatpush3.msra.mxu0 %v11399_v52  ;;  %v11404_v52 = vmax.f32 %v9586_v55, 0.0  ;;  %11687 = vst [vmem:[#allocation225_spill] sm:$0xff] %v9634_v63  ;;  %v11412_v36 = vmax.f32 %v9634_v63, 0.0 }
 0x473   :  { %6269 = vmatprep.subr.mxu0 %v11400_v38  ;;  %v11405_v38 = vmax.f32 %v9592_v2, 0.0 }
 0x474   :  { %6270 = vmatpush3.msra.mxu0 %v11401_v21  ;;  %v11406_v21 = vmax.f32 %v9598_v57, 0.0 }
 0x475   :  { %6271 = vmatprep.subr.mxu0 %v11402_v32  ;;  %v11408_v32 = vmax.f32 %v9604_v1, 0.0 }
 0x476   :  { %6272 = vmatpush3.msra.mxu0 %v11403_v58  ;;  %v11407_v58 = vmax.f32 %v9610_v6, 0.0 }
 0x477   :  { %6273 = vmatprep.subr.mxu0 %v11404_v52  ;;  %v11409_v52 = vmax.f32 %v9616_v43, 0.0 }
 0x478   :  { %6274 = vmatpush3.msra.mxu0 %v11405_v38  ;;  %v11410_v38 = vmax.f32 %v9622_v18, 0.0 }
 0x479   :  { %6275 = vmatprep.subr.mxu0 %v11406_v21  ;;  %v9659_v21 = vadd.f32 %v9563_v19, %v2114_v60  ;;  %v9675_v60 = vadd.f32 %v9556_v56, %v9563_v19 }
 0x47a   :  { %6276 = vmatpush3.msra.mxu0 %v11408_v32  ;;  %v9669_v32 = vpop.f32.mrf.mxu1 }
 0x47b   :  { %6277 = vmatprep.subr.mxu0 %v11407_v58  ;;  %11689 = vst [vmem:[#allocation227_spill] sm:$0xff] %v9659_v21  ;;  %v9666_v58 = vadd.f32 %v9563_v19, %v9546_v4  ;;  %11690 = vst [vmem:[#allocation228_spill] sm:$0xff] %v9675_v60  ;;  %v9682_v4 = vadd.f32 %v9540_v48, %v9563_v19  ;;  %v11418_v56 = vmax.f32 %v9659_v21, 0.0 }
 0x47c   :  { %6278 = vmatpush3.msra.mxu0 %v11409_v52  ;;  %v11415_v52 = vmax.f32 %v9646_v13, 0.0  ;;  %v9699_v63 = vpop.f32.mrf.mxu1 }
 0x47d   :  { %6279 = vmatprep.subr.mxu0 %v11410_v38  ;;  %v11417_v38 = vmax.f32 %v9653_v11, 0.0  ;;  %v11693_v13 = vmax.f32 %v9666_v58, 0.0 }
 0x47e   :  { %6280 = vmatpush3.msra.mxu0 %v11411_v34  ;;  %v9689_v34 = vadd.f32 %v9563_v19, %v9558_v28  ;;  %v9705_v28 = vadd.f32 %v9552_v17, %v9563_v19  ;;  %v9715_v48 = vpop.f32.mrf.mxu1  ;;  %v9721_v17 = vadd.f32 %v9563_v19, %v9554_v3 }
 0x47f   :  { %6281 = vmatprep.subr.mxu0 %v11412_v36  ;;  %v9696_v36 = vadd.f32 %v9563_v19, %v9542_v7  ;;  %v9712_v7 = vadd.f32 %v9536_v22, %v9563_v19  ;;  %v9728_v22 = vadd.f32 %v9563_v19, %v9538_v42 }
 0x480   :  { %6282 = vmatpush3.msra.mxu0 %v11414_v8  ;;  %11691 = vst [vmem:[#allocation229_spill] sm:$0xff] %v9689_v34  ;;  %11692 = vst [vmem:[#allocation230_spill] sm:$0xff] %v9705_v28  ;;  %v11419_v8 = vmax.f32 %v9675_v60, 0.0  ;;  %v11425_v3 = vmax.f32 %v9705_v28, 0.0  ;;  %v9745_v60 = vpop.f32.mrf.mxu1 }
 0x481   :  { %6283 = vmatprep.subr.mxu0 %v11415_v52  ;;  %v11421_v52 = vmax.f32 %v9682_v4, 0.0  ;;  %11694 = vst [vmem:[#allocation231_spill] sm:$0xff] %v9721_v17 }
 0x482   :  { %6284 = vmatpush3.msra.mxu0 %v11417_v38  ;;  %v11422_v38 = vmax.f32 %v9689_v34, 0.0  ;;  %v9761_v42 = vpop.f32.mrf.mxu1  ;;  %v11697_v34 = vmax.f32 %v9712_v7, 0.0 }
 0x483   :  { %6285 = vmatprep.subr.mxu0 %v11418_v56  ;;  %v11424_v56 = vmax.f32 %v9696_v36, 0.0 }
 0x484   :  { %6286 = vmatpush3.msra.mxu0 %v11693_v13  ;;  %v9735_v13 = vadd.f32 %v9548_v15, %v9563_v19  ;;  %v9751_v15 = vadd.f32 %v9563_v19, %v9550_v12  ;;  %v9775_v28 = vpop.f32.mrf.mxu1 }
 0x485   :  { %6287 = vmatprep.subr.mxu0 %v11419_v8  ;;  %v9742_v8 = vadd.f32 %v9532_v0, %v9563_v19  ;;  %v9758_v0 = vadd.f32 %v9563_v19, %v9534_v50 }
 0x486   :  { %6288 = vmatpush3.msra.mxu0 %v11421_v52  ;;  %11695 = vst [vmem:[#allocation232_spill] sm:$0xff] %v9735_v13  ;;  %11696 = vst [vmem:[#allocation233_spill] sm:$0xff] %v9751_v15  ;;  %v11428_v52 = vmax.f32 %v9721_v17, 0.0  ;;  %v11435_v50 = vmax.f32 %v9751_v15, 0.0 }
 0x487   :  { %6289 = vmatprep.subr.mxu0 %v11422_v38  ;;  %v11429_v38 = vmax.f32 %v9728_v22, 0.0  ;;  %v11432_v12 = vmax.f32 %v9742_v8, 0.0 }
 0x488   :  { %6290 = vmatpush3.msra.mxu0 %v11424_v56  ;;  %v11427_v56 = vmax.f32 %v9735_v13, 0.0 }
 0x489   :  { %6291 = vmatprep.subr.mxu0 %v11425_v3  ;;  %v11437_v3 = vmax.f32 %v9758_v0, 0.0 }
 0x48a   :  { %6292 = vmatpush3.msra.mxu0 %v11697_v34  ;;  %v7330_v34 = vpop.f32.mrf.mxu1 }
 0x48b   :  { %6293 = vmatprep.subr.mxu0 %v11428_v52 }
 0x48c   :  { %6294 = vmatpush3.msra.mxu0 %v11429_v38 }
 0x48d   :  { %6295 = vmatprep.subr.mxu0 %v11427_v56  ;;  %v2194_v56 = vpop.f32.mrf.mxu1 }
 0x48e   :  { %6296 = vmatpush3.msra.mxu0 %v11432_v12 }
 0x48f   :  { %6297 = vmatprep.subr.mxu0 %v11435_v50 }
 0x490   :  { %6298 = vmatpush3.msra.mxu0 %v11437_v3  ;;  %v7333_v52 = vpop.f32.mrf.mxu1 }
 0x491   :  { %7343 = vmatprep.subr.mxu0 %v11679_v20  ;;  %2356 = vmatmul.mubr.f32.vlgmr.msra.gmra.mxu0 %v8842_v24 }
 0x492   :  { %7375 = vmatprep.mubr.msk.f32.mxu0 %vm8467_vm0, %v11679_v20  ;;  %v2204_v38 = vpop.f32.mrf.mxu1 }
 0x498   :  { %v7336_v13 = vpop.f32.mrf.mxu1 }
 0x499   :  { %v2220_v5 = vadd.f32 %v7336_v13, %v9563_v19  ;;  %v2185_v13 = vadd.f32 %v9563_v19, %v9775_v28  ;;  %v2170_v28 = vadd.f32 %v9669_v32, %v9563_v19 }
 0x49a   :  { %v2214_v17 = vpop.f32.mrf.mxu1 }
 0x4a0   :  { %v7339_v12 = vpop.f32.mrf.mxu1 }
 0x4a1   :  { %v2230_v3 = vadd.f32 %v7339_v12, %v9563_v19 }
 0x4a2   :  { %v2224_v21 = vpop.f32.mrf.mxu1 }
 0x4a3   :  { %v2225_v55 = vadd.f32 %v9563_v19, %v2224_v21  ;;  %v2210_v21 = vadd.f32 %v7333_v52, %v9563_v19 }
 0x4a5   :  { %v2287_v12 = vmax.f32 %v2225_v55, 0.0  ;;  %v2284_v55 = vmax.f32 %v2210_v21, 0.0  ;;  %v2444_v21 = vld [vmem:[#allocation13 + $0xe0] sm:$0xff] }
 0x4a8   :  { %v7342_v15 = vpop.f32.mrf.mxu1 }
 0x4a9   :  { %v2240_v50 = vadd.f32 %v7342_v15, %v9563_v19  ;;  %v2288_v15 = vmax.f32 %v2230_v3, 0.0 }
 0x4aa   :  { %v2234_v18 = vpop.f32.mrf.mxu1 }
 0x4ab   :  { %v2290_v6 = vmax.f32 %v2240_v50, 0.0  ;;  %v2235_v57 = vadd.f32 %v9563_v19, %v2234_v18  ;;  %v2215_v18 = vadd.f32 %v9563_v19, %v2214_v17 }
 0x4ac   :  { %v9790_v24 = vpop.f32.mrf.mxu1 }
 0x4ad   :  { %11698 = vst [vmem:[#allocation234_spill] sm:$0xff] %v9790_v24  ;;  %v2289_v46 = vmax.f32 %v2235_v57, 0.0  ;;  %7344 = vmatpush3.msra.mxu0 %v2290_v6  ;;  %7448 = vmatprep.subr.mxu1 %v2290_v6  ;;  %v2205_v57 = vadd.f32 %v9563_v19, %v2204_v38  ;;  %v2190_v38 = vadd.f32 %v9761_v42, %v9563_v19  ;;  %v11724_v24 = vld [vmem:[#allocation199_spill] sm:$0xff] }
 0x4ae   :  { %7345 = vmatprep.subr.mxu0 %v11679_v20  ;;  %v7447_v54 = vpop.f32.mrf.mxu1  ;;  %7449 = vmatpush3.msra.mxu1 %v2290_v6  ;;  %v2285_v6 = vmax.f32 %v2215_v18, 0.0  ;;  %v2175_v42 = vadd.f32 %v9563_v19, %v9745_v60  ;;  %v2276_v60 = vmax.f32 %v2170_v28, 0.0  ;;  %v11703_v28 = vld [vmem:[#allocation157_spill] sm:$0xff] }
 0x4af   :  { %7346 = vmatpush3.msra.mxu0 %v2289_v46  ;;  %7450 = vmatprep.subr.mxu1 %v2289_v46  ;;  %v2286_v54 = vmax.f32 %v2220_v5, 0.0  ;;  %v2195_v5 = vadd.f32 %v9563_v19, %v2194_v56  ;;  %v2283_v52 = vmax.f32 %v2205_v57, 0.0  ;;  %v2180_v56 = vadd.f32 %v9715_v48, %v9563_v19  ;;  %v2442_v57 = vld [vmem:[#allocation13 + $0xd0] sm:$0xff] }
 0x4b0   :  { %7347 = vmatprep.subr.mxu0 %v11679_v20  ;;  %7451 = vmatpush3.msra.mxu1 %v2289_v46  ;;  %v2200_v46 = vadd.f32 %v7330_v34, %v9563_v19  ;;  %v2280_v50 = vmax.f32 %v2190_v38, 0.0  ;;  %v2279_v34 = vmax.f32 %v2185_v13, 0.0  ;;  %v2165_v48 = vadd.f32 %v9563_v19, %v9699_v63  ;;  %v2447_v19 = vld [vmem:[#allocation13 + $0xf8] sm:$0xff]  ;;  %v2446_v63 = vld [vmem:[#allocation13 + $0xf0] sm:$0xff]  ;;  %v2436_v38 = vld [vmem:[#allocation13 + $0xa0] sm:$0xff] }
 0x4b1   :  { %7348 = vmatpush3.msra.mxu0 %v2288_v15  ;;  %7452 = vmatprep.subr.mxu1 %v2288_v15  ;;  %v2281_v3 = vmax.f32 %v2195_v5, 0.0  ;;  %v2277_v18 = vmax.f32 %v2175_v42, 0.0  ;;  %v2438_v5 = vld [vmem:[#allocation13 + $0xb0] sm:$0xff]  ;;  %v11701_v42 = vld [vmem:[#allocation153_spill] sm:$0xff] }
 0x4b2   :  { %7349 = vmatprep.subr.mxu0 %v11679_v20  ;;  %7453 = vmatpush3.msra.mxu1 %v2288_v15  ;;  %v2282_v17 = vmax.f32 %v2200_v46, 0.0  ;;  %v2278_v15 = vmax.f32 %v2180_v56, 0.0  ;;  %v2275_v32 = vmax.f32 %v2165_v48, 0.0  ;;  %v2440_v46 = vld [vmem:[#allocation13 + $0xc0] sm:$0xff]  ;;  %v2434_v13 = vld [vmem:[#allocation13 + $0x90] sm:$0xff]  ;;  %v11699_v56 = vld [vmem:[#allocation149_spill] sm:$0xff] }
 0x4b3   :  { %7350 = vmatpush3.msra.mxu0 %v2287_v12  ;;  %7454 = vmatprep.subr.mxu1 %v2287_v12  ;;  %v11705_v48 = vld [vmem:[#allocation161_spill] sm:$0xff] }
 0x4b4   :  { %7351 = vmatprep.subr.mxu0 %v11679_v20  ;;  %7455 = vmatpush3.msra.mxu1 %v2287_v12  ;;  %v2445_v12 = vld [vmem:[#allocation13 + $0xe8] sm:$0xff] }
 0x4b5   :  { %7352 = vmatpush3.msra.mxu0 %v2286_v54  ;;  %7456 = vmatprep.subr.mxu1 %v2286_v54 }
 0x4b6   :  { %7353 = vmatprep.subr.mxu0 %v11679_v20  ;;  %7457 = vmatpush3.msra.mxu1 %v2286_v54  ;;  %v2443_v54 = vld [vmem:[#allocation13 + $0xd8] sm:$0xff] }
 0x4b7   :  { %7354 = vmatpush3.msra.mxu0 %v2285_v6  ;;  %7458 = vmatprep.subr.mxu1 %v2285_v6 }
 0x4b8   :  { %7355 = vmatprep.subr.mxu0 %v11679_v20  ;;  %7459 = vmatpush3.msra.mxu1 %v2285_v6  ;;  %v2441_v6 = vld [vmem:[#allocation13 + $0xc8] sm:$0xff] }
 0x4b9   :  { %7356 = vmatpush3.msra.mxu0 %v2284_v55  ;;  %7460 = vmatprep.subr.mxu1 %v2284_v55 }
 0x4ba   :  { %7357 = vmatprep.subr.mxu0 %v11679_v20  ;;  %7461 = vmatpush3.msra.mxu1 %v2284_v55  ;;  %v2439_v55 = vld [vmem:[#allocation13 + $0xb8] sm:$0xff] }
 0x4bb   :  { %7358 = vmatpush3.msra.mxu0 %v2283_v52  ;;  %7462 = vmatprep.subr.mxu1 %v2283_v52 }
 0x4bc   :  { %7359 = vmatprep.subr.mxu0 %v11679_v20  ;;  %7463 = vmatpush3.msra.mxu1 %v2283_v52  ;;  %v2437_v52 = vld [vmem:[#allocation13 + $0xa8] sm:$0xff] }
 0x4bd   :  { %7360 = vmatpush3.msra.mxu0 %v2282_v17  ;;  %7464 = vmatprep.subr.mxu1 %v2282_v17 }
 0x4be   :  { %7361 = vmatprep.subr.mxu0 %v11679_v20  ;;  %7465 = vmatpush3.msra.mxu1 %v2282_v17  ;;  %v2435_v17 = vld [vmem:[#allocation13 + $0x98] sm:$0xff] }
 0x4bf   :  { %7362 = vmatpush3.msra.mxu0 %v2281_v3  ;;  %7466 = vmatprep.subr.mxu1 %v2281_v3 }
 0x4c0   :  { %7363 = vmatprep.subr.mxu0 %v11679_v20  ;;  %7467 = vmatpush3.msra.mxu1 %v2281_v3  ;;  %v2433_v3 = vld [vmem:[#allocation13 + $0x88] sm:$0xff] }
 0x4c1   :  { %7364 = vmatpush3.msra.mxu0 %v2280_v50  ;;  %7468 = vmatprep.subr.mxu1 %v2280_v50 }
 0x4c2   :  { %7365 = vmatprep.subr.mxu0 %v11679_v20  ;;  %7469 = vmatpush3.msra.mxu1 %v2280_v50  ;;  %v11700_v50 = vld [vmem:[#allocation151_spill] sm:$0xff] }
 0x4c3   :  { %7366 = vmatpush3.msra.mxu0 %v2279_v34  ;;  %7470 = vmatprep.subr.mxu1 %v2279_v34 }
 0x4c4   :  { %7367 = vmatprep.subr.mxu0 %v11679_v20  ;;  %7471 = vmatpush3.msra.mxu1 %v2279_v34  ;;  %v11702_v34 = vld [vmem:[#allocation155_spill] sm:$0xff] }
 0x4c5   :  { %7368 = vmatpush3.msra.mxu0 %v2278_v15  ;;  %7472 = vmatprep.subr.mxu1 %v2278_v15 }
 0x4c6   :  { %7369 = vmatprep.subr.mxu0 %v11679_v20  ;;  %7473 = vmatpush3.msra.mxu1 %v2278_v15  ;;  %v11704_v15 = vld [vmem:[#allocation159_spill] sm:$0xff] }
 0x4c7   :  { %7370 = vmatpush3.msra.mxu0 %v2277_v18  ;;  %7474 = vmatprep.subr.mxu1 %v2277_v18 }
 0x4c8   :  { %7371 = vmatprep.subr.mxu0 %v11679_v20  ;;  %7475 = vmatpush3.msra.mxu1 %v2277_v18  ;;  %v11706_v18 = vld [vmem:[#allocation163_spill] sm:$0xff] }
 0x4c9   :  { %7372 = vmatpush3.msra.mxu0 %v2276_v60  ;;  %7476 = vmatprep.subr.mxu1 %v2276_v60 }
 0x4ca   :  { %7373 = vmatprep.subr.mxu0 %v11679_v20  ;;  %7477 = vmatpush3.msra.mxu1 %v2276_v60  ;;  %v11707_v60 = vld [vmem:[#allocation165_spill] sm:$0xff] }
 0x4cb   :  { %7374 = vmatpush3.msra.mxu0 %v2275_v32  ;;  %7478 = vmatprep.subr.mxu1 %v2275_v32 }
 0x4cc   :  { %7376 = vmatmul.mubr.f32.vlgmr.msra.gmra.mxu0 %v8985_v62  ;;  %7479 = vmatpush3.msra.mxu1 %v2275_v32  ;;  %v11708_v32 = vld [vmem:[#allocation167_spill] sm:$0xff] }
 0x4cd   :  { %7378 = vmatprep.subr.mxu0 %v11679_v20  ;;  %7410 = vmatprep.mubr.msk.f32.mxu0 %vm8467_vm0, %v11679_v20 }
 0x4ce   :  { %7481 = vmatmul.mubr.f32.vlgmr.msra.gmra.mxu1 %v9077_v30  ;;  %7379 = vmatpush3.msra.mxu0 %v2447_v19  ;;  %v11709_v19 = vld [vmem:[#allocation169_spill] sm:$0xff]  ;;  %v11835_v30 = vld [vmem:[#allocation164_spill] sm:$0xff] }
 0x4cf   :  { %7483 = vmatprep.mubr.f32.mxu1 %v9082_v10  ;;  %7380 = vmatprep.subr.mxu0 %v11679_v20  ;;  %v11834_v10 = vld [vmem:[#allocation162_spill] sm:$0xff] }
 0x4d0   :  { %7381 = vmatpush3.msra.mxu0 %v2446_v63  ;;  %v11710_v63 = vld [vmem:[#allocation171_spill] sm:$0xff] }
 0x4d1   :  { %7382 = vmatprep.subr.mxu0 %v11679_v20 }
 0x4d2   :  { %7484 = vmatmul.mubr.f32.gmra.mxu1 %v9091_v61  ;;  %7383 = vmatpush3.msra.mxu0 %v2445_v12  ;;  %v2432_v12 = vld [vmem:[#allocation13 + $0x80] sm:$0xff]  ;;  %v11833_v61 = vld [vmem:[#allocation160_spill] sm:$0xff] }
 0x4d3   :  { %7486 = vmatprep.mubr.f32.mxu1 %v9096_v9  ;;  %7384 = vmatprep.subr.mxu0 %v11679_v20  ;;  %v11832_v9 = vld [vmem:[#allocation158_spill] sm:$0xff] }
 0x4d4   :  { %7385 = vmatpush3.msra.mxu0 %v2444_v21  ;;  %v11711_v21 = vld [vmem:[#allocation173_spill] sm:$0xff] }
 0x4d5   :  { %7386 = vmatprep.subr.mxu0 %v11679_v20 }
 0x4d6   :  { %7487 = vmatmul.mubr.f32.gmra.mxu1 %v9103_v16  ;;  %7387 = vmatpush3.msra.mxu0 %v2443_v54  ;;  %v11712_v54 = vld [vmem:[#allocation175_spill] sm:$0xff]  ;;  %v11831_v16 = vld [vmem:[#allocation156_spill] sm:$0xff] }
 0x4d7   :  { %7489 = vmatprep.mubr.f32.mxu1 %v9108_v59  ;;  %7388 = vmatprep.subr.mxu0 %v11679_v20  ;;  %v11830_v59 = vld [vmem:[#allocation154_spill] sm:$0xff] }
 0x4d8   :  { %7389 = vmatpush3.msra.mxu0 %v2442_v57  ;;  %v11713_v57 = vld [vmem:[#allocation178_spill] sm:$0xff] }
 0x4d9   :  { %7390 = vmatprep.subr.mxu0 %v11679_v20 }
 0x4da   :  { %7490 = vmatmul.mubr.f32.gmra.mxu1 %v9115_v51  ;;  %7391 = vmatpush3.msra.mxu0 %v2441_v6  ;;  %v11714_v6 = vld [vmem:[#allocation179_spill] sm:$0xff]  ;;  %v11829_v51 = vld [vmem:[#allocation152_spill] sm:$0xff] }
 0x4db   :  { %7492 = vmatprep.mubr.f32.mxu1 %v9120_v35  ;;  %7392 = vmatprep.subr.mxu0 %v11679_v20  ;;  %v11828_v35 = vld [vmem:[#allocation150_spill] sm:$0xff] }
 0x4dc   :  { %7393 = vmatpush3.msra.mxu0 %v2440_v46  ;;  %v11715_v46 = vld [vmem:[#allocation182_spill] sm:$0xff] }
 0x4dd   :  { %7394 = vmatprep.subr.mxu0 %v11679_v20 }
 0x4de   :  { %7493 = vmatmul.mubr.f32.gmra.mxu1 %v9127_v47  ;;  %7395 = vmatpush3.msra.mxu0 %v2439_v55  ;;  %v11716_v55 = vld [vmem:[#allocation183_spill] sm:$0xff]  ;;  %v11827_v47 = vld [vmem:[#allocation148_spill] sm:$0xff] }
 0x4df   :  { %7495 = vmatprep.mubr.f32.mxu1 %v9132_v27  ;;  %7396 = vmatprep.subr.mxu0 %v11679_v20  ;;  %v11826_v27 = vld [vmem:[#allocation146_spill] sm:$0xff] }
 0x4e0   :  { %7397 = vmatpush3.msra.mxu0 %v2438_v5  ;;  %v11717_v5 = vld [vmem:[#allocation186_spill] sm:$0xff] }
 0x4e1   :  { %7398 = vmatprep.subr.mxu0 %v11679_v20 }
 0x4e2   :  { %7496 = vmatmul.mubr.f32.gmra.mxu1 %v9139_v41  ;;  %7399 = vmatpush3.msra.mxu0 %v2437_v52  ;;  %v11718_v52 = vld [vmem:[#allocation187_spill] sm:$0xff]  ;;  %v11825_v41 = vld [vmem:[#allocation144_spill] sm:$0xff] }
 0x4e3   :  { %7498 = vmatprep.mubr.f32.mxu1 %v9144_v49  ;;  %7400 = vmatprep.subr.mxu0 %v11679_v20  ;;  %v11824_v49 = vld [vmem:[#allocation142_spill] sm:$0xff] }
 0x4e4   :  { %7401 = vmatpush3.msra.mxu0 %v2436_v38  ;;  %v11719_v38 = vld [vmem:[#allocation190_spill] sm:$0xff] }
 0x4e5   :  { %7402 = vmatprep.subr.mxu0 %v11679_v20 }
 0x4e6   :  { %7499 = vmatmul.mubr.f32.gmra.mxu1 %v9151_v33  ;;  %7403 = vmatpush3.msra.mxu0 %v2435_v17  ;;  %v11720_v17 = vld [vmem:[#allocation191_spill] sm:$0xff]  ;;  %v11823_v33 = vld [vmem:[#allocation140_spill] sm:$0xff] }
 0x4e7   :  { %7501 = vmatprep.mubr.f32.mxu1 %v9156_v45  ;;  %7404 = vmatprep.subr.mxu0 %v11679_v20  ;;  %v11822_v45 = vld [vmem:[#allocation138_spill] sm:$0xff] }
 0x4e8   :  { %7405 = vmatpush3.msra.mxu0 %v2434_v13  ;;  %v11721_v13 = vld [vmem:[#allocation194_spill] sm:$0xff] }
 0x4e9   :  { %7406 = vmatprep.subr.mxu0 %v11679_v20 }
 0x4ea   :  { %7502 = vmatmul.mubr.f32.gmra.mxu1 %v9163_v23  ;;  %7407 = vmatpush3.msra.mxu0 %v2433_v3  ;;  %v11722_v3 = vld [vmem:[#allocation195_spill] sm:$0xff]  ;;  %v11820_v23 = vld [vmem:[#allocation134_spill] sm:$0xff] }
 0x4eb   :  { %7504 = vmatprep.mubr.f32.mxu1 %v9168_v39  ;;  %7408 = vmatprep.subr.mxu0 %v11679_v20  ;;  %v11819_v39 = vld [vmem:[#allocation132_spill] sm:$0xff] }
 0x4ec   :  { %7409 = vmatpush3.msra.mxu0 %v2432_v12  ;;  %v11723_v12 = vld [vmem:[#allocation198_spill] sm:$0xff] }
 0x4ed   :  { %2588 = vmatprep.subr.mxu0 %v11679_v20 }
 0x4ee   :  { %7505 = vmatmul.mubr.f32.gmra.mxu1 %v9175_v37  ;;  %v11817_v37 = vld [vmem:[#allocation128_spill] sm:$0xff] }
 0x4ef   :  { %7507 = vmatprep.mubr.f32.mxu1 %v9180_v31  ;;  %v11815_v31 = vld [vmem:[#allocation124_spill] sm:$0xff] }
 0x4f2   :  { %7508 = vmatmul.mubr.f32.gmra.mxu1 %v9187_v29  ;;  %v11814_v29 = vld [vmem:[#allocation122_spill] sm:$0xff] }
 0x4f3   :  { %7510 = vmatprep.mubr.f32.mxu1 %v9192_v25  ;;  %v11812_v25 = vld [vmem:[#allocation118_spill] sm:$0xff] }
 0x4f6   :  { %7511 = vmatmul.mubr.f32.gmra.mxu1 %v11699_v56  ;;  %v11810_v56 = vld [vmem:[#allocation114_spill] sm:$0xff] }
 0x4f7   :  { %7513 = vmatprep.mubr.f32.mxu1 %v11700_v50  ;;  %v11809_v50 = vld [vmem:[#allocation112_spill] sm:$0xff] }
 0x4fa   :  { %7514 = vmatmul.mubr.f32.gmra.mxu1 %v11701_v42  ;;  %v11808_v42 = vld [vmem:[#allocation110_spill] sm:$0xff] }
 0x4fb   :  { %7516 = vmatprep.mubr.f32.mxu1 %v11702_v34  ;;  %v11806_v34 = vld [vmem:[#allocation107_spill] sm:$0xff] }
 0x4fe   :  { %7517 = vmatmul.mubr.f32.gmra.mxu1 %v11703_v28  ;;  %v3202_v28 = vld [vmem:[#allocation10 + $0x98] sm:$0xff] }
 0x4ff   :  { %7519 = vmatprep.mubr.f32.mxu1 %v11704_v15  ;;  %v3204_v15 = vld [vmem:[#allocation10 + $0xa8] sm:$0xff] }
 0x502   :  { %7520 = vmatmul.mubr.f32.gmra.mxu1 %v11705_v48  ;;  %v11804_v48 = vld [vmem:[#allocation105_spill] sm:$0xff] }
 0x503   :  { %7522 = vmatprep.mubr.f32.mxu1 %v11706_v18  ;;  %v3206_v18 = vld [vmem:[#allocation10 + $0xb8] sm:$0xff] }
 0x506   :  { %7523 = vmatmul.mubr.f32.gmra.mxu1 %v11707_v60  ;;  %v11802_v60 = vld [vmem:[#allocation103_spill] sm:$0xff] }
 0x507   :  { %7525 = vmatprep.mubr.f32.mxu1 %v11708_v32  ;;  %v3208_v32 = vld [vmem:[#allocation10 + $0xc8] sm:$0xff] }
 0x50a   :  { %7526 = vmatmul.mubr.f32.gmra.mxu1 %v11709_v19  ;;  %v11800_v19 = vld [vmem:[#allocation101_spill] sm:$0xff] }
 0x50b   :  { %7528 = vmatprep.mubr.f32.mxu1 %v11710_v63  ;;  %v3209_v63 = vld [vmem:[#allocation10 + $0xd0] sm:$0xff] }
 0x50e   :  { %7529 = vmatmul.mubr.f32.gmra.mxu1 %v11711_v21  ;;  %v3210_v21 = vld [vmem:[#allocation10 + $0xd8] sm:$0xff] }
 0x50f   :  { %7531 = vmatprep.mubr.f32.mxu1 %v11712_v54 }
 0x512   :  { %7532 = vmatmul.mubr.f32.gmra.mxu1 %v11713_v57 }
 0x513   :  { %7534 = vmatprep.mubr.f32.mxu1 %v11714_v6  ;;  %v11725_v6 = vld [vmem:[#allocation202_spill] sm:$0xff] }
 0x516   :  { %7535 = vmatmul.mubr.f32.gmra.mxu1 %v11715_v46 }
 0x517   :  { %7537 = vmatprep.mubr.f32.mxu1 %v11716_v55 }
 0x51a   :  { %7538 = vmatmul.mubr.f32.gmra.mxu1 %v11717_v5 }
 0x51b   :  { %7540 = vmatprep.mubr.f32.mxu1 %v11718_v52 }
 0x51e   :  { %7541 = vmatmul.mubr.f32.gmra.mxu1 %v11719_v38  ;;  %v11726_v38 = vmax.f32 %v9566_v44, 0.0  ;;  %v11731_v44 = vmax.f32 %v9604_v1, 0.0  ;;  %v11735_v1 = vmax.f32 %v9653_v11, 0.0  ;;  %v11739_v11 = vmax.f32 %v9712_v7, 0.0 }
 0x51f   :  { %7543 = vmatprep.mubr.f32.mxu1 %v11720_v17  ;;  %v11727_v17 = vld [vmem:[#allocation23_spill] sm:$0xff] }
 0x522   :  { %7544 = vmatmul.mubr.f32.gmra.mxu1 %v11721_v13  ;;  %v11798_v13 = vld [vmem:[#allocation99_spill] sm:$0xff] }
 0x523   :  { %7546 = vmatprep.mubr.f32.mxu1 %v11722_v3  ;;  %v3211_v3 = vld [vmem:[#allocation10 + $0xe0] sm:$0xff] }
 0x526   :  { %7547 = vmatmul.mubr.f32.gmra.mxu1 %v11723_v12  ;;  %v11728_v12 = vmax.f32 %v9572_v40, 0.0  ;;  %v11732_v40 = vmax.f32 %v9616_v43, 0.0  ;;  %v11736_v43 = vmax.f32 %v9666_v58, 0.0  ;;  %v11740_v58 = vmax.f32 %v9728_v22, 0.0 }
 0x527   :  { %7549 = vmatprep.mubr.f32.mxu1 %v11724_v24  ;;  %v11797_v24 = vld [vmem:[#allocation98_spill] sm:$0xff] }
 0x52a   :  { %7550 = vmatmul.mubr.f32.gmra.mxu1 %v11725_v6  ;;  %v11729_v6 = vmax.f32 %v9582_v14, 0.0  ;;  %v11733_v14 = vmax.f32 %v9628_v26, 0.0  ;;  %v11737_v26 = vmax.f32 %v9682_v4, 0.0  ;;  %v11741_v4 = vmax.f32 %v9742_v8, 0.0 }
 0x551   :  { %v6299_v46 = vpop.f32.mrf.mxu0 }
 0x553   :  { %v6300_v55 = vpop.f32.mrf.mxu0 }
 0x554   :  { %v6301_v57 = vadd.f32 %v6300_v55, %v6299_v46  ;;  %v11747_v46 = vld [vmem:[#allocation219_spill] sm:$0xff]  ;;  %v11749_v55 = vld [vmem:[#allocation221_spill] sm:$0xff] }
 0x555   :  { %v11748_v8 = vmax.f32 %v11747_v46, 0.0 }
 0x58c   :  { %v2427_v5 = vpop.f32.mrf.mxu0 }
 0x58d   :  { %v2428_v54 = vadd.f32 %v6301_v57, %v2427_v5  ;;  %v11730_v57 = vmax.f32 %v9592_v2, 0.0  ;;  %v11734_v2 = vmax.f32 %v9640_v53, 0.0  ;;  %v11738_v53 = vmax.f32 %v9696_v36, 0.0  ;;  %v11751_v5 = vld [vmem:[#allocation222_spill] sm:$0xff] }
 0x58e   :  { %v7377_v52 = vpop.f32.mrf.mxu0  ;;  %v11742_v36 = vmax.f32 %v9758_v0, 0.0  ;;  %v11750_v0 = vmax.f32 %v11749_v55, 0.0 }
 0x58f   :  { %7411 = vmatmul.mubr.f32.vlgmr.msra.gmra.mxu0 %v2428_v54  ;;  %v11743_v54 = vld [vmem:[#allocation218_spill] sm:$0xff]  ;;  %v11752_v52 = vmax.f32 %v11751_v5, 0.0  ;;  %v11776_v5 = vld [vmem:[#allocation59_spill] sm:$0xff] }
 0x590   :  { %2589 = vmatpush1.msra.mxu0 %v11726_v38  ;;  %2652 = vmatprep.mubr.f32.mxu0 %v11727_v17  ;;  %v11744_v7 = vmax.f32 %v11743_v54, 0.0  ;;  %v11753_v38 = vld [vmem:[#allocation223_spill] sm:$0xff] }
 0x591   :  { %2590 = vmatprep.subr.mxu0 %v11679_v20 }
 0x592   :  { %2591 = vmatpush1.msra.mxu0 %v11728_v12  ;;  %v11754_v12 = vmax.f32 %v11753_v38, 0.0  ;;  %v11778_v38 = vld [vmem:[#allocation63_spill] sm:$0xff] }
 0x593   :  { %2592 = vmatprep.subr.mxu0 %v11679_v20 }
 0x594   :  { %2593 = vmatpush1.msra.mxu0 %v11729_v6  ;;  %v11745_v6 = vld [vmem:[#allocation220_spill] sm:$0xff] }
 0x595   :  { %2594 = vmatprep.subr.mxu0 %v11679_v20  ;;  %v11746_v22 = vmax.f32 %v11745_v6, 0.0 }
 0x596   :  { %2595 = vmatpush1.msra.mxu0 %v11730_v57  ;;  %v11755_v57 = vld [vmem:[#allocation224_spill] sm:$0xff] }
 0x597   :  { %2596 = vmatprep.subr.mxu0 %v11679_v20 }
 0x598   :  { %2597 = vmatpush1.msra.mxu0 %v11731_v44  ;;  %v11756_v44 = vmax.f32 %v11755_v57, 0.0  ;;  %v11780_v57 = vld [vmem:[#allocation67_spill] sm:$0xff] }
 0x599   :  { %2598 = vmatprep.subr.mxu0 %v11679_v20 }
 0x59a   :  { %2599 = vmatpush1.msra.mxu0 %v11732_v40  ;;  %v11757_v40 = vld [vmem:[#allocation225_spill] sm:$0xff] }
 0x59b   :  { %2600 = vmatprep.subr.mxu0 %v11679_v20 }
 0x59c   :  { %2601 = vmatpush1.msra.mxu0 %v11733_v14  ;;  %v11758_v14 = vmax.f32 %v11757_v40, 0.0  ;;  %v11782_v40 = vld [vmem:[#allocation71_spill] sm:$0xff] }
 0x59d   :  { %2602 = vmatprep.subr.mxu0 %v11679_v20 }
 0x59e   :  { %2603 = vmatpush1.msra.mxu0 %v11734_v2  ;;  %v11759_v2 = vld [vmem:[#allocation226_spill] sm:$0xff] }
 0x59f   :  { %2604 = vmatprep.subr.mxu0 %v11679_v20 }
 0x5a0   :  { %2605 = vmatpush1.msra.mxu0 %v11735_v1  ;;  %v11760_v1 = vmax.f32 %v11759_v2, 0.0  ;;  %v11784_v2 = vld [vmem:[#allocation75_spill] sm:$0xff] }
 0x5a1   :  { %2606 = vmatprep.subr.mxu0 %v11679_v20 }
 0x5a2   :  { %2607 = vmatpush1.msra.mxu0 %v11736_v43  ;;  %v11761_v43 = vld [vmem:[#allocation227_spill] sm:$0xff] }
 0x5a3   :  { %2608 = vmatprep.subr.mxu0 %v11679_v20 }
 0x5a4   :  { %2609 = vmatpush1.msra.mxu0 %v11737_v26  ;;  %v11762_v26 = vmax.f32 %v11761_v43, 0.0  ;;  %v11786_v43 = vld [vmem:[#allocation78_spill] sm:$0xff] }
 0x5a5   :  { %2610 = vmatprep.subr.mxu0 %v11679_v20 }
 0x5a6   :  { %2611 = vmatpush1.msra.mxu0 %v11738_v53  ;;  %v11763_v53 = vld [vmem:[#allocation228_spill] sm:$0xff] }
 0x5a7   :  { %2612 = vmatprep.subr.mxu0 %v11679_v20 }
 0x5a8   :  { %2613 = vmatpush1.msra.mxu0 %v11739_v11  ;;  %v11764_v11 = vmax.f32 %v11763_v53, 0.0  ;;  %v11788_v53 = vld [vmem:[#allocation82_spill] sm:$0xff] }
 0x5a9   :  { %2614 = vmatprep.subr.mxu0 %v11679_v20 }
 0x5aa   :  { %2615 = vmatpush1.msra.mxu0 %v11740_v58  ;;  %v11765_v58 = vld [vmem:[#allocation229_spill] sm:$0xff] }
 0x5ab   :  { %2616 = vmatprep.subr.mxu0 %v11679_v20 }
 0x5ac   :  { %2617 = vmatpush1.msra.mxu0 %v11741_v4  ;;  %v11766_v4 = vmax.f32 %v11765_v58, 0.0  ;;  %v11790_v58 = vld [vmem:[#allocation86_spill] sm:$0xff] }
 0x5ad   :  { %2618 = vmatprep.subr.mxu0 %v11679_v20 }
 0x5ae   :  { %2619 = vmatpush1.msra.mxu0 %v11742_v36  ;;  %v11767_v36 = vld [vmem:[#allocation230_spill] sm:$0xff] }
 0x5af   :  { %2620 = vmatprep.subr.mxu0 %v11679_v20  ;;  %v11768_v54 = vmax.f32 %v11767_v36, 0.0  ;;  %v11792_v36 = vld [vmem:[#allocation92_spill] sm:$0xff] }
 0x5b0   :  { %2621 = vmatpush2.msra.mxu0 %v11744_v7  ;;  %v11769_v7 = vld [vmem:[#allocation231_spill] sm:$0xff] }
 0x5b1   :  { %2622 = vmatprep.subr.mxu0 %v11679_v20  ;;  %v11770_v6 = vmax.f32 %v11769_v7, 0.0  ;;  %v11794_v7 = vld [vmem:[#allocation95_spill] sm:$0xff] }
 0x5b2   :  { %2623 = vmatpush2.msra.mxu0 %v11746_v22  ;;  %v11771_v22 = vld [vmem:[#allocation232_spill] sm:$0xff] }
 0x5b3   :  { %2624 = vmatprep.subr.mxu0 %v11679_v20  ;;  %v11772_v46 = vmax.f32 %v11771_v22, 0.0  ;;  %v11795_v22 = vld [vmem:[#allocation96_spill] sm:$0xff] }
 0x5b4   :  { %2625 = vmatpush2.msra.mxu0 %v11748_v8  ;;  %v11773_v8 = vld [vmem:[#allocation233_spill] sm:$0xff] }
 0x5b5   :  { %2626 = vmatprep.subr.mxu0 %v11679_v20  ;;  %v11774_v55 = vmax.f32 %v11773_v8, 0.0  ;;  %v11796_v8 = vld [vmem:[#allocation97_spill] sm:$0xff] }
 0x5b6   :  { %2627 = vmatpush2.msra.mxu0 %v11750_v0  ;;  %v11775_v0 = vld [vmem:[#allocation56_spill] sm:$0xff] }
 0x5b7   :  { %2628 = vmatprep.subr.mxu0 %v11679_v20 }
 0x5b8   :  { %2629 = vmatpush2.msra.mxu0 %v11752_v52  ;;  %v11777_v52 = vld [vmem:[#allocation61_spill] sm:$0xff] }
 0x5b9   :  { %2630 = vmatprep.subr.mxu0 %v11679_v20 }
 0x5ba   :  { %2631 = vmatpush2.msra.mxu0 %v11754_v12  ;;  %v11779_v12 = vld [vmem:[#allocation66_spill] sm:$0xff] }
 0x5bb   :  { %2632 = vmatprep.subr.mxu0 %v11679_v20 }
 0x5bc   :  { %2633 = vmatpush2.msra.mxu0 %v11756_v44  ;;  %v11781_v44 = vld [vmem:[#allocation70_spill] sm:$0xff] }
 0x5bd   :  { %2634 = vmatprep.subr.mxu0 %v11679_v20 }
 0x5be   :  { %2635 = vmatpush2.msra.mxu0 %v11758_v14  ;;  %v11783_v14 = vld [vmem:[#allocation74_spill] sm:$0xff] }
 0x5bf   :  { %2636 = vmatprep.subr.mxu0 %v11679_v20 }
 0x5c0   :  { %2637 = vmatpush2.msra.mxu0 %v11760_v1  ;;  %v11785_v1 = vld [vmem:[#allocation77_spill] sm:$0xff] }
 0x5c1   :  { %2638 = vmatprep.subr.mxu0 %v11679_v20 }
 0x5c2   :  { %2639 = vmatpush2.msra.mxu0 %v11762_v26  ;;  %v11787_v26 = vld [vmem:[#allocation81_spill] sm:$0xff] }
 0x5c3   :  { %2640 = vmatprep.subr.mxu0 %v11679_v20 }
 0x5c4   :  { %2641 = vmatpush2.msra.mxu0 %v11764_v11  ;;  %v11789_v11 = vld [vmem:[#allocation85_spill] sm:$0xff] }
 0x5c5   :  { %2642 = vmatprep.subr.mxu0 %v11679_v20 }
 0x5c6   :  { %2643 = vmatpush2.msra.mxu0 %v11766_v4  ;;  %v11791_v4 = vld [vmem:[#allocation89_spill] sm:$0xff] }
 0x5c7   :  { %2644 = vmatprep.subr.mxu0 %v11679_v20 }
 0x5c8   :  { %2645 = vmatpush2.msra.mxu0 %v11768_v54  ;;  %v11793_v54 = vld [vmem:[#allocation94_spill] sm:$0xff] }
 0x5c9   :  { %2646 = vmatprep.subr.mxu0 %v11679_v20 }
 0x5ca   :  { %2647 = vmatpush2.msra.mxu0 %v11770_v6  ;;  %v3214_v6 = vld [vmem:[#allocation10 + $0xf8] sm:$0xff] }
 0x5cb   :  { %2648 = vmatprep.subr.mxu0 %v11679_v20  ;;  %7552 = vmatprep.subr.mxu1 %v3214_v6 }
 0x5cc   :  { %2649 = vmatpush2.msra.mxu0 %v11772_v46  ;;  %7553 = vmatpush3.msra.mxu1 %v3214_v6  ;;  %v3213_v46 = vld [vmem:[#allocation10 + $0xf0] sm:$0xff] }
 0x5cd   :  { %2650 = vmatprep.subr.mxu0 %v11679_v20  ;;  %7554 = vmatprep.subr.mxu1 %v3213_v46  ;;  %v11799_v6 = vld [vmem:[#allocation100_spill] sm:$0xff] }
 0x5ce   :  { %2651 = vmatpush2.msra.mxu0 %v11774_v55  ;;  %v3212_v55 = vld [vmem:[#allocation10 + $0xe8] sm:$0xff]  ;;  %7555 = vmatpush3.msra.mxu1 %v3213_v46  ;;  %v11801_v46 = vld [vmem:[#allocation102_spill] sm:$0xff] }
 0x5cf   :  { %2653 = vmatmul.mubr.f32.vlgmr.msra.gmra.mxu0 %v11775_v0  ;;  %7556 = vmatprep.subr.mxu1 %v3212_v55 }
 0x5d0   :  { %2657 = vmatprep.mubr.f32.mxu0 %v11776_v5  ;;  %7557 = vmatpush3.msra.mxu1 %v3212_v55  ;;  %v3207_v55 = vld [vmem:[#allocation10 + $0xc0] sm:$0xff] }
 0x5d1   :  { %7558 = vmatprep.subr.mxu1 %v3211_v3 }
 0x5d2   :  { %7559 = vmatpush3.msra.mxu1 %v3211_v3  ;;  %v11803_v3 = vld [vmem:[#allocation104_spill] sm:$0xff] }
 0x5d3   :  { %2658 = vmatmul.mubr.f32.gmra.mxu0 %v11777_v52  ;;  %7560 = vmatprep.subr.mxu1 %v3210_v21 }
 0x5d4   :  { %2662 = vmatprep.mubr.f32.mxu0 %v11778_v38  ;;  %7561 = vmatpush3.msra.mxu1 %v3210_v21  ;;  %v3205_v21 = vld [vmem:[#allocation10 + $0xb0] sm:$0xff] }
 0x5d5   :  { %7562 = vmatprep.subr.mxu1 %v3209_v63 }
 0x5d6   :  { %7563 = vmatpush3.msra.mxu1 %v3209_v63  ;;  %v11805_v63 = vld [vmem:[#allocation106_spill] sm:$0xff] }
 0x5d7   :  { %2663 = vmatmul.mubr.f32.gmra.mxu0 %v11779_v12  ;;  %7564 = vmatprep.subr.mxu1 %v3208_v32 }
 0x5d8   :  { %2667 = vmatprep.mubr.f32.mxu0 %v11780_v57  ;;  %7565 = vmatpush3.msra.mxu1 %v3208_v32  ;;  %v3203_v32 = vld [vmem:[#allocation10 + $0xa0] sm:$0xff] }
 0x5d9   :  { %7566 = vmatprep.subr.mxu1 %v3207_v55 }
 0x5da   :  { %7567 = vmatpush3.msra.mxu1 %v3207_v55  ;;  %v11807_v55 = vld [vmem:[#allocation108_spill] sm:$0xff] }
 0x5db   :  { %2668 = vmatmul.mubr.f32.gmra.mxu0 %v11781_v44  ;;  %7568 = vmatprep.subr.mxu1 %v3206_v18 }
 0x5dc   :  { %2672 = vmatprep.mubr.f32.mxu0 %v11782_v40  ;;  %7569 = vmatpush3.msra.mxu1 %v3206_v18  ;;  %v3201_v18 = vld [vmem:[#allocation10 + $0x90] sm:$0xff] }
 0x5dd   :  { %7570 = vmatprep.subr.mxu1 %v3205_v21 }
 0x5de   :  { %7571 = vmatpush3.msra.mxu1 %v3205_v21  ;;  %v3200_v21 = vld [vmem:[#allocation10 + $0x88] sm:$0xff] }
 0x5df   :  { %2673 = vmatmul.mubr.f32.gmra.mxu0 %v11783_v14  ;;  %7572 = vmatprep.subr.mxu1 %v3204_v15 }
 0x5e0   :  { %2677 = vmatprep.mubr.f32.mxu0 %v11784_v2  ;;  %7573 = vmatpush3.msra.mxu1 %v3204_v15  ;;  %v3199_v15 = vld [vmem:[#allocation10 + $0x80] sm:$0xff] }
 0x5e1   :  { %7574 = vmatprep.subr.mxu1 %v3203_v32 }
 0x5e2   :  { %7575 = vmatpush3.msra.mxu1 %v3203_v32  ;;  %v11811_v32 = vld [vmem:[#allocation116_spill] sm:$0xff] }
 0x5e3   :  { %2678 = vmatmul.mubr.f32.gmra.mxu0 %v11785_v1  ;;  %7576 = vmatprep.subr.mxu1 %v3202_v28 }
 0x5e4   :  { %2682 = vmatprep.mubr.f32.mxu0 %v11786_v43  ;;  %7577 = vmatpush3.msra.mxu1 %v3202_v28  ;;  %v11813_v28 = vld [vmem:[#allocation120_spill] sm:$0xff] }
 0x5e5   :  { %7578 = vmatprep.subr.mxu1 %v3201_v18 }
 0x5e6   :  { %7579 = vmatpush3.msra.mxu1 %v3201_v18  ;;  %v11816_v18 = vld [vmem:[#allocation126_spill] sm:$0xff] }
 0x5e7   :  { %2683 = vmatmul.mubr.f32.gmra.mxu0 %v11787_v26  ;;  %7580 = vmatprep.subr.mxu1 %v3200_v21 }
 0x5e8   :  { %2687 = vmatprep.mubr.f32.mxu0 %v11788_v53  ;;  %7581 = vmatpush3.msra.mxu1 %v3200_v21  ;;  %v11818_v21 = vld [vmem:[#allocation130_spill] sm:$0xff] }
 0x5e9   :  { %7582 = vmatprep.subr.mxu1 %v3199_v15 }
 0x5ea   :  { %7583 = vmatpush3.msra.mxu1 %v3199_v15  ;;  %v11821_v15 = vld [vmem:[#allocation136_spill] sm:$0xff] }
 0x5eb   :  { %2688 = vmatmul.mubr.f32.gmra.mxu0 %v11789_v11 }
 0x5ec   :  { %2692 = vmatprep.mubr.f32.mxu0 %v11790_v58 }
 0x5ef   :  { %2693 = vmatmul.mubr.f32.gmra.mxu0 %v11791_v4  ;;  %v11891_v4 = vld [vmem:[#allocation44_spill] sm:$0xff] }
 0x5f0   :  { %2697 = vmatprep.mubr.f32.mxu0 %v11792_v36 }
 0x5f3   :  { %2698 = vmatmul.mubr.f32.gmra.mxu0 %v11793_v54 }
 0x5f4   :  { %2702 = vmatprep.mubr.f32.mxu0 %v11794_v7  ;;  %v11890_v7 = vld [vmem:[#allocation42_spill] sm:$0xff] }
 0x5f7   :  { %2703 = vmatmul.mubr.f32.gmra.mxu0 %v11795_v22 }
 0x5f8   :  { %2707 = vmatprep.mubr.f32.mxu0 %v11796_v8 }
 0x5fb   :  { %2708 = vmatmul.mubr.f32.gmra.mxu0 %v11797_v24  ;;  %v11889_v24 = vld [vmem:[#allocation43_spill] sm:$0xff] }
 0x5fc   :  { %2712 = vmatprep.mubr.f32.mxu0 %v11798_v13 }
 0x5ff   :  { %2713 = vmatmul.mubr.f32.gmra.mxu0 %v11799_v6 }
 0x600   :  { %2717 = vmatprep.mubr.f32.mxu0 %v11800_v19 }
 0x603   :  { %2718 = vmatmul.mubr.f32.gmra.mxu0 %v11801_v46  ;;  %v11888_v46 = vld [vmem:[#allocation41_spill] sm:$0xff] }
 0x604   :  { %2722 = vmatprep.mubr.f32.mxu0 %v11802_v60 }
 0x607   :  { %2723 = vmatmul.mubr.f32.gmra.mxu0 %v11803_v3 }
 0x608   :  { %2727 = vmatprep.mubr.f32.mxu0 %v11804_v48 }
 0x60b   :  { %2728 = vmatmul.mubr.f32.gmra.mxu0 %v11805_v63 }
 0x60c   :  { %2732 = vmatprep.mubr.f32.mxu0 %v11806_v34 }
 0x60f   :  { %2733 = vmatmul.mubr.f32.gmra.mxu0 %v11807_v55 }
 0x610   :  { %2737 = vmatprep.mubr.f32.mxu0 %v11808_v42 }
 0x613   :  { %2738 = vmatmul.mubr.f32.gmra.mxu0 %v11809_v50  ;;  %v11874_v50 = vld [vmem:[#allocation26_spill] sm:$0xff] }
 0x614   :  { %2742 = vmatprep.mubr.f32.mxu0 %v11810_v56 }
 0x617   :  { %2743 = vmatmul.mubr.f32.gmra.mxu0 %v11811_v32 }
 0x618   :  { %2747 = vmatprep.mubr.f32.mxu0 %v11812_v25  ;;  %v11873_v25 = vld [vmem:[#allocation27_spill] sm:$0xff] }
 0x61b   :  { %2748 = vmatmul.mubr.f32.gmra.mxu0 %v11813_v28 }
 0x61c   :  { %2752 = vmatprep.mubr.f32.mxu0 %v11814_v29 }
 0x61f   :  { %2753 = vmatmul.mubr.f32.gmra.mxu0 %v11815_v31 }
 0x620   :  { %2757 = vmatprep.mubr.f32.mxu0 %v11816_v18  ;;  %v11872_v18 = vld [vmem:[#allocation25_spill] sm:$0xff] }
 0x623   :  { %2758 = vmatmul.mubr.f32.gmra.mxu0 %v11817_v37 }
 0x624   :  { %2762 = vmatprep.mubr.f32.mxu0 %v11818_v21 }
 0x627   :  { %2763 = vmatmul.mubr.f32.gmra.mxu0 %v11819_v39 }
 0x628   :  { %2767 = vmatprep.mubr.f32.mxu0 %v11820_v23 }
 0x62b   :  { %2768 = vmatmul.mubr.f32.gmra.mxu0 %v11821_v15 }
 0x62c   :  { %2772 = vmatprep.mubr.f32.mxu0 %v11822_v45 }
 0x62f   :  { %2773 = vmatmul.mubr.f32.gmra.mxu0 %v11823_v33 }
 0x630   :  { %2777 = vmatprep.mubr.f32.mxu0 %v11824_v49 }
 0x633   :  { %2778 = vmatmul.mubr.f32.gmra.mxu0 %v11825_v41  ;;  %v11836_v41 = vld [vmem:[#allocation166_spill] sm:$0xff] }
 0x634   :  { %2782 = vmatprep.mubr.f32.mxu0 %v11826_v27  ;;  %v11837_v27 = vld [vmem:[#allocation168_spill] sm:$0xff] }
 0x637   :  { %2783 = vmatmul.mubr.f32.gmra.mxu0 %v11827_v47  ;;  %v11838_v47 = vld [vmem:[#allocation170_spill] sm:$0xff] }
 0x638   :  { %2787 = vmatprep.mubr.f32.mxu0 %v11828_v35  ;;  %v11839_v35 = vld [vmem:[#allocation172_spill] sm:$0xff] }
 0x63b   :  { %2788 = vmatmul.mubr.f32.gmra.mxu0 %v11829_v51 }
 0x63c   :  { %2792 = vmatprep.mubr.f32.mxu0 %v11830_v59  ;;  %v11841_v59 = vld [vmem:[#allocation174_spill] sm:$0xff] }
 0x63f   :  { %2793 = vmatmul.mubr.f32.gmra.mxu0 %v11831_v16 }
 0x640   :  { %2797 = vmatprep.mubr.f32.mxu0 %v11832_v9  ;;  %v11842_v9 = vld [vmem:[#allocation176_spill] sm:$0xff] }
 0x643   :  { %2798 = vmatmul.mubr.f32.gmra.mxu0 %v11833_v61  ;;  %v11843_v61 = vld [vmem:[#allocation177_spill] sm:$0xff] }
 0x644   :  { %2802 = vmatprep.mubr.f32.mxu0 %v11834_v10  ;;  %v11844_v10 = vld [vmem:[#allocation180_spill] sm:$0xff] }
 0x647   :  { %2803 = vmatmul.mubr.f32.gmra.mxu0 %v11835_v30  ;;  %v11845_v30 = vld [vmem:[#allocation181_spill] sm:$0xff] }
 0x648   :  { %2807 = vmatprep.mubr.f32.mxu0 %v11836_v41  ;;  %v11846_v41 = vld [vmem:[#allocation184_spill] sm:$0xff] }
 0x64b   :  { %2808 = vmatmul.mubr.f32.gmra.mxu0 %v11837_v27  ;;  %v11847_v27 = vld [vmem:[#allocation185_spill] sm:$0xff] }
 0x64c   :  { %2812 = vmatprep.mubr.f32.mxu0 %v11838_v47  ;;  %v11848_v47 = vld [vmem:[#allocation188_spill] sm:$0xff] }
 0x64f   :  { %2813 = vmatmul.mubr.f32.gmra.mxu0 %v11839_v35  ;;  %v10054_v51 = vpop.f32.mrf.mxu0  ;;  %v11849_v35 = vld [vmem:[#allocation189_spill] sm:$0xff] }
 0x650   :  { %11840 = vst [vmem:[#allocation23_spill] sm:$0xff] %v10054_v51  ;;  %2817 = vmatprep.mubr.f32.mxu0 %v11841_v59  ;;  %v11850_v51 = vld [vmem:[#allocation192_spill] sm:$0xff]  ;;  %v11851_v59 = vld [vmem:[#allocation193_spill] sm:$0xff] }
 0x651   :  { %v7412_v16 = vpop.f32.mrf.mxu0 }
 0x652   :  { %v11852_v16 = vld [vmem:[#allocation196_spill] sm:$0xff] }
 0x653   :  { %2818 = vmatmul.mubr.f32.gmra.mxu0 %v11842_v9  ;;  %v11853_v9 = vld [vmem:[#allocation197_spill] sm:$0xff] }
 0x654   :  { %2822 = vmatprep.mubr.f32.mxu0 %v11843_v61  ;;  %v11854_v61 = vld [vmem:[#allocation200_spill] sm:$0xff] }
 0x657   :  { %2823 = vmatmul.mubr.f32.gmra.mxu0 %v11844_v10  ;;  %v11855_v10 = vld [vmem:[#allocation201_spill] sm:$0xff] }
 0x658   :  { %2827 = vmatprep.mubr.f32.mxu0 %v11845_v30  ;;  %v11856_v30 = vld [vmem:[#allocation203_spill] sm:$0xff] }
 0x65b   :  { %2828 = vmatmul.mubr.f32.gmra.mxu0 %v11846_v41  ;;  %v11857_v41 = vld [vmem:[#allocation204_spill] sm:$0xff] }
 0x65c   :  { %2832 = vmatprep.mubr.f32.mxu0 %v11847_v27  ;;  %v11858_v27 = vld [vmem:[#allocation205_spill] sm:$0xff] }
 0x65f   :  { %2833 = vmatmul.mubr.f32.gmra.mxu0 %v11848_v47  ;;  %v11859_v47 = vld [vmem:[#allocation206_spill] sm:$0xff] }
 0x660   :  { %2837 = vmatprep.mubr.f32.mxu0 %v11849_v35  ;;  %v11860_v35 = vld [vmem:[#allocation207_spill] sm:$0xff] }
 0x663   :  { %2838 = vmatmul.mubr.f32.gmra.mxu0 %v11850_v51  ;;  %v11861_v51 = vld [vmem:[#allocation208_spill] sm:$0xff] }
 0x664   :  { %2842 = vmatprep.mubr.f32.mxu0 %v11851_v59  ;;  %v11862_v59 = vld [vmem:[#allocation209_spill] sm:$0xff] }
 0x667   :  { %2843 = vmatmul.mubr.f32.gmra.mxu0 %v11852_v16  ;;  %v11863_v16 = vld [vmem:[#allocation210_spill] sm:$0xff] }
 0x668   :  { %2847 = vmatprep.mubr.f32.mxu0 %v11853_v9  ;;  %v11864_v9 = vld [vmem:[#allocation211_spill] sm:$0xff] }
 0x66b   :  { %2848 = vmatmul.mubr.f32.gmra.mxu0 %v11854_v61  ;;  %v11865_v61 = vld [vmem:[#allocation212_spill] sm:$0xff] }
 0x66c   :  { %2852 = vmatprep.mubr.f32.mxu0 %v11855_v10  ;;  %v11866_v10 = vld [vmem:[#allocation213_spill] sm:$0xff] }
 0x66f   :  { %2853 = vmatmul.mubr.f32.gmra.mxu0 %v11856_v30  ;;  %v11867_v30 = vld [vmem:[#allocation214_spill] sm:$0xff] }
 0x670   :  { %2857 = vmatprep.mubr.f32.mxu0 %v11857_v41  ;;  %v11868_v41 = vld [vmem:[#allocation215_spill] sm:$0xff] }
 0x673   :  { %2858 = vmatmul.mubr.f32.gmra.mxu0 %v11858_v27  ;;  %v11869_v27 = vld [vmem:[#allocation216_spill] sm:$0xff] }
 0x674   :  { %2862 = vmatprep.mubr.f32.mxu0 %v11859_v47  ;;  %v7482_v47 = vpop.f32.mrf.mxu1 }
 0x677   :  { %2863 = vmatmul.mubr.f32.gmra.mxu0 %v11860_v35  ;;  %v11870_v35 = vld [vmem:[#allocation217_spill] sm:$0xff] }
 0x678   :  { %2867 = vmatprep.mubr.f32.mxu0 %v11861_v51  ;;  %v11871_v51 = vld [vmem:[#allocation24_spill] sm:$0xff] }
 0x67b   :  { %2868 = vmatmul.mubr.f32.gmra.mxu0 %v11862_v59  ;;  %v2959_v59 = vpop.f32.mrf.mxu1 }
 0x67c   :  { %2872 = vmatprep.mubr.f32.mxu0 %v11863_v16 }
 0x67f   :  { %2873 = vmatmul.mubr.f32.gmra.mxu0 %v11864_v9  ;;  %v7485_v9 = vpop.f32.mrf.mxu1 }
 0x680   :  { %2877 = vmatprep.mubr.f32.mxu0 %v11865_v61 }
 0x681   :  { %v2969_v15 = vpop.f32.mrf.mxu1 }
 0x683   :  { %2878 = vmatmul.mubr.f32.gmra.mxu0 %v11866_v10 }
 0x684   :  { %2882 = vmatprep.mubr.f32.mxu0 %v11867_v30 }
 0x687   :  { %2883 = vmatmul.mubr.f32.gmra.mxu0 %v11868_v41 }
 0x688   :  { %2887 = vmatprep.mubr.f32.mxu0 %v11869_v27  ;;  %v7488_v27 = vpop.f32.mrf.mxu1 }
 0x68b   :  { %2888 = vmatmul.mubr.f32.gmra.mxu0 %v11870_v35 }
 0x68c   :  { %4066 = vmatprep.mubr.f32.mxu0 %v11871_v51  ;;  %v2979_v51 = vpop.f32.mrf.mxu1 }
 0x68f   :  { %v2654_v49 = vpop.f32.mrf.mxu0 }
 0x690   :  { %v2960_v16 = vadd.f32 %v2959_v59, %v2654_v49 }
 0x691   :  { %v2656_v33 = vpop.f32.mrf.mxu0 }
 0x692   :  { %7584 = vmatprep.mubr.f32.mxu1 %v2960_v16  ;;  %v7491_v33 = vpop.f32.mrf.mxu1 }
 0x693   :  { %v2659_v61 = vpop.f32.mrf.mxu0 }
 0x694   :  { %v2965_v45 = vadd.f32 %v7482_v47, %v2659_v61  ;;  %v2989_v47 = vpop.f32.mrf.mxu1 }
 0x695   :  { %v2661_v10 = vpop.f32.mrf.mxu0 }
 0x696   :  { %7585 = vmatmul.mubr.f32.vlgmr.msra.gmra.mxu1 %v2965_v45 }
 0x697   :  { %v2664_v30 = vpop.f32.mrf.mxu0 }
 0x698   :  { %v2970_v41 = vadd.f32 %v2969_v15, %v2664_v30  ;;  %v7494_v15 = vpop.f32.mrf.mxu1 }
 0x699   :  { %v2666_v23 = vpop.f32.mrf.mxu0 }
 0x69a   :  { %7587 = vmatprep.mubr.f32.mxu1 %v2970_v41 }
 0x69b   :  { %v2669_v39 = vpop.f32.mrf.mxu0 }
 0x69c   :  { %v2975_v35 = vadd.f32 %v7485_v9, %v2669_v39 }
 0x69d   :  { %v2671_v21 = vpop.f32.mrf.mxu0 }
 0x69e   :  { %7588 = vmatmul.mubr.f32.gmra.mxu1 %v2975_v35  ;;  %v2999_v21 = vpop.f32.mrf.mxu1 }
 0x69f   :  { %v2674_v37 = vpop.f32.mrf.mxu0 }
 0x6a0   :  { %v2980_v59 = vadd.f32 %v2979_v51, %v2674_v37 }
 0x6a1   :  { %v2676_v49 = vpop.f32.mrf.mxu0 }
 0x6a2   :  { %7590 = vmatprep.mubr.f32.mxu1 %v2980_v59  ;;  %v7497_v49 = vpop.f32.mrf.mxu1 }
 0x6a3   :  { %v2679_v16 = vpop.f32.mrf.mxu0 }
 0x6a4   :  { %v2985_v61 = vadd.f32 %v7488_v27, %v2679_v16 }
 0x6a5   :  { %v2681_v10 = vpop.f32.mrf.mxu0 }
 0x6a6   :  { %7591 = vmatmul.mubr.f32.gmra.mxu1 %v2985_v61  ;;  %v3009_v10 = vpop.f32.mrf.mxu1 }
 0x6a7   :  { %v2684_v45 = vpop.f32.mrf.mxu0 }
 0x6a8   :  { %v2990_v30 = vadd.f32 %v2989_v47, %v2684_v45 }
 0x6a9   :  { %v2686_v23 = vpop.f32.mrf.mxu0 }
 0x6aa   :  { %7593 = vmatprep.mubr.f32.mxu1 %v2990_v30  ;;  %v7500_v23 = vpop.f32.mrf.mxu1 }
 0x6ab   :  { %v2689_v41 = vpop.f32.mrf.mxu0 }
 0x6ac   :  { %v2995_v9 = vadd.f32 %v7491_v33, %v2689_v41 }
 0x6ad   :  { %v2691_v39 = vpop.f32.mrf.mxu0 }
 0x6ae   :  { %7594 = vmatmul.mubr.f32.gmra.mxu1 %v2995_v9  ;;  %v3019_v39 = vpop.f32.mrf.mxu1  ;;  %v3592_v9 = vld [vmem:[#allocation11 + $0xf8] sm:$0xff] }
 0x6af   :  { %v2694_v35 = vpop.f32.mrf.mxu0  ;;  %7656 = vmatprep.subr.mxu1 %v3592_v9 }
 0x6b0   :  { %v3000_v51 = vadd.f32 %v2999_v21, %v2694_v35  ;;  %7657 = vmatpush3.msra.mxu1 %v3592_v9  ;;  %v3591_v35 = vld [vmem:[#allocation11 + $0xf0] sm:$0xff]  ;;  %v3586_v9 = vld [vmem:[#allocation11 + $0xc8] sm:$0xff] }
 0x6b1   :  { %v2696_v37 = vpop.f32.mrf.mxu0  ;;  %7658 = vmatprep.subr.mxu1 %v3591_v35 }
 0x6b2   :  { %7596 = vmatprep.mubr.f32.mxu1 %v3000_v51  ;;  %v7503_v37 = vpop.f32.mrf.mxu1  ;;  %7659 = vmatpush3.msra.mxu1 %v3591_v35 }
 0x6b3   :  { %v2699_v59 = vpop.f32.mrf.mxu0 }
 0x6b4   :  { %v3005_v27 = vadd.f32 %v7494_v15, %v2699_v59  ;;  %v3590_v59 = vld [vmem:[#allocation11 + $0xe8] sm:$0xff] }
 0x6b5   :  { %v2701_v16 = vpop.f32.mrf.mxu0  ;;  %7660 = vmatprep.subr.mxu1 %v3590_v59 }
 0x6b6   :  { %7597 = vmatmul.mubr.f32.gmra.mxu1 %v3005_v27  ;;  %v3589_v16 = vld [vmem:[#allocation11 + $0xe0] sm:$0xff] }
 0x6b7   :  { %v2704_v61 = vpop.f32.mrf.mxu0  ;;  %7661 = vmatpush3.msra.mxu1 %v3590_v59  ;;  %v3584_v59 = vld [vmem:[#allocation11 + $0xb8] sm:$0xff] }
 0x6b8   :  { %v3010_v47 = vadd.f32 %v3009_v10, %v2704_v61  ;;  %7662 = vmatprep.subr.mxu1 %v3589_v16  ;;  %v3029_v61 = vpop.f32.mrf.mxu1 }
 0x6b9   :  { %v2706_v45 = vpop.f32.mrf.mxu0  ;;  %7663 = vmatpush3.msra.mxu1 %v3589_v16 }
 0x6ba   :  { %7599 = vmatprep.mubr.f32.mxu1 %v3010_v47  ;;  %v3588_v47 = vld [vmem:[#allocation11 + $0xd8] sm:$0xff] }
 0x6bb   :  { %v2709_v30 = vpop.f32.mrf.mxu0  ;;  %7664 = vmatprep.subr.mxu1 %v3588_v47 }
 0x6bc   :  { %v3015_v33 = vadd.f32 %v7497_v49, %v2709_v30  ;;  %7665 = vmatpush3.msra.mxu1 %v3588_v47  ;;  %v3587_v30 = vld [vmem:[#allocation11 + $0xd0] sm:$0xff] }
 0x6bd   :  { %v2711_v41 = vpop.f32.mrf.mxu0  ;;  %7666 = vmatprep.subr.mxu1 %v3587_v30 }
 0x6be   :  { %7600 = vmatmul.mubr.f32.gmra.mxu1 %v3015_v33 }
 0x6bf   :  { %v2714_v21 = vpop.f32.mrf.mxu0  ;;  %7667 = vmatpush3.msra.mxu1 %v3587_v30 }
 0x6c0   :  { %v3020_v51 = vadd.f32 %v3019_v39, %v2714_v21  ;;  %v7506_v39 = vpop.f32.mrf.mxu1  ;;  %7668 = vmatprep.subr.mxu1 %v3586_v9 }
 0x6c1   :  { %v2716_v15 = vpop.f32.mrf.mxu0  ;;  %7669 = vmatpush3.msra.mxu1 %v3586_v9  ;;  %v3580_v9 = vld [vmem:[#allocation11 + $0x98] sm:$0xff] }
 0x6c2   :  { %7602 = vmatprep.mubr.f32.mxu1 %v3020_v51  ;;  %v3039_v15 = vpop.f32.mrf.mxu1 }
 0x6c3   :  { %v2719_v27 = vpop.f32.mrf.mxu0 }
 0x6c4   :  { %v3025_v49 = vadd.f32 %v7500_v23, %v2719_v27  ;;  %v3585_v23 = vld [vmem:[#allocation11 + $0xc0] sm:$0xff]  ;;  %v3583_v27 = vld [vmem:[#allocation11 + $0xb0] sm:$0xff]  ;;  %v7509_v47 = vpop.f32.mrf.mxu1 }
 0x6c5   :  { %v2721_v10 = vpop.f32.mrf.mxu0  ;;  %7670 = vmatprep.subr.mxu1 %v3585_v23 }
 0x6c6   :  { %7603 = vmatmul.mubr.f32.gmra.mxu1 %v3025_v49  ;;  %v3582_v49 = vld [vmem:[#allocation11 + $0xa8] sm:$0xff] }
 0x6c7   :  { %v2724_v45 = vpop.f32.mrf.mxu0  ;;  %7671 = vmatpush3.msra.mxu1 %v3585_v23  ;;  %v3579_v23 = vld [vmem:[#allocation11 + $0x90] sm:$0xff] }
 0x6c8   :  { %v3030_v33 = vadd.f32 %v3029_v61, %v2724_v45  ;;  %7672 = vmatprep.subr.mxu1 %v3584_v59  ;;  %v3581_v45 = vld [vmem:[#allocation11 + $0xa0] sm:$0xff] }
 0x6c9   :  { %v2726_v41 = vpop.f32.mrf.mxu0  ;;  %7673 = vmatpush3.msra.mxu1 %v3584_v59  ;;  %v3578_v59 = vld [vmem:[#allocation11 + $0x88] sm:$0xff] }
 0x6ca   :  { %7605 = vmatprep.mubr.f32.mxu1 %v3030_v33  ;;  %7674 = vmatprep.subr.mxu1 %v3583_v27  ;;  %v3049_v41 = vpop.f32.mrf.mxu1 }
 0x6cb   :  { %v2729_v21 = vpop.f32.mrf.mxu0  ;;  %7675 = vmatpush3.msra.mxu1 %v3583_v27 }
 0x6cc   :  { %v3035_v35 = vadd.f32 %v7503_v37, %v2729_v21  ;;  %7676 = vmatprep.subr.mxu1 %v3582_v49 }
 0x6cd   :  { %v2731_v51 = vpop.f32.mrf.mxu0  ;;  %7677 = vmatpush3.msra.mxu1 %v3582_v49 }
 0x6ce   :  { %7606 = vmatmul.mubr.f32.gmra.mxu1 %v3035_v35  ;;  %7678 = vmatprep.subr.mxu1 %v3581_v45 }
 0x6cf   :  { %v2734_v16 = vpop.f32.mrf.mxu0  ;;  %7679 = vmatpush3.msra.mxu1 %v3581_v45 }
 0x6d0   :  { %v3040_v10 = vadd.f32 %v3039_v15, %v2734_v16  ;;  %7680 = vmatprep.subr.mxu1 %v3580_v9  ;;  %v7512_v15 = vpop.f32.mrf.mxu1 }
 0x6d1   :  { %v2736_v61 = vpop.f32.mrf.mxu0  ;;  %7681 = vmatpush3.msra.mxu1 %v3580_v9 }
 0x6d2   :  { %7608 = vmatprep.mubr.f32.mxu1 %v3040_v10  ;;  %7682 = vmatprep.subr.mxu1 %v3579_v23  ;;  %v3059_v10 = vpop.f32.mrf.mxu1 }
 0x6d3   :  { %v2739_v37 = vpop.f32.mrf.mxu0  ;;  %7683 = vmatpush3.msra.mxu1 %v3579_v23 }
 0x6d4   :  { %v3045_v30 = vadd.f32 %v7506_v39, %v2739_v37  ;;  %7684 = vmatprep.subr.mxu1 %v3578_v59  ;;  %v3577_v39 = vld [vmem:[#allocation11 + $0x80] sm:$0xff] }
 0x6d5   :  { %v2741_v33 = vpop.f32.mrf.mxu0  ;;  %7685 = vmatpush3.msra.mxu1 %v3578_v59 }
 0x6d6   :  { %7609 = vmatmul.mubr.f32.gmra.mxu1 %v3045_v30  ;;  %7686 = vmatprep.subr.mxu1 %v3577_v39  ;;  %v7515_v30 = vpop.f32.mrf.mxu1 }
 0x6d7   :  { %v2744_v21 = vpop.f32.mrf.mxu0  ;;  %7687 = vmatpush3.msra.mxu1 %v3577_v39 }
 0x6d8   :  { %v3050_v35 = vadd.f32 %v3049_v41, %v2744_v21  ;;  %4230 = vmatprep.subr.mxu1 %v11679_v20  ;;  %v3069_v21 = vpop.f32.mrf.mxu1 }
 0x6d9   :  { %v2746_v51 = vpop.f32.mrf.mxu0 }
 0x6da   :  { %7611 = vmatprep.mubr.f32.mxu1 %v3050_v35  ;;  %v7518_v51 = vpop.f32.mrf.mxu1 }
 0x6db   :  { %v2749_v27 = vpop.f32.mrf.mxu0 }
 0x6dc   :  { %v3055_v16 = vadd.f32 %v7509_v47, %v2749_v27 }
 0x6dd   :  { %v2751_v49 = vpop.f32.mrf.mxu0 }
 0x6de   :  { %7612 = vmatmul.mubr.f32.gmra.mxu1 %v3055_v16  ;;  %v3079_v16 = vpop.f32.mrf.mxu1 }
 0x6df   :  { %v2754_v61 = vpop.f32.mrf.mxu0 }
 0x6e0   :  { %v3060_v45 = vadd.f32 %v3059_v10, %v2754_v61 }
 0x6e1   :  { %v2756_v37 = vpop.f32.mrf.mxu0 }
 0x6e2   :  { %7614 = vmatprep.mubr.f32.mxu1 %v3060_v45  ;;  %v7521_v37 = vpop.f32.mrf.mxu1 }
 0x6e3   :  { %v2759_v33 = vpop.f32.mrf.mxu0 }
 0x6e4   :  { %v3065_v41 = vadd.f32 %v7512_v15, %v2759_v33 }
 0x6e5   :  { %v2761_v9 = vpop.f32.mrf.mxu0 }
 0x6e6   :  { %7615 = vmatmul.mubr.f32.gmra.mxu1 %v3065_v41  ;;  %v3089_v9 = vpop.f32.mrf.mxu1 }
 0x6e7   :  { %v2764_v23 = vpop.f32.mrf.mxu0 }
 0x6e8   :  { %v3070_v35 = vadd.f32 %v3069_v21, %v2764_v23 }
 0x6e9   :  { %v2766_v47 = vpop.f32.mrf.mxu0 }
 0x6ea   :  { %7617 = vmatprep.mubr.f32.mxu1 %v3070_v35  ;;  %v7524_v47 = vpop.f32.mrf.mxu1 }
 0x6eb   :  { %v2769_v59 = vpop.f32.mrf.mxu0 }
 0x6ec   :  { %v3075_v27 = vadd.f32 %v7515_v30, %v2769_v59 }
 0x6ed   :  { %v2771_v39 = vpop.f32.mrf.mxu0 }
 0x6ee   :  { %7618 = vmatmul.mubr.f32.gmra.mxu1 %v3075_v27  ;;  %v3099_v39 = vpop.f32.mrf.mxu1 }
 0x6ef   :  { %v2774_v49 = vpop.f32.mrf.mxu0 }
 0x6f0   :  { %v3080_v10 = vadd.f32 %v3079_v16, %v2774_v49 }
 0x6f1   :  { %v2776_v61 = vpop.f32.mrf.mxu0 }
 0x6f2   :  { %7620 = vmatprep.mubr.f32.mxu1 %v3080_v10  ;;  %v7527_v61 = vpop.f32.mrf.mxu1 }
 0x6f3   :  { %v2779_v45 = vpop.f32.mrf.mxu0 }
 0x6f4   :  { %v3085_v15 = vadd.f32 %v7518_v51, %v2779_v45 }
 0x6f5   :  { %v2781_v33 = vpop.f32.mrf.mxu0 }
 0x6f6   :  { %7621 = vmatmul.mubr.f32.gmra.mxu1 %v3085_v15  ;;  %v3109_v33 = vpop.f32.mrf.mxu1 }
 0x6f7   :  { %v2784_v41 = vpop.f32.mrf.mxu0 }
 0x6f8   :  { %v3090_v21 = vadd.f32 %v3089_v9, %v2784_v41 }
 0x6f9   :  { %v2786_v23 = vpop.f32.mrf.mxu0 }
 0x6fa   :  { %7623 = vmatprep.mubr.f32.mxu1 %v3090_v21  ;;  %v7530_v23 = vpop.f32.mrf.mxu1 }
 0x6fb   :  { %v2789_v35 = vpop.f32.mrf.mxu0 }
 0x6fc   :  { %v3095_v30 = vadd.f32 %v7521_v37, %v2789_v35 }
 0x6fd   :  { %v2791_v59 = vpop.f32.mrf.mxu0 }
 0x6fe   :  { %7624 = vmatmul.mubr.f32.gmra.mxu1 %v3095_v30  ;;  %v3119_v59 = vpop.f32.mrf.mxu1 }
 0x6ff   :  { %v2794_v27 = vpop.f32.mrf.mxu0 }
 0x700   :  { %v3100_v16 = vadd.f32 %v3099_v39, %v2794_v27 }
 0x701   :  { %v2796_v49 = vpop.f32.mrf.mxu0 }
 0x702   :  { %7626 = vmatprep.mubr.f32.mxu1 %v3100_v16  ;;  %v7533_v49 = vpop.f32.mrf.mxu1 }
 0x703   :  { %v2799_v10 = vpop.f32.mrf.mxu0 }
 0x704   :  { %v3105_v51 = vadd.f32 %v7524_v47, %v2799_v10 }
 0x705   :  { %v2801_v45 = vpop.f32.mrf.mxu0 }
 0x706   :  { %7627 = vmatmul.mubr.f32.gmra.mxu1 %v3105_v51  ;;  %v3129_v45 = vpop.f32.mrf.mxu1 }
 0x707   :  { %v2804_v15 = vpop.f32.mrf.mxu0 }
 0x708   :  { %v3110_v9 = vadd.f32 %v3109_v33, %v2804_v15 }
 0x709   :  { %v2806_v41 = vpop.f32.mrf.mxu0 }
 0x70a   :  { %7629 = vmatprep.mubr.f32.mxu1 %v3110_v9  ;;  %v7536_v41 = vpop.f32.mrf.mxu1 }
 0x70b   :  { %v2809_v21 = vpop.f32.mrf.mxu0 }
 0x70c   :  { %v3115_v37 = vadd.f32 %v7527_v61, %v2809_v21 }
 0x70d   :  { %v2811_v35 = vpop.f32.mrf.mxu0 }
 0x70e   :  { %7630 = vmatmul.mubr.f32.gmra.mxu1 %v3115_v37  ;;  %v3139_v35 = vpop.f32.mrf.mxu1 }
 0x70f   :  { %v2814_v30 = vpop.f32.mrf.mxu0 }
 0x710   :  { %v3120_v39 = vadd.f32 %v3119_v59, %v2814_v30 }
 0x711   :  { %v2816_v27 = vpop.f32.mrf.mxu0 }
 0x712   :  { %7632 = vmatprep.mubr.f32.mxu1 %v3120_v39  ;;  %v7539_v27 = vpop.f32.mrf.mxu1 }
 0x713   :  { %v2819_v16 = vpop.f32.mrf.mxu0 }
 0x714   :  { %v3125_v47 = vadd.f32 %v7530_v23, %v2819_v16 }
 0x715   :  { %v2821_v10 = vpop.f32.mrf.mxu0 }
 0x716   :  { %7633 = vmatmul.mubr.f32.gmra.mxu1 %v3125_v47  ;;  %v3149_v10 = vpop.f32.mrf.mxu1 }
 0x717   :  { %v2824_v51 = vpop.f32.mrf.mxu0 }
 0x718   :  { %v3130_v33 = vadd.f32 %v3129_v45, %v2824_v51 }
 0x719   :  { %v2826_v15 = vpop.f32.mrf.mxu0 }
 0x71a   :  { %7635 = vmatprep.mubr.f32.mxu1 %v3130_v33  ;;  %v7542_v15 = vpop.f32.mrf.mxu1 }
 0x71b   :  { %v2829_v9 = vpop.f32.mrf.mxu0 }
 0x71c   :  { %v3135_v61 = vadd.f32 %v7533_v49, %v2829_v9 }
 0x71d   :  { %v2831_v21 = vpop.f32.mrf.mxu0 }
 0x71e   :  { %7636 = vmatmul.mubr.f32.gmra.mxu1 %v3135_v61  ;;  %v3159_v21 = vpop.f32.mrf.mxu1 }
 0x71f   :  { %v2834_v37 = vpop.f32.mrf.mxu0 }
 0x720   :  { %v3140_v59 = vadd.f32 %v3139_v35, %v2834_v37 }
 0x721   :  { %v2836_v30 = vpop.f32.mrf.mxu0 }
 0x722   :  { %7638 = vmatprep.mubr.f32.mxu1 %v3140_v59  ;;  %v7545_v30 = vpop.f32.mrf.mxu1 }
 0x723   :  { %v2839_v39 = vpop.f32.mrf.mxu0 }
 0x724   :  { %v3145_v23 = vadd.f32 %v7536_v41, %v2839_v39 }
 0x725   :  { %v2841_v16 = vpop.f32.mrf.mxu0 }
 0x726   :  { %7639 = vmatmul.mubr.f32.gmra.mxu1 %v3145_v23  ;;  %v3169_v16 = vpop.f32.mrf.mxu1 }
 0x727   :  { %v2844_v47 = vpop.f32.mrf.mxu0 }
 0x728   :  { %v3150_v45 = vadd.f32 %v3149_v10, %v2844_v47 }
 0x729   :  { %v2846_v51 = vpop.f32.mrf.mxu0 }
 0x72a   :  { %7641 = vmatprep.mubr.f32.mxu1 %v3150_v45  ;;  %v7548_v51 = vpop.f32.mrf.mxu1 }
 0x72b   :  { %v2849_v33 = vpop.f32.mrf.mxu0 }
 0x72c   :  { %v3155_v49 = vadd.f32 %v7539_v27, %v2849_v33 }
 0x72d   :  { %v2851_v9 = vpop.f32.mrf.mxu0 }
 0x72e   :  { %7642 = vmatmul.mubr.f32.gmra.mxu1 %v3155_v49  ;;  %v3179_v9 = vpop.f32.mrf.mxu1 }
 0x72f   :  { %v2854_v61 = vpop.f32.mrf.mxu0 }
 0x730   :  { %v3160_v35 = vadd.f32 %v3159_v21, %v2854_v61 }
 0x731   :  { %v2856_v37 = vpop.f32.mrf.mxu0 }
 0x732   :  { %7644 = vmatprep.mubr.f32.mxu1 %v3160_v35  ;;  %v7551_v37 = vpop.f32.mrf.mxu1 }
 0x733   :  { %v2859_v59 = vpop.f32.mrf.mxu0 }
 0x734   :  { %v3165_v41 = vadd.f32 %v7542_v15, %v2859_v59 }
 0x735   :  { %v2861_v39 = vpop.f32.mrf.mxu0 }
 0x736   :  { %7645 = vmatmul.mubr.f32.gmra.mxu1 %v3165_v41  ;;  %v3189_v39 = vpop.f32.mrf.mxu1 }
 0x737   :  { %v2864_v23 = vpop.f32.mrf.mxu0 }
 0x738   :  { %v3170_v10 = vadd.f32 %v3169_v16, %v2864_v23 }
 0x739   :  { %v2866_v47 = vpop.f32.mrf.mxu0 }
 0x73a   :  { %7647 = vmatprep.mubr.f32.mxu1 %v3170_v10 }
 0x73b   :  { %v2869_v45 = vpop.f32.mrf.mxu0 }
 0x73c   :  { %v3175_v27 = vadd.f32 %v7545_v30, %v2869_v45  ;;  %v10091_v45 = vld [vmem:[%s11091_s6 + $0x1] ss:$0 sm:$0xff] }
 0x73d   :  { %v2871_v33 = vpop.f32.mrf.mxu0 }
 0x73e   :  { %7648 = vmatmul.mubr.f32.gmra.mxu1 %v3175_v27 }
 0x73f   :  { %v2874_v49 = vpop.f32.mrf.mxu0 }
 0x740   :  { %v3180_v21 = vadd.f32 %v3179_v9, %v2874_v49 }
 0x741   :  { %v2876_v61 = vpop.f32.mrf.mxu0 }
 0x742   :  { %7650 = vmatprep.mubr.f32.mxu1 %v3180_v21 }
 0x743   :  { %v2879_v35 = vpop.f32.mrf.mxu0 }
 0x744   :  { %v3185_v15 = vadd.f32 %v7548_v51, %v2879_v35 }
 0x745   :  { %v2881_v59 = vpop.f32.mrf.mxu0 }
 0x746   :  { %7651 = vmatmul.mubr.f32.gmra.mxu1 %v3185_v15 }
 0x747   :  { %v2884_v41 = vpop.f32.mrf.mxu0 }
 0x748   :  { %v3190_v16 = vadd.f32 %v3189_v39, %v2884_v41 }
 0x749   :  { %v2886_v23 = vpop.f32.mrf.mxu0 }
 0x74a   :  { %7653 = vmatprep.mubr.f32.mxu1 %v3190_v16 }
 0x74b   :  { %v2889_v10 = vpop.f32.mrf.mxu0 }
 0x74c   :  { %v3195_v47 = vadd.f32 %v7551_v37, %v2889_v10 }
 0x74d   :  { %v2891_v30 = vpop.f32.mrf.mxu0 }
 0x74e   :  { %7654 = vmatmul.mubr.f32.gmra.mxu1 %v3195_v47 }
 0x756   :  { %v7586_v27 = vpop.f32.mrf.mxu1 }
 0x757   :  { %v3295_v33 = vadd.f32 %v7586_v27, %v10091_v45 }
 0x758   :  { %v3289_v51 = vpop.f32.mrf.mxu1 }
 0x759   :  { %v3290_v9 = vadd.f32 %v10091_v45, %v3289_v51  ;;  %v3529_v21 = vmax.f32 %v3295_v33, 0.0 }
 0x75b   :  { %v3528_v49 = vmax.f32 %v3290_v9, 0.0 }
 0x75d   :  { %7688 = vmatprep.mubr.f32.mxu1 %v3528_v49 }
 0x75e   :  { %v7589_v61 = vpop.f32.mrf.mxu1  ;;  %7689 = vmatmul.mubr.f32.vlgmr.msra.gmra.mxu1 %v3529_v21 }
 0x75f   :  { %v3305_v37 = vadd.f32 %v7589_v61, %v10091_v45 }
 0x760   :  { %v3299_v35 = vpop.f32.mrf.mxu1 }
 0x761   :  { %v3300_v15 = vadd.f32 %v10091_v45, %v3299_v35  ;;  %v3531_v39 = vmax.f32 %v3305_v37, 0.0 }
 0x763   :  { %v3530_v59 = vmax.f32 %v3300_v15, 0.0 }
 0x765   :  { %7691 = vmatprep.mubr.f32.mxu1 %v3530_v59 }
 0x766   :  { %v7592_v41 = vpop.f32.mrf.mxu1  ;;  %7692 = vmatmul.mubr.f32.gmra.mxu1 %v3531_v39 }
 0x767   :  { %v3315_v16 = vadd.f32 %v7592_v41, %v10091_v45 }
 0x768   :  { %v3309_v23 = vpop.f32.mrf.mxu1 }
 0x769   :  { %v3310_v10 = vadd.f32 %v10091_v45, %v3309_v23  ;;  %v3533_v30 = vmax.f32 %v3315_v16, 0.0 }
 0x76b   :  { %v3532_v47 = vmax.f32 %v3310_v10, 0.0 }
 0x76d   :  { %7694 = vmatprep.mubr.f32.mxu1 %v3532_v47 }
 0x76e   :  { %v7595_v27 = vpop.f32.mrf.mxu1  ;;  %7695 = vmatmul.mubr.f32.gmra.mxu1 %v3533_v30 }
 0x76f   :  { %v3325_v33 = vadd.f32 %v7595_v27, %v10091_v45 }
 0x770   :  { %v3319_v51 = vpop.f32.mrf.mxu1 }
 0x771   :  { %v3320_v9 = vadd.f32 %v10091_v45, %v3319_v51  ;;  %v3535_v21 = vmax.f32 %v3325_v33, 0.0 }
 0x773   :  { %v3534_v49 = vmax.f32 %v3320_v9, 0.0 }
 0x775   :  { %7697 = vmatprep.mubr.f32.mxu1 %v3534_v49 }
 0x776   :  { %v7598_v61 = vpop.f32.mrf.mxu1  ;;  %7698 = vmatmul.mubr.f32.gmra.mxu1 %v3535_v21 }
 0x777   :  { %v3335_v37 = vadd.f32 %v7598_v61, %v10091_v45 }
 0x778   :  { %v3329_v35 = vpop.f32.mrf.mxu1 }
 0x779   :  { %v3330_v15 = vadd.f32 %v10091_v45, %v3329_v35  ;;  %v3537_v39 = vmax.f32 %v3335_v37, 0.0 }
 0x77b   :  { %v3536_v59 = vmax.f32 %v3330_v15, 0.0 }
 0x77d   :  { %7700 = vmatprep.mubr.f32.mxu1 %v3536_v59 }
 0x77e   :  { %v7601_v41 = vpop.f32.mrf.mxu1  ;;  %7701 = vmatmul.mubr.f32.gmra.mxu1 %v3537_v39 }
 0x77f   :  { %v3345_v16 = vadd.f32 %v7601_v41, %v10091_v45 }
 0x780   :  { %v3339_v23 = vpop.f32.mrf.mxu1 }
 0x781   :  { %v3340_v10 = vadd.f32 %v10091_v45, %v3339_v23  ;;  %v3539_v30 = vmax.f32 %v3345_v16, 0.0 }
 0x783   :  { %v3538_v47 = vmax.f32 %v3340_v10, 0.0 }
 0x785   :  { %7703 = vmatprep.mubr.f32.mxu1 %v3538_v47 }
 0x786   :  { %v7604_v27 = vpop.f32.mrf.mxu1  ;;  %7704 = vmatmul.mubr.f32.gmra.mxu1 %v3539_v30 }
 0x787   :  { %v3355_v33 = vadd.f32 %v7604_v27, %v10091_v45 }
 0x788   :  { %v3349_v51 = vpop.f32.mrf.mxu1 }
 0x789   :  { %v3350_v9 = vadd.f32 %v10091_v45, %v3349_v51  ;;  %v3541_v21 = vmax.f32 %v3355_v33, 0.0 }
 0x78b   :  { %v3540_v49 = vmax.f32 %v3350_v9, 0.0 }
 0x78d   :  { %7706 = vmatprep.mubr.f32.mxu1 %v3540_v49 }
 0x78e   :  { %v7607_v61 = vpop.f32.mrf.mxu1  ;;  %7707 = vmatmul.mubr.f32.gmra.mxu1 %v3541_v21 }
 0x78f   :  { %v3365_v37 = vadd.f32 %v7607_v61, %v10091_v45 }
 0x790   :  { %v3359_v35 = vpop.f32.mrf.mxu1 }
 0x791   :  { %v3360_v15 = vadd.f32 %v10091_v45, %v3359_v35  ;;  %v3543_v39 = vmax.f32 %v3365_v37, 0.0 }
 0x793   :  { %v3542_v59 = vmax.f32 %v3360_v15, 0.0 }
 0x795   :  { %7709 = vmatprep.mubr.f32.mxu1 %v3542_v59 }
 0x796   :  { %v7610_v41 = vpop.f32.mrf.mxu1  ;;  %7710 = vmatmul.mubr.f32.gmra.mxu1 %v3543_v39 }
 0x797   :  { %v3375_v16 = vadd.f32 %v7610_v41, %v10091_v45 }
 0x798   :  { %v3369_v23 = vpop.f32.mrf.mxu1 }
 0x799   :  { %v3370_v10 = vadd.f32 %v10091_v45, %v3369_v23  ;;  %v3545_v30 = vmax.f32 %v3375_v16, 0.0 }
 0x79b   :  { %v3544_v47 = vmax.f32 %v3370_v10, 0.0 }
 0x79d   :  { %7712 = vmatprep.mubr.f32.mxu1 %v3544_v47 }
 0x79e   :  { %v7613_v27 = vpop.f32.mrf.mxu1  ;;  %7713 = vmatmul.mubr.f32.gmra.mxu1 %v3545_v30 }
 0x79f   :  { %v3385_v33 = vadd.f32 %v7613_v27, %v10091_v45 }
 0x7a0   :  { %v3379_v51 = vpop.f32.mrf.mxu1 }
 0x7a1   :  { %v3380_v9 = vadd.f32 %v10091_v45, %v3379_v51  ;;  %v3547_v21 = vmax.f32 %v3385_v33, 0.0 }
 0x7a3   :  { %v3546_v49 = vmax.f32 %v3380_v9, 0.0 }
 0x7a5   :  { %7715 = vmatprep.mubr.f32.mxu1 %v3546_v49 }
 0x7a6   :  { %v7616_v61 = vpop.f32.mrf.mxu1  ;;  %7716 = vmatmul.mubr.f32.gmra.mxu1 %v3547_v21 }
 0x7a7   :  { %v3395_v37 = vadd.f32 %v7616_v61, %v10091_v45 }
 0x7a8   :  { %v3389_v35 = vpop.f32.mrf.mxu1 }
 0x7a9   :  { %v3390_v15 = vadd.f32 %v10091_v45, %v3389_v35  ;;  %v3549_v39 = vmax.f32 %v3395_v37, 0.0 }
 0x7ab   :  { %v3548_v59 = vmax.f32 %v3390_v15, 0.0 }
 0x7ad   :  { %7718 = vmatprep.mubr.f32.mxu1 %v3548_v59 }
 0x7ae   :  { %v7619_v41 = vpop.f32.mrf.mxu1  ;;  %7719 = vmatmul.mubr.f32.gmra.mxu1 %v3549_v39 }
 0x7af   :  { %v3405_v16 = vadd.f32 %v7619_v41, %v10091_v45 }
 0x7b0   :  { %v3399_v23 = vpop.f32.mrf.mxu1 }
 0x7b1   :  { %v3400_v10 = vadd.f32 %v10091_v45, %v3399_v23  ;;  %v3551_v30 = vmax.f32 %v3405_v16, 0.0 }
 0x7b3   :  { %v3550_v47 = vmax.f32 %v3400_v10, 0.0 }
 0x7b5   :  { %7721 = vmatprep.mubr.f32.mxu1 %v3550_v47 }
 0x7b6   :  { %v7622_v27 = vpop.f32.mrf.mxu1  ;;  %7722 = vmatmul.mubr.f32.gmra.mxu1 %v3551_v30 }
 0x7b7   :  { %v3415_v33 = vadd.f32 %v7622_v27, %v10091_v45 }
 0x7b8   :  { %v3409_v51 = vpop.f32.mrf.mxu1 }
 0x7b9   :  { %v3410_v9 = vadd.f32 %v10091_v45, %v3409_v51  ;;  %v3553_v21 = vmax.f32 %v3415_v33, 0.0 }
 0x7bb   :  { %v3552_v49 = vmax.f32 %v3410_v9, 0.0 }
 0x7bd   :  { %7724 = vmatprep.mubr.f32.mxu1 %v3552_v49 }
 0x7be   :  { %v7625_v61 = vpop.f32.mrf.mxu1  ;;  %7725 = vmatmul.mubr.f32.gmra.mxu1 %v3553_v21 }
 0x7bf   :  { %v3425_v37 = vadd.f32 %v7625_v61, %v10091_v45 }
 0x7c0   :  { %v3419_v35 = vpop.f32.mrf.mxu1 }
 0x7c1   :  { %v3420_v15 = vadd.f32 %v10091_v45, %v3419_v35  ;;  %v3555_v39 = vmax.f32 %v3425_v37, 0.0 }
 0x7c3   :  { %v3554_v59 = vmax.f32 %v3420_v15, 0.0 }
 0x7c5   :  { %7727 = vmatprep.mubr.f32.mxu1 %v3554_v59 }
 0x7c6   :  { %v7628_v41 = vpop.f32.mrf.mxu1  ;;  %7728 = vmatmul.mubr.f32.gmra.mxu1 %v3555_v39 }
 0x7c7   :  { %v3435_v16 = vadd.f32 %v7628_v41, %v10091_v45 }
 0x7c8   :  { %v3429_v23 = vpop.f32.mrf.mxu1 }
 0x7c9   :  { %v3430_v10 = vadd.f32 %v10091_v45, %v3429_v23  ;;  %v3557_v30 = vmax.f32 %v3435_v16, 0.0 }
 0x7cb   :  { %v3556_v47 = vmax.f32 %v3430_v10, 0.0 }
 0x7cd   :  { %7730 = vmatprep.mubr.f32.mxu1 %v3556_v47 }
 0x7ce   :  { %v7631_v27 = vpop.f32.mrf.mxu1  ;;  %7731 = vmatmul.mubr.f32.gmra.mxu1 %v3557_v30 }
 0x7cf   :  { %v3445_v33 = vadd.f32 %v7631_v27, %v10091_v45 }
 0x7d0   :  { %v3439_v51 = vpop.f32.mrf.mxu1 }
 0x7d1   :  { %v3440_v9 = vadd.f32 %v10091_v45, %v3439_v51  ;;  %v3559_v21 = vmax.f32 %v3445_v33, 0.0 }
 0x7d3   :  { %v3558_v49 = vmax.f32 %v3440_v9, 0.0 }
 0x7d5   :  { %7733 = vmatprep.mubr.f32.mxu1 %v3558_v49 }
 0x7d6   :  { %v7634_v61 = vpop.f32.mrf.mxu1  ;;  %7734 = vmatmul.mubr.f32.gmra.mxu1 %v3559_v21 }
 0x7d7   :  { %v3455_v37 = vadd.f32 %v7634_v61, %v10091_v45 }
 0x7d8   :  { %v3449_v35 = vpop.f32.mrf.mxu1 }
 0x7d9   :  { %v3450_v15 = vadd.f32 %v10091_v45, %v3449_v35  ;;  %v3561_v39 = vmax.f32 %v3455_v37, 0.0 }
 0x7db   :  { %v3560_v59 = vmax.f32 %v3450_v15, 0.0 }
 0x7dd   :  { %7736 = vmatprep.mubr.f32.mxu1 %v3560_v59 }
 0x7de   :  { %v7637_v41 = vpop.f32.mrf.mxu1  ;;  %7737 = vmatmul.mubr.f32.gmra.mxu1 %v3561_v39 }
 0x7df   :  { %v3465_v16 = vadd.f32 %v7637_v41, %v10091_v45 }
 0x7e0   :  { %v3459_v23 = vpop.f32.mrf.mxu1 }
 0x7e1   :  { %v3460_v10 = vadd.f32 %v10091_v45, %v3459_v23  ;;  %v3563_v30 = vmax.f32 %v3465_v16, 0.0 }
 0x7e3   :  { %v3562_v47 = vmax.f32 %v3460_v10, 0.0 }
 0x7e5   :  { %7739 = vmatprep.mubr.f32.mxu1 %v3562_v47 }
 0x7e6   :  { %v7640_v27 = vpop.f32.mrf.mxu1  ;;  %7740 = vmatmul.mubr.f32.gmra.mxu1 %v3563_v30 }
 0x7e7   :  { %v3475_v33 = vadd.f32 %v7640_v27, %v10091_v45 }
 0x7e8   :  { %v3469_v51 = vpop.f32.mrf.mxu1 }
 0x7e9   :  { %v3470_v9 = vadd.f32 %v10091_v45, %v3469_v51  ;;  %v3565_v21 = vmax.f32 %v3475_v33, 0.0 }
 0x7eb   :  { %v3564_v49 = vmax.f32 %v3470_v9, 0.0 }
 0x7ed   :  { %7742 = vmatprep.mubr.f32.mxu1 %v3564_v49 }
 0x7ee   :  { %v7643_v61 = vpop.f32.mrf.mxu1  ;;  %7743 = vmatmul.mubr.f32.gmra.mxu1 %v3565_v21 }
 0x7ef   :  { %v3485_v37 = vadd.f32 %v7643_v61, %v10091_v45 }
 0x7f0   :  { %v3479_v35 = vpop.f32.mrf.mxu1 }
 0x7f1   :  { %v3480_v15 = vadd.f32 %v10091_v45, %v3479_v35  ;;  %v3567_v39 = vmax.f32 %v3485_v37, 0.0 }
 0x7f3   :  { %v3566_v59 = vmax.f32 %v3480_v15, 0.0 }
 0x7f5   :  { %7745 = vmatprep.mubr.f32.mxu1 %v3566_v59 }
 0x7f6   :  { %v7646_v41 = vpop.f32.mrf.mxu1  ;;  %7746 = vmatmul.mubr.f32.gmra.mxu1 %v3567_v39 }
 0x7f7   :  { %v3495_v16 = vadd.f32 %v7646_v41, %v10091_v45 }
 0x7f8   :  { %v3489_v23 = vpop.f32.mrf.mxu1 }
 0x7f9   :  { %v3490_v10 = vadd.f32 %v10091_v45, %v3489_v23  ;;  %v3569_v30 = vmax.f32 %v3495_v16, 0.0 }
 0x7fb   :  { %v3568_v47 = vmax.f32 %v3490_v10, 0.0 }
 0x7fd   :  { %7748 = vmatprep.mubr.f32.mxu1 %v3568_v47 }
 0x7fe   :  { %v7649_v27 = vpop.f32.mrf.mxu1  ;;  %7749 = vmatmul.mubr.f32.gmra.mxu1 %v3569_v30 }
 0x7ff   :  { %v3505_v33 = vadd.f32 %v7649_v27, %v10091_v45 }
 0x800   :  { %v3499_v51 = vpop.f32.mrf.mxu1 }
 0x801   :  { %v3500_v9 = vadd.f32 %v10091_v45, %v3499_v51  ;;  %v3571_v21 = vmax.f32 %v3505_v33, 0.0 }
 0x803   :  { %v3570_v49 = vmax.f32 %v3500_v9, 0.0 }
 0x805   :  { %7751 = vmatprep.mubr.f32.mxu1 %v3570_v49 }
 0x806   :  { %v7652_v61 = vpop.f32.mrf.mxu1  ;;  %7752 = vmatmul.mubr.f32.gmra.mxu1 %v3571_v21 }
 0x807   :  { %v3515_v37 = vadd.f32 %v7652_v61, %v10091_v45 }
 0x808   :  { %v3509_v35 = vpop.f32.mrf.mxu1 }
 0x809   :  { %v3510_v15 = vadd.f32 %v10091_v45, %v3509_v35  ;;  %v3573_v39 = vmax.f32 %v3515_v37, 0.0 }
 0x80b   :  { %v3572_v59 = vmax.f32 %v3510_v15, 0.0 }
 0x80d   :  { %7754 = vmatprep.mubr.f32.mxu1 %v3572_v59 }
 0x80e   :  { %v7655_v41 = vpop.f32.mrf.mxu1  ;;  %7755 = vmatmul.mubr.f32.gmra.mxu1 %v3573_v39 }
 0x80f   :  { %v3525_v16 = vadd.f32 %v7655_v41, %v10091_v45 }
 0x810   :  { %v3519_v23 = vpop.f32.mrf.mxu1 }
 0x811   :  { %v3520_v10 = vadd.f32 %v10091_v45, %v3519_v23  ;;  %v3575_v30 = vmax.f32 %v3525_v16, 0.0 }
 0x813   :  { %v3574_v47 = vmax.f32 %v3520_v10, 0.0 }
 0x815   :  { %7757 = vmatprep.mubr.f32.mxu1 %v3574_v47 }
 0x816   :  { %7758 = vmatmul.mubr.f32.gmra.mxu1 %v3575_v30 }
 0x817   :  { %4294 = vmatprep.mubr.f32.mxu1 %v11727_v17  ;;  %v10151_v17 = vld [vmem:[%s11093_s8 + $0x1] ss:$0 sm:$0xff] }
 0x81e   :  { %v10142_v27 = vpop.f32.mrf.mxu1 }
 0x820   :  { %v10144_v33 = vpop.f32.mrf.mxu1 }
 0x826   :  { %v7693_v51 = vpop.f32.mrf.mxu1 }
 0x828   :  { %v10146_v9 = vpop.f32.mrf.mxu1 }
 0x82e   :  { %v7696_v49 = vpop.f32.mrf.mxu1 }
 0x830   :  { %v3687_v21 = vpop.f32.mrf.mxu1 }
 0x836   :  { %v7699_v61 = vpop.f32.mrf.mxu1 }
 0x838   :  { %v3697_v37 = vpop.f32.mrf.mxu1 }
 0x83e   :  { %v7702_v35 = vpop.f32.mrf.mxu1 }
 0x840   :  { %v3707_v15 = vpop.f32.mrf.mxu1 }
 0x846   :  { %v7705_v45 = vpop.f32.mrf.mxu1 }
 0x847   :  { %v3723_v28 = vadd.f32 %v7705_v45, %v10151_v17  ;;  %v11876_v45 = vld [vmem:[#allocation29_spill] sm:$0xff] }
 0x848   :  { %v3717_v59 = vpop.f32.mrf.mxu1 }
 0x84e   :  { %v7708_v39 = vpop.f32.mrf.mxu1 }
 0x84f   :  { %v3733_v23 = vadd.f32 %v7708_v39, %v10151_v17  ;;  %v3718_v39 = vadd.f32 %v10151_v17, %v3717_v59  ;;  %v11877_v59 = vld [vmem:[#allocation30_spill] sm:$0xff] }
 0x850   :  { %v3727_v41 = vpop.f32.mrf.mxu1 }
 0x851   :  { %v3728_v30 = vadd.f32 %v10151_v17, %v3727_v41  ;;  %v10162_v32 = vadd.f32 %v3733_v23, %v11873_v25  ;;  %v3713_v25 = vadd.f32 %v7702_v35, %v10151_v17  ;;  %v10178_v41 = vadd.f32 %v3723_v28, %v11876_v45  ;;  %v11878_v35 = vld [vmem:[#allocation31_spill] sm:$0xff] }
 0x852   :  { %v10186_v23 = vadd.f32 %v3718_v39, %v11877_v59  ;;  %v3703_v28 = vadd.f32 %v7699_v61, %v10151_v17  ;;  %v11879_v39 = vld [vmem:[#allocation32_spill] sm:$0xff]  ;;  %v3693_v61 = vadd.f32 %v7696_v49, %v10151_v17  ;;  %v3683_v49 = vadd.f32 %v7693_v51, %v10151_v17 }
 0x854   :  { %v11467_v45 = vmax.f32 %v10186_v23, 0.0 }
 0x856   :  { %v7711_v16 = vpop.f32.mrf.mxu1 }
 0x857   :  { %v3743_v10 = vadd.f32 %v7711_v16, %v10151_v17  ;;  %v11875_v16 = vld [vmem:[#allocation28_spill] sm:$0xff] }
 0x858   :  { %v3737_v47 = vpop.f32.mrf.mxu1  ;;  %v10170_v55 = vadd.f32 %v3728_v30, %v11875_v16  ;;  %v11466_v30 = vmax.f32 %v10178_v41, 0.0 }
 0x859   :  { %v10157_v31 = vadd.f32 %v3743_v10, %v11872_v18  ;;  %v3738_v29 = vadd.f32 %v10151_v17, %v3737_v47  ;;  %v10194_v47 = vadd.f32 %v3713_v25, %v11878_v35  ;;  %v11880_v25 = vld [vmem:[#allocation33_spill] sm:$0xff] }
 0x85a   :  { %v11470_v10 = vmax.f32 %v10170_v55, 0.0  ;;  %v10210_v59 = vadd.f32 %v3703_v28, %v11880_v25  ;;  %v11882_v28 = vld [vmem:[#allocation35_spill] sm:$0xff] }
 0x85b   :  { %v11479_v56 = vmax.f32 %v10157_v31, 0.0  ;;  %v10166_v42 = vadd.f32 %v3738_v29, %v11874_v50  ;;  %v11473_v29 = vmax.f32 %v10162_v32, 0.0  ;;  %v3708_v50 = vadd.f32 %v10151_v17, %v3707_v15 }
 0x85c   :  { %v3698_v15 = vadd.f32 %v10151_v17, %v3697_v37  ;;  %v11468_v35 = vmax.f32 %v10194_v47, 0.0  ;;  %v3688_v37 = vadd.f32 %v10151_v17, %v3687_v21  ;;  %v10226_v25 = vadd.f32 %v3693_v61, %v11882_v28  ;;  %v11884_v28 = vld [vmem:[#allocation37_spill] sm:$0xff] }
 0x85d   :  { %v11478_v18 = vmax.f32 %v10166_v42, 0.0  ;;  %4231 = vmatpush1.msra.mxu1 %v11479_v56  ;;  %v10202_v16 = vadd.f32 %v3708_v50, %v11879_v39  ;;  %v11881_v50 = vld [vmem:[#allocation34_spill] sm:$0xff]  ;;  %v3673_v61 = vadd.f32 %v10142_v27, %v10151_v17 }
 0x85e   :  { %4232 = vmatprep.subr.mxu1 %v11679_v20  ;;  %v10218_v39 = vadd.f32 %v3698_v15, %v11881_v50  ;;  %v10231_v21 = vpop.f32.mrf.mxu1  ;;  %v3678_v15 = vadd.f32 %v10151_v17, %v10146_v9  ;;  %v11883_v50 = vld [vmem:[#allocation36_spill] sm:$0xff] }
 0x85f   :  { %4233 = vmatpush1.msra.mxu1 %v11478_v18 }
 0x860   :  { %4234 = vmatprep.subr.mxu1 %v11679_v20  ;;  %v11472_v51 = vmax.f32 %v10218_v39, 0.0  ;;  %v10251_v9 = vpop.f32.mrf.mxu1 }
 0x861   :  { %4235 = vmatpush1.msra.mxu1 %v11473_v29 }
 0x862   :  { %4236 = vmatprep.subr.mxu1 %v11679_v20 }
 0x863   :  { %4237 = vmatpush1.msra.mxu1 %v11470_v10  ;;  %v11474_v10 = vmax.f32 %v10226_v25, 0.0 }
 0x864   :  { %4238 = vmatprep.subr.mxu1 %v11679_v20 }
 0x865   :  { %4239 = vmatpush1.msra.mxu1 %v11466_v30  ;;  %v11469_v30 = vmax.f32 %v10202_v16, 0.0 }
 0x866   :  { %4240 = vmatprep.subr.mxu1 %v11679_v20 }
 0x867   :  { %4241 = vmatpush1.msra.mxu1 %v11467_v45  ;;  %v11471_v45 = vmax.f32 %v10210_v59, 0.0 }
 0x868   :  { %4242 = vmatprep.subr.mxu1 %v11679_v20 }
 0x869   :  { %4243 = vmatpush1.msra.mxu1 %v11468_v35  ;;  %v10237_v35 = vadd.f32 %v3688_v37, %v11883_v50  ;;  %v3668_v37 = vadd.f32 %v10151_v17, %v10144_v33  ;;  %v11885_v50 = vld [vmem:[#allocation38_spill] sm:$0xff]  ;;  %v11887_v33 = vld [vmem:[#allocation40_spill] sm:$0xff] }
 0x86a   :  { %4244 = vmatprep.subr.mxu1 %v11679_v20 }
 0x86b   :  { %4245 = vmatpush1.msra.mxu1 %v11469_v30  ;;  %v10246_v30 = vadd.f32 %v3683_v49, %v11884_v28  ;;  %v11476_v27 = vmax.f32 %v10237_v35, 0.0  ;;  %v10262_v49 = vpop.f32.mrf.mxu1  ;;  %v11886_v28 = vld [vmem:[#allocation39_spill] sm:$0xff] }
 0x86c   :  { %4246 = vmatprep.subr.mxu1 %v11679_v20 }
 0x86d   :  { %4247 = vmatpush1.msra.mxu1 %v11471_v45  ;;  %v10257_v45 = vadd.f32 %v3678_v15, %v11885_v50  ;;  %v11475_v29 = vmax.f32 %v10246_v30, 0.0  ;;  %v10273_v15 = vadd.f32 %v3668_v37, %v11887_v33 }
 0x86e   :  { %4248 = vmatprep.subr.mxu1 %v11679_v20 }
 0x86f   :  { %4249 = vmatpush1.msra.mxu1 %v11472_v51  ;;  %v10266_v51 = vadd.f32 %v3673_v61, %v11886_v28  ;;  %v11477_v50 = vmax.f32 %v10257_v45, 0.0  ;;  %v11483_v37 = vmax.f32 %v10273_v15, 0.0 }
 0x870   :  { %4250 = vmatprep.subr.mxu1 %v11679_v20 }
 0x871   :  { %4251 = vmatpush1.msra.mxu1 %v11474_v10  ;;  %v10278_v10 = vpop.f32.mrf.mxu1  ;;  %v11482_v61 = vmax.f32 %v10266_v51, 0.0 }
 0x872   :  { %4252 = vmatprep.subr.mxu1 %v11679_v20 }
 0x873   :  { %4253 = vmatpush1.msra.mxu1 %v11476_v27  ;;  %v7720_v28 = vpop.f32.mrf.mxu1 }
 0x874   :  { %4254 = vmatprep.subr.mxu1 %v11679_v20 }
 0x875   :  { %4255 = vmatpush1.msra.mxu1 %v11475_v29  ;;  %v10291_v33 = vpop.f32.mrf.mxu1 }
 0x876   :  { %4256 = vmatprep.subr.mxu1 %v11679_v20 }
 0x877   :  { %4257 = vmatpush1.msra.mxu1 %v11477_v50  ;;  %v7723_v29 = vpop.f32.mrf.mxu1 }
 0x878   :  { %4258 = vmatprep.subr.mxu1 %v11679_v20 }
 0x879   :  { %4259 = vmatpush1.msra.mxu1 %v11482_v61  ;;  %v3777_v27 = vpop.f32.mrf.mxu1 }
 0x87a   :  { %4260 = vmatprep.subr.mxu1 %v11679_v20 }
 0x87b   :  { %4261 = vmatpush1.msra.mxu1 %v11483_v37 }
 0x87c   :  { %4262 = vmatprep.subr.mxu1 %v11679_v20 }
 0x87e   :  { %v7726_v50 = vpop.f32.mrf.mxu1 }
 0x880   :  { %v3787_v18 = vpop.f32.mrf.mxu1 }
 0x886   :  { %v7729_v56 = vpop.f32.mrf.mxu1 }
 0x887   :  { %v3803_v13 = vadd.f32 %v7729_v56, %v10151_v17  ;;  %v11893_v56 = vld [vmem:[#allocation45_spill] sm:$0xff] }
 0x888   :  { %v3797_v62 = vpop.f32.mrf.mxu1 }
 0x889   :  { %v3798_v36 = vadd.f32 %v10151_v17, %v3797_v62  ;;  %v3788_v62 = vadd.f32 %v10151_v17, %v3787_v18 }
 0x88e   :  { %v7732_v34 = vpop.f32.mrf.mxu1 }
 0x88f   :  { %v3813_v61 = vadd.f32 %v7732_v34, %v10151_v17 }
 0x890   :  { %v3807_v63 = vpop.f32.mrf.mxu1 }
 0x891   :  { %v3808_v37 = vadd.f32 %v10151_v17, %v3807_v63  ;;  %v3935_v8 = vadd.f32 %v3813_v61, %v11889_v24  ;;  %v11892_v63 = vmax.f32 %v10157_v31, 0.0  ;;  %v11901_v61 = vld [vmem:[#allocation49_spill] sm:$0xff] }
 0x893   :  { %v3934_v34 = vadd.f32 %v3808_v37, %v11891_v4  ;;  %v3983_v24 = vmax.f32 %v3935_v8, 0.0  ;;  %v11895_v4 = vld [vmem:[#allocation46_spill] sm:$0xff] }
 0x895   :  { %v3982_v31 = vmax.f32 %v3934_v34, 0.0  ;;  %v11902_v34 = vmax.f32 %v10186_v23, 0.0  ;;  %v11905_v23 = vld [vmem:[#allocation51_spill] sm:$0xff] }
 0x896   :  { %v7735_v48 = vpop.f32.mrf.mxu1 }
 0x897   :  { %v3823_v3 = vadd.f32 %v7735_v48, %v10151_v17 }
 0x898   :  { %v3817_v60 = vpop.f32.mrf.mxu1 }
 0x899   :  { %v3937_v19 = vadd.f32 %v3823_v3, %v11888_v46  ;;  %v3818_v6 = vadd.f32 %v10151_v17, %v3817_v60  ;;  %v3793_v60 = vadd.f32 %v7726_v50, %v10151_v17  ;;  %v3933_v46 = vadd.f32 %v3803_v13, %v11893_v56  ;;  %v11899_v3 = vld [vmem:[#allocation48_spill] sm:$0xff] }
 0x89a   :  { %v3783_v13 = vadd.f32 %v7723_v29, %v10151_v17  ;;  %v3930_v18 = vadd.f32 %v3788_v62, %v11899_v3  ;;  %v11900_v50 = vmax.f32 %v10178_v41, 0.0  ;;  %v3773_v29 = vadd.f32 %v7720_v28, %v10151_v17 }
 0x89b   :  { %v3985_v22 = vmax.f32 %v3937_v19, 0.0  ;;  %v3936_v54 = vadd.f32 %v3818_v6, %v11890_v7  ;;  %v11894_v19 = vmax.f32 %v10166_v42, 0.0  ;;  %v11896_v7 = vmax.f32 %v10162_v32, 0.0 }
 0x89c   :  { %v3981_v42 = vmax.f32 %v3933_v46, 0.0  ;;  %v11898_v6 = vmax.f32 %v10170_v55, 0.0  ;;  %v3929_v37 = vadd.f32 %v3783_v13, %v11901_v61  ;;  %v11904_v28 = vmax.f32 %v10194_v47, 0.0 }
 0x89d   :  { %6545 = vmatprep.subr.mxu0 %v3985_v22  ;;  %4263 = vmatpush2.msra.mxu1 %v3985_v22  ;;  %v3984_v48 = vmax.f32 %v3936_v54, 0.0  ;;  %v3932_v54 = vadd.f32 %v3798_v36, %v11895_v4  ;;  %v11897_v22 = vld [vmem:[#allocation47_spill] sm:$0xff]  ;;  %v3778_v36 = vadd.f32 %v10151_v17, %v3777_v27  ;;  %v3768_v27 = vadd.f32 %v10151_v17, %v10291_v33 }
 0x89e   :  { %6546 = vmatpush3.msra.mxu0 %v11892_v63  ;;  %4264 = vmatprep.subr.mxu1 %v11679_v20  ;;  %v3931_v8 = vadd.f32 %v3793_v60, %v11897_v22  ;;  %v3978_v63 = vmax.f32 %v3930_v18, 0.0  ;;  %v3763_v60 = vadd.f32 %v10262_v49, %v10151_v17  ;;  %v3927_v56 = vadd.f32 %v3773_v29, %v11905_v23  ;;  %v11911_v22 = vld [vmem:[#allocation54_spill] sm:$0xff] }
 0x89f   :  { %6547 = vmatprep.subr.mxu0 %v3984_v48  ;;  %4265 = vmatpush2.msra.mxu1 %v3984_v48  ;;  %v3980_v32 = vmax.f32 %v3932_v54, 0.0  ;;  %v11903_v48 = vld [vmem:[#allocation50_spill] sm:$0xff]  ;;  %v3977_v46 = vmax.f32 %v3929_v37, 0.0  ;;  %v11906_v33 = vmax.f32 %v10202_v16, 0.0  ;;  %v3758_v47 = vadd.f32 %v10151_v17, %v10278_v10  ;;  %v11909_v16 = vld [vmem:[#allocation53_spill] sm:$0xff] }
 0x8a0   :  { %6548 = vmatpush3.msra.mxu0 %v11894_v19  ;;  %4266 = vmatprep.subr.mxu1 %v11679_v20  ;;  %v3979_v55 = vmax.f32 %v3931_v8, 0.0  ;;  %v3928_v41 = vadd.f32 %v3778_v36, %v11903_v48  ;;  %v11907_v19 = vld [vmem:[#allocation52_spill] sm:$0xff]  ;;  %v11908_v4 = vmax.f32 %v10210_v59, 0.0  ;;  %v3753_v54 = vadd.f32 %v10231_v21, %v10151_v17  ;;  %v11913_v36 = vld [vmem:[#allocation55_spill] sm:$0xff] }
 0x8a1   :  { %6549 = vmatprep.subr.mxu0 %v3983_v24  ;;  %4267 = vmatpush2.msra.mxu1 %v3983_v24  ;;  %v10341_v24 = vpop.f32.mrf.mxu1  ;;  %v3926_v62 = vadd.f32 %v3768_v27, %v11907_v19  ;;  %v11910_v10 = vmax.f32 %v10218_v39, 0.0  ;;  %v3748_v59 = vadd.f32 %v10151_v17, %v10251_v9  ;;  %v3924_v8 = vadd.f32 %v3758_v47, %v11911_v22  ;;  %v11915_v9 = vld [vmem:[#allocation57_spill] sm:$0xff]  ;;  %v11926_v19 = vld [vmem:[#allocation92_spill] sm:$0xff] }
 0x8a2   :  { %6550 = vmatpush3.msra.mxu0 %v11896_v7  ;;  %4268 = vmatprep.subr.mxu1 %v11679_v20  ;;  %v3976_v49 = vmax.f32 %v3928_v41, 0.0  ;;  %v3975_v7 = vmax.f32 %v3927_v56, 0.0  ;;  %v3923_v39 = vadd.f32 %v3753_v54, %v11913_v36  ;;  %v11914_v18 = vmax.f32 %v10237_v35, 0.0  ;;  %v11924_v56 = vld [vmem:[#allocation89_spill] sm:$0xff]  ;;  %v11928_v54 = vld [vmem:[#allocation94_spill] sm:$0xff]  ;;  %v11932_v36 = vld [vmem:[#allocation96_spill] sm:$0xff] }
 0x8a3   :  { %6551 = vmatprep.subr.mxu0 %v3982_v31  ;;  %4269 = vmatpush2.msra.mxu1 %v3982_v31  ;;  %v3925_v31 = vadd.f32 %v3763_v60, %v11909_v16  ;;  %v10355_v13 = vpop.f32.mrf.mxu1  ;;  %v3974_v21 = vmax.f32 %v3926_v62, 0.0  ;;  %v11917_v35 = vmax.f32 %v10257_v45, 0.0  ;;  %v11919_v27 = vmax.f32 %v10273_v15, 0.0  ;;  %v11920_v45 = vld [vmem:[#allocation58_spill] sm:$0xff]  ;;  %v11927_v62 = vld [vmem:[#allocation68_spill] sm:$0xff] }
 0x8a4   :  { %6552 = vmatpush3.msra.mxu0 %v11898_v6  ;;  %4270 = vmatprep.subr.mxu1 %v11679_v20  ;;  %v11912_v6 = vmax.f32 %v10226_v25, 0.0  ;;  %v11916_v25 = vmax.f32 %v10246_v30, 0.0  ;;  %v3971_v61 = vmax.f32 %v3923_v39, 0.0  ;;  %v11923_v60 = vld [vmem:[#allocation62_spill] sm:$0xff] }
 0x8a5   :  { %6553 = vmatprep.subr.mxu0 %v3981_v42  ;;  %4271 = vmatpush2.msra.mxu1 %v3981_v42  ;;  %v3973_v3 = vmax.f32 %v3925_v31, 0.0  ;;  %v11929_v31 = vld [vmem:[#allocation69_spill] sm:$0xff] }
 0x8a6   :  { %6554 = vmatpush3.msra.mxu0 %v11900_v50  ;;  %4272 = vmatprep.subr.mxu1 %v11679_v20  ;;  %v10363_v42 = vpop.f32.mrf.mxu1  ;;  %v3972_v50 = vmax.f32 %v3924_v8, 0.0  ;;  %v11931_v8 = vld [vmem:[#allocation72_spill] sm:$0xff] }
 0x8a7   :  { %6555 = vmatprep.subr.mxu0 %v3980_v32  ;;  %4273 = vmatpush2.msra.mxu1 %v3980_v32  ;;  %v3922_v32 = vadd.f32 %v3748_v59, %v11915_v9  ;;  %v11930_v59 = vld [vmem:[#allocation95_spill] sm:$0xff] }
 0x8a8   :  { %6556 = vmatpush3.msra.mxu0 %v11902_v34  ;;  %4274 = vmatprep.subr.mxu1 %v11679_v20  ;;  %v10373_v29 = vpop.f32.mrf.mxu1  ;;  %v11918_v34 = vmax.f32 %v10266_v51, 0.0 }
 0x8a9   :  { %6557 = vmatprep.subr.mxu0 %v3979_v55  ;;  %4275 = vmatpush2.msra.mxu1 %v3979_v55  ;;  %v3970_v55 = vmax.f32 %v3922_v32, 0.0  ;;  %v11934_v32 = vld [vmem:[#allocation97_spill] sm:$0xff] }
 0x8aa   :  { %6558 = vmatpush3.msra.mxu0 %v11904_v28  ;;  %4276 = vmatprep.subr.mxu1 %v11679_v20 }
 0x8ab   :  { %6559 = vmatprep.subr.mxu0 %v3978_v63  ;;  %4277 = vmatpush2.msra.mxu1 %v3978_v63 }
 0x8ac   :  { %6560 = vmatpush3.msra.mxu0 %v11906_v33  ;;  %4278 = vmatprep.subr.mxu1 %v11679_v20 }
 0x8ad   :  { %6561 = vmatprep.subr.mxu0 %v3977_v46  ;;  %4279 = vmatpush2.msra.mxu1 %v3977_v46  ;;  %v11925_v46 = vld [vmem:[#allocation65_spill] sm:$0xff] }
 0x8ae   :  { %6562 = vmatpush3.msra.mxu0 %v11908_v4  ;;  %4280 = vmatprep.subr.mxu1 %v11679_v20  ;;  %v10378_v37 = vpop.f32.mrf.mxu1 }
 0x8af   :  { %6563 = vmatprep.subr.mxu0 %v3976_v49  ;;  %4281 = vmatpush2.msra.mxu1 %v3976_v49 }
 0x8b0   :  { %6564 = vmatpush3.msra.mxu0 %v11910_v10  ;;  %4282 = vmatprep.subr.mxu1 %v11679_v20  ;;  %v10386_v30 = vpop.f32.mrf.mxu1 }
 0x8b1   :  { %6565 = vmatprep.subr.mxu0 %v3975_v7  ;;  %4283 = vmatpush2.msra.mxu1 %v3975_v7 }
 0x8b2   :  { %6566 = vmatpush3.msra.mxu0 %v11912_v6  ;;  %4284 = vmatprep.subr.mxu1 %v11679_v20 }
 0x8b3   :  { %6567 = vmatprep.subr.mxu0 %v3974_v21  ;;  %4285 = vmatpush2.msra.mxu1 %v3974_v21 }
 0x8b4   :  { %6568 = vmatpush3.msra.mxu0 %v11914_v18  ;;  %4286 = vmatprep.subr.mxu1 %v11679_v20 }
 0x8b5   :  { %6569 = vmatprep.subr.mxu0 %v3973_v3  ;;  %4287 = vmatpush2.msra.mxu1 %v3973_v3  ;;  %v11933_v3 = vld [vmem:[#allocation73_spill] sm:$0xff] }
 0x8b6   :  { %6570 = vmatpush3.msra.mxu0 %v11916_v25  ;;  %4288 = vmatprep.subr.mxu1 %v11679_v20  ;;  %v7747_v48 = vpop.f32.mrf.mxu1  ;;  %v11935_v25 = vld [vmem:[#allocation76_spill] sm:$0xff] }
 0x8b7   :  { %6571 = vmatprep.subr.mxu0 %v3972_v50  ;;  %4289 = vmatpush2.msra.mxu1 %v3972_v50  ;;  %v3863_v22 = vadd.f32 %v7747_v48, %v10151_v17  ;;  %v3853_v50 = vadd.f32 %v10378_v37, %v10151_v17  ;;  %v11938_v37 = vld [vmem:[#allocation99_spill] sm:$0xff] }
 0x8b8   :  { %6572 = vmatpush3.msra.mxu0 %v11917_v35  ;;  %4290 = vmatprep.subr.mxu1 %v11679_v20  ;;  %v3857_v51 = vpop.f32.mrf.mxu1 }
 0x8b9   :  { %6573 = vmatprep.subr.mxu0 %v3971_v61  ;;  %4291 = vmatpush2.msra.mxu1 %v3971_v61  ;;  %v3858_v39 = vadd.f32 %v10151_v17, %v3857_v51  ;;  %v3945_v61 = vadd.f32 %v3863_v22, %v11935_v25  ;;  %v4155_v22 = vld [vmem:[#allocation13 + $0x160] sm:$0xff]  ;;  %v4150_v25 = vld [vmem:[#allocation13 + $0x138] sm:$0xff] }
 0x8ba   :  { %6574 = vmatpush3.msra.mxu0 %v11918_v34  ;;  %4292 = vmatprep.subr.mxu1 %v11679_v20  ;;  %v3848_v34 = vadd.f32 %v10151_v17, %v10386_v30  ;;  %v11940_v30 = vld [vmem:[#allocation100_spill] sm:$0xff] }
 0x8bb   :  { %6575 = vmatprep.subr.mxu0 %v3970_v55  ;;  %4293 = vmatpush2.msra.mxu1 %v3970_v55  ;;  %v11936_v55 = vld [vmem:[#allocation98_spill] sm:$0xff] }
 0x8bc   :  { %6576 = vmatpush3.msra.mxu0 %v11919_v27  ;;  %4295 = vmatmul.mubr.f32.vlgmr.msra.gmra.mxu1 %v11775_v0  ;;  %v11937_v27 = vld [vmem:[#allocation79_spill] sm:$0xff] }
 0x8bd   :  { %7760 = vmatprep.subr.mxu0 %v11679_v20  ;;  %4067 = vmatmul.mubr.f32.vlgmr.msra.gmra.mxu0 %v11920_v45  ;;  %v3944_v48 = vadd.f32 %v3858_v39, %v11937_v27  ;;  %v4153_v39 = vld [vmem:[#allocation13 + $0x150] sm:$0xff]  ;;  %v4148_v27 = vld [vmem:[#allocation13 + $0x128] sm:$0xff] }
 0x8be   :  { %7792 = vmatprep.mubr.msk.f32.mxu0 %vm8467_vm0, %v11679_v20  ;;  %4299 = vmatprep.mubr.f32.mxu1 %v11776_v5  ;;  %v7750_v41 = vpop.f32.mrf.mxu1 }
 0x8c0   :  { %4300 = vmatmul.mubr.f32.gmra.mxu1 %v11777_v52  ;;  %v3867_v0 = vpop.f32.mrf.mxu1 }
 0x8c1   :  { %4304 = vmatprep.mubr.f32.mxu1 %v11778_v38  ;;  %v3868_v16 = vadd.f32 %v10151_v17, %v3867_v0  ;;  %v11939_v0 = vld [vmem:[#allocation80_spill] sm:$0xff] }
 0x8c3   :  { %v3946_v18 = vadd.f32 %v3868_v16, %v11933_v3  ;;  %v4157_v16 = vld [vmem:[#allocation13 + $0x170] sm:$0xff]  ;;  %v4152_v3 = vld [vmem:[#allocation13 + $0x148] sm:$0xff] }
 0x8c4   :  { %4305 = vmatmul.mubr.f32.gmra.mxu1 %v11779_v12 }
 0x8c5   :  { %4309 = vmatprep.mubr.f32.mxu1 %v11780_v57  ;;  %v10467_v51 = vmax.f32 %v3946_v18, 0.0  ;;  %v11958_v18 = vld [vmem:[#allocation116_spill] sm:$0xff] }
 0x8c6   :  { %v7753_v15 = vpop.f32.mrf.mxu1 }
 0x8c8   :  { %4310 = vmatmul.mubr.f32.gmra.mxu1 %v11781_v44  ;;  %v3877_v5 = vpop.f32.mrf.mxu1 }
 0x8c9   :  { %4314 = vmatprep.mubr.f32.mxu1 %v11782_v40 }
 0x8cc   :  { %4315 = vmatmul.mubr.f32.gmra.mxu1 %v11783_v14 }
 0x8cd   :  { %4319 = vmatprep.mubr.f32.mxu1 %v11784_v2  ;;  %v11921_v2 = vld [vmem:[#allocation60_spill] sm:$0xff] }
 0x8ce   :  { %v7756_v52 = vpop.f32.mrf.mxu1 }
 0x8cf   :  { %v3893_v57 = vadd.f32 %v7756_v52, %v10151_v17  ;;  %v3838_v52 = vadd.f32 %v10151_v17, %v10373_v29  ;;  %v11944_v29 = vld [vmem:[#allocation102_spill] sm:$0xff] }
 0x8d0   :  { %4320 = vmatmul.mubr.f32.gmra.mxu1 %v11785_v1  ;;  %v3887_v38 = vpop.f32.mrf.mxu1 }
 0x8d1   :  { %4324 = vmatprep.mubr.f32.mxu1 %v11786_v43  ;;  %v3888_v14 = vadd.f32 %v10151_v17, %v3887_v38  ;;  %v3883_v43 = vadd.f32 %v7753_v15, %v10151_v17  ;;  %v3943_v15 = vadd.f32 %v3853_v50, %v11939_v0  ;;  %v11941_v38 = vld [vmem:[#allocation83_spill] sm:$0xff]  ;;  %v4151_v50 = vld [vmem:[#allocation13 + $0x140] sm:$0xff]  ;;  %v4146_v0 = vld [vmem:[#allocation13 + $0x118] sm:$0xff] }
 0x8d3   :  { %v3950_v33 = vadd.f32 %v3888_v14, %v11925_v46  ;;  %v3949_v49 = vadd.f32 %v3883_v43, %v11927_v62  ;;  %v11950_v46 = vld [vmem:[#allocation105_spill] sm:$0xff]  ;;  %v11952_v62 = vld [vmem:[#allocation107_spill] sm:$0xff] }
 0x8d4   :  { %4325 = vmatmul.mubr.f32.gmra.mxu1 %v11787_v26  ;;  %v11922_v26 = vld [vmem:[#allocation64_spill] sm:$0xff] }
 0x8d5   :  { %4329 = vmatprep.mubr.f32.mxu1 %v11788_v53  ;;  %v3951_v53 = vadd.f32 %v3893_v57, %v11922_v26  ;;  %v10437_v10 = vmax.f32 %v3950_v33, 0.0  ;;  %v10444_v6 = vmax.f32 %v3949_v49, 0.0  ;;  %v10483_v57 = vmax.f32 %v3944_v48, 0.0  ;;  %v4158_v49 = vld [vmem:[#allocation13 + $0x178] sm:$0xff]  ;;  %v11962_v48 = vld [vmem:[#allocation124_spill] sm:$0xff] }
 0x8d6   :  { %v7759_v12 = vpop.f32.mrf.mxu1 }
 0x8d7   :  { %v3903_v44 = vadd.f32 %v7759_v12, %v10151_v17  ;;  %v10430_v4 = vmax.f32 %v3951_v53, 0.0  ;;  %v3942_v12 = vadd.f32 %v3848_v34, %v11941_v38  ;;  %v11947_v53 = vld [vmem:[#allocation88_spill] sm:$0xff]  ;;  %v4144_v38 = vld [vmem:[#allocation13 + $0x108] sm:$0xff] }
 0x8d8   :  { %v3897_v40 = vpop.f32.mrf.mxu1  ;;  %4330 = vmatmul.mubr.f32.gmra.mxu1 %v11789_v11  ;;  %v3878_v11 = vadd.f32 %v10151_v17, %v3877_v5  ;;  %v10475_v5 = vmax.f32 %v3945_v61, 0.0  ;;  %v11960_v61 = vld [vmem:[#allocation120_spill] sm:$0xff] }
 0x8d9   :  { %v3953_v63 = vadd.f32 %v3903_v44, %v11921_v2  ;;  %v3898_v1 = vadd.f32 %v10151_v17, %v3897_v40  ;;  %4334 = vmatprep.mubr.f32.mxu1 %v11790_v58  ;;  %v3873_v58 = vadd.f32 %v7750_v41, %v10151_v17  ;;  %v3843_v41 = vadd.f32 %v10363_v42, %v10151_v17  ;;  %v11942_v42 = vld [vmem:[#allocation101_spill] sm:$0xff]  ;;  %v11943_v40 = vld [vmem:[#allocation84_spill] sm:$0xff] }
 0x8da   :  { %v3948_v7 = vadd.f32 %v3878_v11, %v11929_v31  ;;  %v3833_v44 = vadd.f32 %v10341_v24, %v10151_v17  ;;  %v10491_v2 = vmax.f32 %v3943_v15, 0.0  ;;  %v10499_v26 = vmax.f32 %v3942_v12, 0.0  ;;  %v11946_v24 = vld [vmem:[#allocation103_spill] sm:$0xff]  ;;  %v4149_v34 = vld [vmem:[#allocation13 + $0x130] sm:$0xff] }
 0x8db   :  { %v10417_v28 = vmax.f32 %v3953_v63, 0.0  ;;  %v3952_v23 = vadd.f32 %v3898_v1, %v11923_v60  ;;  %v3947_v21 = vadd.f32 %v3873_v58, %v11931_v8  ;;  %v3941_v14 = vadd.f32 %v3843_v41, %v11943_v40  ;;  %v11945_v1 = vld [vmem:[#allocation87_spill] sm:$0xff]  ;;  %v4154_v8 = vld [vmem:[#allocation13 + $0x158] sm:$0xff]  ;;  %v4147_v41 = vld [vmem:[#allocation13 + $0x120] sm:$0xff] }
 0x8dc   :  { %4335 = vmatmul.mubr.f32.gmra.mxu1 %v11924_v56  ;;  %v10451_v9 = vmax.f32 %v3948_v7, 0.0  ;;  %v3828_v63 = vadd.f32 %v10151_v17, %v10355_v13  ;;  %v3940_v43 = vadd.f32 %v3838_v52, %v11945_v1  ;;  %v3939_v60 = vadd.f32 %v3833_v44, %v11947_v53  ;;  %v11948_v56 = vld [vmem:[#allocation104_spill] sm:$0xff]  ;;  %v11949_v17 = vld [vmem:[#allocation91_spill] sm:$0xff]  ;;  %v4143_v44 = vld [vmem:[#allocation13 + $0x100] sm:$0xff] }
 0x8dd   :  { %v10423_v47 = vmax.f32 %v3952_v23, 0.0  ;;  %7761 = vmatpush3.msra.mxu0 %v10417_v28  ;;  %4339 = vmatprep.mubr.f32.mxu1 %v11926_v19  ;;  %v10459_v35 = vmax.f32 %v3947_v21, 0.0  ;;  %v10505_v23 = vmax.f32 %v3941_v14, 0.0  ;;  %v11951_v19 = vld [vmem:[#allocation106_spill] sm:$0xff]  ;;  %v4156_v31 = vld [vmem:[#allocation13 + $0x168] sm:$0xff]  ;;  %v11954_v7 = vld [vmem:[#allocation108_spill] sm:$0xff] }
 0x8de   :  { %7762 = vmatprep.subr.mxu0 %v11679_v20  ;;  %v3938_v13 = vadd.f32 %v3828_v63, %v11949_v17  ;;  %v10511_v11 = vmax.f32 %v3940_v43, 0.0  ;;  %v10516_v33 = vmax.f32 %v3939_v60, 0.0  ;;  %v11956_v21 = vld [vmem:[#allocation112_spill] sm:$0xff]  ;;  %v11969_v14 = vld [vmem:[#allocation138_spill] sm:$0xff] }
 0x8df   :  { %7763 = vmatpush3.msra.mxu0 %v10423_v47  ;;  %v11964_v15 = vld [vmem:[#allocation128_spill] sm:$0xff]  ;;  %v11971_v63 = vld [vmem:[#allocation142_spill] sm:$0xff] }
 0x8e0   :  { %7764 = vmatprep.subr.mxu0 %v11679_v20  ;;  %4340 = vmatmul.mubr.f32.gmra.mxu1 %v11928_v54  ;;  %v10521_v58 = vmax.f32 %v3938_v13, 0.0  ;;  %v11953_v54 = vld [vmem:[#allocation90_spill] sm:$0xff]  ;;  %v4145_v52 = vld [vmem:[#allocation13 + $0x110] sm:$0xff] }
 0x8e1   :  { %7765 = vmatpush3.msra.mxu0 %v10430_v4  ;;  %4344 = vmatprep.mubr.f32.mxu1 %v11930_v59  ;;  %v11955_v59 = vld [vmem:[#allocation110_spill] sm:$0xff]  ;;  %v11966_v12 = vld [vmem:[#allocation132_spill] sm:$0xff] }
 0x8e2   :  { %7766 = vmatprep.subr.mxu0 %v11679_v20  ;;  %v11968_v40 = vld [vmem:[#allocation136_spill] sm:$0xff]  ;;  %v11973_v43 = vld [vmem:[#allocation146_spill] sm:$0xff] }
 0x8e3   :  { %7767 = vmatpush3.msra.mxu0 %v10437_v10  ;;  %v11972_v1 = vld [vmem:[#allocation144_spill] sm:$0xff]  ;;  %v11975_v53 = vld [vmem:[#allocation150_spill] sm:$0xff] }
 0x8e4   :  { %7768 = vmatprep.subr.mxu0 %v11679_v20  ;;  %4345 = vmatmul.mubr.f32.gmra.mxu1 %v11932_v36  ;;  %v11957_v36 = vld [vmem:[#allocation114_spill] sm:$0xff]  ;;  %v11976_v60 = vld [vmem:[#allocation152_spill] sm:$0xff] }
 0x8e5   :  { %7769 = vmatpush3.msra.mxu0 %v10444_v6  ;;  %4349 = vmatprep.mubr.f32.mxu1 %v11934_v32  ;;  %v11959_v32 = vld [vmem:[#allocation118_spill] sm:$0xff]  ;;  %v11978_v17 = vld [vmem:[#allocation156_spill] sm:$0xff] }
 0x8e6   :  { %7770 = vmatprep.subr.mxu0 %v11679_v20  ;;  %v11979_v13 = vld [vmem:[#allocation158_spill] sm:$0xff] }
 0x8e7   :  { %7771 = vmatpush3.msra.mxu0 %v10451_v9 }
 0x8e8   :  { %7772 = vmatprep.subr.mxu0 %v11679_v20  ;;  %4350 = vmatmul.mubr.f32.gmra.mxu1 %v11936_v55  ;;  %v11961_v55 = vld [vmem:[#allocation122_spill] sm:$0xff] }
 0x8e9   :  { %7773 = vmatpush3.msra.mxu0 %v10459_v35  ;;  %4354 = vmatprep.mubr.f32.mxu1 %v11938_v37  ;;  %v11963_v37 = vld [vmem:[#allocation126_spill] sm:$0xff] }
 0x8ea   :  { %7774 = vmatprep.subr.mxu0 %v11679_v20 }
 0x8eb   :  { %7775 = vmatpush3.msra.mxu0 %v10467_v51 }
 0x8ec   :  { %7776 = vmatprep.subr.mxu0 %v11679_v20  ;;  %4355 = vmatmul.mubr.f32.gmra.mxu1 %v11940_v30  ;;  %v11965_v30 = vld [vmem:[#allocation130_spill] sm:$0xff] }
 0x8ed   :  { %7777 = vmatpush3.msra.mxu0 %v10475_v5  ;;  %4359 = vmatprep.mubr.f32.mxu1 %v11942_v42  ;;  %v11967_v42 = vld [vmem:[#allocation134_spill] sm:$0xff] }
 0x8ee   :  { %7778 = vmatprep.subr.mxu0 %v11679_v20 }
 0x8ef   :  { %7779 = vmatpush3.msra.mxu0 %v10483_v57 }
 0x8f0   :  { %7780 = vmatprep.subr.mxu0 %v11679_v20  ;;  %4360 = vmatmul.mubr.f32.gmra.mxu1 %v11944_v29  ;;  %v11970_v29 = vld [vmem:[#allocation140_spill] sm:$0xff] }
 0x8f1   :  { %7781 = vmatpush3.msra.mxu0 %v10491_v2  ;;  %4364 = vmatprep.mubr.f32.mxu1 %v11946_v24  ;;  %v11974_v24 = vld [vmem:[#allocation148_spill] sm:$0xff] }
 0x8f2   :  { %7782 = vmatprep.subr.mxu0 %v11679_v20 }
 0x8f3   :  { %7783 = vmatpush3.msra.mxu0 %v10499_v26 }
 0x8f4   :  { %7784 = vmatprep.subr.mxu0 %v11679_v20  ;;  %4365 = vmatmul.mubr.f32.gmra.mxu1 %v11948_v56  ;;  %v11977_v56 = vld [vmem:[#allocation154_spill] sm:$0xff] }
 0x8f5   :  { %7785 = vmatpush3.msra.mxu0 %v10505_v23  ;;  %4369 = vmatprep.mubr.f32.mxu1 %v11950_v46  ;;  %v11980_v46 = vld [vmem:[#allocation160_spill] sm:$0xff] }
 0x8f6   :  { %7786 = vmatprep.subr.mxu0 %v11679_v20 }
 0x8f7   :  { %7787 = vmatpush3.msra.mxu0 %v10511_v11 }
 0x8f8   :  { %7788 = vmatprep.subr.mxu0 %v11679_v20  ;;  %4370 = vmatmul.mubr.f32.gmra.mxu1 %v11951_v19  ;;  %v11981_v19 = vld [vmem:[#allocation162_spill] sm:$0xff] }
 0x8f9   :  { %7789 = vmatpush3.msra.mxu0 %v10516_v33  ;;  %4374 = vmatprep.mubr.f32.mxu1 %v11952_v62  ;;  %v11982_v62 = vld [vmem:[#allocation164_spill] sm:$0xff] }
 0x8fa   :  { %7790 = vmatprep.subr.mxu0 %v11679_v20 }
 0x8fb   :  { %7791 = vmatpush3.msra.mxu0 %v10521_v58 }
 0x8fc   :  { %7793 = vmatmul.mubr.f32.vlgmr.msra.gmra.mxu0 %v11953_v54  ;;  %7795 = vmatprep.subr.mxu0 %v11679_v20 }
 0x8fd   :  { %7796 = vmatpush3.msra.mxu0 %v4158_v49  ;;  %7827 = vmatprep.mubr.msk.f32.mxu0 %vm8467_vm0, %v11679_v20  ;;  %v11983_v49 = vld [vmem:[#allocation166_spill] sm:$0xff] }
 0x8fe   :  { %7797 = vmatprep.subr.mxu0 %v11679_v20  ;;  %4375 = vmatmul.mubr.f32.gmra.mxu1 %v11954_v7  ;;  %v11986_v7 = vld [vmem:[#allocation172_spill] sm:$0xff] }
 0x8ff   :  { %7798 = vmatpush3.msra.mxu0 %v4157_v16  ;;  %4379 = vmatprep.mubr.f32.mxu1 %v11955_v59  ;;  %v11984_v16 = vld [vmem:[#allocation168_spill] sm:$0xff]  ;;  %v11987_v59 = vld [vmem:[#allocation174_spill] sm:$0xff] }
 0x900   :  { %7799 = vmatprep.subr.mxu0 %v11679_v20 }
 0x901   :  { %7800 = vmatpush3.msra.mxu0 %v4156_v31  ;;  %v11985_v31 = vld [vmem:[#allocation170_spill] sm:$0xff] }
 0x902   :  { %7801 = vmatprep.subr.mxu0 %v11679_v20  ;;  %4380 = vmatmul.mubr.f32.gmra.mxu1 %v11956_v21  ;;  %v11990_v21 = vld [vmem:[#allocation180_spill] sm:$0xff] }
 0x903   :  { %7802 = vmatpush3.msra.mxu0 %v4155_v22  ;;  %4384 = vmatprep.mubr.f32.mxu1 %v11957_v36  ;;  %v11988_v22 = vld [vmem:[#allocation176_spill] sm:$0xff]  ;;  %v11991_v36 = vld [vmem:[#allocation181_spill] sm:$0xff] }
 0x904   :  { %7803 = vmatprep.subr.mxu0 %v11679_v20 }
 0x905   :  { %7804 = vmatpush3.msra.mxu0 %v4154_v8  ;;  %v11989_v8 = vld [vmem:[#allocation177_spill] sm:$0xff] }
 0x906   :  { %7805 = vmatprep.subr.mxu0 %v11679_v20  ;;  %4385 = vmatmul.mubr.f32.gmra.mxu1 %v11958_v18  ;;  %v11994_v18 = vld [vmem:[#allocation188_spill] sm:$0xff] }
 0x907   :  { %7806 = vmatpush3.msra.mxu0 %v4153_v39  ;;  %4389 = vmatprep.mubr.f32.mxu1 %v11959_v32  ;;  %v11992_v39 = vld [vmem:[#allocation184_spill] sm:$0xff]  ;;  %v11995_v32 = vld [vmem:[#allocation189_spill] sm:$0xff] }
 0x908   :  { %7807 = vmatprep.subr.mxu0 %v11679_v20 }
 0x909   :  { %7808 = vmatpush3.msra.mxu0 %v4152_v3  ;;  %v11993_v3 = vld [vmem:[#allocation185_spill] sm:$0xff] }
 0x90a   :  { %7809 = vmatprep.subr.mxu0 %v11679_v20  ;;  %4390 = vmatmul.mubr.f32.gmra.mxu1 %v11960_v61  ;;  %v11998_v61 = vld [vmem:[#allocation196_spill] sm:$0xff] }
 0x90b   :  { %7810 = vmatpush3.msra.mxu0 %v4151_v50  ;;  %4394 = vmatprep.mubr.f32.mxu1 %v11961_v55  ;;  %v11996_v50 = vld [vmem:[#allocation192_spill] sm:$0xff]  ;;  %v11999_v55 = vld [vmem:[#allocation197_spill] sm:$0xff] }
 0x90c   :  { %7811 = vmatprep.subr.mxu0 %v11679_v20 }
 0x90d   :  { %7812 = vmatpush3.msra.mxu0 %v4150_v25  ;;  %v11997_v25 = vld [vmem:[#allocation193_spill] sm:$0xff] }
 0x90e   :  { %7813 = vmatprep.subr.mxu0 %v11679_v20  ;;  %4395 = vmatmul.mubr.f32.gmra.mxu1 %v11962_v48  ;;  %v12002_v48 = vld [vmem:[#allocation203_spill] sm:$0xff] }
 0x90f   :  { %7814 = vmatpush3.msra.mxu0 %v4149_v34  ;;  %4399 = vmatprep.mubr.f32.mxu1 %v11963_v37  ;;  %v12000_v34 = vld [vmem:[#allocation200_spill] sm:$0xff] }
 0x910   :  { %7815 = vmatprep.subr.mxu0 %v11679_v20  ;;  %v12003_v37 = vld [vmem:[#allocation204_spill] sm:$0xff] }
 0x911   :  { %7816 = vmatpush3.msra.mxu0 %v4148_v27  ;;  %v12001_v27 = vld [vmem:[#allocation201_spill] sm:$0xff] }
 0x912   :  { %7817 = vmatprep.subr.mxu0 %v11679_v20  ;;  %4400 = vmatmul.mubr.f32.gmra.mxu1 %v11964_v15  ;;  %v12006_v15 = vld [vmem:[#allocation207_spill] sm:$0xff] }
 0x913   :  { %7818 = vmatpush3.msra.mxu0 %v4147_v41  ;;  %4404 = vmatprep.mubr.f32.mxu1 %v11965_v30  ;;  %v12004_v41 = vld [vmem:[#allocation205_spill] sm:$0xff]  ;;  %v12007_v30 = vld [vmem:[#allocation208_spill] sm:$0xff] }
 0x914   :  { %7819 = vmatprep.subr.mxu0 %v11679_v20 }
 0x915   :  { %7820 = vmatpush3.msra.mxu0 %v4146_v0  ;;  %v12005_v0 = vld [vmem:[#allocation206_spill] sm:$0xff] }
 0x916   :  { %7821 = vmatprep.subr.mxu0 %v11679_v20  ;;  %4405 = vmatmul.mubr.f32.gmra.mxu1 %v11966_v12  ;;  %v12010_v12 = vld [vmem:[#allocation211_spill] sm:$0xff] }
 0x917   :  { %7822 = vmatpush3.msra.mxu0 %v4145_v52  ;;  %4409 = vmatprep.mubr.f32.mxu1 %v11967_v42  ;;  %v12008_v52 = vld [vmem:[#allocation209_spill] sm:$0xff]  ;;  %v12011_v42 = vld [vmem:[#allocation212_spill] sm:$0xff] }
 0x918   :  { %7823 = vmatprep.subr.mxu0 %v11679_v20 }
 0x919   :  { %7824 = vmatpush3.msra.mxu0 %v4144_v38  ;;  %v12009_v38 = vld [vmem:[#allocation210_spill] sm:$0xff] }
 0x91a   :  { %7825 = vmatprep.subr.mxu0 %v11679_v20  ;;  %4410 = vmatmul.mubr.f32.gmra.mxu1 %v11968_v40  ;;  %v12013_v40 = vld [vmem:[#allocation214_spill] sm:$0xff] }
 0x91b   :  { %7826 = vmatpush3.msra.mxu0 %v4143_v44  ;;  %4414 = vmatprep.mubr.f32.mxu1 %v11969_v14  ;;  %v12012_v44 = vld [vmem:[#allocation213_spill] sm:$0xff]  ;;  %v12014_v14 = vld [vmem:[#allocation215_spill] sm:$0xff] }
 0x91c   :  { %7830 = vmatprep.subr.mxu0 %v10417_v28 }
 0x91e   :  { %4415 = vmatmul.mubr.f32.gmra.mxu1 %v11970_v29  ;;  %v12015_v29 = vld [vmem:[#allocation216_spill] sm:$0xff] }
 0x91f   :  { %4419 = vmatprep.mubr.f32.mxu1 %v11971_v63  ;;  %v12016_v63 = vld [vmem:[#allocation217_spill] sm:$0xff] }
 0x922   :  { %4420 = vmatmul.mubr.f32.gmra.mxu1 %v11972_v1 }
 0x923   :  { %4424 = vmatprep.mubr.f32.mxu1 %v11973_v43 }
 0x926   :  { %4425 = vmatmul.mubr.f32.gmra.mxu1 %v11974_v24 }
 0x927   :  { %4429 = vmatprep.mubr.f32.mxu1 %v11975_v53 }
 0x92a   :  { %4430 = vmatmul.mubr.f32.gmra.mxu1 %v11976_v60 }
 0x92b   :  { %4434 = vmatprep.mubr.f32.mxu1 %v11977_v56 }
 0x92e   :  { %4435 = vmatmul.mubr.f32.gmra.mxu1 %v11978_v17 }
 0x92f   :  { %4439 = vmatprep.mubr.f32.mxu1 %v11979_v13 }
 0x932   :  { %4440 = vmatmul.mubr.f32.gmra.mxu1 %v11980_v46 }
 0x933   :  { %4444 = vmatprep.mubr.f32.mxu1 %v11981_v19  ;;  %v12017_v19 = vld [vmem:[#allocation93_spill] sm:$0xff] }
 0x936   :  { %4445 = vmatmul.mubr.f32.gmra.mxu1 %v11982_v62 }
 0x937   :  { %4449 = vmatprep.mubr.f32.mxu1 %v11983_v49 }
 0x93a   :  { %4450 = vmatmul.mubr.f32.gmra.mxu1 %v11984_v16 }
 0x93b   :  { %4454 = vmatprep.mubr.f32.mxu1 %v11985_v31 }
 0x93e   :  { %4455 = vmatmul.mubr.f32.gmra.mxu1 %v11986_v7 }
 0x93f   :  { %4459 = vmatprep.mubr.f32.mxu1 %v11987_v59 }
 0x942   :  { %4460 = vmatmul.mubr.f32.gmra.mxu1 %v11988_v22  ;;  %v12020_v22 = vld [vmem:[#allocation113_spill] sm:$0xff] }
 0x943   :  { %4464 = vmatprep.mubr.f32.mxu1 %v11989_v8  ;;  %v12021_v8 = vld [vmem:[#allocation115_spill] sm:$0xff] }
 0x946   :  { %4465 = vmatmul.mubr.f32.gmra.mxu1 %v11990_v21 }
 0x947   :  { %4469 = vmatprep.mubr.f32.mxu1 %v11991_v36 }
 0x94a   :  { %4470 = vmatmul.mubr.f32.gmra.mxu1 %v11992_v39  ;;  %v12023_v39 = vld [vmem:[#allocation119_spill] sm:$0xff] }
 0x94b   :  { %4474 = vmatprep.mubr.f32.mxu1 %v11993_v3  ;;  %v12024_v3 = vld [vmem:[#allocation121_spill] sm:$0xff] }
 0x94e   :  { %4475 = vmatmul.mubr.f32.gmra.mxu1 %v11994_v18 }
 0x94f   :  { %4479 = vmatprep.mubr.f32.mxu1 %v11995_v32  ;;  %v12025_v32 = vld [vmem:[#allocation123_spill] sm:$0xff] }
 0x952   :  { %4480 = vmatmul.mubr.f32.gmra.mxu1 %v11996_v50 }
 0x953   :  { %4484 = vmatprep.mubr.f32.mxu1 %v11997_v25  ;;  %v12026_v25 = vld [vmem:[#allocation125_spill] sm:$0xff] }
 0x956   :  { %4485 = vmatmul.mubr.f32.gmra.mxu1 %v11998_v61 }
 0x957   :  { %4489 = vmatprep.mubr.f32.mxu1 %v11999_v55  ;;  %v12027_v55 = vld [vmem:[#allocation127_spill] sm:$0xff] }
 0x95a   :  { %4490 = vmatmul.mubr.f32.gmra.mxu1 %v12000_v34 }
 0x95b   :  { %4494 = vmatprep.mubr.f32.mxu1 %v12001_v27  ;;  %v12028_v27 = vld [vmem:[#allocation129_spill] sm:$0xff] }
 0x95e   :  { %4495 = vmatmul.mubr.f32.gmra.mxu1 %v12002_v48 }
 0x95f   :  { %4499 = vmatprep.mubr.f32.mxu1 %v12003_v37  ;;  %v12029_v37 = vld [vmem:[#allocation131_spill] sm:$0xff] }
 0x962   :  { %4500 = vmatmul.mubr.f32.gmra.mxu1 %v12004_v41 }
 0x963   :  { %4504 = vmatprep.mubr.f32.mxu1 %v12005_v0  ;;  %v12030_v0 = vld [vmem:[#allocation133_spill] sm:$0xff] }
 0x966   :  { %4505 = vmatmul.mubr.f32.gmra.mxu1 %v12006_v15 }
 0x967   :  { %4509 = vmatprep.mubr.f32.mxu1 %v12007_v30  ;;  %v12031_v30 = vld [vmem:[#allocation135_spill] sm:$0xff] }
 0x96a   :  { %4510 = vmatmul.mubr.f32.gmra.mxu1 %v12008_v52 }
 0x96b   :  { %4514 = vmatprep.mubr.f32.mxu1 %v12009_v38  ;;  %v12032_v38 = vld [vmem:[#allocation137_spill] sm:$0xff] }
 0x96e   :  { %4515 = vmatmul.mubr.f32.gmra.mxu1 %v12010_v12  ;;  %v12033_v12 = vld [vmem:[#allocation139_spill] sm:$0xff] }
 0x96f   :  { %4519 = vmatprep.mubr.f32.mxu1 %v12011_v42  ;;  %v12034_v42 = vld [vmem:[#allocation141_spill] sm:$0xff] }
 0x972   :  { %4520 = vmatmul.mubr.f32.gmra.mxu1 %v12012_v44  ;;  %v12035_v44 = vld [vmem:[#allocation143_spill] sm:$0xff] }
 0x973   :  { %4524 = vmatprep.mubr.f32.mxu1 %v12013_v40 }
 0x976   :  { %4525 = vmatmul.mubr.f32.gmra.mxu1 %v12014_v14  ;;  %v4856_v14 = vld [vmem:[#allocation10 + $0x178] sm:$0xff] }
 0x977   :  { %4529 = vmatprep.mubr.f32.mxu1 %v12015_v29  ;;  %v4855_v29 = vld [vmem:[#allocation10 + $0x170] sm:$0xff] }
 0x97a   :  { %4530 = vmatmul.mubr.f32.gmra.mxu1 %v12016_v63 }
 0x97c   :  { %v10610_v53 = vpop.f32.mrf.mxu1 }
 0x97d   :  { %v6577_v1 = vpop.f32.mrf.mxu0 }
 0x97e   :  { %v4298_v17 = vpop.f32.mrf.mxu1 }
 0x97f   :  { %v6578_v43 = vpop.f32.mrf.mxu0 }
 0x980   :  { %v6579_v24 = vadd.f32 %v6578_v43, %v6577_v1  ;;  %v10612_v46 = vpop.f32.mrf.mxu1  ;;  %v4854_v1 = vld [vmem:[#allocation10 + $0x168] sm:$0xff]  ;;  %v12036_v43 = vld [vmem:[#allocation145_spill] sm:$0xff] }
 0x982   :  { %v4303_v62 = vpop.f32.mrf.mxu1 }
 0x983   :  { %v12039_v62 = vld [vmem:[#allocation151_spill] sm:$0xff] }
 0x984   :  { %v10619_v49 = vpop.f32.mrf.mxu1 }
 0x986   :  { %v4308_v16 = vpop.f32.mrf.mxu1 }
 0x9bc   :  { %v4138_v60 = vpop.f32.mrf.mxu0 }
 0x9bd   :  { %v4139_v56 = vadd.f32 %v6579_v24, %v4138_v60  ;;  %v12037_v24 = vld [vmem:[#allocation147_spill] sm:$0xff] }
 0x9be   :  { %v7794_v13 = vpop.f32.mrf.mxu0 }
 0x9bf   :  { %7828 = vmatmul.mubr.f32.vlgmr.msra.gmra.mxu0 %v4139_v56  ;;  %v4853_v56 = vld [vmem:[#allocation10 + $0x160] sm:$0xff]  ;;  %v4852_v13 = vld [vmem:[#allocation10 + $0x158] sm:$0xff] }
 0x9c0   :  { %7831 = vmatpush3.msra.mxu0 %v10417_v28  ;;  %7862 = vmatprep.mubr.f32.mxu0 %v12017_v19  ;;  %v10625_v28 = vpop.f32.mrf.mxu1  ;;  %v12038_v19 = vld [vmem:[#allocation149_spill] sm:$0xff] }
 0x9c1   :  { %7832 = vmatprep.subr.mxu0 %v10423_v47 }
 0x9c2   :  { %7833 = vmatpush3.msra.mxu0 %v10423_v47  ;;  %v4313_v47 = vpop.f32.mrf.mxu1 }
 0x9c3   :  { %7834 = vmatprep.subr.mxu0 %v10430_v4  ;;  %v4851_v47 = vld [vmem:[#allocation10 + $0x150] sm:$0xff] }
 0x9c4   :  { %7835 = vmatpush3.msra.mxu0 %v10430_v4  ;;  %v10631_v31 = vpop.f32.mrf.mxu1 }
 0x9c5   :  { %7836 = vmatprep.subr.mxu0 %v10437_v10 }
 0x9c6   :  { %7837 = vmatpush3.msra.mxu0 %v10437_v10  ;;  %v4318_v4 = vpop.f32.mrf.mxu1 }
 0x9c7   :  { %7838 = vmatprep.subr.mxu0 %v10444_v6 }
 0x9c8   :  { %7839 = vmatpush3.msra.mxu0 %v10444_v6  ;;  %v10637_v10 = vpop.f32.mrf.mxu1 }
 0x9c9   :  { %7840 = vmatprep.subr.mxu0 %v10451_v9 }
 0x9ca   :  { %7841 = vmatpush3.msra.mxu0 %v10451_v9  ;;  %v4323_v6 = vpop.f32.mrf.mxu1 }
 0x9cb   :  { %7842 = vmatprep.subr.mxu0 %v10459_v35  ;;  %v4850_v6 = vld [vmem:[#allocation10 + $0x148] sm:$0xff] }
 0x9cc   :  { %7843 = vmatpush3.msra.mxu0 %v10459_v35  ;;  %v10643_v9 = vpop.f32.mrf.mxu1 }
 0x9cd   :  { %7844 = vmatprep.subr.mxu0 %v10467_v51 }
 0x9ce   :  { %7845 = vmatpush3.msra.mxu0 %v10467_v51  ;;  %v4328_v35 = vpop.f32.mrf.mxu1 }
 0x9cf   :  { %7846 = vmatprep.subr.mxu0 %v10475_v5  ;;  %v12040_v35 = vld [vmem:[#allocation153_spill] sm:$0xff] }
 0x9d0   :  { %7847 = vmatpush3.msra.mxu0 %v10475_v5  ;;  %v10649_v51 = vpop.f32.mrf.mxu1 }
 0x9d1   :  { %7848 = vmatprep.subr.mxu0 %v10483_v57 }
 0x9d2   :  { %7849 = vmatpush3.msra.mxu0 %v10483_v57  ;;  %v4333_v5 = vpop.f32.mrf.mxu1 }
 0x9d3   :  { %7850 = vmatprep.subr.mxu0 %v10491_v2  ;;  %v12041_v5 = vld [vmem:[#allocation155_spill] sm:$0xff] }
 0x9d4   :  { %7851 = vmatpush3.msra.mxu0 %v10491_v2  ;;  %v10655_v57 = vpop.f32.mrf.mxu1 }
 0x9d5   :  { %7852 = vmatprep.subr.mxu0 %v10499_v26 }
 0x9d6   :  { %7853 = vmatpush3.msra.mxu0 %v10499_v26  ;;  %v4338_v2 = vpop.f32.mrf.mxu1  ;;  %v12018_v26 = vld [vmem:[#allocation109_spill] sm:$0xff] }
 0x9d7   :  { %7854 = vmatprep.subr.mxu0 %v10505_v23 }
 0x9d8   :  { %7855 = vmatpush3.msra.mxu0 %v10505_v23  ;;  %v10661_v7 = vpop.f32.mrf.mxu1  ;;  %v12019_v23 = vld [vmem:[#allocation111_spill] sm:$0xff] }
 0x9d9   :  { %7856 = vmatprep.subr.mxu0 %v10511_v11 }
 0x9da   :  { %7857 = vmatpush3.msra.mxu0 %v10511_v11  ;;  %v4343_v59 = vpop.f32.mrf.mxu1 }
 0x9db   :  { %7858 = vmatprep.subr.mxu0 %v10516_v33  ;;  %v4848_v59 = vld [vmem:[#allocation10 + $0x138] sm:$0xff] }
 0x9dc   :  { %7859 = vmatpush3.msra.mxu0 %v10516_v33  ;;  %v10665_v11 = vpop.f32.mrf.mxu1  ;;  %v12022_v33 = vld [vmem:[#allocation117_spill] sm:$0xff] }
 0x9dd   :  { %7860 = vmatprep.subr.mxu0 %v10521_v58 }
 0x9de   :  { %7861 = vmatpush3.msra.mxu0 %v10521_v58  ;;  %v4348_v21 = vpop.f32.mrf.mxu1 }
 0x9df   :  { %7863 = vmatmul.mubr.f32.vlgmr.msra.gmra.mxu0 %v12018_v26  ;;  %7934 = vmatprep.subr.mxu0 %v4856_v14  ;;  %v4849_v26 = vld [vmem:[#allocation10 + $0x140] sm:$0xff] }
 0x9e0   :  { %7865 = vmatprep.mubr.f32.mxu0 %v12019_v23  ;;  %v10669_v36 = vpop.f32.mrf.mxu1  ;;  %7935 = vmatpush3.msra.mxu0 %v4856_v14  ;;  %v12051_v14 = vld [vmem:[#allocation175_spill] sm:$0xff] }
 0x9e1   :  { %7936 = vmatprep.subr.mxu0 %v4855_v29 }
 0x9e2   :  { %v4353_v58 = vpop.f32.mrf.mxu1  ;;  %7937 = vmatpush3.msra.mxu0 %v4855_v29  ;;  %v4842_v29 = vld [vmem:[#allocation10 + $0x108] sm:$0xff] }
 0x9e3   :  { %7866 = vmatmul.mubr.f32.gmra.mxu0 %v12020_v22  ;;  %7938 = vmatprep.subr.mxu0 %v4854_v1  ;;  %v12042_v22 = vld [vmem:[#allocation157_spill] sm:$0xff]  ;;  %v4846_v58 = vld [vmem:[#allocation10 + $0x128] sm:$0xff] }
 0x9e4   :  { %7868 = vmatprep.mubr.f32.mxu0 %v12021_v8  ;;  %v10673_v18 = vpop.f32.mrf.mxu1  ;;  %7939 = vmatpush3.msra.mxu0 %v4854_v1  ;;  %v12043_v8 = vld [vmem:[#allocation159_spill] sm:$0xff]  ;;  %v4841_v1 = vld [vmem:[#allocation10 + $0x100] sm:$0xff] }
 0x9e5   :  { %7940 = vmatprep.subr.mxu0 %v4853_v56 }
 0x9e6   :  { %v4358_v50 = vpop.f32.mrf.mxu1  ;;  %7941 = vmatpush3.msra.mxu0 %v4853_v56  ;;  %v12053_v56 = vld [vmem:[#allocation179_spill] sm:$0xff] }
 0x9e7   :  { %7869 = vmatmul.mubr.f32.gmra.mxu0 %v12022_v33  ;;  %7942 = vmatprep.subr.mxu0 %v4852_v13  ;;  %v4847_v33 = vld [vmem:[#allocation10 + $0x130] sm:$0xff] }
 0x9e8   :  { %7871 = vmatprep.mubr.f32.mxu0 %v12023_v39  ;;  %v10677_v61 = vpop.f32.mrf.mxu1  ;;  %7943 = vmatpush3.msra.mxu0 %v4852_v13 }
 0x9e9   :  { %7944 = vmatprep.subr.mxu0 %v4851_v47 }
 0x9ea   :  { %v4363_v34 = vpop.f32.mrf.mxu1  ;;  %7945 = vmatpush3.msra.mxu0 %v4851_v47 }
 0x9eb   :  { %7872 = vmatmul.mubr.f32.gmra.mxu0 %v12024_v3  ;;  %7946 = vmatprep.subr.mxu0 %v4850_v6  ;;  %v12044_v3 = vld [vmem:[#allocation161_spill] sm:$0xff] }
 0x9ec   :  { %7874 = vmatprep.mubr.f32.mxu0 %v12025_v32  ;;  %v10681_v48 = vpop.f32.mrf.mxu1  ;;  %7947 = vmatpush3.msra.mxu0 %v4850_v6  ;;  %v12045_v32 = vld [vmem:[#allocation163_spill] sm:$0xff]  ;;  %v4844_v34 = vld [vmem:[#allocation10 + $0x118] sm:$0xff]  ;;  %v12056_v6 = vld [vmem:[#allocation186_spill] sm:$0xff] }
 0x9ed   :  { %7948 = vmatprep.subr.mxu0 %v4849_v26 }
 0x9ee   :  { %v4368_v41 = vpop.f32.mrf.mxu1  ;;  %7949 = vmatpush3.msra.mxu0 %v4849_v26 }
 0x9ef   :  { %7875 = vmatmul.mubr.f32.gmra.mxu0 %v12026_v25  ;;  %7950 = vmatprep.subr.mxu0 %v4848_v59  ;;  %v4845_v25 = vld [vmem:[#allocation10 + $0x120] sm:$0xff] }
 0x9f0   :  { %7877 = vmatprep.mubr.f32.mxu0 %v12027_v55  ;;  %v10685_v15 = vpop.f32.mrf.mxu1  ;;  %7951 = vmatpush3.msra.mxu0 %v4848_v59  ;;  %v12059_v59 = vld [vmem:[#allocation191_spill] sm:$0xff] }
 0x9f1   :  { %7952 = vmatprep.subr.mxu0 %v4847_v33 }
 0x9f2   :  { %v4373_v52 = vpop.f32.mrf.mxu1  ;;  %7953 = vmatpush3.msra.mxu0 %v4847_v33  ;;  %v12060_v33 = vld [vmem:[#allocation194_spill] sm:$0xff] }
 0x9f3   :  { %7878 = vmatmul.mubr.f32.gmra.mxu0 %v12028_v27  ;;  %7954 = vmatprep.subr.mxu0 %v4846_v58  ;;  %v12046_v27 = vld [vmem:[#allocation165_spill] sm:$0xff]  ;;  %v12049_v52 = vld [vmem:[#allocation171_spill] sm:$0xff] }
 0x9f4   :  { %7880 = vmatprep.mubr.f32.mxu0 %v12029_v37  ;;  %v10692_v40 = vpop.f32.mrf.mxu1  ;;  %7955 = vmatpush3.msra.mxu0 %v4846_v58  ;;  %v12047_v37 = vld [vmem:[#allocation167_spill] sm:$0xff] }
 0x9f5   :  { %7956 = vmatprep.subr.mxu0 %v4845_v25 }
 0x9f6   :  { %v4378_v63 = vpop.f32.mrf.mxu1  ;;  %7957 = vmatpush3.msra.mxu0 %v4845_v25  ;;  %v12063_v25 = vld [vmem:[#allocation199_spill] sm:$0xff] }
 0x9f7   :  { %7881 = vmatmul.mubr.f32.gmra.mxu0 %v12030_v0  ;;  %7958 = vmatprep.subr.mxu0 %v4844_v34 }
 0x9f8   :  { %7883 = vmatprep.mubr.f32.mxu0 %v12031_v30  ;;  %v10696_v60 = vpop.f32.mrf.mxu1  ;;  %7959 = vmatpush3.msra.mxu0 %v4844_v34  ;;  %v12048_v30 = vld [vmem:[#allocation169_spill] sm:$0xff] }
 0x9fa   :  { %v4383_v17 = vpop.f32.mrf.mxu1 }
 0x9fb   :  { %7884 = vmatmul.mubr.f32.gmra.mxu0 %v12032_v38 }
 0x9fc   :  { %7886 = vmatprep.mubr.f32.mxu0 %v12033_v12  ;;  %v10700_v16 = vpop.f32.mrf.mxu1  ;;  %v4843_v12 = vld [vmem:[#allocation10 + $0x110] sm:$0xff] }
 0x9fd   :  { %7960 = vmatprep.subr.mxu0 %v4843_v12 }
 0x9fe   :  { %v4388_v4 = vpop.f32.mrf.mxu1  ;;  %7961 = vmatpush3.msra.mxu0 %v4843_v12 }
 0x9ff   :  { %7887 = vmatmul.mubr.f32.gmra.mxu0 %v12034_v42  ;;  %7962 = vmatprep.subr.mxu0 %v4842_v29 }
 0xa00   :  { %7889 = vmatprep.mubr.f32.mxu0 %v12035_v44  ;;  %v10704_v2 = vpop.f32.mrf.mxu1  ;;  %v12050_v44 = vld [vmem:[#allocation173_spill] sm:$0xff]  ;;  %7963 = vmatpush3.msra.mxu0 %v4842_v29 }
 0xa01   :  { %7964 = vmatprep.subr.mxu0 %v4841_v1 }
 0xa02   :  { %v4393_v23 = vpop.f32.mrf.mxu1  ;;  %7965 = vmatpush3.msra.mxu0 %v4841_v1 }
 0xa03   :  { %7890 = vmatmul.mubr.f32.gmra.mxu0 %v12036_v43  ;;  %v12058_v23 = vld [vmem:[#allocation190_spill] sm:$0xff] }
 0xa04   :  { %7892 = vmatprep.mubr.f32.mxu0 %v12037_v24  ;;  %v10708_v21 = vpop.f32.mrf.mxu1  ;;  %v12052_v24 = vld [vmem:[#allocation178_spill] sm:$0xff] }
 0xa06   :  { %v4398_v39 = vpop.f32.mrf.mxu1 }
 0xa07   :  { %7893 = vmatmul.mubr.f32.gmra.mxu0 %v12038_v19  ;;  %v12054_v19 = vld [vmem:[#allocation182_spill] sm:$0xff]  ;;  %v12061_v39 = vld [vmem:[#allocation195_spill] sm:$0xff] }
 0xa08   :  { %7895 = vmatprep.mubr.f32.mxu0 %v12039_v62  ;;  %v10712_v50 = vpop.f32.mrf.mxu1  ;;  %v12055_v62 = vld [vmem:[#allocation183_spill] sm:$0xff] }
 0xa0a   :  { %v4403_v55 = vpop.f32.mrf.mxu1 }
 0xa0b   :  { %7896 = vmatmul.mubr.f32.gmra.mxu0 %v12040_v35  ;;  %v12057_v35 = vld [vmem:[#allocation187_spill] sm:$0xff] }
 0xa0c   :  { %7898 = vmatprep.mubr.f32.mxu0 %v12041_v5  ;;  %v10716_v41 = vpop.f32.mrf.mxu1 }
 0xa0e   :  { %v4408_v0 = vpop.f32.mrf.mxu1 }
 0xa0f   :  { %7899 = vmatmul.mubr.f32.gmra.mxu0 %v12042_v22 }
 0xa10   :  { %7901 = vmatprep.mubr.f32.mxu0 %v12043_v8  ;;  %v10720_v38 = vpop.f32.mrf.mxu1 }
 0xa12   :  { %v4413_v42 = vpop.f32.mrf.mxu1 }
 0xa13   :  { %7902 = vmatmul.mubr.f32.gmra.mxu0 %v12044_v3 }
 0xa14   :  { %7904 = vmatprep.mubr.f32.mxu0 %v12045_v32  ;;  %v10724_v63 = vpop.f32.mrf.mxu1  ;;  %v12062_v32 = vld [vmem:[#allocation198_spill] sm:$0xff] }
 0xa16   :  { %v4418_v43 = vpop.f32.mrf.mxu1 }
 0xa17   :  { %7905 = vmatmul.mubr.f32.gmra.mxu0 %v12046_v27  ;;  %v12064_v27 = vld [vmem:[#allocation202_spill] sm:$0xff] }
 0xa18   :  { %7907 = vmatprep.mubr.f32.mxu0 %v12047_v37  ;;  %v10728_v17 = vpop.f32.mrf.mxu1 }
 0xa1a   :  { %v4423_v13 = vpop.f32.mrf.mxu1 }
 0xa1b   :  { %7908 = vmatmul.mubr.f32.gmra.mxu0 %v12048_v30 }
 0xa1c   :  { %7910 = vmatprep.mubr.f32.mxu0 %v12049_v52  ;;  %v10732_v47 = vpop.f32.mrf.mxu1 }
 0xa1e   :  { %v4428_v4 = vpop.f32.mrf.mxu1 }
 0xa1f   :  { %7911 = vmatmul.mubr.f32.gmra.mxu0 %v12050_v44 }
 0xa20   :  { %7913 = vmatprep.mubr.f32.mxu0 %v12051_v14  ;;  %v10736_v5 = vpop.f32.mrf.mxu1 }
 0xa22   :  { %v4433_v26 = vpop.f32.mrf.mxu1 }
 0xa23   :  { %7914 = vmatmul.mubr.f32.gmra.mxu0 %v12052_v24 }
 0xa24   :  { %7916 = vmatprep.mubr.f32.mxu0 %v12053_v56  ;;  %v10740_v22 = vpop.f32.mrf.mxu1 }
 0xa26   :  { %v4438_v8 = vpop.f32.mrf.mxu1 }
 0xa27   :  { %7917 = vmatmul.mubr.f32.gmra.mxu0 %v12054_v19 }
 0xa28   :  { %7919 = vmatprep.mubr.f32.mxu0 %v12055_v62  ;;  %v10744_v58 = vpop.f32.mrf.mxu1 }
 0xa2a   :  { %v4443_v3 = vpop.f32.mrf.mxu1 }
 0xa2b   :  { %7920 = vmatmul.mubr.f32.gmra.mxu0 %v12056_v6 }
 0xa2c   :  { %7922 = vmatprep.mubr.f32.mxu0 %v12057_v35  ;;  %v10748_v55 = vpop.f32.mrf.mxu1 }
 0xa2e   :  { %v4448_v34 = vpop.f32.mrf.mxu1 }
 0xa2f   :  { %7923 = vmatmul.mubr.f32.gmra.mxu0 %v12058_v23 }
 0xa30   :  { %7925 = vmatprep.mubr.f32.mxu0 %v12059_v59  ;;  %v10751_v37 = vpop.f32.mrf.mxu1 }
 0xa32   :  { %v4453_v0 = vpop.f32.mrf.mxu1 }
 0xa33   :  { %7926 = vmatmul.mubr.f32.gmra.mxu0 %v12060_v33 }
 0xa34   :  { %7928 = vmatprep.mubr.f32.mxu0 %v12061_v39  ;;  %v10753_v30 = vpop.f32.mrf.mxu1 }
 0xa36   :  { %v4458_v52 = vpop.f32.mrf.mxu1 }
 0xa37   :  { %7929 = vmatmul.mubr.f32.gmra.mxu0 %v12062_v32 }
 0xa38   :  { %7931 = vmatprep.mubr.f32.mxu0 %v12063_v25  ;;  %v10755_v12 = vpop.f32.mrf.mxu1 }
 0xa3a   :  { %v4463_v42 = vpop.f32.mrf.mxu1 }
 0xa3b   :  { %7932 = vmatmul.mubr.f32.gmra.mxu0 %v12064_v27 }
 0xa3c   :  { %v10757_v44 = vpop.f32.mrf.mxu1 }
 0xa3e   :  { %v4468_v14 = vpop.f32.mrf.mxu1 }
 0xa3f   :  { %v12065_v14 = vld [vmem:[#allocation23_spill] sm:$0xff] }
 0xa40   :  { %v10759_v29 = vpop.f32.mrf.mxu1 }
 0xa42   :  { %v4473_v1 = vpop.f32.mrf.mxu1 }
 0xa43   :  { %v12066_v1 = vld [vmem:[#allocation234_spill] sm:$0xff] }
 0xa44   :  { %v10761_v43 = vpop.f32.mrf.mxu1 }
 0xa46   :  { %v4478_v24 = vpop.f32.mrf.mxu1 }
 0xa47   :  { %v2585_v24 = vadd.f32 %v12066_v1, %v12065_v14  ;;  %v5228_v14 = vld [vmem:[#allocation11 + $0x148] sm:$0xff]  ;;  %v5227_v1 = vld [vmem:[#allocation11 + $0x140] sm:$0xff] }
 0xa48   :  { %v10763_v56 = vpop.f32.mrf.mxu1 }
 0xa4a   :  { %v4483_v13 = vpop.f32.mrf.mxu1 }
 0xa4c   :  { %v10765_v19 = vpop.f32.mrf.mxu1 }
 0xa4e   :  { %v4488_v62 = vpop.f32.mrf.mxu1 }
 0xa50   :  { %v10767_v4 = vpop.f32.mrf.mxu1 }
 0xa52   :  { %v4493_v6 = vpop.f32.mrf.mxu1 }
 0xa54   :  { %v10769_v35 = vpop.f32.mrf.mxu1 }
 0xa56   :  { %v4498_v26 = vpop.f32.mrf.mxu1 }
 0xa58   :  { %v10771_v23 = vpop.f32.mrf.mxu1 }
 0xa5a   :  { %v4503_v59 = vpop.f32.mrf.mxu1 }
 0xa5b   :  { %v5234_v59 = vld [vmem:[#allocation11 + $0x178] sm:$0xff] }
 0xa5c   :  { %v10773_v8 = vpop.f32.mrf.mxu1  ;;  %8038 = vmatprep.subr.mxu1 %v5234_v59 }
 0xa5d   :  { %8039 = vmatpush3.msra.mxu1 %v5234_v59 }
 0xa5e   :  { %v4508_v33 = vpop.f32.mrf.mxu1 }
 0xa5f   :  { %v5233_v33 = vld [vmem:[#allocation11 + $0x170] sm:$0xff] }
 0xa60   :  { %v10775_v39 = vpop.f32.mrf.mxu1  ;;  %8040 = vmatprep.subr.mxu1 %v5233_v33 }
 0xa61   :  { %8041 = vmatpush3.msra.mxu1 %v5233_v33 }
 0xa62   :  { %v4513_v3 = vpop.f32.mrf.mxu1 }
 0xa63   :  { %v5232_v3 = vld [vmem:[#allocation11 + $0x168] sm:$0xff] }
 0xa64   :  { %v10777_v32 = vpop.f32.mrf.mxu1  ;;  %8042 = vmatprep.subr.mxu1 %v5232_v3 }
 0xa65   :  { %8043 = vmatpush3.msra.mxu1 %v5232_v3 }
 0xa66   :  { %v4518_v25 = vpop.f32.mrf.mxu1 }
 0xa67   :  { %v5231_v25 = vld [vmem:[#allocation11 + $0x160] sm:$0xff] }
 0xa68   :  { %v10779_v34 = vpop.f32.mrf.mxu1  ;;  %8044 = vmatprep.subr.mxu1 %v5231_v25 }
 0xa69   :  { %8045 = vmatpush3.msra.mxu1 %v5231_v25 }
 0xa6a   :  { %v4523_v27 = vpop.f32.mrf.mxu1 }
 0xa6b   :  { %v5230_v27 = vld [vmem:[#allocation11 + $0x158] sm:$0xff] }
 0xa6c   :  { %v10781_v0 = vpop.f32.mrf.mxu1  ;;  %8046 = vmatprep.subr.mxu1 %v5230_v27 }
 0xa6d   :  { %8047 = vmatpush3.msra.mxu1 %v5230_v27 }
 0xa6e   :  { %v4528_v52 = vpop.f32.mrf.mxu1 }
 0xa6f   :  { %v5229_v52 = vld [vmem:[#allocation11 + $0x150] sm:$0xff] }
 0xa70   :  { %v10783_v42 = vpop.f32.mrf.mxu1  ;;  %8048 = vmatprep.subr.mxu1 %v5229_v52 }
 0xa71   :  { %8049 = vmatpush3.msra.mxu1 %v5229_v52 }
 0xa72   :  { %v4533_v13 = vpop.f32.mrf.mxu1  ;;  %8050 = vmatprep.subr.mxu1 %v5228_v14 }
 0xa73   :  { %8051 = vmatpush3.msra.mxu1 %v5228_v14  ;;  %v5225_v13 = vld [vmem:[#allocation11 + $0x130] sm:$0xff] }
 0xa74   :  { %8052 = vmatprep.subr.mxu1 %v5227_v1 }
 0xa75   :  { %8053 = vmatpush3.msra.mxu1 %v5227_v1 }
 0xa7f   :  { %v4225_v62 = vpop.f32.mrf.mxu0 }
 0xa80   :  { %v10787_v6 = vadd.f32 %v4225_v62, %v2585_v24  ;;  %v5226_v24 = vld [vmem:[#allocation11 + $0x138] sm:$0xff]  ;;  %v5224_v62 = vld [vmem:[#allocation11 + $0x128] sm:$0xff] }
 0xa81   :  { %v7829_v26 = vpop.f32.mrf.mxu0  ;;  %8054 = vmatprep.subr.mxu1 %v5226_v24 }
 0xa82   :  { %12067 = vst [vmem:[#allocation218_spill] sm:$0xff] %v10787_v6  ;;  %8055 = vmatpush3.msra.mxu1 %v5226_v24  ;;  %v5223_v26 = vld [vmem:[#allocation11 + $0x120] sm:$0xff] }
 0xa83   :  { %8056 = vmatprep.subr.mxu1 %v5225_v13 }
 0xa84   :  { %8057 = vmatpush3.msra.mxu1 %v5225_v13 }
 0xa85   :  { %8058 = vmatprep.subr.mxu1 %v5224_v62 }
 0xa86   :  { %8059 = vmatpush3.msra.mxu1 %v5224_v62 }
 0xa87   :  { %8060 = vmatprep.subr.mxu1 %v5223_v26 }
 0xa88   :  { %8061 = vmatpush3.msra.mxu1 %v5223_v26 }
 0xa9f   :  { %v7864_v59 = vpop.f32.mrf.mxu0 }
 0xaa0   :  { %v4607_v25 = vadd.f32 %v7864_v59, %v10612_v46 }
 0xaa1   :  { %v4601_v33 = vpop.f32.mrf.mxu0 }
 0xaa2   :  { %v4602_v3 = vadd.f32 %v4601_v33, %v10610_v53 }
 0xaa3   :  { %v7867_v27 = vpop.f32.mrf.mxu0 }
 0xaa4   :  { %7966 = vmatprep.mubr.f32.mxu0 %v4602_v3  ;;  %v4617_v1 = vadd.f32 %v7867_v27, %v10625_v28 }
 0xaa5   :  { %v4611_v52 = vpop.f32.mrf.mxu0  ;;  %7967 = vmatmul.mubr.f32.vlgmr.msra.gmra.mxu0 %v4607_v25 }
 0xaa6   :  { %v4612_v14 = vadd.f32 %v4611_v52, %v10619_v49 }
 0xaa7   :  { %v7870_v24 = vpop.f32.mrf.mxu0 }
 0xaa8   :  { %7969 = vmatprep.mubr.f32.mxu0 %v4612_v14  ;;  %v4627_v26 = vadd.f32 %v7870_v24, %v10637_v10 }
 0xaa9   :  { %v4621_v13 = vpop.f32.mrf.mxu0  ;;  %7970 = vmatmul.mubr.f32.gmra.mxu0 %v4617_v1 }
 0xaaa   :  { %v4622_v62 = vadd.f32 %v4621_v13, %v10631_v31 }
 0xaab   :  { %v7873_v6 = vpop.f32.mrf.mxu0 }
 0xaac   :  { %7972 = vmatprep.mubr.f32.mxu0 %v4622_v62  ;;  %v4637_v59 = vadd.f32 %v7873_v6, %v10649_v51 }
 0xaad   :  { %v4631_v53 = vpop.f32.mrf.mxu0  ;;  %7973 = vmatmul.mubr.f32.gmra.mxu0 %v4627_v26 }
 0xaae   :  { %v4632_v46 = vadd.f32 %v4631_v53, %v10643_v9 }
 0xaaf   :  { %v7876_v33 = vpop.f32.mrf.mxu0 }
 0xab0   :  { %7975 = vmatprep.mubr.f32.mxu0 %v4632_v46  ;;  %v4647_v3 = vadd.f32 %v7876_v33, %v10661_v7 }
 0xab1   :  { %v4641_v49 = vpop.f32.mrf.mxu0  ;;  %7976 = vmatmul.mubr.f32.gmra.mxu0 %v4637_v59 }
 0xab2   :  { %v4642_v28 = vadd.f32 %v4641_v49, %v10655_v57 }
 0xab3   :  { %v7879_v25 = vpop.f32.mrf.mxu0 }
 0xab4   :  { %7978 = vmatprep.mubr.f32.mxu0 %v4642_v28  ;;  %v4657_v27 = vadd.f32 %v7879_v25, %v10669_v36 }
 0xab5   :  { %v4651_v31 = vpop.f32.mrf.mxu0  ;;  %7979 = vmatmul.mubr.f32.gmra.mxu0 %v4647_v3 }
 0xab6   :  { %v4652_v10 = vadd.f32 %v4651_v31, %v10665_v11 }
 0xab7   :  { %v7882_v52 = vpop.f32.mrf.mxu0 }
 0xab8   :  { %7981 = vmatprep.mubr.f32.mxu0 %v4652_v10  ;;  %v4667_v6 = vadd.f32 %v7882_v52, %v10677_v61 }
 0xab9   :  { %v4661_v9 = vpop.f32.mrf.mxu0  ;;  %7982 = vmatmul.mubr.f32.gmra.mxu0 %v4657_v27 }
 0xaba   :  { %v4662_v51 = vadd.f32 %v4661_v9, %v10673_v18 }
 0xabb   :  { %v7885_v14 = vpop.f32.mrf.mxu0 }
 0xabc   :  { %7984 = vmatprep.mubr.f32.mxu0 %v4662_v51  ;;  %v4677_v1 = vadd.f32 %v7885_v14, %v10685_v15 }
 0xabd   :  { %v4671_v57 = vpop.f32.mrf.mxu0  ;;  %7985 = vmatmul.mubr.f32.gmra.mxu0 %v4667_v6 }
 0xabe   :  { %v4672_v7 = vadd.f32 %v4671_v57, %v10681_v48 }
 0xabf   :  { %v7888_v24 = vpop.f32.mrf.mxu0 }
 0xac0   :  { %7987 = vmatprep.mubr.f32.mxu0 %v4672_v7  ;;  %v4687_v13 = vadd.f32 %v7888_v24, %v10696_v60  ;;  %v5220_v7 = vld [vmem:[#allocation11 + $0x108] sm:$0xff] }
 0xac1   :  { %v4681_v11 = vpop.f32.mrf.mxu0  ;;  %7988 = vmatmul.mubr.f32.gmra.mxu0 %v4677_v1  ;;  %v5219_v1 = vld [vmem:[#allocation11 + $0x100] sm:$0xff] }
 0xac2   :  { %v4682_v36 = vadd.f32 %v4681_v11, %v10692_v40 }
 0xac3   :  { %v7891_v62 = vpop.f32.mrf.mxu0 }
 0xac4   :  { %7990 = vmatprep.mubr.f32.mxu0 %v4682_v36  ;;  %v4697_v26 = vadd.f32 %v7891_v62, %v10704_v2 }
 0xac5   :  { %v4691_v18 = vpop.f32.mrf.mxu0  ;;  %7991 = vmatmul.mubr.f32.gmra.mxu0 %v4687_v13 }
 0xac6   :  { %v4692_v61 = vadd.f32 %v4691_v18, %v10700_v16 }
 0xac7   :  { %v7894_v53 = vpop.f32.mrf.mxu0 }
 0xac8   :  { %7993 = vmatprep.mubr.f32.mxu0 %v4692_v61  ;;  %v4707_v46 = vadd.f32 %v7894_v53, %v10712_v50 }
 0xac9   :  { %v4701_v48 = vpop.f32.mrf.mxu0  ;;  %7994 = vmatmul.mubr.f32.gmra.mxu0 %v4697_v26 }
 0xaca   :  { %v4702_v15 = vadd.f32 %v4701_v48, %v10708_v21 }
 0xacb   :  { %v7897_v59 = vpop.f32.mrf.mxu0 }
 0xacc   :  { %7996 = vmatprep.mubr.f32.mxu0 %v4702_v15  ;;  %v4717_v33 = vadd.f32 %v7897_v59, %v10720_v38 }
 0xacd   :  { %v4711_v40 = vpop.f32.mrf.mxu0  ;;  %7997 = vmatmul.mubr.f32.gmra.mxu0 %v4707_v46 }
 0xace   :  { %v4712_v60 = vadd.f32 %v4711_v40, %v10716_v41 }
 0xacf   :  { %v7900_v49 = vpop.f32.mrf.mxu0 }
 0xad0   :  { %7999 = vmatprep.mubr.f32.mxu0 %v4712_v60  ;;  %v4727_v28 = vadd.f32 %v7900_v49, %v10728_v17 }
 0xad1   :  { %v4721_v16 = vpop.f32.mrf.mxu0  ;;  %8000 = vmatmul.mubr.f32.gmra.mxu0 %v4717_v33 }
 0xad2   :  { %v4722_v2 = vadd.f32 %v4721_v16, %v10724_v63 }
 0xad3   :  { %v7903_v3 = vpop.f32.mrf.mxu0 }
 0xad4   :  { %8002 = vmatprep.mubr.f32.mxu0 %v4722_v2  ;;  %v4737_v25 = vadd.f32 %v7903_v3, %v10736_v5 }
 0xad5   :  { %v4731_v21 = vpop.f32.mrf.mxu0  ;;  %8003 = vmatmul.mubr.f32.gmra.mxu0 %v4727_v28 }
 0xad6   :  { %v4732_v50 = vadd.f32 %v4731_v21, %v10732_v47 }
 0xad7   :  { %v7906_v31 = vpop.f32.mrf.mxu0 }
 0xad8   :  { %8005 = vmatprep.mubr.f32.mxu0 %v4732_v50  ;;  %v4747_v10 = vadd.f32 %v7906_v31, %v10744_v58 }
 0xad9   :  { %v4741_v41 = vpop.f32.mrf.mxu0  ;;  %8006 = vmatmul.mubr.f32.gmra.mxu0 %v4737_v25 }
 0xada   :  { %v4742_v38 = vadd.f32 %v4741_v41, %v10740_v22  ;;  %v5222_v22 = vld [vmem:[#allocation11 + $0x118] sm:$0xff] }
 0xadb   :  { %v7909_v27 = vpop.f32.mrf.mxu0  ;;  %8062 = vmatprep.subr.mxu1 %v5222_v22 }
 0xadc   :  { %8008 = vmatprep.mubr.f32.mxu0 %v4742_v38  ;;  %v4757_v52 = vadd.f32 %v7909_v27, %v10751_v37  ;;  %8063 = vmatpush3.msra.mxu1 %v5222_v22 }
 0xadd   :  { %v4751_v63 = vpop.f32.mrf.mxu0  ;;  %8009 = vmatmul.mubr.f32.gmra.mxu0 %v4747_v10 }
 0xade   :  { %v4752_v17 = vadd.f32 %v4751_v63, %v10748_v55  ;;  %v5221_v55 = vld [vmem:[#allocation11 + $0x110] sm:$0xff] }
 0xadf   :  { %v7912_v9 = vpop.f32.mrf.mxu0  ;;  %8064 = vmatprep.subr.mxu1 %v5221_v55 }
 0xae0   :  { %8011 = vmatprep.mubr.f32.mxu0 %v4752_v17  ;;  %v4767_v51 = vadd.f32 %v7912_v9, %v10755_v12  ;;  %8065 = vmatpush3.msra.mxu1 %v5221_v55 }
 0xae1   :  { %8012 = vmatmul.mubr.f32.gmra.mxu0 %v4757_v52  ;;  %v4761_v47 = vpop.f32.mrf.mxu0  ;;  %8066 = vmatprep.subr.mxu1 %v5220_v7 }
 0xae2   :  { %v4762_v5 = vadd.f32 %v4761_v47, %v10753_v30  ;;  %8067 = vmatpush3.msra.mxu1 %v5220_v7 }
 0xae3   :  { %v7915_v6 = vpop.f32.mrf.mxu0  ;;  %8068 = vmatprep.subr.mxu1 %v5219_v1 }
 0xae4   :  { %8014 = vmatprep.mubr.f32.mxu0 %v4762_v5  ;;  %v4777_v37 = vadd.f32 %v7915_v6, %v10759_v29  ;;  %8069 = vmatpush3.msra.mxu1 %v5219_v1 }
 0xae5   :  { %v4771_v58 = vpop.f32.mrf.mxu0  ;;  %8015 = vmatmul.mubr.f32.gmra.mxu0 %v4767_v51  ;;  %8212 = vmatprep.subr.mxu1 %v11679_v20 }
 0xae6   :  { %v4772_v14 = vadd.f32 %v4771_v58, %v10757_v44 }
 0xae7   :  { %v7918_v57 = vpop.f32.mrf.mxu0 }
 0xae8   :  { %8017 = vmatprep.mubr.f32.mxu0 %v4772_v14  ;;  %v4787_v24 = vadd.f32 %v7918_v57, %v10763_v56 }
 0xae9   :  { %v4781_v30 = vpop.f32.mrf.mxu0  ;;  %8018 = vmatmul.mubr.f32.gmra.mxu0 %v4777_v37 }
 0xaea   :  { %v4782_v12 = vadd.f32 %v4781_v30, %v10761_v43 }
 0xaeb   :  { %v7921_v11 = vpop.f32.mrf.mxu0 }
 0xaec   :  { %8020 = vmatprep.mubr.f32.mxu0 %v4782_v12  ;;  %v4797_v36 = vadd.f32 %v7921_v11, %v10767_v4 }
 0xaed   :  { %v4791_v44 = vpop.f32.mrf.mxu0  ;;  %8021 = vmatmul.mubr.f32.gmra.mxu0 %v4787_v24 }
 0xaee   :  { %v4792_v29 = vadd.f32 %v4791_v44, %v10765_v19 }
 0xaef   :  { %v7924_v13 = vpop.f32.mrf.mxu0 }
 0xaf0   :  { %8023 = vmatprep.mubr.f32.mxu0 %v4792_v29  ;;  %v4807_v56 = vadd.f32 %v7924_v13, %v10771_v23 }
 0xaf1   :  { %v4801_v62 = vpop.f32.mrf.mxu0  ;;  %8024 = vmatmul.mubr.f32.gmra.mxu0 %v4797_v36 }
 0xaf2   :  { %v4802_v43 = vadd.f32 %v4801_v62, %v10769_v35 }
 0xaf3   :  { %v7927_v18 = vpop.f32.mrf.mxu0 }
 0xaf4   :  { %8026 = vmatprep.mubr.f32.mxu0 %v4802_v43  ;;  %v4817_v53 = vadd.f32 %v7927_v18, %v10775_v39  ;;  %v10842_v39 = vld [vmem:[%s11091_s6 + $0x2] ss:$0 sm:$0xff] }
 0xaf5   :  { %v4811_v61 = vpop.f32.mrf.mxu0  ;;  %8027 = vmatmul.mubr.f32.gmra.mxu0 %v4807_v56 }
 0xaf6   :  { %v4812_v26 = vadd.f32 %v4811_v61, %v10773_v8  ;;  %v12068_v8 = vld [vmem:[#allocation24_spill] sm:$0xff] }
 0xaf7   :  { %v7930_v48 = vpop.f32.mrf.mxu0 }
 0xaf8   :  { %8029 = vmatprep.mubr.f32.mxu0 %v4812_v26  ;;  %v4827_v15 = vadd.f32 %v7930_v48, %v10779_v34 }
 0xaf9   :  { %v4821_v19 = vpop.f32.mrf.mxu0  ;;  %8030 = vmatmul.mubr.f32.gmra.mxu0 %v4817_v53 }
 0xafa   :  { %v4822_v4 = vadd.f32 %v4821_v19, %v10777_v32 }
 0xafb   :  { %v7933_v46 = vpop.f32.mrf.mxu0 }
 0xafc   :  { %8032 = vmatprep.mubr.f32.mxu0 %v4822_v4  ;;  %v4837_v59 = vadd.f32 %v7933_v46, %v10783_v42 }
 0xafd   :  { %v4831_v35 = vpop.f32.mrf.mxu0  ;;  %8033 = vmatmul.mubr.f32.gmra.mxu0 %v4827_v15 }
 0xafe   :  { %v4832_v23 = vadd.f32 %v4831_v35, %v10781_v0 }
 0xb00   :  { %8035 = vmatprep.mubr.f32.mxu0 %v4832_v23 }
 0xb01   :  { %8036 = vmatmul.mubr.f32.gmra.mxu0 %v4837_v59 }
 0xb02   :  { %5660 = vmatprep.mubr.f32.mxu0 %v12068_v8 }
 0xb65   :  { %v7968_v32 = vpop.f32.mrf.mxu0 }
 0xb66   :  { %v4937_v34 = vadd.f32 %v7968_v32, %v10842_v39 }
 0xb67   :  { %v4931_v40 = vpop.f32.mrf.mxu0 }
 0xb68   :  { %v4932_v60 = vadd.f32 %v10842_v39, %v4931_v40  ;;  %v5171_v0 = vmax.f32 %v4937_v34, 0.0 }
 0xb69   :  { %v7971_v33 = vpop.f32.mrf.mxu0 }
 0xb6a   :  { %v5170_v49 = vmax.f32 %v4932_v60, 0.0  ;;  %v4947_v42 = vadd.f32 %v7971_v33, %v10842_v39 }
 0xb6b   :  { %v4941_v16 = vpop.f32.mrf.mxu0 }
 0xb6c   :  { %v4942_v2 = vadd.f32 %v10842_v39, %v4941_v16  ;;  %8070 = vmatprep.mubr.f32.mxu1 %v5170_v49  ;;  %v5173_v21 = vmax.f32 %v4947_v42, 0.0 }
 0xb6d   :  { %v7974_v28 = vpop.f32.mrf.mxu0  ;;  %8071 = vmatmul.mubr.f32.vlgmr.msra.gmra.mxu1 %v5171_v0 }
 0xb6e   :  { %v5172_v3 = vmax.f32 %v4942_v2, 0.0  ;;  %v4957_v50 = vadd.f32 %v7974_v28, %v10842_v39 }
 0xb6f   :  { %v4951_v25 = vpop.f32.mrf.mxu0 }
 0xb70   :  { %v4952_v31 = vadd.f32 %v10842_v39, %v4951_v25  ;;  %8073 = vmatprep.mubr.f32.mxu1 %v5172_v3  ;;  %v5175_v10 = vmax.f32 %v4957_v50, 0.0 }
 0xb71   :  { %v7977_v41 = vpop.f32.mrf.mxu0  ;;  %8074 = vmatmul.mubr.f32.gmra.mxu1 %v5173_v21 }
 0xb72   :  { %v5174_v38 = vmax.f32 %v4952_v31, 0.0  ;;  %v4967_v27 = vadd.f32 %v7977_v41, %v10842_v39 }
 0xb73   :  { %v4961_v63 = vpop.f32.mrf.mxu0 }
 0xb74   :  { %v4962_v17 = vadd.f32 %v10842_v39, %v4961_v63  ;;  %8076 = vmatprep.mubr.f32.mxu1 %v5174_v38  ;;  %v5177_v47 = vmax.f32 %v4967_v27, 0.0 }
 0xb75   :  { %v7980_v52 = vpop.f32.mrf.mxu0  ;;  %8077 = vmatmul.mubr.f32.gmra.mxu1 %v5175_v10 }
 0xb76   :  { %v5176_v9 = vmax.f32 %v4962_v17, 0.0  ;;  %v4977_v5 = vadd.f32 %v7980_v52, %v10842_v39 }
 0xb77   :  { %v4971_v51 = vpop.f32.mrf.mxu0 }
 0xb78   :  { %v4972_v6 = vadd.f32 %v10842_v39, %v4971_v51  ;;  %8079 = vmatprep.mubr.f32.mxu1 %v5176_v9  ;;  %v5179_v14 = vmax.f32 %v4977_v5, 0.0 }
 0xb79   :  { %v7983_v22 = vpop.f32.mrf.mxu0  ;;  %8080 = vmatmul.mubr.f32.gmra.mxu1 %v5177_v47 }
 0xb7a   :  { %v5178_v58 = vmax.f32 %v4972_v6, 0.0  ;;  %v4987_v55 = vadd.f32 %v7983_v22, %v10842_v39 }
 0xb7b   :  { %v4981_v37 = vpop.f32.mrf.mxu0 }
 0xb7c   :  { %v4982_v57 = vadd.f32 %v10842_v39, %v4981_v37  ;;  %8082 = vmatprep.mubr.f32.mxu1 %v5178_v58  ;;  %v5181_v12 = vmax.f32 %v4987_v55, 0.0 }
 0xb7d   :  { %v7986_v7 = vpop.f32.mrf.mxu0  ;;  %8083 = vmatmul.mubr.f32.gmra.mxu1 %v5179_v14 }
 0xb7e   :  { %v5180_v30 = vmax.f32 %v4982_v57, 0.0  ;;  %v4997_v1 = vadd.f32 %v7986_v7, %v10842_v39 }
 0xb7f   :  { %v4991_v24 = vpop.f32.mrf.mxu0 }
 0xb80   :  { %v4992_v11 = vadd.f32 %v10842_v39, %v4991_v24  ;;  %8085 = vmatprep.mubr.f32.mxu1 %v5180_v30  ;;  %v5183_v36 = vmax.f32 %v4997_v1, 0.0 }
 0xb81   :  { %v7989_v44 = vpop.f32.mrf.mxu0  ;;  %8086 = vmatmul.mubr.f32.gmra.mxu1 %v5181_v12 }
 0xb82   :  { %v5182_v29 = vmax.f32 %v4992_v11, 0.0  ;;  %v5007_v13 = vadd.f32 %v7989_v44, %v10842_v39 }
 0xb83   :  { %v5001_v62 = vpop.f32.mrf.mxu0 }
 0xb84   :  { %v5002_v43 = vadd.f32 %v10842_v39, %v5001_v62  ;;  %8088 = vmatprep.mubr.f32.mxu1 %v5182_v29  ;;  %v5185_v61 = vmax.f32 %v5007_v13, 0.0 }
 0xb85   :  { %v7992_v56 = vpop.f32.mrf.mxu0  ;;  %8089 = vmatmul.mubr.f32.gmra.mxu1 %v5183_v36 }
 0xb86   :  { %v5184_v18 = vmax.f32 %v5002_v43, 0.0  ;;  %v5017_v26 = vadd.f32 %v7992_v56, %v10842_v39 }
 0xb87   :  { %v5011_v53 = vpop.f32.mrf.mxu0 }
 0xb88   :  { %v5012_v48 = vadd.f32 %v10842_v39, %v5011_v53  ;;  %8091 = vmatprep.mubr.f32.mxu1 %v5184_v18  ;;  %v5187_v15 = vmax.f32 %v5017_v26, 0.0 }
 0xb89   :  { %v7995_v19 = vpop.f32.mrf.mxu0  ;;  %8092 = vmatmul.mubr.f32.gmra.mxu1 %v5185_v61 }
 0xb8a   :  { %v5186_v4 = vmax.f32 %v5012_v48, 0.0  ;;  %v5027_v46 = vadd.f32 %v7995_v19, %v10842_v39 }
 0xb8b   :  { %v5021_v35 = vpop.f32.mrf.mxu0 }
 0xb8c   :  { %v5022_v23 = vadd.f32 %v10842_v39, %v5021_v35  ;;  %8094 = vmatprep.mubr.f32.mxu1 %v5186_v4  ;;  %v5189_v32 = vmax.f32 %v5027_v46, 0.0 }
 0xb8d   :  { %v7998_v59 = vpop.f32.mrf.mxu0  ;;  %8095 = vmatmul.mubr.f32.gmra.mxu1 %v5187_v15 }
 0xb8e   :  { %v5188_v8 = vmax.f32 %v5022_v23, 0.0  ;;  %v5037_v34 = vadd.f32 %v7998_v59, %v10842_v39 }
 0xb8f   :  { %v5031_v40 = vpop.f32.mrf.mxu0 }
 0xb90   :  { %v5032_v60 = vadd.f32 %v10842_v39, %v5031_v40  ;;  %8097 = vmatprep.mubr.f32.mxu1 %v5188_v8  ;;  %v5191_v0 = vmax.f32 %v5037_v34, 0.0 }
 0xb91   :  { %v8001_v33 = vpop.f32.mrf.mxu0  ;;  %8098 = vmatmul.mubr.f32.gmra.mxu1 %v5189_v32 }
 0xb92   :  { %v5190_v49 = vmax.f32 %v5032_v60, 0.0  ;;  %v5047_v42 = vadd.f32 %v8001_v33, %v10842_v39 }
 0xb93   :  { %v5041_v16 = vpop.f32.mrf.mxu0 }
 0xb94   :  { %v5042_v2 = vadd.f32 %v10842_v39, %v5041_v16  ;;  %8100 = vmatprep.mubr.f32.mxu1 %v5190_v49  ;;  %v5193_v21 = vmax.f32 %v5047_v42, 0.0 }
 0xb95   :  { %v8004_v28 = vpop.f32.mrf.mxu0  ;;  %8101 = vmatmul.mubr.f32.gmra.mxu1 %v5191_v0 }
 0xb96   :  { %v5192_v3 = vmax.f32 %v5042_v2, 0.0  ;;  %v5057_v50 = vadd.f32 %v8004_v28, %v10842_v39 }
 0xb97   :  { %v5051_v25 = vpop.f32.mrf.mxu0 }
 0xb98   :  { %v5052_v31 = vadd.f32 %v10842_v39, %v5051_v25  ;;  %8103 = vmatprep.mubr.f32.mxu1 %v5192_v3  ;;  %v5195_v10 = vmax.f32 %v5057_v50, 0.0 }
 0xb99   :  { %v8007_v41 = vpop.f32.mrf.mxu0  ;;  %8104 = vmatmul.mubr.f32.gmra.mxu1 %v5193_v21 }
 0xb9a   :  { %v5194_v38 = vmax.f32 %v5052_v31, 0.0  ;;  %v5067_v27 = vadd.f32 %v8007_v41, %v10842_v39 }
 0xb9b   :  { %v5061_v63 = vpop.f32.mrf.mxu0 }
 0xb9c   :  { %v5062_v17 = vadd.f32 %v10842_v39, %v5061_v63  ;;  %8106 = vmatprep.mubr.f32.mxu1 %v5194_v38  ;;  %v5197_v47 = vmax.f32 %v5067_v27, 0.0 }
 0xb9d   :  { %v8010_v52 = vpop.f32.mrf.mxu0  ;;  %8107 = vmatmul.mubr.f32.gmra.mxu1 %v5195_v10 }
 0xb9e   :  { %v5196_v9 = vmax.f32 %v5062_v17, 0.0  ;;  %v5077_v5 = vadd.f32 %v8010_v52, %v10842_v39 }
 0xb9f   :  { %v5071_v51 = vpop.f32.mrf.mxu0 }
 0xba0   :  { %v5072_v6 = vadd.f32 %v10842_v39, %v5071_v51  ;;  %8109 = vmatprep.mubr.f32.mxu1 %v5196_v9  ;;  %v5199_v14 = vmax.f32 %v5077_v5, 0.0 }
 0xba1   :  { %v8013_v22 = vpop.f32.mrf.mxu0  ;;  %8110 = vmatmul.mubr.f32.gmra.mxu1 %v5197_v47 }
 0xba2   :  { %v5198_v58 = vmax.f32 %v5072_v6, 0.0  ;;  %v5087_v55 = vadd.f32 %v8013_v22, %v10842_v39 }
 0xba3   :  { %v5081_v37 = vpop.f32.mrf.mxu0 }
 0xba4   :  { %v5082_v57 = vadd.f32 %v10842_v39, %v5081_v37  ;;  %8112 = vmatprep.mubr.f32.mxu1 %v5198_v58  ;;  %v5201_v12 = vmax.f32 %v5087_v55, 0.0 }
 0xba5   :  { %8113 = vmatmul.mubr.f32.gmra.mxu1 %v5199_v14  ;;  %v8016_v7 = vpop.f32.mrf.mxu0 }
 0xba6   :  { %v5200_v30 = vmax.f32 %v5082_v57, 0.0  ;;  %v5097_v1 = vadd.f32 %v8016_v7, %v10842_v39 }
 0xba7   :  { %v5091_v24 = vpop.f32.mrf.mxu0 }
 0xba8   :  { %v5092_v11 = vadd.f32 %v10842_v39, %v5091_v24  ;;  %8115 = vmatprep.mubr.f32.mxu1 %v5200_v30  ;;  %v5203_v36 = vmax.f32 %v5097_v1, 0.0 }
 0xba9   :  { %8116 = vmatmul.mubr.f32.gmra.mxu1 %v5201_v12  ;;  %v8019_v44 = vpop.f32.mrf.mxu0 }
 0xbaa   :  { %v5202_v29 = vmax.f32 %v5092_v11, 0.0  ;;  %v5107_v13 = vadd.f32 %v8019_v44, %v10842_v39 }
 0xbab   :  { %v5101_v62 = vpop.f32.mrf.mxu0 }
 0xbac   :  { %v5102_v43 = vadd.f32 %v10842_v39, %v5101_v62  ;;  %8118 = vmatprep.mubr.f32.mxu1 %v5202_v29  ;;  %v5205_v61 = vmax.f32 %v5107_v13, 0.0 }
 0xbad   :  { %v8022_v56 = vpop.f32.mrf.mxu0  ;;  %8119 = vmatmul.mubr.f32.gmra.mxu1 %v5203_v36 }
 0xbae   :  { %v5204_v18 = vmax.f32 %v5102_v43, 0.0  ;;  %v5117_v26 = vadd.f32 %v8022_v56, %v10842_v39 }
 0xbaf   :  { %v5111_v53 = vpop.f32.mrf.mxu0 }
 0xbb0   :  { %v5112_v48 = vadd.f32 %v10842_v39, %v5111_v53  ;;  %8121 = vmatprep.mubr.f32.mxu1 %v5204_v18  ;;  %v5207_v15 = vmax.f32 %v5117_v26, 0.0 }
 0xbb1   :  { %v8025_v19 = vpop.f32.mrf.mxu0  ;;  %8122 = vmatmul.mubr.f32.gmra.mxu1 %v5205_v61 }
 0xbb2   :  { %v5206_v4 = vmax.f32 %v5112_v48, 0.0  ;;  %v5127_v46 = vadd.f32 %v8025_v19, %v10842_v39 }
 0xbb3   :  { %v5121_v35 = vpop.f32.mrf.mxu0 }
 0xbb4   :  { %v5122_v23 = vadd.f32 %v10842_v39, %v5121_v35  ;;  %8124 = vmatprep.mubr.f32.mxu1 %v5206_v4  ;;  %v5209_v32 = vmax.f32 %v5127_v46, 0.0  ;;  %v10927_v4 = vld [vmem:[%s11093_s8 + $0x2] ss:$0 sm:$0xff] }
 0xbb5   :  { %v8028_v59 = vpop.f32.mrf.mxu0  ;;  %8125 = vmatmul.mubr.f32.gmra.mxu1 %v5207_v15 }
 0xbb6   :  { %v5208_v8 = vmax.f32 %v5122_v23, 0.0  ;;  %v5137_v34 = vadd.f32 %v8028_v59, %v10842_v39 }
 0xbb7   :  { %v5131_v40 = vpop.f32.mrf.mxu0 }
 0xbb8   :  { %v5132_v60 = vadd.f32 %v10842_v39, %v5131_v40  ;;  %8127 = vmatprep.mubr.f32.mxu1 %v5208_v8  ;;  %v5211_v0 = vmax.f32 %v5137_v34, 0.0 }
 0xbb9   :  { %v8031_v33 = vpop.f32.mrf.mxu0  ;;  %8128 = vmatmul.mubr.f32.gmra.mxu1 %v5209_v32 }
 0xbba   :  { %v5210_v49 = vmax.f32 %v5132_v60, 0.0  ;;  %v5147_v42 = vadd.f32 %v8031_v33, %v10842_v39 }
 0xbbb   :  { %v5141_v16 = vpop.f32.mrf.mxu0 }
 0xbbc   :  { %v5142_v2 = vadd.f32 %v10842_v39, %v5141_v16  ;;  %8130 = vmatprep.mubr.f32.mxu1 %v5210_v49  ;;  %v5213_v21 = vmax.f32 %v5147_v42, 0.0 }
 0xbbd   :  { %v8034_v28 = vpop.f32.mrf.mxu0  ;;  %8131 = vmatmul.mubr.f32.gmra.mxu1 %v5211_v0 }
 0xbbe   :  { %v5212_v3 = vmax.f32 %v5142_v2, 0.0  ;;  %v5157_v50 = vadd.f32 %v8034_v28, %v10842_v39 }
 0xbbf   :  { %v5151_v25 = vpop.f32.mrf.mxu0 }
 0xbc0   :  { %v5152_v31 = vadd.f32 %v10842_v39, %v5151_v25  ;;  %8133 = vmatprep.mubr.f32.mxu1 %v5212_v3  ;;  %v5215_v10 = vmax.f32 %v5157_v50, 0.0 }
 0xbc1   :  { %v8037_v41 = vpop.f32.mrf.mxu0  ;;  %8134 = vmatmul.mubr.f32.gmra.mxu1 %v5213_v21 }
 0xbc2   :  { %v5214_v38 = vmax.f32 %v5152_v31, 0.0  ;;  %v5167_v27 = vadd.f32 %v8037_v41, %v10842_v39 }
 0xbc3   :  { %v5161_v63 = vpop.f32.mrf.mxu0 }
 0xbc4   :  { %v5162_v17 = vadd.f32 %v10842_v39, %v5161_v63  ;;  %8136 = vmatprep.mubr.f32.mxu1 %v5214_v38  ;;  %v5217_v9 = vmax.f32 %v5167_v27, 0.0 }
 0xbc5   :  { %8137 = vmatmul.mubr.f32.gmra.mxu1 %v5215_v10 }
 0xbc6   :  { %v5216_v52 = vmax.f32 %v5162_v17, 0.0 }
 0xbc8   :  { %8139 = vmatprep.mubr.f32.mxu1 %v5216_v52 }
 0xbc9   :  { %8140 = vmatmul.mubr.f32.gmra.mxu1 %v5217_v9 }
 0xbca   :  { %8244 = vmatprep.mubr.msk.f32.mxu1 %vm8467_vm0, %v11679_v20 }
 0xc2d   :  { %v10894_v47 = vpop.f32.mrf.mxu1 }
 0xc2f   :  { %v10896_v5 = vpop.f32.mrf.mxu1 }
 0xc31   :  { %v10898_v51 = vpop.f32.mrf.mxu1 }
 0xc33   :  { %v10900_v6 = vpop.f32.mrf.mxu1 }
 0xc35   :  { %v10902_v22 = vpop.f32.mrf.mxu1 }
 0xc37   :  { %v10904_v39 = vpop.f32.mrf.mxu1 }
 0xc39   :  { %v10906_v58 = vpop.f32.mrf.mxu1 }
 0xc3b   :  { %v10908_v14 = vpop.f32.mrf.mxu1 }
 0xc3d   :  { %v8084_v55 = vpop.f32.mrf.mxu1 }
 0xc3e   :  { %v5355_v52 = vadd.f32 %v8084_v55, %v10927_v4  ;;  %v5345_v55 = vadd.f32 %v10906_v58, %v10927_v4  ;;  %v5335_v58 = vadd.f32 %v10902_v22, %v10927_v4 }
 0xc3f   :  { %v10910_v37 = vpop.f32.mrf.mxu1 }
 0xc41   :  { %v8087_v57 = vpop.f32.mrf.mxu1 }
 0xc42   :  { %v5365_v21 = vadd.f32 %v8087_v57, %v10927_v4 }
 0xc43   :  { %v5359_v7 = vpop.f32.mrf.mxu1 }
 0xc44   :  { %v5360_v38 = vadd.f32 %v10927_v4, %v5359_v7  ;;  %v5559_v9 = vmax.f32 %v5365_v21, 0.0  ;;  %v5350_v7 = vadd.f32 %v10927_v4, %v10910_v37  ;;  %v5340_v37 = vadd.f32 %v10927_v4, %v10908_v14 }
 0xc45   :  { %v8090_v30 = vpop.f32.mrf.mxu1 }
 0xc46   :  { %v5375_v40 = vadd.f32 %v8090_v30, %v10927_v4 }
 0xc47   :  { %v5369_v12 = vpop.f32.mrf.mxu1 }
 0xc48   :  { %v5370_v42 = vadd.f32 %v10927_v4, %v5369_v12  ;;  %v5561_v50 = vmax.f32 %v5375_v40, 0.0  ;;  %v5325_v40 = vadd.f32 %v10898_v51, %v10927_v4  ;;  %v5315_v51 = vadd.f32 %v10894_v47, %v10927_v4 }
 0xc49   :  { %v8093_v1 = vpop.f32.mrf.mxu1 }
 0xc4a   :  { %v5385_v15 = vadd.f32 %v8093_v1, %v10927_v4  ;;  %v5560_v10 = vmax.f32 %v5370_v42, 0.0  ;;  %v5558_v1 = vmax.f32 %v5360_v38, 0.0  ;;  %v5549_v38 = vmax.f32 %v5315_v51, 0.0  ;;  %v5847_v51 = vld [vmem:[#allocation14 + $0x70] sm:$0xff] }
 0xc4b   :  { %v5379_v24 = vpop.f32.mrf.mxu1 }
 0xc4c   :  { %v5380_v23 = vadd.f32 %v10927_v4, %v5379_v24  ;;  %v5563_v60 = vmax.f32 %v5385_v15, 0.0  ;;  %v5556_v15 = vmax.f32 %v5350_v7, 0.0 }
 0xc4d   :  { %v10912_v11 = vpop.f32.mrf.mxu1 }
 0xc4e   :  { %v5562_v16 = vmax.f32 %v5380_v23, 0.0  ;;  %v5555_v23 = vmax.f32 %v5345_v55, 0.0 }
 0xc4f   :  { %v10914_v44 = vpop.f32.mrf.mxu1 }
 0xc51   :  { %v10916_v29 = vpop.f32.mrf.mxu1 }
 0xc53   :  { %v10918_v36 = vpop.f32.mrf.mxu1 }
 0xc55   :  { %v10920_v13 = vpop.f32.mrf.mxu1 }
 0xc57   :  { %v10922_v62 = vpop.f32.mrf.mxu1 }
 0xc59   :  { %v8105_v43 = vpop.f32.mrf.mxu1 }
 0xc5b   :  { %v5419_v56 = vpop.f32.mrf.mxu1 }
 0xc5d   :  { %v8108_v18 = vpop.f32.mrf.mxu1 }
 0xc5e   :  { %v5435_v63 = vadd.f32 %v8108_v18, %v10927_v4  ;;  %v5425_v18 = vadd.f32 %v8105_v43, %v10927_v4  ;;  %v5415_v43 = vadd.f32 %v10920_v13, %v10927_v4 }
 0xc5f   :  { %v5429_v61 = vpop.f32.mrf.mxu1 }
 0xc60   :  { %v5430_v30 = vadd.f32 %v10927_v4, %v5429_v61  ;;  %v5420_v61 = vadd.f32 %v10927_v4, %v5419_v56  ;;  %v5569_v22 = vmax.f32 %v5415_v43, 0.0 }
 0xc61   :  { %v8111_v26 = vpop.f32.mrf.mxu1 }
 0xc62   :  { %v5445_v28 = vadd.f32 %v8111_v26, %v10927_v4  ;;  %v5573_v26 = vmax.f32 %v5435_v63, 0.0  ;;  %v5570_v14 = vmax.f32 %v5420_v61, 0.0 }
 0xc63   :  { %v5439_v53 = vpop.f32.mrf.mxu1 }
 0xc64   :  { %v5440_v31 = vadd.f32 %v10927_v4, %v5439_v53  ;;  %v5575_v17 = vmax.f32 %v5445_v28, 0.0  ;;  %v5557_v53 = vmax.f32 %v5355_v52, 0.0 }
 0xc65   :  { %v8114_v48 = vpop.f32.mrf.mxu1 }
 0xc66   :  { %v5455_v8 = vadd.f32 %v8114_v48, %v10927_v4  ;;  %v5574_v12 = vmax.f32 %v5440_v31, 0.0 }
 0xc67   :  { %v5449_v19 = vpop.f32.mrf.mxu1 }
 0xc68   :  { %v5450_v49 = vadd.f32 %v10927_v4, %v5449_v19  ;;  %v5577_v3 = vmax.f32 %v5455_v8, 0.0  ;;  %v5572_v19 = vmax.f32 %v5430_v30, 0.0  ;;  %v5330_v8 = vadd.f32 %v10927_v4, %v10904_v39 }
 0xc69   :  { %v8117_v46 = vpop.f32.mrf.mxu1  ;;  %v5320_v39 = vadd.f32 %v10927_v4, %v10900_v6  ;;  %v5310_v6 = vadd.f32 %v10927_v4, %v10896_v5 }
 0xc6a   :  { %v5465_v35 = vadd.f32 %v8117_v46, %v10927_v4  ;;  %v5576_v41 = vmax.f32 %v5450_v49, 0.0  ;;  %v5400_v49 = vadd.f32 %v10927_v4, %v10918_v36  ;;  %v5552_v42 = vmax.f32 %v5330_v8, 0.0 }
 0xc6b   :  { %v5459_v59 = vpop.f32.mrf.mxu1  ;;  %v5390_v36 = vadd.f32 %v10927_v4, %v10914_v44  ;;  %v5550_v31 = vmax.f32 %v5320_v39, 0.0  ;;  %v5740_v39 = vld [vmem:[#allocation13 + $0x198] sm:$0xff] }
 0xc6c   :  { %v5579_v32 = vmax.f32 %v5465_v35, 0.0  ;;  %v5460_v34 = vadd.f32 %v10927_v4, %v5459_v59  ;;  %v5571_v35 = vmax.f32 %v5425_v18, 0.0  ;;  %v5410_v59 = vadd.f32 %v10927_v4, %v10922_v62 }
 0xc6d   :  { %v10935_v33 = vpop.f32.mrf.mxu1  ;;  %v5564_v47 = vmax.f32 %v5390_v36, 0.0  ;;  %v5844_v36 = vld [vmem:[#allocation14 + $0x58] sm:$0xff] }
 0xc6e   :  { %v5578_v0 = vmax.f32 %v5460_v34, 0.0  ;;  %6806 = vmatprep.subr.mxu0 %v5579_v32  ;;  %v5554_v32 = vmax.f32 %v5340_v37, 0.0  ;;  %v5405_v34 = vadd.f32 %v10916_v29, %v10927_v4  ;;  %v5395_v29 = vadd.f32 %v10912_v11, %v10927_v4 }
 0xc6f   :  { %6807 = vmatpush3.msra.mxu0 %v5563_v60  ;;  %v10939_v2 = vpop.f32.mrf.mxu1  ;;  %v5553_v60 = vmax.f32 %v5335_v58, 0.0 }
 0xc70   :  { %6808 = vmatprep.subr.mxu0 %v5578_v0  ;;  %v5568_v0 = vmax.f32 %v5410_v59, 0.0  ;;  %v5567_v28 = vmax.f32 %v5405_v34, 0.0  ;;  %v5565_v11 = vmax.f32 %v5395_v29, 0.0  ;;  %v5748_v34 = vld [vmem:[#allocation13 + $0x1d8] sm:$0xff]  ;;  %v5737_v29 = vld [vmem:[#allocation13 + $0x180] sm:$0xff] }
 0xc71   :  { %6809 = vmatpush3.msra.mxu0 %v5562_v16  ;;  %v10943_v25 = vpop.f32.mrf.mxu1 }
 0xc72   :  { %6810 = vmatprep.subr.mxu0 %v5577_v3  ;;  %v5551_v3 = vmax.f32 %v5325_v40, 0.0  ;;  %v5745_v40 = vld [vmem:[#allocation13 + $0x1c0] sm:$0xff] }
 0xc73   :  { %6811 = vmatpush3.msra.mxu0 %v5561_v50  ;;  %v10947_v27 = vpop.f32.mrf.mxu1  ;;  %v5566_v50 = vmax.f32 %v5400_v49, 0.0  ;;  %v5742_v49 = vld [vmem:[#allocation13 + $0x1a8] sm:$0xff] }
 0xc74   :  { %6812 = vmatprep.subr.mxu0 %v5576_v41 }
 0xc75   :  { %6813 = vmatpush3.msra.mxu0 %v5560_v10  ;;  %v10951_v57 = vpop.f32.mrf.mxu1 }
 0xc76   :  { %6814 = vmatprep.subr.mxu0 %v5575_v17  ;;  %v5548_v17 = vmax.f32 %v5310_v6, 0.0  ;;  %v5842_v6 = vld [vmem:[#allocation14 + $0x48] sm:$0xff] }
 0xc77   :  { %6815 = vmatpush3.msra.mxu0 %v5559_v9  ;;  %v10956_v24 = vpop.f32.mrf.mxu1 }
 0xc78   :  { %6816 = vmatprep.subr.mxu0 %v5574_v12 }
 0xc79   :  { %6817 = vmatpush3.msra.mxu0 %v5558_v1  ;;  %v10961_v48 = vpop.f32.mrf.mxu1 }
 0xc7a   :  { %6818 = vmatprep.subr.mxu0 %v5573_v26 }
 0xc7b   :  { %6819 = vmatpush3.msra.mxu0 %v5557_v53  ;;  %v10966_v46 = vpop.f32.mrf.mxu1 }
 0xc7c   :  { %6820 = vmatprep.subr.mxu0 %v5572_v19  ;;  %v5505_v19 = vadd.f32 %v10961_v48, %v10927_v4  ;;  %v5490_v48 = vadd.f32 %v10927_v4, %v10956_v24  ;;  %v5475_v24 = vadd.f32 %v10935_v33, %v10927_v4  ;;  %v5752_v33 = vld [vmem:[#allocation13 + $0x1f8] sm:$0xff] }
 0xc7d   :  { %6821 = vmatpush3.msra.mxu0 %v5556_v15  ;;  %v10972_v56 = vpop.f32.mrf.mxu1  ;;  %v5500_v15 = vadd.f32 %v10927_v4, %v10966_v46  ;;  %v5485_v46 = vadd.f32 %v10943_v25, %v10927_v4  ;;  %v5470_v25 = vadd.f32 %v10927_v4, %v10939_v2  ;;  %v5749_v2 = vld [vmem:[#allocation13 + $0x1e0] sm:$0xff] }
 0xc7e   :  { %6822 = vmatprep.subr.mxu0 %v5571_v35  ;;  %v5495_v35 = vadd.f32 %v10951_v57, %v10927_v4  ;;  %v5587_v58 = vmax.f32 %v5505_v19, 0.0  ;;  %v5480_v57 = vadd.f32 %v10927_v4, %v10947_v27  ;;  %v5584_v59 = vmax.f32 %v5490_v48, 0.0  ;;  %v5958_v19 = vld [vmem:[%s11097_s12] ss:$0 sm:$0xff] }
 0xc7f   :  { %6823 = vmatpush3.msra.mxu0 %v5555_v23  ;;  %v10978_v13 = vpop.f32.mrf.mxu1  ;;  %v5586_v23 = vmax.f32 %v5500_v15, 0.0  ;;  %v5580_v27 = vmax.f32 %v5470_v25, 0.0 }
 0xc80   :  { %6824 = vmatprep.subr.mxu0 %v5570_v14  ;;  %v5510_v53 = vadd.f32 %v10927_v4, %v10978_v13  ;;  %v5583_v14 = vmax.f32 %v5485_v46, 0.0  ;;  %v5582_v8 = vmax.f32 %v5480_v57, 0.0  ;;  %v5751_v13 = vld [vmem:[#allocation13 + $0x1f0] sm:$0xff] }
 0xc81   :  { %6825 = vmatpush3.msra.mxu0 %v5554_v32  ;;  %v8135_v62 = vpop.f32.mrf.mxu1  ;;  %v5581_v32 = vmax.f32 %v5475_v24, 0.0 }
 0xc82   :  { %6826 = vmatprep.subr.mxu0 %v5569_v22  ;;  %v5525_v7 = vadd.f32 %v8135_v62, %v10927_v4  ;;  %v5588_v43 = vmax.f32 %v5510_v53, 0.0  ;;  %v5746_v22 = vld [vmem:[#allocation13 + $0x1c8] sm:$0xff]  ;;  %v5743_v62 = vld [vmem:[#allocation13 + $0x1b0] sm:$0xff] }
 0xc83   :  { %6827 = vmatpush3.msra.mxu0 %v5553_v60  ;;  %v5519_v16 = vpop.f32.mrf.mxu1  ;;  %v5744_v60 = vld [vmem:[#allocation13 + $0x1b8] sm:$0xff] }
 0xc84   :  { %6828 = vmatprep.subr.mxu0 %v5568_v0  ;;  %v5520_v18 = vadd.f32 %v10927_v4, %v5519_v16  ;;  %v5591_v55 = vmax.f32 %v5525_v7, 0.0  ;;  %v5741_v0 = vld [vmem:[#allocation13 + $0x1a0] sm:$0xff]  ;;  %v5738_v16 = vld [vmem:[#allocation13 + $0x188] sm:$0xff] }
 0xc85   :  { %6829 = vmatpush3.msra.mxu0 %v5552_v42  ;;  %v8138_v21 = vpop.f32.mrf.mxu1  ;;  %v5739_v42 = vld [vmem:[#allocation13 + $0x190] sm:$0xff]  ;;  %v5833_v7 = vld [vmem:[#allocation14] sm:$0xff] }
 0xc86   :  { %6830 = vmatprep.subr.mxu0 %v5567_v28  ;;  %v5535_v5 = vadd.f32 %v8138_v21, %v10927_v4  ;;  %v5590_v61 = vmax.f32 %v5520_v18, 0.0  ;;  %v5848_v28 = vld [vmem:[#allocation14 + $0x78] sm:$0xff]  ;;  %v5845_v21 = vld [vmem:[#allocation14 + $0x60] sm:$0xff]  ;;  %v5957_v18 = vld [vmem:[%s11095_s10] ss:$0 sm:$0xff] }
 0xc87   :  { %6831 = vmatpush3.msra.mxu0 %v5551_v3  ;;  %v5529_v41 = vpop.f32.mrf.mxu1  ;;  %8213 = vmatpush3.msra.mxu1 %v5848_v28  ;;  %v5846_v3 = vld [vmem:[#allocation14 + $0x68] sm:$0xff] }
 0xc88   :  { %6832 = vmatprep.subr.mxu0 %v5566_v50  ;;  %v5530_v12 = vadd.f32 %v10927_v4, %v5529_v41  ;;  %v5593_v1 = vmax.f32 %v5535_v5, 0.0  ;;  %8214 = vmatprep.subr.mxu1 %v11679_v20  ;;  %v5843_v50 = vld [vmem:[#allocation14 + $0x50] sm:$0xff]  ;;  %v5840_v41 = vld [vmem:[#allocation14 + $0x38] sm:$0xff] }
 0xc89   :  { %6833 = vmatpush3.msra.mxu0 %v5550_v31  ;;  %v8141_v10 = vpop.f32.mrf.mxu1  ;;  %8215 = vmatpush3.msra.mxu1 %v5847_v51  ;;  %v5841_v31 = vld [vmem:[#allocation14 + $0x40] sm:$0xff]  ;;  %v5836_v5 = vld [vmem:[#allocation14 + $0x18] sm:$0xff] }
 0xc8a   :  { %v5545_v63 = vadd.f32 %v8141_v10, %v10927_v4  ;;  %6834 = vmatprep.subr.mxu0 %v5565_v11  ;;  %v5592_v26 = vmax.f32 %v5530_v12, 0.0  ;;  %8216 = vmatprep.subr.mxu1 %v11679_v20  ;;  %v5839_v11 = vld [vmem:[#allocation14 + $0x30] sm:$0xff]  ;;  %v5837_v10 = vld [vmem:[#allocation14 + $0x20] sm:$0xff]  ;;  %v5834_v12 = vld [vmem:[#allocation14 + $0x8] sm:$0xff] }
 0xc8b   :  { %6835 = vmatpush3.msra.mxu0 %v5549_v38  ;;  %v5539_v44 = vpop.f32.mrf.mxu1  ;;  %8217 = vmatpush3.msra.mxu1 %v5846_v3  ;;  %v5838_v38 = vld [vmem:[#allocation14 + $0x28] sm:$0xff] }
 0xc8c   :  { %v5595_v52 = vmax.f32 %v5545_v63, 0.0  ;;  %v5540_v9 = vadd.f32 %v10927_v4, %v5539_v44  ;;  %6836 = vmatprep.subr.mxu0 %v5564_v47  ;;  %8218 = vmatprep.subr.mxu1 %v11679_v20 }
 0xc8d   :  { %6837 = vmatpush3.msra.mxu0 %v5548_v17  ;;  %8219 = vmatpush3.msra.mxu1 %v5845_v21 }
 0xc8e   :  { %v5594_v30 = vmax.f32 %v5540_v9, 0.0  ;;  %8142 = vmatprep.subr.mxu0 %v11679_v20  ;;  %5661 = vmatmul.mubr.f32.vlgmr.msra.gmra.mxu0 %v11920_v45  ;;  %v5515_v45 = vadd.f32 %v10972_v56, %v10927_v4  ;;  %v5585_v56 = vmax.f32 %v5495_v35, 0.0  ;;  %v5750_v4 = vld [vmem:[#allocation13 + $0x1e8] sm:$0xff] }
 0xc8f   :  { %8143 = vmatpush3.msra.mxu0 %v5595_v52  ;;  %8174 = vmatprep.mubr.msk.f32.mxu0 %vm8467_vm0, %v11679_v20 }
 0xc90   :  { %8144 = vmatprep.subr.mxu0 %v11679_v20  ;;  %v5589_v37 = vmax.f32 %v5515_v45, 0.0  ;;  %8220 = vmatprep.subr.mxu1 %v11679_v20 }
 0xc91   :  { %8145 = vmatpush3.msra.mxu0 %v5594_v30  ;;  %8221 = vmatpush3.msra.mxu1 %v5844_v36  ;;  %v5835_v30 = vld [vmem:[#allocation14 + $0x10] sm:$0xff] }
 0xc92   :  { %8146 = vmatprep.subr.mxu0 %v11679_v20  ;;  %8222 = vmatprep.subr.mxu1 %v11679_v20 }
 0xc93   :  { %8147 = vmatpush3.msra.mxu0 %v5593_v1  ;;  %8223 = vmatpush3.msra.mxu1 %v5843_v50 }
 0xc94   :  { %8148 = vmatprep.subr.mxu0 %v11679_v20  ;;  %8224 = vmatprep.subr.mxu1 %v11679_v20 }
 0xc95   :  { %8149 = vmatpush3.msra.mxu0 %v5592_v26  ;;  %8225 = vmatpush3.msra.mxu1 %v5842_v6  ;;  %v12069_v26 = vld [vmem:[#allocation218_spill] sm:$0xff] }
 0xc96   :  { %8150 = vmatprep.subr.mxu0 %v11679_v20  ;;  %8226 = vmatprep.subr.mxu1 %v11679_v20 }
 0xc97   :  { %8151 = vmatpush3.msra.mxu0 %v5591_v55  ;;  %8227 = vmatpush3.msra.mxu1 %v5841_v31 }
 0xc98   :  { %8152 = vmatprep.subr.mxu0 %v11679_v20  ;;  %8228 = vmatprep.subr.mxu1 %v11679_v20 }
 0xc99   :  { %8153 = vmatpush3.msra.mxu0 %v5590_v61  ;;  %8229 = vmatpush3.msra.mxu1 %v5840_v41 }
 0xc9a   :  { %8154 = vmatprep.subr.mxu0 %v11679_v20  ;;  %8230 = vmatprep.subr.mxu1 %v11679_v20 }
 0xc9b   :  { %8155 = vmatpush3.msra.mxu0 %v5589_v37  ;;  %8231 = vmatpush3.msra.mxu1 %v5839_v11 }
 0xc9c   :  { %8156 = vmatprep.subr.mxu0 %v11679_v20  ;;  %8232 = vmatprep.subr.mxu1 %v11679_v20 }
 0xc9d   :  { %8157 = vmatpush3.msra.mxu0 %v5588_v43  ;;  %8233 = vmatpush3.msra.mxu1 %v5838_v38 }
 0xc9e   :  { %8158 = vmatprep.subr.mxu0 %v11679_v20  ;;  %8234 = vmatprep.subr.mxu1 %v11679_v20 }
 0xc9f   :  { %8159 = vmatpush3.msra.mxu0 %v5587_v58  ;;  %8235 = vmatpush3.msra.mxu1 %v5837_v10 }
 0xca0   :  { %8160 = vmatprep.subr.mxu0 %v11679_v20  ;;  %8236 = vmatprep.subr.mxu1 %v11679_v20 }
 0xca1   :  { %8161 = vmatpush3.msra.mxu0 %v5586_v23  ;;  %8237 = vmatpush3.msra.mxu1 %v5836_v5 }
 0xca2   :  { %8162 = vmatprep.subr.mxu0 %v11679_v20  ;;  %8238 = vmatprep.subr.mxu1 %v11679_v20 }
 0xca3   :  { %8163 = vmatpush3.msra.mxu0 %v5585_v56  ;;  %8239 = vmatpush3.msra.mxu1 %v5835_v30 }
 0xca4   :  { %8164 = vmatprep.subr.mxu0 %v11679_v20  ;;  %8240 = vmatprep.subr.mxu1 %v11679_v20 }
 0xca5   :  { %8165 = vmatpush3.msra.mxu0 %v5584_v59  ;;  %8241 = vmatpush3.msra.mxu1 %v5834_v12 }
 0xca6   :  { %8166 = vmatprep.subr.mxu0 %v11679_v20  ;;  %8242 = vmatprep.subr.mxu1 %v11679_v20 }
 0xca7   :  { %8167 = vmatpush3.msra.mxu0 %v5583_v14  ;;  %8243 = vmatpush3.msra.mxu1 %v5833_v7 }
 0xca8   :  { %8168 = vmatprep.subr.mxu0 %v11679_v20 }
 0xca9   :  { %8169 = vmatpush3.msra.mxu0 %v5582_v8 }
 0xcaa   :  { %8170 = vmatprep.subr.mxu0 %v11679_v20 }
 0xcab   :  { %8171 = vmatpush3.msra.mxu0 %v5581_v32 }
 0xcac   :  { %8172 = vmatprep.subr.mxu0 %v11679_v20 }
 0xcad   :  { %8173 = vmatpush3.msra.mxu0 %v5580_v27 }
 0xcae   :  { %8175 = vmatmul.mubr.f32.vlgmr.msra.gmra.mxu0 %v11953_v54  ;;  %8177 = vmatprep.subr.mxu0 %v11679_v20  ;;  %v5747_v54 = vld [vmem:[#allocation13 + $0x1d0] sm:$0xff] }
 0xcaf   :  { %8178 = vmatpush3.msra.mxu0 %v5752_v33  ;;  %8209 = vmatprep.mubr.msk.f32.mxu0 %vm8467_vm0, %v11679_v20 }
 0xcb0   :  { %8179 = vmatprep.subr.mxu0 %v11679_v20 }
 0xcb1   :  { %8180 = vmatpush3.msra.mxu0 %v5751_v13 }
 0xcb2   :  { %8181 = vmatprep.subr.mxu0 %v11679_v20 }
 0xcb3   :  { %8182 = vmatpush3.msra.mxu0 %v5750_v4 }
 0xcb4   :  { %8183 = vmatprep.subr.mxu0 %v11679_v20 }
 0xcb5   :  { %8184 = vmatpush3.msra.mxu0 %v5749_v2 }
 0xcb6   :  { %8185 = vmatprep.subr.mxu0 %v11679_v20 }
 0xcb7   :  { %8186 = vmatpush3.msra.mxu0 %v5748_v34 }
 0xcb8   :  { %8187 = vmatprep.subr.mxu0 %v11679_v20 }
 0xcb9   :  { %8188 = vmatpush3.msra.mxu0 %v5747_v54 }
 0xcba   :  { %8189 = vmatprep.subr.mxu0 %v11679_v20 }
 0xcbb   :  { %8190 = vmatpush3.msra.mxu0 %v5746_v22 }
 0xcbc   :  { %8191 = vmatprep.subr.mxu0 %v11679_v20 }
 0xcbd   :  { %8192 = vmatpush3.msra.mxu0 %v5745_v40 }
 0xcbe   :  { %8193 = vmatprep.subr.mxu0 %v11679_v20 }
 0xcbf   :  { %8194 = vmatpush3.msra.mxu0 %v5744_v60 }
 0xcc0   :  { %8195 = vmatprep.subr.mxu0 %v11679_v20 }
 0xcc1   :  { %8196 = vmatpush3.msra.mxu0 %v5743_v62 }
 0xcc2   :  { %8197 = vmatprep.subr.mxu0 %v11679_v20 }
 0xcc3   :  { %8198 = vmatpush3.msra.mxu0 %v5742_v49 }
 0xcc4   :  { %8199 = vmatprep.subr.mxu0 %v11679_v20 }
 0xcc5   :  { %8200 = vmatpush3.msra.mxu0 %v5741_v0 }
 0xcc6   :  { %8201 = vmatprep.subr.mxu0 %v11679_v20 }
 0xcc7   :  { %8202 = vmatpush3.msra.mxu0 %v5740_v39 }
 0xcc8   :  { %8203 = vmatprep.subr.mxu0 %v11679_v20 }
 0xcc9   :  { %8204 = vmatpush3.msra.mxu0 %v5739_v42 }
 0xcca   :  { %8205 = vmatprep.subr.mxu0 %v11679_v20 }
 0xccb   :  { %8206 = vmatpush3.msra.mxu0 %v5738_v16 }
 0xccc   :  { %8207 = vmatprep.subr.mxu0 %v11679_v20 }
 0xccd   :  { %8208 = vmatpush3.msra.mxu0 %v5737_v29 }
 0xd4e   :  { %v6838_v47 = vpop.f32.mrf.mxu0 }
 0xd50   :  { %v6839_v63 = vpop.f32.mrf.mxu0 }
 0xd51   :  { %v6840_v17 = vadd.f32 %v6839_v63, %v6838_v47 }
 0xd6e   :  { %v5732_v44 = vpop.f32.mrf.mxu0 }
 0xd6f   :  { %v5733_v52 = vadd.f32 %v6840_v17, %v5732_v44 }
 0xd70   :  { %v8176_v9 = vpop.f32.mrf.mxu0 }
 0xd71   :  { %8210 = vmatmul.mubr.f32.vlgmr.msra.gmra.mxu0 %v5733_v52 }
 0xe31   :  { %v5819_v1 = vpop.f32.mrf.mxu0 }
 0xe32   :  { %v5823_v45 = vadd.f32 %v5819_v1, %v12069_v26 }
 0xe33   :  { %v8211_v55 = vpop.f32.mrf.mxu0 }
 0xe34   :  { %v5831_v53 = vadd.f32 %v5957_v18, %v5823_v45 }
 0xe36   :  { %v5832_v61 = vmax.f32 %v5831_v53, 0.0 }
 0xe38   :  { %8245 = vmatmul.mubr.f32.vlgmr.msra.gmra.mxu1 %v5832_v61 }
 0xef8   :  { %v5922_v20 = vpop.f32.mrf.mxu1 }
 0xef9   :  { %v5923_v37 = vadd.f32 %v5958_v19, %v5922_v20 }
 0xefa   :  { %v8246_v15 = vpop.f32.mrf.mxu1 }
 0xefb   :  { %5926 = vst [vmem:[#allocation16] sm:$0xff] %v5923_v37 }
 0xefc   :  { %8433 = shalt.err (!%p8430_p2)
}
 0xefd   :  { %5936 = dma.vmem_to_hbm [thread:$0]  %s5934_s1, 128, %s11098_s13, [#allocation4]  }
 0xefe   :  { %8452 = dma.done.wait [#allocation4], 128  }
 0xeff   :  { %8453 = vsyncadd [#allocation4], 4294967168 }
 0xf00   :  { %5940 = vsyncpa [#allocation3], 1 }
 0xf01   :  { %5941 = vsyncpa [#allocation6], 1 }
 0xf02   :  { %5942 = vsyncpa [#allocation9], 1 }
 0xf03   :  { %5943 = vsyncpa [#allocation12], 1 }
 0xf04   :  { %5944 = vsyncpa [#allocation15], 1 }
 0xf05   :  { %5945 = vsyncpa [#allocation4], 1 }

</bundles_post_ra>
